<compile_context>
chip_gen: v6e
topology: v6e:2x2x1
jax: 0.10.0
libtpu: 0.0.40
codegen_flags: <defaults>
</compile_context>

<pallas_src>
import functools

import jax
import jax.numpy as jnp
from jax import lax
from jax.experimental import pallas as pl
from jax.experimental.pallas import tpu as pltpu


_LANES = 512  # lane-dense last dim (multiple of 128)


def _tpu_generation():
    """Best-effort TPU generation (5, 6, 7, ...); 0 if unknown."""
    try:
        dev = jax.devices()[0]
        if dev.platform != "tpu":
            return 0
        kind = str(getattr(dev, "device_kind", "")).lower()
    except Exception:
        return 0
    for g in (7, 6, 5, 4):
        if ("v%d" % g) in kind:
            return g
    return 0


@functools.lru_cache(maxsize=None)
def _config():
    gen = _tpu_generation()
    if gen >= 7:
        # v7x: 3.2 TB/s HBM -> bigger blocks needed to amortize the ~0.35 us
        # per-step overhead; 2 TensorCores -> 2 parts.
        tile_rows = 2048
        num_parts = 2
        dim_sems = (getattr(pltpu, "CORE_PARALLEL", "parallel"), "arbitrary")
    else:
        # v5e / v6e: single TensorCore.  1024x512 f32 blocks (~2 MiB) reach
        # ~90% of the HBM roofline; working set (10 MiB) fits even v5e's
        # 16 MiB scoped-VMEM default (we still set the limit explicitly).
        tile_rows = 1024
        num_parts = 1
        dim_sems = ("parallel", "arbitrary")
    tile_elems = tile_rows * _LANES
    # Below ~2 grid steps per part (and never below ~2M elements) the pipeline
    # never gets going; XLA's fused elementwise+reduce wins there.
    min_elems = max(1 << 21, 2 * num_parts * tile_elems)
    return {
        "tile_rows": tile_rows,
        "num_parts": num_parts,
        "dim_sems": dim_sems,
        "min_elems": min_elems,
    }


def _make_kernel(tile_rows, tiles_per_part, rows, needs_mask):
    def kernel(mu_ref, logvar_ref, out_ref, acc_ref):
        p = pl.program_id(0)
        t = pl.program_id(1)

        @pl.when(t == 0)
        def _init():
            acc_ref[...] = jnp.zeros_like(acc_ref)

        mu = mu_ref[...].astype(jnp.float32)
        lv = logvar_ref[...].astype(jnp.float32)
        # Pure VPU (+ one EUP exp) per element; no per-step cross-lane reduce.
        # Lane-pad zeros are neutral: 1 + 0 - 0 - exp(0) == 0.
        val = 1.0 + lv - mu * mu - jnp.exp(lv)

        if needs_mask:
            # Mask rows past the end of the (lane-padded) input.  Covers both
            # the partial last tile and duplicated (clamped) tiles of an
            # over-provisioned part.  The '+1.0' term is masked too — the
            # zero-neutrality trick does not protect garbage rows.
            block_idx = p * tiles_per_part + t
            row_start = block_idx * tile_rows
            row_ids = row_start + lax.broadcasted_iota(
                jnp.int32, (tile_rows, 1), 0
            )
            val = jnp.where(row_ids < rows, val, 0.0)

        acc_ref[...] += val

        @pl.when(t == pl.num_programs(1) - 1)
        def _finalize():
            # Single XLU cross-lane/sublane reduce per part + the -0.5 scale.
            out_ref[0, 0] = -0.5 * jnp.sum(acc_ref[...])

    return kernel


def _kld_sum_pallas(mu, logvar, cfg):
    """-0.5 * sum(1 + logvar - mu^2 - exp(logvar)) over all elements."""
    tile_rows = cfg["tile_rows"]
    num_parts = cfg["num_parts"]

    n = mu.size
    rows = pl.cdiv(n, _LANES)
    n_lane = rows * _LANES

    def _prep(x):
        x = jnp.ravel(x)                      # free reshape (contiguous)
        if n_lane != n:
            # Pad only to a lane multiple (<= 511 zeros); zeros are neutral.
            x = jnp.pad(x, (0, n_lane - n))
        return x.reshape(rows, _LANES)

    mu2 = _prep(mu)
    lv2 = _prep(logvar)

    num_tiles = pl.cdiv(rows, tile_rows)
    tiles_per_part = max(1, pl.cdiv(num_tiles, num_parts))
    needs_mask = (num_parts * tiles_per_part * tile_rows != rows)

    def in_map(p, t):
        # Clamp so the DMA always targets an in-range block; logically
        # out-of-range (duplicated) blocks are fully masked in-kernel.
        idx = p * tiles_per_part + t
        return (jnp.minimum(idx, num_tiles - 1), 0)

    kernel = _make_kernel(tile_rows, tiles_per_part, rows, needs_mask)

    cost = pl.CostEstimate(
        flops=5 * n,
        transcendentals=n,
        bytes_accessed=n * (mu.dtype.itemsize + logvar.dtype.itemsize)
        + num_parts * 4,
    )

    partials = pl.pallas_call(
        kernel,
        out_shape=jax.ShapeDtypeStruct((num_parts, 1), jnp.float32),
        grid_spec=pltpu.PrefetchScalarGridSpec(
            num_scalar_prefetch=0,
            grid=(num_parts, tiles_per_part),
            in_specs=[
                pl.BlockSpec((tile_rows, _LANES), in_map),
                pl.BlockSpec((tile_rows, _LANES), in_map),
            ],
            out_specs=pl.BlockSpec(
                (1, 1), lambda p, t: (p, 0), memory_space=pltpu.SMEM
            ),
            scratch_shapes=[pltpu.VMEM((tile_rows, _LANES), jnp.float32)],
        ),
        compiler_params=pltpu.CompilerParams(
            dimension_semantics=cfg["dim_sems"],
            vmem_limit_bytes=40 * 1024 * 1024,   # safe on v5e/v6e/v7x
        ),
        cost_estimate=cost,
    )(mu2, lv2)

    return jnp.sum(partials)


def _kld_sum_ref(mu, logvar):
    """Pure-JAX path for tiny inputs (and the correctness reference)."""
    mu = mu.astype(jnp.float32)
    lv = logvar.astype(jnp.float32)
    return -0.5 * jnp.sum(1.0 + lv - jnp.square(mu) - jnp.exp(lv))


def kld_loss(mu, logvar, reduction="mean"):
    """KL(N(mu, exp(logvar)) || N(0, 1)), matching the PyTorch KLDLoss module."""
    assert mu.shape == logvar.shape
    B = mu.shape[0]
    cfg = _config()

    if mu.size < cfg["min_elems"]:
        d = _kld_sum_ref(mu, logvar)          # kernel overhead > work here
    else:
        d = _kld_sum_pallas(mu, logvar, cfg)

    if reduction == "mean":
        return d / B
    return d


def _kld_ref(mu, logvar, reduction="mean"):
    d = _kld_sum_ref(mu, logvar)
    if reduction == "mean":
        return d / mu.shape[0]
    return d


if __name__ == "__main__":
    cfg = _config()
    key = jax.random.PRNGKey(0)
    k1, k2, k3, k4, k5, k6 = jax.random.split(key, 6)

    # 1) Module-spec small shape (batch=2, latent=32): tiny-input fallback.
    B, Z = 2, 32
    mu_s = jax.random.normal(k1, (B, Z), dtype=jnp.float32)
    lv_s = 0.1 * jax.random.normal(k2, (B, Z), dtype=jnp.float32)
    out_s = jax.block_until_ready(kld_loss(mu_s, lv_s, reduction="mean"))
    ref_s = _kld_ref(mu_s, lv_s, reduction="mean")
    assert jnp.allclose(out_s, ref_s, rtol=1e-5, atol=1e-5), (out_s, ref_s)

    # 2) Pallas path, exact tile fit (no padding, no masking), f32, 'mean'.
    rows_aligned = 4 * cfg["num_parts"] * cfg["tile_rows"]
    Z = 8192
    B = (rows_aligned * _LANES) // Z
    mu_l = jax.random.normal(k3, (B, Z), dtype=jnp.float32)
    lv_l = 0.1 * jax.random.normal(k4, (B, Z), dtype=jnp.float32)
    out_l = jax.block_until_ready(kld_loss(mu_l, lv_l, reduction="mean"))
    ref_l = _kld_ref(mu_l, lv_l, reduction="mean")
    assert jnp.allclose(out_l, ref_l, rtol=5e-4, atol=1e-2), (out_l, ref_l)

    # 3) Pallas path, ragged shape (lane pad + in-kernel row mask), bf16, 'sum'.
    Z = 7000                                   # not a multiple of 512
    B = -(-2 * cfg["min_elems"] // Z)          # comfortably above threshold
    mu_p = jax.random.normal(k5, (B, Z), dtype=jnp.bfloat16)
    lv_p = (0.1 * jax.random.normal(k6, (B, Z), dtype=jnp.float32)).astype(
        jnp.bfloat16
    )
    out_p = jax.block_until_ready(kld_loss(mu_p, lv_p, reduction="sum"))
    ref_p = _kld_ref(mu_p, lv_p, reduction="sum")
    assert jnp.allclose(out_p, ref_p, rtol=5e-4, atol=1.0), (out_p, ref_p)

    print("KERNEL_OK")
</pallas_src>

<mosaic_0001>
module attributes {stable_mosaic.version = 11 : i64} {
  func.func @kernel(%arg0: i32, %arg1: i32, %arg2: memref<1024x512xf32, #tpu.memory_space<vmem>>, %arg3: memref<1024x512xf32, #tpu.memory_space<vmem>>, %arg4: memref<1x1xf32, #tpu.memory_space<smem>>, %arg5: memref<1024x512xf32, #tpu.memory_space<vmem>>) attributes {dimension_semantics = [#tpu.dimension_semantics<parallel>, #tpu.dimension_semantics<arbitrary>], iteration_bounds = array<i64: 1, 4>, scalar_prefetch = 0 : i64, scratch_operands = 1 : i64, tpu.core_type = #tpu.core_type<tc>, window_params = [{transform_indices = @transform_0, window_bounds = array<i64: 1024, 512>}, {transform_indices = @transform_1, window_bounds = array<i64: 1024, 512>}, {transform_indices = @transform_2, window_bounds = array<i64: 1, 1>}]} {
    %c0_i32 = arith.constant 0 : i32
    %0 = arith.cmpi eq, %arg1, %c0_i32 : i32
    %1 = arith.extui %0 : i1 to i32
    %c0_i32_0 = arith.constant 0 : i32
    %2 = arith.cmpi ne, %1, %c0_i32_0 : i32
    scf.if %2 {
      %cst_9 = arith.constant 0.000000e+00 : f32
      %17 = vector.broadcast %cst_9 : f32 to vector<1024x512xf32>
      %c0_10 = arith.constant 0 : index
      %c0_11 = arith.constant 0 : index
      %18 = vector.load %arg5[%c0_10, %c0_11] : memref<1024x512xf32, #tpu.memory_space<vmem>>, vector<1024x512xf32>
      tpu.vector_store %arg5[%c0_10, %c0_11], %17 {strides = array<i32>} : memref<1024x512xf32, #tpu.memory_space<vmem>>, vector<1024x512xf32>,
    } else {
    }
    %c0 = arith.constant 0 : index
    %c0_1 = arith.constant 0 : index
    %3 = vector.load %arg2[%c0, %c0_1] : memref<1024x512xf32, #tpu.memory_space<vmem>>, vector<1024x512xf32>
    %c0_2 = arith.constant 0 : index
    %c0_3 = arith.constant 0 : index
    %4 = vector.load %arg3[%c0_2, %c0_3] : memref<1024x512xf32, #tpu.memory_space<vmem>>, vector<1024x512xf32>
    %cst = arith.constant 1.000000e+00 : f32
    %5 = vector.broadcast %cst : f32 to vector<1024x512xf32>
    %6 = arith.addf %5, %4 : vector<1024x512xf32>
    %7 = arith.mulf %3, %3 : vector<1024x512xf32>
    %8 = arith.subf %6, %7 : vector<1024x512xf32>
    %9 = math.exp %4 : vector<1024x512xf32>
    %10 = arith.subf %8, %9 : vector<1024x512xf32>
    %c0_4 = arith.constant 0 : index
    %c0_5 = arith.constant 0 : index
    %11 = vector.load %arg5[%c0_4, %c0_5] : memref<1024x512xf32, #tpu.memory_space<vmem>>, vector<1024x512xf32>
    %12 = arith.addf %11, %10 : vector<1024x512xf32>
    %c0_6 = arith.constant 0 : index
    %c0_7 = arith.constant 0 : index
    %13 = vector.load %arg5[%c0_6, %c0_7] : memref<1024x512xf32, #tpu.memory_space<vmem>>, vector<1024x512xf32>
    tpu.vector_store %arg5[%c0_6, %c0_7], %12 {strides = array<i32>} : memref<1024x512xf32, #tpu.memory_space<vmem>>, vector<1024x512xf32>,
    %c3_i32 = arith.constant 3 : i32
    %14 = arith.cmpi eq, %arg1, %c3_i32 : i32
    %15 = arith.extui %14 : i1 to i32
    %c0_i32_8 = arith.constant 0 : i32
    %16 = arith.cmpi ne, %15, %c0_i32_8 : i32
    scf.if %16 {
      %c0_9 = arith.constant 0 : index
      %c0_10 = arith.constant 0 : index
      %17 = vector.load %arg5[%c0_9, %c0_10] : memref<1024x512xf32, #tpu.memory_space<vmem>>, vector<1024x512xf32>
      %18 = vector.shape_cast %17 : vector<1024x512xf32> to vector<1x1024x512xf32>
      %cst_11 = arith.constant dense<0.000000e+00> : vector<1xf32>
      %19 = vector.multi_reduction <add>, %18, %cst_11 [1, 2] : vector<1x1024x512xf32> to vector<1xf32>
      %20 = vector.shape_cast %19 : vector<1xf32> to vector<1x1x1xf32>
      %21 = vector.extract %20[0, 0, 0] : f32 from vector<1x1x1xf32>
      %cst_12 = arith.constant -5.000000e-01 : f32
      %22 = arith.mulf %cst_12, %21 : f32
      %c0_13 = arith.constant 0 : index
      %c0_14 = arith.constant 0 : index
      %23 = memref.load %arg4[%c0_13, %c0_14] : memref<1x1xf32, #tpu.memory_space<smem>>
      memref.store %22, %arg4[%c0_13, %c0_14] : memref<1x1xf32, #tpu.memory_space<smem>>
    } else {
    }
    return
  }
  func.func @transform_0(%arg0: i32, %arg1: i32) -> (i32, i32) {
    %c4_i32 = arith.constant 4 : i32
    %0 = arith.muli %arg0, %c4_i32 : i32
    %1 = arith.addi %0, %arg1 : i32
    %c3_i32 = arith.constant 3 : i32
    %2 = arith.minsi %1, %c3_i32 : i32
    %c0_i32 = arith.constant 0 : i32
    %c0_i32_0 = arith.constant 0 : i32
    return %2, %c0_i32 : i32, i32
  }
  func.func @transform_1(%arg0: i32, %arg1: i32) -> (i32, i32) {
    %c4_i32 = arith.constant 4 : i32
    %0 = arith.muli %arg0, %c4_i32 : i32
    %1 = arith.addi %0, %arg1 : i32
    %c3_i32 = arith.constant 3 : i32
    %2 = arith.minsi %1, %c3_i32 : i32
    %c0_i32 = arith.constant 0 : i32
    %c0_i32_0 = arith.constant 0 : i32
    return %2, %c0_i32 : i32, i32
  }
  func.func @transform_2(%arg0: i32, %arg1: i32) -> (i32, i32) {
    %c0_i32 = arith.constant 0 : i32
    %c0_i32_0 = arith.constant 0 : i32
    return %arg0, %c0_i32 : i32, i32
  }
}

</mosaic_0001>

<bundles_post_ra>
// kernel: tpu_custom_call.1
= control target key start
LH: loop header
LB: loop body
LE: loop exit
PB: predicated region body
PF: predicated region fallthrough
CT: control target
= control target key end

     0   :  { %7 = vsyncpa [#allocation4], 0  ;;  %s13500_s0 = inlined_call_operand.hbm [shape: f32[4096,512], index: 0, kind: input, shape index: {}]   ;;  %s13501_s1 = inlined_call_operand.hbm [shape: f32[4096,512], index: 1, kind: input, shape index: {}]   ;;  %s13502_s2 = inlined_call_operand.hbm [shape: f32[1,1], index: 2, kind: output, shape index: {}]  }
   0x1   :  { %9 = vsyncpa [#allocation4 + $0x1], 0 }
   0x2   :  { %10 = vsyncpa [#allocation7], 0 }
   0x3   :  { %12 = vsyncpa [#allocation7 + $0x1], 0 }
   0x4   :  { %13 = vsyncpa [#allocation5], 0  ;;  %s8789_s9 = smov 0   ;;  %s8791_s10 = smov 0  }
   0x5   :  { %s8793_s11 = smov 0   ;;  %s8795_s12 = smov 0  }
   0x6   :  { %s8797_s13 = smov 0   ;;  %s8799_s14 = smov 0  }
   0x7 LB: > { %s7522_s15 = sadd.s32 4294967295, %s8766_s14   ;;  %s28_s16 = sadd.s32 1, %s8762_s13  ;;  %s8766_s14 = sphi %s8799_s14, %s19_s14   ;;  %s8762_s13 = sphi %s8797_s13, %s13510_s13   ;;  %s8758_s12 = sphi %s8795_s12, %s13509_s12   ;;  %s8754_s11 = sphi %s8793_s11, %s13508_s11   ;;  %s8750_s10 = sphi %s8791_s10, %s13507_s10   ;;  %s8746_s9 = sphi %s8789_s9, %s13506_s9  }
   0x8   : > { %p29_p0 = scmp.ge.s32.totalorder %s28_s16, 4  ;;  %p37_p1 = scmp.lt.s32.totalorder %s8762_s13, 3 }
   0x9   : > { %s46_s17 = sadd.s32 1, %s8754_s11  ;;  %p53_p2 = scmp.ne.s32.totalorder %s8754_s11, %s8750_s10 }
   0xa   : > { %s13512_s16 = smov (%p29_p0, %s28_s16), 0  ;;  %p54_p4 = scmp.eq.s32.totalorder %s8766_s14, 0 }
   0xb   : > { %s8826_s18 = scalar_select %p37_p1, %s8762_s13, 3 }
   0xc   : > { %p41_p3 = scmp.lt.s32.totalorder %s13512_s16, 3  ;;  %p59_p5 = scmp.ne.s32.totalorder %s8750_s10, %s8746_s9 }
   0xd   : > { %p60_p6 = scmp.eq.s32.totalorder %s7522_s15, 0  ;;  %p55_p7 = por %p54_p4, %p53_p2 }
   0xe   : > { %s42_s19 = scalar_select %p41_p3, %s13512_s16, 3 }
   0xf   : > { %p8834_p8 = por %p60_p6, %p59_p5  ;;  %p7563_p10 = scmp.lt.s32.totalorder %s8766_s14, 4 }
  0x10   : > { %s43_s21 = ssub.s32 %s8826_s18, %s42_s19  ;;  %s8841_s22 = sand.u32 1, %s8754_s11  }
  0x11   : > { %p44_p9 = scmp.eq.s32.totalorder %s43_s21, 0  ;;  %s7543_s23 = sshll.u32 %s8826_s18, 16 }
  0x12   : > { %s7525_s25 = sshll.u32 %s8841_s22, 12  ;;  %s158_s28 = scalar_lea.hbm %s13500_s0, %s7543_s23 }
  0x13   : > { %s8845_s24 = scalar_select %p44_p9, %s8754_s11, %s46_s17  }
  0x14   : > { %s147_s29 = scalar_lea.vmem [#allocation3], %s7525_s25  ;;  %p8853_p11 = pnand %p7563_p10, %p55_p7 }
  0x15   : > { %s159_s30 = sshll.u32 %s147_s29, 4  ;;  %s144_s4 = scalar_lea.sflag [#allocation4], %s8841_s22  ;;  %s160_s30 = int_to_ptr.vmem [resolvable:$true] %s159_s30 }
  0x16   : > { %p8644_p12 = pneg %p8853_p11  ;;  %s8655_s5 = scalar_lea.vmem %s160_s30, 65536 }
  0x17   : > { %p8656_p13 = scmp.ne.s32.totalorder %s160_s30, %s8655_s5  ;;  %s8768_s6 = smov [#allocation3]  }
  0x18   : > { %s8660_s7 = sshll.u32 %s8768_s6, 4  ;;  %s8661_s7 = int_to_ptr.vmem [resolvable:$false] %s8660_s7 }
  0x19   : > { %p8658_p0 = pnand %p8656_p13, %p8644_p12  ;;  %s8662_s8 = scalar_lea.vmem %s8661_s7, 131072 }
  0x1a   : > { %p8663_p2 = scmp.lt.s32.totalorder %s160_s30, %s8661_s7  ;;  %p8664_p3 = scmp.lt.s32.totalorder %s8662_s8, %s8655_s5 }
  0x1b   : > { %p8659_p1 = pneg %p8658_p0 }
  0x1c   : > { %p8665_p4 = por %p8664_p3, %p8663_p2 }
  0x1e   : > { %p8666_p5 = pnand %p8665_p4, %p8659_p1 }
  0x20   : > { %8669 = shalt.err (!%p8666_p5)
}
  0x21   : > { %s8769_s9 = smov 512   ;;  %s8770_s17 = smov 32  }
  0x22   : > { %7559 = dma.hbm_to_vmem [thread:$0]  (!%p8853_p11), %s158_s28, 65536, %s160_s30, %s144_s4, %s8769_s9, %s8769_s9, %s8770_s17  }
  0x23   : > { %p7533_p6 = scmp.ge.s32.totalorder %s8766_s14, 1  ;;  %p193_p7 = scmp.lt.s32.totalorder %s8766_s14, 5 }
  0x24   : > { %s184_s27 = scalar_lea.hbm %s13501_s1, %s7543_s23  ;;  %s173_s29 = scalar_lea.vmem [#allocation6], %s7525_s25 }
  0x25   : > { %p8867_p9 = pnand %p7533_p6, %p193_p7  ;;  %s185_s5 = sshll.u32 %s173_s29, 4  ;;  %s186_s5 = int_to_ptr.vmem [resolvable:$true] %s185_s5 }
  0x26   : > { %s170_s6 = scalar_lea.sflag [#allocation7], %s8841_s22  ;;  %s8683_s7 = scalar_lea.vmem %s186_s5, 65536 }
  0x27   : > { %p8684_p10 = scmp.ne.s32.totalorder %s186_s5, %s8683_s7  ;;  %s8771_s28 = smov [#allocation6]  }
  0x28   : > { %s8688_s30 = sshll.u32 %s8771_s28, 4  ;;  %s8689_s30 = int_to_ptr.vmem [resolvable:$false] %s8688_s30 }
  0x29   : > { %p8686_p13 = pnand %p8684_p10, %p8644_p12  ;;  %s8690_s4 = scalar_lea.vmem %s8689_s30, 131072 }
  0x2a   : > { %p8691_p1 = scmp.lt.s32.totalorder %s186_s5, %s8689_s30  ;;  %p8692_p2 = scmp.lt.s32.totalorder %s8690_s4, %s8683_s7 }
  0x2b   : > { %p8687_p0 = pneg %p8686_p13 }
  0x2c   : > { %p8693_p3 = por %p8692_p2, %p8691_p1 }
  0x2e   : > { %p8694_p4 = pnand %p8693_p3, %p8687_p0 }
  0x30   : > { %8697 = shalt.err (!%p8694_p4)
}
  0x31   : > { %7562 = dma.hbm_to_vmem [thread:$0]  (!%p8853_p11), %s184_s27, 65536, %s186_s5, %s170_s6, %s8769_s9, %s8769_s9, %s8770_s17  }
  0x32   : > { %197 = sbr.rel (%p8867_p9) target bundleno = 2463 (0x99f), region = 28  ;;  %s199_s18 = sand.u32 (!%p8867_p9), 1, %s8750_s10  }
  0x33   : > { %s7534_s22 = sshll.u32 (!%p8867_p9), %s199_s18, 12  ;;  %s200_s23 = scalar_lea.sflag (!%p8867_p9), [#allocation4], %s199_s18 }
  0x34   : > { %s8885_s25 = scalar_lea.vmem (!%p8867_p9), [#allocation3], %s7534_s22 }
  0x37   : > { %8733 = dma.done.wait (%p8834_p8), %s200_s23, 65536  }
  0x38   : > { %8735 = vsyncadd (%p8834_p8), %s200_s23, 4294901760  ;;  %s209_s8 = scalar_lea.sflag [#allocation7], %s199_s18  ;;  %s8891_s21 = scalar_lea.vmem [#allocation6], %s7534_s22 }
  0x39   : > { %8737 = dma.done.wait (%p8834_p8), %s209_s8, 65536  }
  0x3a   : > { %8739 = vsyncadd (%p8834_p8), %s209_s8, 4294901760  ;;  %p7536_p11 = scmp.ne.s32.totalorder %s8758_s12, 0 }
  0x3c   : > { %246 = sbr.rel (%p7536_p11) target bundleno = 322 (0x142), region = 40 }
  0x41   : > { %v8772_v0 = vmov 0.0  }
  0x42   : > { %247 = vst [vmem:[#allocation2 + $0xab0] sm:$0xff] %v8772_v0  ;;  %248 = vst [vmem:[#allocation2 + $0xbb0] sm:$0xff] %v8772_v0 }
  0x43   : > { %249 = vst [vmem:[#allocation2 + $0x4d8] sm:$0xff] %v8772_v0  ;;  %250 = vst [vmem:[#allocation2 + $0x818] sm:$0xff] %v8772_v0 }
  0x44   : > { %251 = vst [vmem:[#allocation2 + $0xc50] sm:$0xff] %v8772_v0  ;;  %252 = vst [vmem:[#allocation2 + $0x810] sm:$0xff] %v8772_v0 }
  0x45   : > { %253 = vst [vmem:[#allocation2 + $0x770] sm:$0xff] %v8772_v0  ;;  %254 = vst [vmem:[#allocation2 + $0x338] sm:$0xff] %v8772_v0 }
  0x46   : > { %255 = vst [vmem:[#allocation2 + $0x450] sm:$0xff] %v8772_v0  ;;  %256 = vst [vmem:[#allocation2 + $0xb88] sm:$0xff] %v8772_v0 }
  0x47   : > { %257 = vst [vmem:[#allocation2 + $0x918] sm:$0xff] %v8772_v0  ;;  %258 = vst [vmem:[#allocation2 + $0xd20] sm:$0xff] %v8772_v0 }
  0x48   : > { %259 = vst [vmem:[#allocation2 + $0xca0] sm:$0xff] %v8772_v0  ;;  %260 = vst [vmem:[#allocation2 + $0xb28] sm:$0xff] %v8772_v0 }
  0x49   : > { %261 = vst [vmem:[#allocation2 + $0xd58] sm:$0xff] %v8772_v0  ;;  %262 = vst [vmem:[#allocation2 + $0x510] sm:$0xff] %v8772_v0 }
  0x4a   : > { %263 = vst [vmem:[#allocation2 + $0x728] sm:$0xff] %v8772_v0  ;;  %264 = vst [vmem:[#allocation2 + $0x6e8] sm:$0xff] %v8772_v0 }
  0x4b   : > { %265 = vst [vmem:[#allocation2 + $0x790] sm:$0xff] %v8772_v0  ;;  %266 = vst [vmem:[#allocation2 + $0x340] sm:$0xff] %v8772_v0 }
  0x4c   : > { %267 = vst [vmem:[#allocation2 + $0x748] sm:$0xff] %v8772_v0  ;;  %268 = vst [vmem:[#allocation2 + $0x830] sm:$0xff] %v8772_v0 }
  0x4d   : > { %269 = vst [vmem:[#allocation2 + $0xaf0] sm:$0xff] %v8772_v0  ;;  %270 = vst [vmem:[#allocation2 + $0x5b8] sm:$0xff] %v8772_v0 }
  0x4e   : > { %271 = vst [vmem:[#allocation2 + $0x5c8] sm:$0xff] %v8772_v0  ;;  %272 = vst [vmem:[#allocation2 + $0xd78] sm:$0xff] %v8772_v0 }
  0x4f   : > { %273 = vst [vmem:[#allocation2 + $0x3f8] sm:$0xff] %v8772_v0  ;;  %274 = vst [vmem:[#allocation2 + $0xf08] sm:$0xff] %v8772_v0 }
  0x50   : > { %275 = vst [vmem:[#allocation2 + $0xea0] sm:$0xff] %v8772_v0  ;;  %276 = vst [vmem:[#allocation2 + $0xb78] sm:$0xff] %v8772_v0 }
  0x51   : > { %277 = vst [vmem:[#allocation2 + $0x948] sm:$0xff] %v8772_v0  ;;  %278 = vst [vmem:[#allocation2 + $0xbf8] sm:$0xff] %v8772_v0 }
  0x52   : > { %279 = vst [vmem:[#allocation2 + $0x9d0] sm:$0xff] %v8772_v0  ;;  %280 = vst [vmem:[#allocation2 + $0xa90] sm:$0xff] %v8772_v0 }
  0x53   : > { %281 = vst [vmem:[#allocation2 + $0x910] sm:$0xff] %v8772_v0  ;;  %282 = vst [vmem:[#allocation2 + $0xbd0] sm:$0xff] %v8772_v0 }
  0x54   : > { %283 = vst [vmem:[#allocation2 + $0xd68] sm:$0xff] %v8772_v0  ;;  %284 = vst [vmem:[#allocation2 + $0xbf0] sm:$0xff] %v8772_v0 }
  0x55   : > { %285 = vst [vmem:[#allocation2 + $0x868] sm:$0xff] %v8772_v0  ;;  %286 = vst [vmem:[#allocation2 + $0xe30] sm:$0xff] %v8772_v0 }
  0x56   : > { %287 = vst [vmem:[#allocation2 + $0xcd8] sm:$0xff] %v8772_v0  ;;  %288 = vst [vmem:[#allocation2 + $0x18] sm:$0xff] %v8772_v0 }
  0x57   : > { %289 = vst [vmem:[#allocation2 + $0x528] sm:$0xff] %v8772_v0  ;;  %290 = vst [vmem:[#allocation2 + $0xfd8] sm:$0xff] %v8772_v0 }
  0x58   : > { %291 = vst [vmem:[#allocation2 + $0x420] sm:$0xff] %v8772_v0  ;;  %292 = vst [vmem:[#allocation2 + $0x940] sm:$0xff] %v8772_v0 }
  0x59   : > { %293 = vst [vmem:[#allocation2 + $0xed0] sm:$0xff] %v8772_v0  ;;  %294 = vst [vmem:[#allocation2 + $0x160] sm:$0xff] %v8772_v0 }
  0x5a   : > { %295 = vst [vmem:[#allocation2 + $0x8e8] sm:$0xff] %v8772_v0  ;;  %296 = vst [vmem:[#allocation2 + $0x8b0] sm:$0xff] %v8772_v0 }
  0x5b   : > { %297 = vst [vmem:[#allocation2 + $0x320] sm:$0xff] %v8772_v0  ;;  %298 = vst [vmem:[#allocation2 + $0x700] sm:$0xff] %v8772_v0 }
  0x5c   : > { %299 = vst [vmem:[#allocation2 + $0x5f8] sm:$0xff] %v8772_v0  ;;  %300 = vst [vmem:[#allocation2 + $0x620] sm:$0xff] %v8772_v0 }
  0x5d   : > { %301 = vst [vmem:[#allocation2 + $0x630] sm:$0xff] %v8772_v0  ;;  %302 = vst [vmem:[#allocation2 + $0x7a8] sm:$0xff] %v8772_v0 }
  0x5e   : > { %303 = vst [vmem:[#allocation2 + $0x70] sm:$0xff] %v8772_v0  ;;  %304 = vst [vmem:[#allocation2 + $0x678] sm:$0xff] %v8772_v0 }
  0x5f   : > { %305 = vst [vmem:[#allocation2 + $0xa88] sm:$0xff] %v8772_v0  ;;  %306 = vst [vmem:[#allocation2 + $0xb80] sm:$0xff] %v8772_v0 }
  0x60   : > { %307 = vst [vmem:[#allocation2 + $0xc58] sm:$0xff] %v8772_v0  ;;  %308 = vst [vmem:[#allocation2 + $0x8d8] sm:$0xff] %v8772_v0 }
  0x61   : > { %309 = vst [vmem:[#allocation2 + $0x9d8] sm:$0xff] %v8772_v0  ;;  %310 = vst [vmem:[#allocation2 + $0x800] sm:$0xff] %v8772_v0 }
  0x62   : > { %311 = vst [vmem:[#allocation2 + $0xe68] sm:$0xff] %v8772_v0  ;;  %312 = vst [vmem:[#allocation2 + $0x6f0] sm:$0xff] %v8772_v0 }
  0x63   : > { %313 = vst [vmem:[#allocation2 + $0xbe8] sm:$0xff] %v8772_v0  ;;  %314 = vst [vmem:[#allocation2 + $0xd30] sm:$0xff] %v8772_v0 }
  0x64   : > { %315 = vst [vmem:[#allocation2 + $0x358] sm:$0xff] %v8772_v0  ;;  %316 = vst [vmem:[#allocation2 + $0x490] sm:$0xff] %v8772_v0 }
  0x65   : > { %317 = vst [vmem:[#allocation2 + $0x488] sm:$0xff] %v8772_v0  ;;  %318 = vst [vmem:[#allocation2 + $0xd60] sm:$0xff] %v8772_v0 }
  0x66   : > { %319 = vst [vmem:[#allocation2 + $0xbd8] sm:$0xff] %v8772_v0  ;;  %320 = vst [vmem:[#allocation2 + $0x580] sm:$0xff] %v8772_v0 }
  0x67   : > { %321 = vst [vmem:[#allocation2 + $0x208] sm:$0xff] %v8772_v0  ;;  %322 = vst [vmem:[#allocation2 + $0x158] sm:$0xff] %v8772_v0 }
  0x68   : > { %323 = vst [vmem:[#allocation2 + $0xec8] sm:$0xff] %v8772_v0  ;;  %324 = vst [vmem:[#allocation2 + $0xdb0] sm:$0xff] %v8772_v0 }
  0x69   : > { %325 = vst [vmem:[#allocation2 + $0x660] sm:$0xff] %v8772_v0  ;;  %326 = vst [vmem:[#allocation2 + $0x6d8] sm:$0xff] %v8772_v0 }
  0x6a   : > { %327 = vst [vmem:[#allocation2 + $0xbc8] sm:$0xff] %v8772_v0  ;;  %328 = vst [vmem:[#allocation2 + $0xf38] sm:$0xff] %v8772_v0 }
  0x6b   : > { %329 = vst [vmem:[#allocation2 + $0x98] sm:$0xff] %v8772_v0  ;;  %330 = vst [vmem:[#allocation2 + $0xa48] sm:$0xff] %v8772_v0 }
  0x6c   : > { %331 = vst [vmem:[#allocation2 + $0x1b8] sm:$0xff] %v8772_v0  ;;  %332 = vst [vmem:[#allocation2 + $0x188] sm:$0xff] %v8772_v0 }
  0x6d   : > { %333 = vst [vmem:[#allocation2 + $0x650] sm:$0xff] %v8772_v0  ;;  %334 = vst [vmem:[#allocation2 + $0x90] sm:$0xff] %v8772_v0 }
  0x6e   : > { %335 = vst [vmem:[#allocation2 + $0xdf0] sm:$0xff] %v8772_v0  ;;  %336 = vst [vmem:[#allocation2 + $0x9b0] sm:$0xff] %v8772_v0 }
  0x6f   : > { %337 = vst [vmem:[#allocation2 + $0x180] sm:$0xff] %v8772_v0  ;;  %338 = vst [vmem:[#allocation2 + $0x288] sm:$0xff] %v8772_v0 }
  0x70   : > { %339 = vst [vmem:[#allocation2 + $0x8e0] sm:$0xff] %v8772_v0  ;;  %340 = vst [vmem:[#allocation2 + $0xc00] sm:$0xff] %v8772_v0 }
  0x71   : > { %341 = vst [vmem:[#allocation2 + $0x230] sm:$0xff] %v8772_v0  ;;  %342 = vst [vmem:[#allocation2 + $0x2e0] sm:$0xff] %v8772_v0 }
  0x72   : > { %343 = vst [vmem:[#allocation2 + $0x708] sm:$0xff] %v8772_v0  ;;  %344 = vst [vmem:[#allocation2 + $0x428] sm:$0xff] %v8772_v0 }
  0x73   : > { %345 = vst [vmem:[#allocation2 + $0xe48] sm:$0xff] %v8772_v0  ;;  %346 = vst [vmem:[#allocation2 + $0xe80] sm:$0xff] %v8772_v0 }
  0x74   : > { %347 = vst [vmem:[#allocation2 + $0x250] sm:$0xff] %v8772_v0  ;;  %348 = vst [vmem:[#allocation2 + $0x380] sm:$0xff] %v8772_v0 }
  0x75   : > { %349 = vst [vmem:[#allocation2 + $0xa58] sm:$0xff] %v8772_v0  ;;  %350 = vst [vmem:[#allocation2 + $0xae0] sm:$0xff] %v8772_v0 }
  0x76   : > { %351 = vst [vmem:[#allocation2 + $0xea8] sm:$0xff] %v8772_v0  ;;  %352 = vst [vmem:[#allocation2 + $0x9c0] sm:$0xff] %v8772_v0 }
  0x77   : > { %353 = vst [vmem:[#allocation2 + $0x418] sm:$0xff] %v8772_v0  ;;  %354 = vst [vmem:[#allocation2 + $0x410] sm:$0xff] %v8772_v0 }
  0x78   : > { %355 = vst [vmem:[#allocation2 + $0x760] sm:$0xff] %v8772_v0  ;;  %356 = vst [vmem:[#allocation2 + $0x9e0] sm:$0xff] %v8772_v0 }
  0x79   : > { %357 = vst [vmem:[#allocation2 + $0x100] sm:$0xff] %v8772_v0  ;;  %358 = vst [vmem:[#allocation2 + $0x78] sm:$0xff] %v8772_v0 }
  0x7a   : > { %359 = vst [vmem:[#allocation2 + $0xec0] sm:$0xff] %v8772_v0  ;;  %360 = vst [vmem:[#allocation2 + $0x438] sm:$0xff] %v8772_v0 }
  0x7b   : > { %361 = vst [vmem:[#allocation2 + $0xca8] sm:$0xff] %v8772_v0  ;;  %362 = vst [vmem:[#allocation2 + $0xaf8] sm:$0xff] %v8772_v0 }
  0x7c   : > { %363 = vst [vmem:[#allocation2 + $0xa28] sm:$0xff] %v8772_v0  ;;  %364 = vst [vmem:[#allocation2 + $0xa20] sm:$0xff] %v8772_v0 }
  0x7d   : > { %365 = vst [vmem:[#allocation2 + $0xd50] sm:$0xff] %v8772_v0  ;;  %366 = vst [vmem:[#allocation2 + $0xbb8] sm:$0xff] %v8772_v0 }
  0x7e   : > { %367 = vst [vmem:[#allocation2 + $0x3d8] sm:$0xff] %v8772_v0  ;;  %368 = vst [vmem:[#allocation2 + $0x5e0] sm:$0xff] %v8772_v0 }
  0x7f   : > { %369 = vst [vmem:[#allocation2 + $0x980] sm:$0xff] %v8772_v0  ;;  %370 = vst [vmem:[#allocation2 + $0x990] sm:$0xff] %v8772_v0 }
  0x80   : > { %371 = vst [vmem:[#allocation2 + $0xb10] sm:$0xff] %v8772_v0  ;;  %372 = vst [vmem:[#allocation2 + $0x960] sm:$0xff] %v8772_v0 }
  0x81   : > { %373 = vst [vmem:[#allocation2 + $0x310] sm:$0xff] %v8772_v0  ;;  %374 = vst [vmem:[#allocation2 + $0xd8] sm:$0xff] %v8772_v0 }
  0x82   : > { %375 = vst [vmem:[#allocation2 + $0x1c0] sm:$0xff] %v8772_v0  ;;  %376 = vst [vmem:[#allocation2 + $0xac8] sm:$0xff] %v8772_v0 }
  0x83   : > { %377 = vst [vmem:[#allocation2 + $0x820] sm:$0xff] %v8772_v0  ;;  %378 = vst [vmem:[#allocation2 + $0x8c8] sm:$0xff] %v8772_v0 }
  0x84   : > { %379 = vst [vmem:[#allocation2 + $0xe20] sm:$0xff] %v8772_v0  ;;  %380 = vst [vmem:[#allocation2 + $0xb60] sm:$0xff] %v8772_v0 }
  0x85   : > { %381 = vst [vmem:[#allocation2 + $0xed8] sm:$0xff] %v8772_v0  ;;  %382 = vst [vmem:[#allocation2 + $0xc80] sm:$0xff] %v8772_v0 }
  0x86   : > { %383 = vst [vmem:[#allocation2 + $0x950] sm:$0xff] %v8772_v0  ;;  %384 = vst [vmem:[#allocation2 + $0x698] sm:$0xff] %v8772_v0 }
  0x87   : > { %385 = vst [vmem:[#allocation2 + $0x2d0] sm:$0xff] %v8772_v0  ;;  %386 = vst [vmem:[#allocation2 + $0xf18] sm:$0xff] %v8772_v0 }
  0x88   : > { %387 = vst [vmem:[#allocation2 + $0xb90] sm:$0xff] %v8772_v0  ;;  %388 = vst [vmem:[#allocation2 + $0x458] sm:$0xff] %v8772_v0 }
  0x89   : > { %389 = vst [vmem:[#allocation2 + $0xf20] sm:$0xff] %v8772_v0  ;;  %390 = vst [vmem:[#allocation2 + $0x8] sm:$0xff] %v8772_v0 }
  0x8a   : > { %391 = vst [vmem:[#allocation2 + $0xc40] sm:$0xff] %v8772_v0  ;;  %392 = vst [vmem:[#allocation2 + $0xd48] sm:$0xff] %v8772_v0 }
  0x8b   : > { %393 = vst [vmem:[#allocation2 + $0x7b8] sm:$0xff] %v8772_v0  ;;  %394 = vst [vmem:[#allocation2 + $0x6b0] sm:$0xff] %v8772_v0 }
  0x8c   : > { %395 = vst [vmem:[#allocation2 + $0x3d0] sm:$0xff] %v8772_v0  ;;  %396 = vst [vmem:[#allocation2 + $0x228] sm:$0xff] %v8772_v0 }
  0x8d   : > { %397 = vst [vmem:[#allocation2 + $0xd00] sm:$0xff] %v8772_v0  ;;  %398 = vst [vmem:[#allocation2 + $0x498] sm:$0xff] %v8772_v0 }
  0x8e   : > { %399 = vst [vmem:[#allocation2 + $0x688] sm:$0xff] %v8772_v0  ;;  %400 = vst [vmem:[#allocation2 + $0x5c0] sm:$0xff] %v8772_v0 }
  0x8f   : > { %401 = vst [vmem:[#allocation2 + $0x858] sm:$0xff] %v8772_v0  ;;  %402 = vst [vmem:[#allocation2 + $0x478] sm:$0xff] %v8772_v0 }
  0x90   : > { %403 = vst [vmem:[#allocation2 + $0x6f8] sm:$0xff] %v8772_v0  ;;  %404 = vst [vmem:[#allocation2 + $0xc70] sm:$0xff] %v8772_v0 }
  0x91   : > { %405 = vst [vmem:[#allocation2 + $0x780] sm:$0xff] %v8772_v0  ;;  %406 = vst [vmem:[#allocation2 + $0x1f8] sm:$0xff] %v8772_v0 }
  0x92   : > { %407 = vst [vmem:[#allocation2 + $0xbc0] sm:$0xff] %v8772_v0  ;;  %408 = vst [vmem:[#allocation2 + $0x788] sm:$0xff] %v8772_v0 }
  0x93   : > { %409 = vst [vmem:[#allocation2 + $0x4b8] sm:$0xff] %v8772_v0  ;;  %410 = vst [vmem:[#allocation2 + $0x4c8] sm:$0xff] %v8772_v0 }
  0x94   : > { %411 = vst [vmem:[#allocation2 + $0x38] sm:$0xff] %v8772_v0  ;;  %412 = vst [vmem:[#allocation2 + $0x3b0] sm:$0xff] %v8772_v0 }
  0x95   : > { %413 = vst [vmem:[#allocation2 + $0x7c8] sm:$0xff] %v8772_v0  ;;  %414 = vst [vmem:[#allocation2 + $0xd90] sm:$0xff] %v8772_v0 }
  0x96   : > { %415 = vst [vmem:[#allocation2 + $0xba8] sm:$0xff] %v8772_v0  ;;  %416 = vst [vmem:[#allocation2 + $0x9c8] sm:$0xff] %v8772_v0 }
  0x97   : > { %417 = vst [vmem:[#allocation2 + $0x2f0] sm:$0xff] %v8772_v0  ;;  %418 = vst [vmem:[#allocation2 + $0x5d0] sm:$0xff] %v8772_v0 }
  0x98   : > { %419 = vst [vmem:[#allocation2 + $0xfe0] sm:$0xff] %v8772_v0  ;;  %420 = vst [vmem:[#allocation2 + $0xb98] sm:$0xff] %v8772_v0 }
  0x99   : > { %421 = vst [vmem:[#allocation2 + $0x840] sm:$0xff] %v8772_v0  ;;  %422 = vst [vmem:[#allocation2 + $0x768] sm:$0xff] %v8772_v0 }
  0x9a   : > { %423 = vst [vmem:[#allocation2 + $0x568] sm:$0xff] %v8772_v0  ;;  %424 = vst [vmem:[#allocation2 + $0xb30] sm:$0xff] %v8772_v0 }
  0x9b   : > { %425 = vst [vmem:[#allocation2 + $0x9f8] sm:$0xff] %v8772_v0  ;;  %426 = vst [vmem:[#allocation2 + $0x138] sm:$0xff] %v8772_v0 }
  0x9c   : > { %427 = vst [vmem:[#allocation2 + $0xf00] sm:$0xff] %v8772_v0  ;;  %428 = vst [vmem:[#allocation2 + $0xd08] sm:$0xff] %v8772_v0 }
  0x9d   : > { %429 = vst [vmem:[#allocation2 + $0xe00] sm:$0xff] %v8772_v0  ;;  %430 = vst [vmem:[#allocation2 + $0xc28] sm:$0xff] %v8772_v0 }
  0x9e   : > { %431 = vst [vmem:[#allocation2 + $0x6e0] sm:$0xff] %v8772_v0  ;;  %432 = vst [vmem:[#allocation2 + $0x970] sm:$0xff] %v8772_v0 }
  0x9f   : > { %433 = vst [vmem:[#allocation2 + $0x628] sm:$0xff] %v8772_v0  ;;  %434 = vst [vmem:[#allocation2 + $0xb50] sm:$0xff] %v8772_v0 }
  0xa0   : > { %435 = vst [vmem:[#allocation2 + $0x920] sm:$0xff] %v8772_v0  ;;  %436 = vst [vmem:[#allocation2 + $0xef8] sm:$0xff] %v8772_v0 }
  0xa1   : > { %437 = vst [vmem:[#allocation2 + $0x370] sm:$0xff] %v8772_v0  ;;  %438 = vst [vmem:[#allocation2 + $0x2e8] sm:$0xff] %v8772_v0 }
  0xa2   : > { %439 = vst [vmem:[#allocation2 + $0x398] sm:$0xff] %v8772_v0  ;;  %440 = vst [vmem:[#allocation2 + $0xe0] sm:$0xff] %v8772_v0 }
  0xa3   : > { %441 = vst [vmem:[#allocation2 + $0x1e0] sm:$0xff] %v8772_v0  ;;  %442 = vst [vmem:[#allocation2 + $0xf90] sm:$0xff] %v8772_v0 }
  0xa4   : > { %443 = vst [vmem:[#allocation2 + $0x270] sm:$0xff] %v8772_v0  ;;  %444 = vst [vmem:[#allocation2 + $0x8f8] sm:$0xff] %v8772_v0 }
  0xa5   : > { %445 = vst [vmem:[#allocation2 + $0x598] sm:$0xff] %v8772_v0  ;;  %446 = vst [vmem:[#allocation2 + $0x750] sm:$0xff] %v8772_v0 }
  0xa6   : > { %447 = vst [vmem:[#allocation2 + $0xb08] sm:$0xff] %v8772_v0  ;;  %448 = vst [vmem:[#allocation2 + $0xde8] sm:$0xff] %v8772_v0 }
  0xa7   : > { %449 = vst [vmem:[#allocation2 + $0x308] sm:$0xff] %v8772_v0  ;;  %450 = vst [vmem:[#allocation2 + $0x9a8] sm:$0xff] %v8772_v0 }
  0xa8   : > { %451 = vst [vmem:[#allocation2 + $0xe98] sm:$0xff] %v8772_v0  ;;  %452 = vst [vmem:[#allocation2 + $0x268] sm:$0xff] %v8772_v0 }
  0xa9   : > { %453 = vst [vmem:[#allocation2 + $0x610] sm:$0xff] %v8772_v0  ;;  %454 = vst [vmem:[#allocation2 + $0x50] sm:$0xff] %v8772_v0 }
  0xaa   : > { %455 = vst [vmem:[#allocation2 + $0x6d0] sm:$0xff] %v8772_v0  ;;  %456 = vst [vmem:[#allocation2 + $0xa60] sm:$0xff] %v8772_v0 }
  0xab   : > { %457 = vst [vmem:[#allocation2 + $0x470] sm:$0xff] %v8772_v0  ;;  %458 = vst [vmem:[#allocation2 + $0x928] sm:$0xff] %v8772_v0 }
  0xac   : > { %459 = vst [vmem:[#allocation2 + $0x8a0] sm:$0xff] %v8772_v0  ;;  %460 = vst [vmem:[#allocation2 + $0xe88] sm:$0xff] %v8772_v0 }
  0xad   : > { %461 = vst [vmem:[#allocation2 + $0xb68] sm:$0xff] %v8772_v0  ;;  %462 = vst [vmem:[#allocation2 + $0x6a8] sm:$0xff] %v8772_v0 }
  0xae   : > { %463 = vst [vmem:[#allocation2 + $0xe50] sm:$0xff] %v8772_v0  ;;  %464 = vst [vmem:[#allocation2 + $0x7c0] sm:$0xff] %v8772_v0 }
  0xaf   : > { %465 = vst [vmem:[#allocation2 + $0xe90] sm:$0xff] %v8772_v0  ;;  %466 = vst [vmem:[#allocation2 + $0xc38] sm:$0xff] %v8772_v0 }
  0xb0   : > { %467 = vst [vmem:[#allocation2 + $0xb8] sm:$0xff] %v8772_v0  ;;  %468 = vst [vmem:[#allocation2 + $0xc48] sm:$0xff] %v8772_v0 }
  0xb1   : > { %469 = vst [vmem:[#allocation2 + $0xb20] sm:$0xff] %v8772_v0  ;;  %470 = vst [vmem:[#allocation2 + $0x30] sm:$0xff] %v8772_v0 }
  0xb2   : > { %471 = vst [vmem:[#allocation2 + $0xc8] sm:$0xff] %v8772_v0  ;;  %472 = vst [vmem:[#allocation2 + $0x2b8] sm:$0xff] %v8772_v0 }
  0xb3   : > { %473 = vst [vmem:[#allocation2 + $0x2a8] sm:$0xff] %v8772_v0  ;;  %474 = vst [vmem:[#allocation2 + $0xf78] sm:$0xff] %v8772_v0 }
  0xb4   : > { %475 = vst [vmem:[#allocation2 + $0x210] sm:$0xff] %v8772_v0  ;;  %476 = vst [vmem:[#allocation2 + $0x998] sm:$0xff] %v8772_v0 }
  0xb5   : > { %477 = vst [vmem:[#allocation2 + $0xc88] sm:$0xff] %v8772_v0  ;;  %478 = vst [vmem:[#allocation2 + $0xab8] sm:$0xff] %v8772_v0 }
  0xb6   : > { %479 = vst [vmem:[#allocation2 + $0x5a8] sm:$0xff] %v8772_v0  ;;  %480 = vst [vmem:[#allocation2 + $0x668] sm:$0xff] %v8772_v0 }
  0xb7   : > { %481 = vst [vmem:[#allocation2 + $0xb18] sm:$0xff] %v8772_v0  ;;  %482 = vst [vmem:[#allocation2 + $0x468] sm:$0xff] %v8772_v0 }
  0xb8   : > { %483 = vst [vmem:[#allocation2 + $0x578] sm:$0xff] %v8772_v0  ;;  %484 = vst [vmem:[#allocation2 + $0x600] sm:$0xff] %v8772_v0 }
  0xb9   : > { %485 = vst [vmem:[#allocation2 + $0x570] sm:$0xff] %v8772_v0  ;;  %486 = vst [vmem:[#allocation2 + $0xb40] sm:$0xff] %v8772_v0 }
  0xba   : > { %487 = vst [vmem:[#allocation2 + $0x170] sm:$0xff] %v8772_v0  ;;  %488 = vst [vmem:[#allocation2 + $0x838] sm:$0xff] %v8772_v0 }
  0xbb   : > { %489 = vst [vmem:[#allocation2 + $0xcb8] sm:$0xff] %v8772_v0  ;;  %490 = vst [vmem:[#allocation2 + $0xe28] sm:$0xff] %v8772_v0 }
  0xbc   : > { %491 = vst [vmem:[#allocation2 + $0x500] sm:$0xff] %v8772_v0  ;;  %492 = vst [vmem:[#allocation2 + $0xe60] sm:$0xff] %v8772_v0 }
  0xbd   : > { %493 = vst [vmem:[#allocation2 + $0x8c0] sm:$0xff] %v8772_v0  ;;  %494 = vst [vmem:[#allocation2 + $0xe08] sm:$0xff] %v8772_v0 }
  0xbe   : > { %495 = vst [vmem:[#allocation2 + $0xb58] sm:$0xff] %v8772_v0  ;;  %496 = vst [vmem:[#allocation2 + $0x618] sm:$0xff] %v8772_v0 }
  0xbf   : > { %497 = vst [vmem:[#allocation2 + $0x200] sm:$0xff] %v8772_v0  ;;  %498 = vst [vmem:[#allocation2 + $0x5b0] sm:$0xff] %v8772_v0 }
  0xc0   : > { %499 = vst [vmem:[#allocation2 + $0x140] sm:$0xff] %v8772_v0  ;;  %500 = vst [vmem:[#allocation2 + $0xc0] sm:$0xff] %v8772_v0 }
  0xc1   : > { %501 = vst [vmem:[#allocation2 + $0xba0] sm:$0xff] %v8772_v0  ;;  %502 = vst [vmem:[#allocation2 + $0xd0] sm:$0xff] %v8772_v0 }
  0xc2   : > { %503 = vst [vmem:[#allocation2 + $0xd70] sm:$0xff] %v8772_v0  ;;  %504 = vst [vmem:[#allocation2 + $0x448] sm:$0xff] %v8772_v0 }
  0xc3   : > { %505 = vst [vmem:[#allocation2 + $0x5a0] sm:$0xff] %v8772_v0  ;;  %506 = vst [vmem:[#allocation2 + $0xc60] sm:$0xff] %v8772_v0 }
  0xc4   : > { %507 = vst [vmem:[#allocation2 + $0x360] sm:$0xff] %v8772_v0  ;;  %508 = vst [vmem:[#allocation2 + $0xde0] sm:$0xff] %v8772_v0 }
  0xc5   : > { %509 = vst [vmem:[#allocation2 + $0x118] sm:$0xff] %v8772_v0  ;;  %510 = vst [vmem:[#allocation2 + $0x690] sm:$0xff] %v8772_v0 }
  0xc6   : > { %511 = vst [vmem:[#allocation2 + $0xb48] sm:$0xff] %v8772_v0  ;;  %512 = vst [vmem:[#allocation2 + $0xeb0] sm:$0xff] %v8772_v0 }
  0xc7   : > { %513 = vst [vmem:[#allocation2 + $0x860] sm:$0xff] %v8772_v0  ;;  %514 = vst [vmem:[#allocation2 + $0xcc8] sm:$0xff] %v8772_v0 }
  0xc8   : > { %515 = vst [vmem:[#allocation2 + $0xff8] sm:$0xff] %v8772_v0  ;;  %516 = vst [vmem:[#allocation2 + $0x758] sm:$0xff] %v8772_v0 }
  0xc9   : > { %517 = vst [vmem:[#allocation2 + $0x590] sm:$0xff] %v8772_v0  ;;  %518 = vst [vmem:[#allocation2 + $0xb00] sm:$0xff] %v8772_v0 }
  0xca   : > { %519 = vst [vmem:[#allocation2 + $0x6c8] sm:$0xff] %v8772_v0  ;;  %520 = vst [vmem:[#allocation2 + $0xee8] sm:$0xff] %v8772_v0 }
  0xcb   : > { %521 = vst [vmem:[#allocation2 + $0x848] sm:$0xff] %v8772_v0  ;;  %522 = vst [vmem:[#allocation2 + $0xe78] sm:$0xff] %v8772_v0 }
  0xcc   : > { %523 = vst [vmem:[#allocation2 + $0x640] sm:$0xff] %v8772_v0  ;;  %524 = vst [vmem:[#allocation2 + $0x258] sm:$0xff] %v8772_v0 }
  0xcd   : > { %525 = vst [vmem:[#allocation2 + $0x7f8] sm:$0xff] %v8772_v0  ;;  %526 = vst [vmem:[#allocation2 + $0x278] sm:$0xff] %v8772_v0 }
  0xce   : > { %527 = vst [vmem:[#allocation2 + $0x648] sm:$0xff] %v8772_v0  ;;  %528 = vst [vmem:[#allocation2 + $0x120] sm:$0xff] %v8772_v0 }
  0xcf   : > { %529 = vst [vmem:[#allocation2 + $0x330] sm:$0xff] %v8772_v0  ;;  %530 = vst [vmem:[#allocation2 + $0x718] sm:$0xff] %v8772_v0 }
  0xd0   : > { %531 = vst [vmem:[#allocation2 + $0x968] sm:$0xff] %v8772_v0  ;;  %532 = vst [vmem:[#allocation2 + $0x7f0] sm:$0xff] %v8772_v0 }
  0xd1   : > { %533 = vst [vmem:[#allocation2 + $0x2f8] sm:$0xff] %v8772_v0  ;;  %534 = vst [vmem:[#allocation2 + $0xc20] sm:$0xff] %v8772_v0 }
  0xd2   : > { %535 = vst [vmem:[#allocation2] sm:$0xff] %v8772_v0  ;;  %536 = vst [vmem:[#allocation2 + $0xe8] sm:$0xff] %v8772_v0 }
  0xd3   : > { %537 = vst [vmem:[#allocation2 + $0xfd0] sm:$0xff] %v8772_v0  ;;  %538 = vst [vmem:[#allocation2 + $0x8a8] sm:$0xff] %v8772_v0 }
  0xd4   : > { %539 = vst [vmem:[#allocation2 + $0xad8] sm:$0xff] %v8772_v0  ;;  %540 = vst [vmem:[#allocation2 + $0x878] sm:$0xff] %v8772_v0 }
  0xd5   : > { %541 = vst [vmem:[#allocation2 + $0x80] sm:$0xff] %v8772_v0  ;;  %542 = vst [vmem:[#allocation2 + $0xda8] sm:$0xff] %v8772_v0 }
  0xd6   : > { %543 = vst [vmem:[#allocation2 + $0x670] sm:$0xff] %v8772_v0  ;;  %544 = vst [vmem:[#allocation2 + $0xda0] sm:$0xff] %v8772_v0 }
  0xd7   : > { %545 = vst [vmem:[#allocation2 + $0x530] sm:$0xff] %v8772_v0  ;;  %546 = vst [vmem:[#allocation2 + $0x20] sm:$0xff] %v8772_v0 }
  0xd8   : > { %547 = vst [vmem:[#allocation2 + $0xf70] sm:$0xff] %v8772_v0  ;;  %548 = vst [vmem:[#allocation2 + $0xeb8] sm:$0xff] %v8772_v0 }
  0xd9   : > { %549 = vst [vmem:[#allocation2 + $0x88] sm:$0xff] %v8772_v0  ;;  %550 = vst [vmem:[#allocation2 + $0x318] sm:$0xff] %v8772_v0 }
  0xda   : > { %551 = vst [vmem:[#allocation2 + $0x520] sm:$0xff] %v8772_v0  ;;  %552 = vst [vmem:[#allocation2 + $0x430] sm:$0xff] %v8772_v0 }
  0xdb   : > { %553 = vst [vmem:[#allocation2 + $0x8b8] sm:$0xff] %v8772_v0  ;;  %554 = vst [vmem:[#allocation2 + $0x4b0] sm:$0xff] %v8772_v0 }
  0xdc   : > { %555 = vst [vmem:[#allocation2 + $0xa38] sm:$0xff] %v8772_v0  ;;  %556 = vst [vmem:[#allocation2 + $0x588] sm:$0xff] %v8772_v0 }
  0xdd   : > { %557 = vst [vmem:[#allocation2 + $0xd80] sm:$0xff] %v8772_v0  ;;  %558 = vst [vmem:[#allocation2 + $0xa0] sm:$0xff] %v8772_v0 }
  0xde   : > { %559 = vst [vmem:[#allocation2 + $0x550] sm:$0xff] %v8772_v0  ;;  %560 = vst [vmem:[#allocation2 + $0xf98] sm:$0xff] %v8772_v0 }
  0xdf   : > { %561 = vst [vmem:[#allocation2 + $0x4f8] sm:$0xff] %v8772_v0  ;;  %562 = vst [vmem:[#allocation2 + $0xce0] sm:$0xff] %v8772_v0 }
  0xe0   : > { %563 = vst [vmem:[#allocation2 + $0xfc8] sm:$0xff] %v8772_v0  ;;  %564 = vst [vmem:[#allocation2 + $0xf48] sm:$0xff] %v8772_v0 }
  0xe1   : > { %565 = vst [vmem:[#allocation2 + $0x828] sm:$0xff] %v8772_v0  ;;  %566 = vst [vmem:[#allocation2 + $0xe40] sm:$0xff] %v8772_v0 }
  0xe2   : > { %567 = vst [vmem:[#allocation2 + $0x978] sm:$0xff] %v8772_v0  ;;  %568 = vst [vmem:[#allocation2 + $0x3e0] sm:$0xff] %v8772_v0 }
  0xe3   : > { %569 = vst [vmem:[#allocation2 + $0xf80] sm:$0xff] %v8772_v0  ;;  %570 = vst [vmem:[#allocation2 + $0xf50] sm:$0xff] %v8772_v0 }
  0xe4   : > { %571 = vst [vmem:[#allocation2 + $0x1b0] sm:$0xff] %v8772_v0  ;;  %572 = vst [vmem:[#allocation2 + $0xdc0] sm:$0xff] %v8772_v0 }
  0xe5   : > { %573 = vst [vmem:[#allocation2 + $0xfb0] sm:$0xff] %v8772_v0  ;;  %574 = vst [vmem:[#allocation2 + $0xdb8] sm:$0xff] %v8772_v0 }
  0xe6   : > { %575 = vst [vmem:[#allocation2 + $0x350] sm:$0xff] %v8772_v0  ;;  %576 = vst [vmem:[#allocation2 + $0x388] sm:$0xff] %v8772_v0 }
  0xe7   : > { %577 = vst [vmem:[#allocation2 + $0xa78] sm:$0xff] %v8772_v0  ;;  %578 = vst [vmem:[#allocation2 + $0xcc0] sm:$0xff] %v8772_v0 }
  0xe8   : > { %579 = vst [vmem:[#allocation2 + $0xf40] sm:$0xff] %v8772_v0  ;;  %580 = vst [vmem:[#allocation2 + $0x908] sm:$0xff] %v8772_v0 }
  0xe9   : > { %581 = vst [vmem:[#allocation2 + $0xc10] sm:$0xff] %v8772_v0  ;;  %582 = vst [vmem:[#allocation2 + $0x1a0] sm:$0xff] %v8772_v0 }
  0xea   : > { %583 = vst [vmem:[#allocation2 + $0x4d0] sm:$0xff] %v8772_v0  ;;  %584 = vst [vmem:[#allocation2 + $0xfa0] sm:$0xff] %v8772_v0 }
  0xeb   : > { %585 = vst [vmem:[#allocation2 + $0xcb0] sm:$0xff] %v8772_v0  ;;  %586 = vst [vmem:[#allocation2 + $0x168] sm:$0xff] %v8772_v0 }
  0xec   : > { %587 = vst [vmem:[#allocation2 + $0xf28] sm:$0xff] %v8772_v0  ;;  %588 = vst [vmem:[#allocation2 + $0xf88] sm:$0xff] %v8772_v0 }
  0xed   : > { %589 = vst [vmem:[#allocation2 + $0xdc8] sm:$0xff] %v8772_v0  ;;  %590 = vst [vmem:[#allocation2 + $0x560] sm:$0xff] %v8772_v0 }
  0xee   : > { %591 = vst [vmem:[#allocation2 + $0x888] sm:$0xff] %v8772_v0  ;;  %592 = vst [vmem:[#allocation2 + $0x608] sm:$0xff] %v8772_v0 }
  0xef   : > { %593 = vst [vmem:[#allocation2 + $0x128] sm:$0xff] %v8772_v0  ;;  %594 = vst [vmem:[#allocation2 + $0x178] sm:$0xff] %v8772_v0 }
  0xf0   : > { %595 = vst [vmem:[#allocation2 + $0xf8] sm:$0xff] %v8772_v0  ;;  %596 = vst [vmem:[#allocation2 + $0x8d0] sm:$0xff] %v8772_v0 }
  0xf1   : > { %597 = vst [vmem:[#allocation2 + $0x130] sm:$0xff] %v8772_v0  ;;  %598 = vst [vmem:[#allocation2 + $0xa8] sm:$0xff] %v8772_v0 }
  0xf2   : > { %599 = vst [vmem:[#allocation2 + $0x1d8] sm:$0xff] %v8772_v0  ;;  %600 = vst [vmem:[#allocation2 + $0xe58] sm:$0xff] %v8772_v0 }
  0xf3   : > { %601 = vst [vmem:[#allocation2 + $0x638] sm:$0xff] %v8772_v0  ;;  %602 = vst [vmem:[#allocation2 + $0x870] sm:$0xff] %v8772_v0 }
  0xf4   : > { %603 = vst [vmem:[#allocation2 + $0xa40] sm:$0xff] %v8772_v0  ;;  %604 = vst [vmem:[#allocation2 + $0x958] sm:$0xff] %v8772_v0 }
  0xf5   : > { %605 = vst [vmem:[#allocation2 + $0xbe0] sm:$0xff] %v8772_v0  ;;  %606 = vst [vmem:[#allocation2 + $0xad0] sm:$0xff] %v8772_v0 }
  0xf6   : > { %607 = vst [vmem:[#allocation2 + $0xa18] sm:$0xff] %v8772_v0  ;;  %608 = vst [vmem:[#allocation2 + $0x300] sm:$0xff] %v8772_v0 }
  0xf7   : > { %609 = vst [vmem:[#allocation2 + $0xa10] sm:$0xff] %v8772_v0  ;;  %610 = vst [vmem:[#allocation2 + $0xd28] sm:$0xff] %v8772_v0 }
  0xf8   : > { %611 = vst [vmem:[#allocation2 + $0x480] sm:$0xff] %v8772_v0  ;;  %612 = vst [vmem:[#allocation2 + $0x240] sm:$0xff] %v8772_v0 }
  0xf9   : > { %613 = vst [vmem:[#allocation2 + $0xcf0] sm:$0xff] %v8772_v0  ;;  %614 = vst [vmem:[#allocation2 + $0x48] sm:$0xff] %v8772_v0 }
  0xfa   : > { %615 = vst [vmem:[#allocation2 + $0x4e8] sm:$0xff] %v8772_v0  ;;  %616 = vst [vmem:[#allocation2 + $0x220] sm:$0xff] %v8772_v0 }
  0xfb   : > { %617 = vst [vmem:[#allocation2 + $0x890] sm:$0xff] %v8772_v0  ;;  %618 = vst [vmem:[#allocation2 + $0x3b8] sm:$0xff] %v8772_v0 }
  0xfc   : > { %619 = vst [vmem:[#allocation2 + $0x3e8] sm:$0xff] %v8772_v0  ;;  %620 = vst [vmem:[#allocation2 + $0xe10] sm:$0xff] %v8772_v0 }
  0xfd   : > { %621 = vst [vmem:[#allocation2 + $0x248] sm:$0xff] %v8772_v0  ;;  %622 = vst [vmem:[#allocation2 + $0x3f0] sm:$0xff] %v8772_v0 }
  0xfe   : > { %623 = vst [vmem:[#allocation2 + $0x3c8] sm:$0xff] %v8772_v0  ;;  %624 = vst [vmem:[#allocation2 + $0xc98] sm:$0xff] %v8772_v0 }
  0xff   : > { %625 = vst [vmem:[#allocation2 + $0x280] sm:$0xff] %v8772_v0  ;;  %626 = vst [vmem:[#allocation2 + $0xa08] sm:$0xff] %v8772_v0 }
 0x100   : > { %627 = vst [vmem:[#allocation2 + $0x540] sm:$0xff] %v8772_v0  ;;  %628 = vst [vmem:[#allocation2 + $0x378] sm:$0xff] %v8772_v0 }
 0x101   : > { %629 = vst [vmem:[#allocation2 + $0x7d8] sm:$0xff] %v8772_v0  ;;  %630 = vst [vmem:[#allocation2 + $0x68] sm:$0xff] %v8772_v0 }
 0x102   : > { %631 = vst [vmem:[#allocation2 + $0xd38] sm:$0xff] %v8772_v0  ;;  %632 = vst [vmem:[#allocation2 + $0x190] sm:$0xff] %v8772_v0 }
 0x103   : > { %633 = vst [vmem:[#allocation2 + $0x548] sm:$0xff] %v8772_v0  ;;  %634 = vst [vmem:[#allocation2 + $0x1e8] sm:$0xff] %v8772_v0 }
 0x104   : > { %635 = vst [vmem:[#allocation2 + $0xc08] sm:$0xff] %v8772_v0  ;;  %636 = vst [vmem:[#allocation2 + $0x2a0] sm:$0xff] %v8772_v0 }
 0x105   : > { %637 = vst [vmem:[#allocation2 + $0x408] sm:$0xff] %v8772_v0  ;;  %638 = vst [vmem:[#allocation2 + $0x7e8] sm:$0xff] %v8772_v0 }
 0x106   : > { %639 = vst [vmem:[#allocation2 + $0xc68] sm:$0xff] %v8772_v0  ;;  %640 = vst [vmem:[#allocation2 + $0x658] sm:$0xff] %v8772_v0 }
 0x107   : > { %641 = vst [vmem:[#allocation2 + $0xf60] sm:$0xff] %v8772_v0  ;;  %642 = vst [vmem:[#allocation2 + $0xfc0] sm:$0xff] %v8772_v0 }
 0x108   : > { %643 = vst [vmem:[#allocation2 + $0x5e8] sm:$0xff] %v8772_v0  ;;  %644 = vst [vmem:[#allocation2 + $0x440] sm:$0xff] %v8772_v0 }
 0x109   : > { %645 = vst [vmem:[#allocation2 + $0xff0] sm:$0xff] %v8772_v0  ;;  %646 = vst [vmem:[#allocation2 + $0x720] sm:$0xff] %v8772_v0 }
 0x10a   : > { %647 = vst [vmem:[#allocation2 + $0x5d8] sm:$0xff] %v8772_v0  ;;  %648 = vst [vmem:[#allocation2 + $0xb70] sm:$0xff] %v8772_v0 }
 0x10b   : > { %649 = vst [vmem:[#allocation2 + $0x2c8] sm:$0xff] %v8772_v0  ;;  %650 = vst [vmem:[#allocation2 + $0x738] sm:$0xff] %v8772_v0 }
 0x10c   : > { %651 = vst [vmem:[#allocation2 + $0x808] sm:$0xff] %v8772_v0  ;;  %652 = vst [vmem:[#allocation2 + $0x60] sm:$0xff] %v8772_v0 }
 0x10d   : > { %653 = vst [vmem:[#allocation2 + $0x6c0] sm:$0xff] %v8772_v0  ;;  %654 = vst [vmem:[#allocation2 + $0xae8] sm:$0xff] %v8772_v0 }
 0x10e   : > { %655 = vst [vmem:[#allocation2 + $0xfb8] sm:$0xff] %v8772_v0  ;;  %656 = vst [vmem:[#allocation2 + $0xb0] sm:$0xff] %v8772_v0 }
 0x10f   : > { %657 = vst [vmem:[#allocation2 + $0xdd8] sm:$0xff] %v8772_v0  ;;  %658 = vst [vmem:[#allocation2 + $0xa30] sm:$0xff] %v8772_v0 }
 0x110   : > { %659 = vst [vmem:[#allocation2 + $0x1d0] sm:$0xff] %v8772_v0  ;;  %660 = vst [vmem:[#allocation2 + $0xdd0] sm:$0xff] %v8772_v0 }
 0x111   : > { %661 = vst [vmem:[#allocation2 + $0x3a0] sm:$0xff] %v8772_v0  ;;  %662 = vst [vmem:[#allocation2 + $0x9b8] sm:$0xff] %v8772_v0 }
 0x112   : > { %663 = vst [vmem:[#allocation2 + $0x198] sm:$0xff] %v8772_v0  ;;  %664 = vst [vmem:[#allocation2 + $0xcd0] sm:$0xff] %v8772_v0 }
 0x113   : > { %665 = vst [vmem:[#allocation2 + $0x5f0] sm:$0xff] %v8772_v0  ;;  %666 = vst [vmem:[#allocation2 + $0x7a0] sm:$0xff] %v8772_v0 }
 0x114   : > { %667 = vst [vmem:[#allocation2 + $0x1f0] sm:$0xff] %v8772_v0  ;;  %668 = vst [vmem:[#allocation2 + $0xd88] sm:$0xff] %v8772_v0 }
 0x115   : > { %669 = vst [vmem:[#allocation2 + $0xef0] sm:$0xff] %v8772_v0  ;;  %670 = vst [vmem:[#allocation2 + $0x148] sm:$0xff] %v8772_v0 }
 0x116   : > { %671 = vst [vmem:[#allocation2 + $0x6b8] sm:$0xff] %v8772_v0  ;;  %672 = vst [vmem:[#allocation2 + $0xf58] sm:$0xff] %v8772_v0 }
 0x117   : > { %673 = vst [vmem:[#allocation2 + $0xa70] sm:$0xff] %v8772_v0  ;;  %674 = vst [vmem:[#allocation2 + $0xe70] sm:$0xff] %v8772_v0 }
 0x118   : > { %675 = vst [vmem:[#allocation2 + $0x7d0] sm:$0xff] %v8772_v0  ;;  %676 = vst [vmem:[#allocation2 + $0xe18] sm:$0xff] %v8772_v0 }
 0x119   : > { %677 = vst [vmem:[#allocation2 + $0x518] sm:$0xff] %v8772_v0  ;;  %678 = vst [vmem:[#allocation2 + $0x9f0] sm:$0xff] %v8772_v0 }
 0x11a   : > { %679 = vst [vmem:[#allocation2 + $0x6a0] sm:$0xff] %v8772_v0  ;;  %680 = vst [vmem:[#allocation2 + $0xf0] sm:$0xff] %v8772_v0 }
 0x11b   : > { %681 = vst [vmem:[#allocation2 + $0x218] sm:$0xff] %v8772_v0  ;;  %682 = vst [vmem:[#allocation2 + $0x58] sm:$0xff] %v8772_v0 }
 0x11c   : > { %683 = vst [vmem:[#allocation2 + $0x28] sm:$0xff] %v8772_v0  ;;  %684 = vst [vmem:[#allocation2 + $0xc18] sm:$0xff] %v8772_v0 }
 0x11d   : > { %685 = vst [vmem:[#allocation2 + $0x290] sm:$0xff] %v8772_v0  ;;  %686 = vst [vmem:[#allocation2 + $0x4e0] sm:$0xff] %v8772_v0 }
 0x11e   : > { %687 = vst [vmem:[#allocation2 + $0x10] sm:$0xff] %v8772_v0  ;;  %688 = vst [vmem:[#allocation2 + $0xa68] sm:$0xff] %v8772_v0 }
 0x11f   : > { %689 = vst [vmem:[#allocation2 + $0xf30] sm:$0xff] %v8772_v0  ;;  %690 = vst [vmem:[#allocation2 + $0x680] sm:$0xff] %v8772_v0 }
 0x120   : > { %691 = vst [vmem:[#allocation2 + $0x108] sm:$0xff] %v8772_v0  ;;  %692 = vst [vmem:[#allocation2 + $0x778] sm:$0xff] %v8772_v0 }
 0x121   : > { %693 = vst [vmem:[#allocation2 + $0x368] sm:$0xff] %v8772_v0  ;;  %694 = vst [vmem:[#allocation2 + $0x110] sm:$0xff] %v8772_v0 }
 0x122   : > { %695 = vst [vmem:[#allocation2 + $0xaa0] sm:$0xff] %v8772_v0  ;;  %696 = vst [vmem:[#allocation2 + $0xee0] sm:$0xff] %v8772_v0 }
 0x123   : > { %697 = vst [vmem:[#allocation2 + $0x260] sm:$0xff] %v8772_v0  ;;  %698 = vst [vmem:[#allocation2 + $0x3a8] sm:$0xff] %v8772_v0 }
 0x124   : > { %699 = vst [vmem:[#allocation2 + $0xf68] sm:$0xff] %v8772_v0  ;;  %700 = vst [vmem:[#allocation2 + $0x880] sm:$0xff] %v8772_v0 }
 0x125   : > { %701 = vst [vmem:[#allocation2 + $0x4f0] sm:$0xff] %v8772_v0  ;;  %702 = vst [vmem:[#allocation2 + $0x850] sm:$0xff] %v8772_v0 }
 0x126   : > { %703 = vst [vmem:[#allocation2 + $0xd10] sm:$0xff] %v8772_v0  ;;  %704 = vst [vmem:[#allocation2 + $0xb38] sm:$0xff] %v8772_v0 }
 0x127   : > { %705 = vst [vmem:[#allocation2 + $0x8f0] sm:$0xff] %v8772_v0  ;;  %706 = vst [vmem:[#allocation2 + $0x798] sm:$0xff] %v8772_v0 }
 0x128   : > { %707 = vst [vmem:[#allocation2 + $0x238] sm:$0xff] %v8772_v0  ;;  %708 = vst [vmem:[#allocation2 + $0xa00] sm:$0xff] %v8772_v0 }
 0x129   : > { %709 = vst [vmem:[#allocation2 + $0xd18] sm:$0xff] %v8772_v0  ;;  %710 = vst [vmem:[#allocation2 + $0xd40] sm:$0xff] %v8772_v0 }
 0x12a   : > { %711 = vst [vmem:[#allocation2 + $0xa80] sm:$0xff] %v8772_v0  ;;  %712 = vst [vmem:[#allocation2 + $0x2b0] sm:$0xff] %v8772_v0 }
 0x12b   : > { %713 = vst [vmem:[#allocation2 + $0x740] sm:$0xff] %v8772_v0  ;;  %714 = vst [vmem:[#allocation2 + $0xaa8] sm:$0xff] %v8772_v0 }
 0x12c   : > { %715 = vst [vmem:[#allocation2 + $0xfa8] sm:$0xff] %v8772_v0  ;;  %716 = vst [vmem:[#allocation2 + $0xa98] sm:$0xff] %v8772_v0 }
 0x12d   : > { %717 = vst [vmem:[#allocation2 + $0xc78] sm:$0xff] %v8772_v0  ;;  %718 = vst [vmem:[#allocation2 + $0x2d8] sm:$0xff] %v8772_v0 }
 0x12e   : > { %719 = vst [vmem:[#allocation2 + $0xc30] sm:$0xff] %v8772_v0  ;;  %720 = vst [vmem:[#allocation2 + $0xf10] sm:$0xff] %v8772_v0 }
 0x12f   : > { %721 = vst [vmem:[#allocation2 + $0x460] sm:$0xff] %v8772_v0  ;;  %722 = vst [vmem:[#allocation2 + $0x898] sm:$0xff] %v8772_v0 }
 0x130   : > { %723 = vst [vmem:[#allocation2 + $0x538] sm:$0xff] %v8772_v0  ;;  %724 = vst [vmem:[#allocation2 + $0x328] sm:$0xff] %v8772_v0 }
 0x131   : > { %725 = vst [vmem:[#allocation2 + $0xa50] sm:$0xff] %v8772_v0  ;;  %726 = vst [vmem:[#allocation2 + $0x7b0] sm:$0xff] %v8772_v0 }
 0x132   : > { %727 = vst [vmem:[#allocation2 + $0xdf8] sm:$0xff] %v8772_v0  ;;  %728 = vst [vmem:[#allocation2 + $0x9a0] sm:$0xff] %v8772_v0 }
 0x133   : > { %729 = vst [vmem:[#allocation2 + $0xe38] sm:$0xff] %v8772_v0  ;;  %730 = vst [vmem:[#allocation2 + $0x390] sm:$0xff] %v8772_v0 }
 0x134   : > { %731 = vst [vmem:[#allocation2 + $0x7e0] sm:$0xff] %v8772_v0  ;;  %732 = vst [vmem:[#allocation2 + $0x900] sm:$0xff] %v8772_v0 }
 0x135   : > { %733 = vst [vmem:[#allocation2 + $0x4c0] sm:$0xff] %v8772_v0  ;;  %734 = vst [vmem:[#allocation2 + $0x710] sm:$0xff] %v8772_v0 }
 0x136   : > { %735 = vst [vmem:[#allocation2 + $0x508] sm:$0xff] %v8772_v0  ;;  %736 = vst [vmem:[#allocation2 + $0x9e8] sm:$0xff] %v8772_v0 }
 0x137   : > { %737 = vst [vmem:[#allocation2 + $0x938] sm:$0xff] %v8772_v0  ;;  %738 = vst [vmem:[#allocation2 + $0x558] sm:$0xff] %v8772_v0 }
 0x138   : > { %739 = vst [vmem:[#allocation2 + $0xac0] sm:$0xff] %v8772_v0  ;;  %740 = vst [vmem:[#allocation2 + $0x930] sm:$0xff] %v8772_v0 }
 0x139   : > { %741 = vst [vmem:[#allocation2 + $0x988] sm:$0xff] %v8772_v0  ;;  %742 = vst [vmem:[#allocation2 + $0x348] sm:$0xff] %v8772_v0 }
 0x13a   : > { %743 = vst [vmem:[#allocation2 + $0xc90] sm:$0xff] %v8772_v0  ;;  %744 = vst [vmem:[#allocation2 + $0xce8] sm:$0xff] %v8772_v0 }
 0x13b   : > { %745 = vst [vmem:[#allocation2 + $0xcf8] sm:$0xff] %v8772_v0  ;;  %746 = vst [vmem:[#allocation2 + $0x1a8] sm:$0xff] %v8772_v0 }
 0x13c   : > { %747 = vst [vmem:[#allocation2 + $0x4a8] sm:$0xff] %v8772_v0  ;;  %748 = vst [vmem:[#allocation2 + $0x40] sm:$0xff] %v8772_v0 }
 0x13d   : > { %749 = vst [vmem:[#allocation2 + $0x1c8] sm:$0xff] %v8772_v0  ;;  %750 = vst [vmem:[#allocation2 + $0xfe8] sm:$0xff] %v8772_v0 }
 0x13e   : > { %751 = vst [vmem:[#allocation2 + $0xd98] sm:$0xff] %v8772_v0  ;;  %752 = vst [vmem:[#allocation2 + $0x150] sm:$0xff] %v8772_v0 }
 0x13f   : > { %753 = vst [vmem:[#allocation2 + $0x400] sm:$0xff] %v8772_v0  ;;  %754 = vst [vmem:[#allocation2 + $0x298] sm:$0xff] %v8772_v0 }
 0x140   : > { %755 = vst [vmem:[#allocation2 + $0x730] sm:$0xff] %v8772_v0  ;;  %756 = vst [vmem:[#allocation2 + $0x3c0] sm:$0xff] %v8772_v0 }
 0x141   : > { %757 = vst [vmem:[#allocation2 + $0x2c0] sm:$0xff] %v8772_v0  ;;  %758 = vst [vmem:[#allocation2 + $0x4a0] sm:$0xff] %v8772_v0 }
 0x142 PF: > { %v759_v1 = vld [vmem:[%s8885_s25] sm:$0xff]  ;;  %v1272_v4 = vld [vmem:[%s8891_s21 + $0x8] sm:$0xff]  ;;  %v1273_v8 = vld [vmem:[%s8891_s21 + $0x10] sm:$0xff]  ;;  %p7537_p8 = scmp.ne.s32.totalorder %s8758_s12, 3 }
 0x143   : > { %v1271_v2 = vld [vmem:[%s8891_s21] sm:$0xff]  ;;  %v9415_v6 = vmul.f32 %v759_v1, %v759_v1  ;;  %v3321_v7 = vmul.f32 1.442695, %v1272_v4  ;;  %v760_v9 = vld [vmem:[%s8885_s25 + $0x8] sm:$0xff]  ;;  %v1274_v10 = vld [vmem:[%s8891_s21 + $0x18] sm:$0xff]  ;;  %v9422_v14 = vadd.f32 1.0, %v1272_v4 }
 0x144   : > { %v3319_v3 = vmul.f32 1.442695, %v1271_v2  ;;  %v9413_v5 = vadd.f32 1.0, %v1271_v2  ;;  %v761_v11 = vld [vmem:[%s8885_s25 + $0x10] sm:$0xff]  ;;  %v3323_v12 = vmul.f32 1.442695, %v1273_v8  ;;  %v9428_v19 = vmul.f32 %v760_v9, %v760_v9 }
 0x145   : > { %v1275_v13 = vld [vmem:[%s8891_s21 + $0x20] sm:$0xff]  ;;  %v762_v15 = vld [vmem:[%s8885_s25 + $0x18] sm:$0xff]  ;;  %v3325_v16 = vmul.f32 1.442695, %v1274_v10  ;;  %v1276_v17 = vld [vmem:[%s8891_s21 + $0x28] sm:$0xff]  ;;  %v9432_v23 = vadd.f32 1.0, %v1273_v8  ;;  %v9434_v24 = vmul.f32 %v761_v11, %v761_v11 }
 0x146   : > { %7618 = vpow2.f32 %v3319_v3  ;;  %v2807_v18 = vsub.f32 %v9413_v5, %v9415_v6  ;;  %v763_v20 = vld [vmem:[%s8885_s25 + $0x20] sm:$0xff]  ;;  %v3327_v21 = vmul.f32 1.442695, %v1275_v13  ;;  %v1277_v22 = vld [vmem:[%s8891_s21 + $0x30] sm:$0xff]  ;;  %v764_v25 = vld [vmem:[%s8885_s25 + $0x28] sm:$0xff]  ;;  %v9439_v29 = vadd.f32 1.0, %v1274_v10 }
 0x147   : > { %7620 = vpow2.f32 %v3321_v7  ;;  %v3329_v26 = vmul.f32 1.442695, %v1276_v17  ;;  %v765_v27 = vld [vmem:[%s8885_s25 + $0x30] sm:$0xff]  ;;  %v1278_v28 = vld [vmem:[%s8891_s21 + $0x38] sm:$0xff]  ;;  %v9441_v30 = vmul.f32 %v762_v15, %v762_v15  ;;  %v9443_v31 = vadd.f32 1.0, %v1275_v13  ;;  %v1279_v33 = vld [vmem:[%s8891_s21 + $0x40] sm:$0xff] }
 0x148   : > { %7622 = vpow2.f32 %v3323_v12  ;;  %v766_v32 = vld [vmem:[%s8885_s25 + $0x38] sm:$0xff]  ;;  %v9447_v34 = vmul.f32 %v763_v20, %v763_v20  ;;  %v9449_v35 = vadd.f32 1.0, %v1276_v17  ;;  %v3331_v36 = vmul.f32 1.442695, %v1277_v22  ;;  %v767_v37 = vld [vmem:[%s8885_s25 + $0x40] sm:$0xff]  ;;  %v1280_v38 = vld [vmem:[%s8891_s21 + $0x48] sm:$0xff] }
 0x149   : > { %7624 = vpow2.f32 %v3325_v16  ;;  %v9453_v39 = vmul.f32 %v764_v25, %v764_v25  ;;  %v9455_v40 = vadd.f32 1.0, %v1277_v22  ;;  %v9457_v41 = vmul.f32 %v765_v27, %v765_v27  ;;  %v768_v46 = vld [vmem:[%s8885_s25 + $0x48] sm:$0xff]  ;;  %v1281_v47 = vld [vmem:[%s8891_s21 + $0x50] sm:$0xff]  ;;  %v1282_v51 = vld [vmem:[%s8891_s21 + $0x58] sm:$0xff] }
 0x14a   : > { %7626 = vpow2.f32 %v3327_v21  ;;  %v3333_v42 = vmul.f32 1.442695, %v1278_v28  ;;  %v9459_v43 = vadd.f32 1.0, %v1278_v28  ;;  %v9461_v44 = vmul.f32 %v766_v32, %v766_v32  ;;  %v1283_v55 = vld [vmem:[%s8891_s21 + $0x60] sm:$0xff]  ;;  %v769_v58 = vld [vmem:[%s8885_s25 + $0x50] sm:$0xff]  ;;  %v1284_v0 = vld [vmem:[%s8891_s21 + $0x68] sm:$0xff] }
 0x14b   : > { %7628 = vpow2.f32 %v3329_v26  ;;  %v3335_v45 = vmul.f32 1.442695, %v1279_v33  ;;  %v9465_v48 = vadd.f32 1.0, %v1279_v33  ;;  %v9467_v49 = vmul.f32 %v767_v37, %v767_v37  ;;  %v4855_v2 = vld [vmem:[#allocation2 + $0xab0] sm:$0xff]  ;;  %v770_v7 = vld [vmem:[%s8885_s25 + $0x58] sm:$0xff]  ;;  %v771_v17 = vld [vmem:[%s8885_s25 + $0x60] sm:$0xff] }
 0x14c   : > { %7630 = vpow2.f32 %v3331_v36  ;;  %v3337_v50 = vmul.f32 1.442695, %v1280_v38  ;;  %v2808_v52 = vsub.f32 %v9422_v14, %v9428_v19  ;;  %v2809_v53 = vsub.f32 %v9432_v23, %v9434_v24  ;;  %v4856_v11 = vld [vmem:[#allocation2 + $0xbb0] sm:$0xff]  ;;  %v772_v19 = vld [vmem:[%s8885_s25 + $0x68] sm:$0xff]  ;;  %v4857_v6 = vld [vmem:[#allocation2 + $0x4d8] sm:$0xff] }
 0x14d   : > { %7632 = vpow2.f32 %v3333_v42  ;;  %v2810_v54 = vsub.f32 %v9439_v29, %v9441_v30  ;;  %v9477_v56 = vadd.f32 1.0, %v1280_v38  ;;  %v9479_v57 = vmul.f32 %v768_v46, %v768_v46  ;;  %v1285_v14 = vld [vmem:[%s8891_s21 + $0x70] sm:$0xff]  ;;  %v1286_v24 = vld [vmem:[%s8891_s21 + $0x78] sm:$0xff]  ;;  %v1287_v37 = vld [vmem:[%s8891_s21 + $0x80] sm:$0xff] }
 0x14e   : > { %7634 = vpow2.f32 %v3335_v45  ;;  %v3339_v59 = vmul.f32 1.442695, %v1281_v47  ;;  %v2811_v60 = vsub.f32 %v9443_v31, %v9447_v34  ;;  %v2812_v61 = vsub.f32 %v9449_v35, %v9453_v39  ;;  %v4858_v28 = vld [vmem:[#allocation2 + $0x818] sm:$0xff]  ;;  %v773_v29 = vld [vmem:[%s8885_s25 + $0x70] sm:$0xff] }
 0x14f   : > { %7636 = vpow2.f32 %v3337_v50  ;;  %v2813_v62 = vsub.f32 %v9455_v40, %v9457_v41  ;;  %v3341_v63 = vmul.f32 1.442695, %v1282_v51  ;;  %v2814_v3 = vsub.f32 %v9459_v43, %v9461_v44  ;;  %v4859_v33 = vld [vmem:[#allocation2 + $0xc50] sm:$0xff]  ;;  %v775_v41 = vld [vmem:[%s8885_s25 + $0x80] sm:$0xff] }
 0x150   : > { %v2815_v4 = vsub.f32 %v9465_v48, %v9467_v49  ;;  %7638 = vpow2.f32 %v3339_v59  ;;  %v3343_v8 = vmul.f32 1.442695, %v1283_v55  ;;  %v9497_v12 = vadd.f32 1.0, %v1281_v47  ;;  %v4860_v45 = vld [vmem:[#allocation2 + $0x810] sm:$0xff] }
 0x151   : > { %v9499_v13 = vmul.f32 %v769_v58, %v769_v58  ;;  %7640 = vpow2.f32 %v3341_v63  ;;  %v2816_v16 = vsub.f32 %v9477_v56, %v9479_v57  ;;  %v3345_v20 = vmul.f32 1.442695, %v1284_v0  ;;  %v4861_v58 = vld [vmem:[#allocation2 + $0x770] sm:$0xff] }
 0x152   : > { %7642 = vpow2.f32 %v3343_v8  ;;  %v9508_v22 = vmul.f32 %v770_v7, %v770_v7  ;;  %v9510_v23 = vadd.f32 1.0, %v1283_v55  ;;  %v3347_v30 = vmul.f32 1.442695, %v1285_v14  ;;  %v774_v8 = vld [vmem:[%s8885_s25 + $0x78] sm:$0xff] }
 0x153   : > { %v7619_v1 = vpop.eup %7618  ;;  %7644 = vpow2.f32 %v3345_v20  ;;  %v9514_v34 = vmul.f32 %v771_v17, %v771_v17  ;;  %v9516_v35 = vadd.f32 1.0, %v1284_v0  ;;  %v9518_v36 = vmul.f32 %v772_v19, %v772_v19  ;;  %v4864_v17 = vld [vmem:[#allocation2 + $0xb88] sm:$0xff] }
 0x154   : > { %v7621_v9 = vpop.eup %7620  ;;  %v4343_v10 = vsub.f32 %v2807_v18, %v7619_v1  ;;  %v9506_v18 = vadd.f32 1.0, %v1282_v51  ;;  %7646 = vpow2.f32 %v3347_v30  ;;  %v3349_v46 = vmul.f32 1.442695, %v1286_v24  ;;  %v4862_v1 = vld [vmem:[#allocation2 + $0x338] sm:$0xff] }
 0x155   : > { %v4344_v15 = vsub.f32 %v2808_v52, %v7621_v9  ;;  %v7623_v21 = vpop.eup %7622  ;;  %v9521_v51 = vadd.f32 1.0, %v1285_v14  ;;  %v9523_v52 = vmul.f32 %v773_v29, %v773_v29  ;;  %v2817_v59 = vsub.f32 %v9497_v12, %v9499_v13  ;;  %v1289_v12 = vld [vmem:[%s8891_s21 + $0x90] sm:$0xff] }
 0x156   : > { %v5367_v5 = vadd.f32 %v4855_v2, %v4343_v10  ;;  %v7625_v25 = vpop.eup %7624  ;;  %v4345_v27 = vsub.f32 %v2809_v53, %v7623_v21  ;;  %v1288_v53 = vld [vmem:[%s8891_s21 + $0x88] sm:$0xff]  ;;  %7648 = vpow2.f32 %v3349_v46  ;;  %v2818_v2 = vsub.f32 %v9506_v18, %v9508_v22  ;;  %v777_v22 = vld [vmem:[%s8885_s25 + $0x90] sm:$0xff] }
 0x157   : > { %v5368_v26 = vadd.f32 %v4856_v11, %v4344_v15  ;;  %v7627_v31 = vpop.eup %7626  ;;  %v4346_v32 = vsub.f32 %v2810_v54, %v7625_v25  ;;  %v2819_v7 = vsub.f32 %v9510_v23, %v9514_v34  ;;  %v4863_v11 = vld [vmem:[#allocation2 + $0x450] sm:$0xff]  ;;  %v2820_v40 = vsub.f32 %v9516_v35, %v9518_v36  ;;  %v1292_v34 = vld [vmem:[%s8891_s21 + $0xa8] sm:$0xff] }
 0x158   : > { %5879 = vst [vmem:[#allocation2 + $0xab0] sm:$0xff] %v5367_v5  ;;  %v7629_v38 = vpop.eup %7628  ;;  %v5369_v39 = vadd.f32 %v4857_v6, %v4345_v27  ;;  %v4347_v42 = vsub.f32 %v2811_v60, %v7627_v31  ;;  %v3351_v60 = vmul.f32 1.442695, %v1287_v37  ;;  %v2821_v43 = vsub.f32 %v9521_v51, %v9523_v52  ;;  %v776_v5 = vld [vmem:[%s8885_s25 + $0x88] sm:$0xff]  ;;  %v4867_v31 = vld [vmem:[#allocation2 + $0xca0] sm:$0xff] }
 0x159   : > { %5880 = vst [vmem:[#allocation2 + $0xbb0] sm:$0xff] %v5368_v26  ;;  %v5370_v47 = vadd.f32 %v4858_v28, %v4346_v32  ;;  %v4348_v50 = vsub.f32 %v2812_v61, %v7629_v38  ;;  %v7631_v54 = vpop.eup %7630  ;;  %v9548_v44 = vadd.f32 1.0, %v1286_v24  ;;  %v9554_v21 = vmul.f32 %v774_v8, %v774_v8  ;;  %v778_v26 = vld [vmem:[%s8885_s25 + $0x98] sm:$0xff]  ;;  %v1291_v28 = vld [vmem:[%s8891_s21 + $0xa0] sm:$0xff] }
 0x15a   : > { %5881 = vst [vmem:[#allocation2 + $0x4d8] sm:$0xff] %v5369_v39  ;;  %v5371_v55 = vadd.f32 %v4859_v33, %v4347_v42  ;;  %v7633_v63 = vpop.eup %7632  ;;  %v4349_v0 = vsub.f32 %v2813_v62, %v7631_v54  ;;  %7650 = vpow2.f32 %v3351_v60  ;;  %v3353_v62 = vmul.f32 1.442695, %v1288_v53  ;;  %v4868_v42 = vld [vmem:[#allocation2 + $0xb28] sm:$0xff]  ;;  %v1295_v8 = vld [vmem:[%s8891_s21 + $0xc0] sm:$0xff] }
 0x15b   : > { %5882 = vst [vmem:[#allocation2 + $0x818] sm:$0xff] %v5370_v47  ;;  %v5372_v61 = vadd.f32 %v4860_v45, %v4348_v50  ;;  %v7635_v9 = vpop.eup %7634  ;;  %v4350_v10 = vsub.f32 %v2814_v3, %v7633_v63  ;;  %v1290_v3 = vld [vmem:[%s8891_s21 + $0x98] sm:$0xff]  ;;  %v9557_v6 = vadd.f32 1.0, %v1287_v37  ;;  %v9559_v18 = vmul.f32 %v775_v41, %v775_v41  ;;  %v1293_v50 = vld [vmem:[%s8891_s21 + $0xb0] sm:$0xff] }
 0x15c   : > { %5883 = vst [vmem:[#allocation2 + $0xc50] sm:$0xff] %v5371_v55  ;;  %v7637_v13 = vpop.eup %7636  ;;  %v5373_v14 = vadd.f32 %v4861_v58, %v4349_v0  ;;  %v4351_v15 = vsub.f32 %v2815_v4, %v7635_v9  ;;  %7652 = vpow2.f32 %v3353_v62  ;;  %v4865_v4 = vld [vmem:[#allocation2 + $0x918] sm:$0xff]  ;;  %v3355_v23 = vmul.f32 1.442695, %v1289_v12  ;;  %v781_v62 = vld [vmem:[%s8885_s25 + $0xb0] sm:$0xff] }
 0x15d   : > { %5884 = vst [vmem:[#allocation2 + $0x810] sm:$0xff] %v5372_v61  ;;  %v5374_v19 = vadd.f32 %v4862_v1, %v4350_v10  ;;  %v4352_v20 = vsub.f32 %v2816_v16, %v7637_v13  ;;  %v7639_v48 = vpop.eup %7638  ;;  %v4866_v16 = vld [vmem:[#allocation2 + $0xd20] sm:$0xff]  ;;  %v9562_v25 = vadd.f32 1.0, %v1288_v53  ;;  %v3357_v27 = vmul.f32 1.442695, %v1290_v3  ;;  %v1294_v55 = vld [vmem:[%s8891_s21 + $0xb8] sm:$0xff] }
 0x15e   : > { %5885 = vst [vmem:[#allocation2 + $0x770] sm:$0xff] %v5373_v14  ;;  %v5375_v49 = vadd.f32 %v4863_v11, %v4351_v15  ;;  %v7641_v24 = vpop.eup %7640  ;;  %v4353_v57 = vsub.f32 %v2817_v59, %v7639_v48  ;;  %v9566_v32 = vmul.f32 %v776_v5, %v776_v5  ;;  %v9568_v33 = vadd.f32 1.0, %v1289_v12  ;;  %v4869_v59 = vld [vmem:[#allocation2 + $0xd58] sm:$0xff]  ;;  %v779_v61 = vld [vmem:[%s8885_s25 + $0xa0] sm:$0xff]  ;;  %v4870_v10 = vld [vmem:[#allocation2 + $0x510] sm:$0xff] }
 0x15f   : > { %5886 = vst [vmem:[#allocation2 + $0x338] sm:$0xff] %v5374_v19  ;;  %v5376_v56 = vadd.f32 %v4864_v17, %v4352_v20  ;;  %v7643_v29 = vpop.eup %7642  ;;  %v4354_v30 = vsub.f32 %v2818_v2, %v7641_v24  ;;  %7654 = vpow2.f32 %v3355_v23  ;;  %v9571_v37 = vmul.f32 %v777_v22, %v777_v22  ;;  %v780_v2 = vld [vmem:[%s8885_s25 + $0xa8] sm:$0xff]  ;;  %v782_v17 = vld [vmem:[%s8885_s25 + $0xb8] sm:$0xff]  ;;  %v1297_v22 = vld [vmem:[%s8891_s21 + $0xd0] sm:$0xff] }
 0x160   : > { %5887 = vst [vmem:[#allocation2 + $0x450] sm:$0xff] %v5375_v49  ;;  %v5377_v35 = vadd.f32 %v4865_v4, %v4353_v57  ;;  %v4355_v36 = vsub.f32 %v2819_v7, %v7643_v29  ;;  %7656 = vpow2.f32 %v3357_v27  ;;  %v7645_v38 = vpop.eup %7644  ;;  %v9573_v45 = vadd.f32 1.0, %v1290_v3  ;;  %v4871_v3 = vld [vmem:[#allocation2 + $0x728] sm:$0xff] }
 0x161   : > { %5888 = vst [vmem:[#allocation2 + $0xb88] sm:$0xff] %v5376_v56  ;;  %v5378_v39 = vadd.f32 %v4866_v16, %v4354_v30  ;;  %v9575_v46 = vmul.f32 %v778_v26, %v778_v26  ;;  %v3359_v47 = vmul.f32 1.442695, %v1291_v28  ;;  %v4356_v52 = vsub.f32 %v2820_v40, %v7645_v38  ;;  %v7647_v58 = vpop.eup %7646  ;;  %v4872_v24 = vld [vmem:[#allocation2 + $0x6e8] sm:$0xff] }
 0x162   : > { %5889 = vst [vmem:[#allocation2 + $0x918] sm:$0xff] %v5377_v35  ;;  %v5379_v51 = vadd.f32 %v4867_v31, %v4355_v36  ;;  %v2822_v53 = vsub.f32 %v9548_v44, %v9554_v21  ;;  %v3361_v54 = vmul.f32 1.442695, %v1292_v34  ;;  %v2823_v60 = vsub.f32 %v9557_v6, %v9559_v18  ;;  %v783_v21 = vld [vmem:[%s8885_s25 + $0xc0] sm:$0xff]  ;;  %v784_v18 = vld [vmem:[%s8885_s25 + $0xc8] sm:$0xff]  ;;  %v4873_v36 = vld [vmem:[#allocation2 + $0x790] sm:$0xff] }
 0x163   : > { %5890 = vst [vmem:[#allocation2 + $0xd20] sm:$0xff] %v5378_v39  ;;  %v2824_v63 = vsub.f32 %v9562_v25, %v9566_v32  ;;  %7658 = vpow2.f32 %v3359_v47  ;;  %v5380_v0 = vadd.f32 %v4868_v42, %v4356_v52  ;;  %v4357_v1 = vsub.f32 %v2821_v43, %v7647_v58  ;;  %v7649_v9 = vpop.eup %7648  ;;  %v1296_v43 = vld [vmem:[%s8891_s21 + $0xc8] sm:$0xff]  ;;  %v1298_v25 = vld [vmem:[%s8891_s21 + $0xd8] sm:$0xff]  ;;  %v4874_v47 = vld [vmem:[#allocation2 + $0x340] sm:$0xff] }
 0x164   : > { %5891 = vst [vmem:[#allocation2 + $0xca0] sm:$0xff] %v5379_v51  ;;  %7660 = vpow2.f32 %v3361_v54  ;;  %v3363_v7 = vmul.f32 1.442695, %v1293_v50  ;;  %v2825_v11 = vsub.f32 %v9568_v33, %v9571_v37  ;;  %v2826_v40 = vsub.f32 %v9573_v45, %v9575_v46  ;;  %v1299_v33 = vld [vmem:[%s8891_s21 + $0xe0] sm:$0xff]  ;;  %v1300_v42 = vld [vmem:[%s8891_s21 + $0xe8] sm:$0xff]  ;;  %v785_v52 = vld [vmem:[%s8885_s25 + $0xd0] sm:$0xff] }
 0x165   : > { %v9592_v41 = vadd.f32 1.0, %v1291_v28  ;;  %v3365_v12 = vmul.f32 1.442695, %v1294_v55  ;;  %5892 = vst [vmem:[#allocation2 + $0xb28] sm:$0xff] %v5380_v0  ;;  %v5381_v13 = vadd.f32 %v4869_v59, %v4357_v1  ;;  %v4358_v14 = vsub.f32 %v2822_v53, %v7649_v9  ;;  %v1301_v59 = vld [vmem:[%s8891_s21 + $0xf0] sm:$0xff]  ;;  %v787_v0 = vld [vmem:[%s8885_s25 + $0xe0] sm:$0xff] }
 0x166   : > { %v9595_v15 = vmul.f32 %v779_v61, %v779_v61  ;;  %7662 = vpow2.f32 %v3363_v7  ;;  %v9599_v19 = vadd.f32 1.0, %v1292_v34  ;;  %v9601_v20 = vmul.f32 %v780_v2, %v780_v2 }
 0x167   : > { %v7651_v44 = vpop.eup %7650  ;;  %7664 = vpow2.f32 %v3365_v12  ;;  %v3367_v5 = vmul.f32 1.442695, %v1295_v8  ;;  %5893 = vst [vmem:[#allocation2 + $0xd58] sm:$0xff] %v5381_v13  ;;  %v5382_v48 = vadd.f32 %v4870_v10, %v4358_v14  ;;  %v9604_v4 = vadd.f32 1.0, %v1293_v50  ;;  %v4876_v12 = vld [vmem:[#allocation2 + $0x830] sm:$0xff] }
 0x168   : > { %v4359_v49 = vsub.f32 %v2823_v60, %v7651_v44  ;;  %v9606_v6 = vmul.f32 %v781_v62, %v781_v62  ;;  %v9610_v56 = vadd.f32 1.0, %v1294_v55  ;;  %v9612_v57 = vmul.f32 %v782_v17, %v782_v17  ;;  %v786_v55 = vld [vmem:[%s8885_s25 + $0xd8] sm:$0xff]  ;;  %v789_v14 = vld [vmem:[%s8885_s25 + $0xf0] sm:$0xff] }
 0x169   : > { %v7653_v23 = vpop.eup %7652  ;;  %7666 = vpow2.f32 %v3367_v5  ;;  %v3369_v16 = vmul.f32 1.442695, %v1296_v43  ;;  %5894 = vst [vmem:[#allocation2 + $0x510] sm:$0xff] %v5382_v48  ;;  %v9615_v28 = vadd.f32 1.0, %v1295_v8  ;;  %v9617_v29 = vmul.f32 %v783_v21, %v783_v21  ;;  %v4875_v8 = vld [vmem:[#allocation2 + $0x748] sm:$0xff]  ;;  %v4877_v5 = vld [vmem:[#allocation2 + $0xaf0] sm:$0xff] }
 0x16a   : > { %v5383_v26 = vadd.f32 %v4871_v3, %v4359_v49  ;;  %v4360_v27 = vsub.f32 %v2824_v63, %v7653_v23  ;;  %v9619_v30 = vadd.f32 1.0, %v1296_v43  ;;  %v9621_v31 = vmul.f32 %v784_v18, %v784_v18  ;;  %v4878_v23 = vld [vmem:[#allocation2 + $0x5b8] sm:$0xff] }
 0x16b   : > { %7668 = vpow2.f32 %v3369_v16  ;;  %v3371_v32 = vmul.f32 1.442695, %v1297_v22  ;;  %v2827_v37 = vsub.f32 %v9592_v41, %v9595_v15  ;;  %v2828_v38 = vsub.f32 %v9599_v19, %v9601_v20  ;;  %v1303_v19 = vld [vmem:[%s8891_s21 + $0x100] sm:$0xff] }
 0x16c   : > { %v7655_v34 = vpop.eup %7654  ;;  %5895 = vst [vmem:[#allocation2 + $0x728] sm:$0xff] %v5383_v26  ;;  %v5384_v35 = vadd.f32 %v4872_v24, %v4360_v27  ;;  %v3373_v39 = vmul.f32 1.442695, %v1298_v25  ;;  %v2829_v50 = vsub.f32 %v9604_v4, %v9606_v6  ;;  %v2830_v51 = vsub.f32 %v9610_v56, %v9612_v57  ;;  %v1304_v4 = vld [vmem:[%s8891_s21 + $0x108] sm:$0xff]  ;;  %v1305_v26 = vld [vmem:[%s8891_s21 + $0x110] sm:$0xff] }
 0x16d   : > { %v7657_v45 = vpop.eup %7656  ;;  %v4361_v46 = vsub.f32 %v2825_v11, %v7655_v34  ;;  %7670 = vpow2.f32 %v3371_v32  ;;  %v2831_v54 = vsub.f32 %v9615_v28, %v9617_v29  ;;  %v3375_v58 = vmul.f32 1.442695, %v1299_v33  ;;  %v788_v11 = vld [vmem:[%s8885_s25 + $0xe8] sm:$0xff]  ;;  %v790_v34 = vld [vmem:[%s8885_s25 + $0xf8] sm:$0xff] }
 0x16e   : > { %5896 = vst [vmem:[#allocation2 + $0x6e8] sm:$0xff] %v5384_v35  ;;  %v4362_v53 = vsub.f32 %v2826_v40, %v7657_v45  ;;  %7672 = vpow2.f32 %v3373_v39  ;;  %v2832_v63 = vsub.f32 %v9619_v30, %v9621_v31  ;;  %v9640_v61 = vadd.f32 1.0, %v1297_v22  ;;  %v1302_v40 = vld [vmem:[%s8891_s21 + $0xf8] sm:$0xff]  ;;  %v4879_v29 = vld [vmem:[#allocation2 + $0x5c8] sm:$0xff]  ;;  %v791_v39 = vld [vmem:[%s8885_s25 + $0x100] sm:$0xff] }
 0x16f   : > { %v5385_v60 = vadd.f32 %v4873_v36, %v4361_v46  ;;  %v3377_v1 = vmul.f32 1.442695, %v1300_v42  ;;  %v9643_v9 = vmul.f32 %v785_v52, %v785_v52  ;;  %v9645_v10 = vadd.f32 1.0, %v1298_v25  ;;  %v4880_v46 = vld [vmem:[#allocation2 + $0xd78] sm:$0xff] }
 0x170   : > { %v7659_v2 = vpop.eup %7658  ;;  %v5386_v7 = vadd.f32 %v4874_v47, %v4362_v53  ;;  %7674 = vpow2.f32 %v3375_v58  ;;  %v9649_v13 = vmul.f32 %v786_v55, %v786_v55  ;;  %v3379_v15 = vmul.f32 1.442695, %v1301_v59 }
 0x171   : > { %v7661_v41 = vpop.eup %7660  ;;  %5897 = vst [vmem:[#allocation2 + $0x790] sm:$0xff] %v5385_v60  ;;  %v4363_v62 = vsub.f32 %v2827_v37, %v7659_v2  ;;  %7676 = vpow2.f32 %v3377_v1  ;;  %v9652_v43 = vadd.f32 1.0, %v1299_v33  ;;  %v9654_v44 = vmul.f32 %v787_v0, %v787_v0  ;;  %v1307_v60 = vld [vmem:[%s8891_s21 + $0x120] sm:$0xff]  ;;  %v4881_v0 = vld [vmem:[#allocation2 + $0x3f8] sm:$0xff] }
 0x172   : > { %5898 = vst [vmem:[#allocation2 + $0x340] sm:$0xff] %v5386_v7  ;;  %v4364_v17 = vsub.f32 %v2828_v38, %v7661_v41  ;;  %v9656_v3 = vadd.f32 1.0, %v1300_v42  ;;  %v9659_v48 = vmul.f32 %v788_v11, %v788_v11  ;;  %7678 = vpow2.f32 %v3379_v15  ;;  %v1306_v42 = vld [vmem:[%s8891_s21 + $0x118] sm:$0xff]  ;;  %v4883_v15 = vld [vmem:[#allocation2 + $0xea0] sm:$0xff] }
 0x173   : > { %v7663_v20 = vpop.eup %7662  ;;  %v5387_v21 = vadd.f32 %v4875_v8, %v4363_v62  ;;  %v3381_v49 = vmul.f32 1.442695, %v1302_v40  ;;  %v9662_v24 = vadd.f32 1.0, %v1301_v59  ;;  %v9664_v56 = vmul.f32 %v789_v14, %v789_v14  ;;  %v793_v59 = vld [vmem:[%s8885_s25 + $0x110] sm:$0xff]  ;;  %v794_v7 = vld [vmem:[%s8885_s25 + $0x118] sm:$0xff] }
 0x174   : > { %v7665_v6 = vpop.eup %7664  ;;  %v5388_v18 = vadd.f32 %v4876_v12, %v4364_v17  ;;  %v4365_v22 = vsub.f32 %v2829_v50, %v7663_v20  ;;  %v2833_v16 = vsub.f32 %v9640_v61, %v9643_v9  ;;  %v3383_v25 = vmul.f32 1.442695, %v1303_v19  ;;  %v1308_v9 = vld [vmem:[%s8891_s21 + $0x128] sm:$0xff] }
 0x175   : > { %5899 = vst [vmem:[#allocation2 + $0x748] sm:$0xff] %v5387_v21  ;;  %v4366_v57 = vsub.f32 %v2830_v51, %v7665_v6  ;;  %7680 = vpow2.f32 %v3381_v49  ;;  %v2834_v32 = vsub.f32 %v9645_v10, %v9649_v13  ;;  %v2835_v33 = vsub.f32 %v9652_v43, %v9654_v44  ;;  %v792_v51 = vld [vmem:[%s8885_s25 + $0x108] sm:$0xff]  ;;  %v1310_v49 = vld [vmem:[%s8891_s21 + $0x138] sm:$0xff] }
 0x176   : > { %v7667_v27 = vpop.eup %7666  ;;  %5900 = vst [vmem:[#allocation2 + $0x830] sm:$0xff] %v5388_v18  ;;  %v5389_v28 = vadd.f32 %v4877_v5, %v4365_v22  ;;  %v3385_v35 = vmul.f32 1.442695, %v1304_v4  ;;  %v2836_v38 = vsub.f32 %v9656_v3, %v9659_v48  ;;  %7682 = vpow2.f32 %v3383_v25  ;;  %v1309_v3 = vld [vmem:[%s8891_s21 + $0x130] sm:$0xff]  ;;  %v4884_v5 = vld [vmem:[#allocation2 + $0xb78] sm:$0xff]  ;;  %v795_v22 = vld [vmem:[%s8885_s25 + $0x120] sm:$0xff] }
 0x177   : > { %v5390_v36 = vadd.f32 %v4878_v23, %v4366_v57  ;;  %v4367_v37 = vsub.f32 %v2831_v54, %v7667_v27  ;;  %v2837_v47 = vsub.f32 %v9662_v24, %v9664_v56  ;;  %v9680_v50 = vadd.f32 1.0, %v1302_v40  ;;  %v796_v23 = vld [vmem:[%s8885_s25 + $0x128] sm:$0xff]  ;;  %v1311_v27 = vld [vmem:[%s8891_s21 + $0x140] sm:$0xff] }
 0x178   : > { %v7669_v45 = vpop.eup %7668  ;;  %5901 = vst [vmem:[#allocation2 + $0xaf0] sm:$0xff] %v5389_v28  ;;  %7684 = vpow2.f32 %v3385_v35  ;;  %v3387_v52 = vmul.f32 1.442695, %v1305_v26  ;;  %v9686_v55 = vmul.f32 %v790_v34, %v790_v34  ;;  %v9688_v58 = vadd.f32 1.0, %v1303_v19  ;;  %v4885_v57 = vld [vmem:[#allocation2 + $0x948] sm:$0xff] }
 0x179   : > { %5902 = vst [vmem:[#allocation2 + $0x5b8] sm:$0xff] %v5390_v36  ;;  %v5391_v53 = vadd.f32 %v4879_v29, %v4367_v37  ;;  %v4368_v54 = vsub.f32 %v2832_v63, %v7669_v45  ;;  %v9692_v1 = vmul.f32 %v791_v39, %v791_v39  ;;  %v9694_v2 = vadd.f32 1.0, %v1304_v4  ;;  %v4882_v63 = vld [vmem:[#allocation2 + $0xf08] sm:$0xff]  ;;  %v4886_v37 = vld [vmem:[#allocation2 + $0xbf8] sm:$0xff] }
 0x17a   : > { %v7671_v61 = vpop.eup %7670  ;;  %7686 = vpow2.f32 %v3387_v52  ;;  %v3389_v8 = vmul.f32 1.442695, %v1306_v42  ;;  %v9698_v11 = vmul.f32 %v792_v51, %v792_v51  ;;  %v9700_v40 = vadd.f32 1.0, %v1305_v26  ;;  %v1312_v35 = vld [vmem:[%s8891_s21 + $0x148] sm:$0xff]  ;;  %v798_v45 = vld [vmem:[%s8885_s25 + $0x138] sm:$0xff]  ;;  %v799_v51 = vld [vmem:[%s8885_s25 + $0x140] sm:$0xff] }
 0x17b   : > { %v7673_v10 = vpop.eup %7672  ;;  %5903 = vst [vmem:[#allocation2 + $0x5c8] sm:$0xff] %v5391_v53  ;;  %v5392_v30 = vadd.f32 %v4880_v46, %v4368_v54  ;;  %v4369_v31 = vsub.f32 %v2833_v16, %v7671_v61  ;;  %v9702_v62 = vmul.f32 %v793_v59, %v793_v59  ;;  %v3391_v12 = vmul.f32 1.442695, %v1307_v60  ;;  %v800_v59 = vld [vmem:[%s8885_s25 + $0x148] sm:$0xff]  ;;  %v1313_v61 = vld [vmem:[%s8891_s21 + $0x150] sm:$0xff] }
 0x17c   : > { %v4370_v41 = vsub.f32 %v2834_v32, %v7673_v10  ;;  %7688 = vpow2.f32 %v3389_v8  ;;  %v9704_v17 = vadd.f32 1.0, %v1306_v42  ;;  %v9706_v43 = vmul.f32 %v794_v7, %v794_v7  ;;  %v4888_v7 = vld [vmem:[#allocation2 + $0xa90] sm:$0xff] }
 0x17d   : > { %v7675_v13 = vpop.eup %7674  ;;  %5904 = vst [vmem:[#allocation2 + $0xd78] sm:$0xff] %v5392_v30  ;;  %v5393_v14 = vadd.f32 %v4881_v0, %v4369_v31  ;;  %v3393_v44 = vmul.f32 1.442695, %v1308_v9  ;;  %v2838_v48 = vsub.f32 %v9680_v50, %v9686_v55  ;;  %7690 = vpow2.f32 %v3391_v12  ;;  %v4887_v50 = vld [vmem:[#allocation2 + $0x9d0] sm:$0xff] }
 0x17e   : > { %v7677_v19 = vpop.eup %7676  ;;  %v5394_v20 = vadd.f32 %v4882_v63, %v4370_v41  ;;  %v4371_v21 = vsub.f32 %v2835_v33, %v7675_v13  ;;  %v2839_v6 = vsub.f32 %v9688_v58, %v9692_v1  ;;  %v2840_v18 = vsub.f32 %v9694_v2, %v9698_v11  ;;  %v797_v33 = vld [vmem:[%s8885_s25 + $0x130] sm:$0xff]  ;;  %v1315_v13 = vld [vmem:[%s8891_s21 + $0x160] sm:$0xff] }
 0x17f   : > { %5905 = vst [vmem:[#allocation2 + $0x3f8] sm:$0xff] %v5393_v14  ;;  %v4372_v4 = vsub.f32 %v2836_v38, %v7677_v19  ;;  %7692 = vpow2.f32 %v3393_v44  ;;  %v7679_v24 = vpop.eup %7678  ;;  %v2841_v16 = vsub.f32 %v9700_v40, %v9702_v62  ;;  %v9720_v25 = vadd.f32 1.0, %v1307_v60  ;;  %v4889_v40 = vld [vmem:[#allocation2 + $0x910] sm:$0xff]  ;;  %v1316_v44 = vld [vmem:[%s8891_s21 + $0x168] sm:$0xff] }
 0x180   : > { %5906 = vst [vmem:[#allocation2 + $0xf08] sm:$0xff] %v5394_v20  ;;  %v5395_v56 = vadd.f32 %v4883_v15, %v4371_v21  ;;  %v3395_v26 = vmul.f32 1.442695, %v1309_v3  ;;  %v4373_v29 = vsub.f32 %v2837_v47, %v7679_v24  ;;  %v2842_v32 = vsub.f32 %v9704_v17, %v9706_v43  ;;  %v4890_v19 = vld [vmem:[#allocation2 + $0xbd0] sm:$0xff] }
 0x181   : > { %v5396_v28 = vadd.f32 %v4884_v5, %v4372_v4  ;;  %v3397_v34 = vmul.f32 1.442695, %v1310_v49  ;;  %v9727_v38 = vmul.f32 %v795_v22, %v795_v22  ;;  %v9729_v39 = vadd.f32 1.0, %v1308_v9  ;;  %v1314_v9 = vld [vmem:[%s8891_s21 + $0x158] sm:$0xff] }
 0x182   : > { %v7681_v36 = vpop.eup %7680  ;;  %5907 = vst [vmem:[#allocation2 + $0xea0] sm:$0xff] %v5395_v56  ;;  %v9731_v42 = vmul.f32 %v796_v23, %v796_v23  ;;  %7694 = vpow2.f32 %v3395_v26  ;;  %v5397_v46 = vadd.f32 %v4885_v57, %v4373_v29  ;;  %v3399_v52 = vmul.f32 1.442695, %v1311_v27  ;;  %v4891_v23 = vld [vmem:[#allocation2 + $0xd68] sm:$0xff]  ;;  %v1317_v26 = vld [vmem:[%s8891_s21 + $0x170] sm:$0xff] }
 0x183   : > { %5908 = vst [vmem:[#allocation2 + $0xb78] sm:$0xff] %v5396_v28  ;;  %v4374_v47 = vsub.f32 %v2838_v48, %v7681_v36  ;;  %7696 = vpow2.f32 %v3397_v34  ;;  %v7683_v53 = vpop.eup %7682  ;;  %v9735_v54 = vadd.f32 1.0, %v1309_v3  ;;  %v9737_v55 = vmul.f32 %v797_v33, %v797_v33  ;;  %v801_v48 = vld [vmem:[%s8885_s25 + $0x150] sm:$0xff]  ;;  %v804_v34 = vld [vmem:[%s8885_s25 + $0x168] sm:$0xff] }
 0x184   : > { %v9739_v58 = vadd.f32 1.0, %v1310_v49  ;;  %v3401_v60 = vmul.f32 1.442695, %v1312_v35  ;;  %5909 = vst [vmem:[#allocation2 + $0x948] sm:$0xff] %v5397_v46  ;;  %v4375_v2 = vsub.f32 %v2839_v6, %v7683_v53  ;;  %v9743_v8 = vmul.f32 %v798_v45, %v798_v45  ;;  %v802_v6 = vld [vmem:[%s8885_s25 + $0x158] sm:$0xff]  ;;  %v805_v46 = vld [vmem:[%s8885_s25 + $0x170] sm:$0xff] }
 0x185   : > { %v7685_v0 = vpop.eup %7684  ;;  %v5398_v1 = vadd.f32 %v4886_v37, %v4374_v47  ;;  %7698 = vpow2.f32 %v3399_v52  ;;  %v9746_v30 = vadd.f32 1.0, %v1311_v27  ;;  %v9748_v31 = vmul.f32 %v799_v51, %v799_v51  ;;  %v4893_v53 = vld [vmem:[#allocation2 + $0x868] sm:$0xff] }
 0x186   : > { %v4376_v10 = vsub.f32 %v2840_v18, %v7685_v0  ;;  %7700 = vpow2.f32 %v3401_v60  ;;  %v5399_v11 = vadd.f32 %v4887_v50, %v4375_v2  ;;  %v9750_v41 = vadd.f32 1.0, %v1312_v35  ;;  %v1318_v35 = vld [vmem:[%s8891_s21 + $0x178] sm:$0xff]  ;;  %v1319_v50 = vld [vmem:[%s8891_s21 + $0x180] sm:$0xff]  ;;  %v4894_v0 = vld [vmem:[#allocation2 + $0xe30] sm:$0xff] }
 0x187   : > { %v7687_v63 = vpop.eup %7686  ;;  %5910 = vst [vmem:[#allocation2 + $0xbf8] sm:$0xff] %v5398_v1  ;;  %v9752_v62 = vmul.f32 %v800_v59, %v800_v59  ;;  %v3403_v12 = vmul.f32 1.442695, %v1313_v61  ;;  %v2843_v17 = vsub.f32 %v9720_v25, %v9727_v38  ;;  %v3405_v43 = vmul.f32 1.442695, %v1314_v9  ;;  %v1320_v59 = vld [vmem:[%s8891_s21 + $0x188] sm:$0xff] }
 0x188   : > { %v5400_v14 = vadd.f32 %v4888_v7, %v4376_v10  ;;  %v4377_v15 = vsub.f32 %v2841_v16, %v7687_v63  ;;  %5911 = vst [vmem:[#allocation2 + $0x9d0] sm:$0xff] %v5399_v11  ;;  %v2844_v20 = vsub.f32 %v9729_v39, %v9731_v42  ;;  %v2845_v21 = vsub.f32 %v9735_v54, %v9737_v55  ;;  %v803_v16 = vld [vmem:[%s8885_s25 + $0x160] sm:$0xff]  ;;  %v4895_v63 = vld [vmem:[#allocation2 + $0xcd8] sm:$0xff] }
 0x189   : > { %v7689_v3 = vpop.eup %7688  ;;  %v2846_v5 = vsub.f32 %v9739_v58, %v9743_v8  ;;  %7702 = vpow2.f32 %v3403_v12  ;;  %v3407_v18 = vmul.f32 1.442695, %v1315_v13  ;;  %v2847_v24 = vsub.f32 %v9746_v30, %v9748_v31 }
 0x18a   : > { %5912 = vst [vmem:[#allocation2 + $0xa90] sm:$0xff] %v5400_v14  ;;  %v5401_v49 = vadd.f32 %v4889_v40, %v4377_v15  ;;  %v4378_v4 = vsub.f32 %v2842_v32, %v7689_v3  ;;  %7704 = vpow2.f32 %v3405_v43  ;;  %v7691_v22 = vpop.eup %7690  ;;  %v2848_v56 = vsub.f32 %v9750_v41, %v9752_v62  ;;  %v4892_v32 = vld [vmem:[#allocation2 + $0xbf0] sm:$0xff]  ;;  %v4896_v15 = vld [vmem:[#allocation2 + $0x18] sm:$0xff]  ;;  %v807_v43 = vld [vmem:[%s8885_s25 + $0x180] sm:$0xff] }
 0x18b   : > { %v9770_v57 = vadd.f32 1.0, %v1313_v61  ;;  %v3409_v25 = vmul.f32 1.442695, %v1316_v44  ;;  %v4379_v29 = vsub.f32 %v2843_v17, %v7691_v22  ;;  %v9774_v33 = vmul.f32 %v801_v48, %v801_v48  ;;  %v1321_v62 = vld [vmem:[%s8891_s21 + $0x190] sm:$0xff] }
 0x18c   : > { %v7693_v27 = vpop.eup %7692  ;;  %5913 = vst [vmem:[#allocation2 + $0x910] sm:$0xff] %v5401_v49  ;;  %v5402_v28 = vadd.f32 %v4890_v19, %v4378_v4  ;;  %7706 = vpow2.f32 %v3407_v18  ;;  %v9778_v37 = vadd.f32 1.0, %v1314_v9  ;;  %v9780_v38 = vmul.f32 %v802_v6, %v802_v6  ;;  %v806_v9 = vld [vmem:[%s8885_s25 + $0x178] sm:$0xff]  ;;  %v809_v4 = vld [vmem:[%s8885_s25 + $0x190] sm:$0xff]  ;;  %v1323_v18 = vld [vmem:[%s8891_s21 + $0x1a0] sm:$0xff] }
 0x18d   : > { %v4380_v36 = vsub.f32 %v2844_v20, %v7693_v27  ;;  %7708 = vpow2.f32 %v3409_v25  ;;  %v5403_v39 = vadd.f32 %v4891_v23, %v4379_v29  ;;  %v9782_v42 = vadd.f32 1.0, %v1315_v13  ;;  %v4898_v29 = vld [vmem:[#allocation2 + $0xfd8] sm:$0xff] }
 0x18e   : > { %5914 = vst [vmem:[#allocation2 + $0xbd0] sm:$0xff] %v5402_v28  ;;  %v9784_v45 = vmul.f32 %v803_v16, %v803_v16  ;;  %v3411_v47 = vmul.f32 1.442695, %v1317_v26  ;;  %v9788_v54 = vadd.f32 1.0, %v1316_v44  ;;  %v9790_v55 = vmul.f32 %v804_v34, %v804_v34  ;;  %v1322_v44 = vld [vmem:[%s8891_s21 + $0x198] sm:$0xff] }
 0x18f   : > { %v7695_v51 = vpop.eup %7694  ;;  %v5404_v52 = vadd.f32 %v4892_v32, %v4380_v36  ;;  %v3413_v58 = vmul.f32 1.442695, %v1318_v35  ;;  %5915 = vst [vmem:[#allocation2 + $0xd68] sm:$0xff] %v5403_v39  ;;  %v2849_v1 = vsub.f32 %v9770_v57, %v9774_v33  ;;  %v9795_v2 = vadd.f32 1.0, %v1317_v26  ;;  %v810_v16 = vld [vmem:[%s8885_s25 + $0x198] sm:$0xff]  ;;  %v1324_v26 = vld [vmem:[%s8891_s21 + $0x1a8] sm:$0xff] }
 0x190   : > { %v7697_v60 = vpop.eup %7696  ;;  %v4381_v61 = vsub.f32 %v2845_v21, %v7695_v51  ;;  %7710 = vpow2.f32 %v3411_v47  ;;  %v9797_v8 = vmul.f32 %v805_v46, %v805_v46  ;;  %v3415_v10 = vmul.f32 1.442695, %v1319_v50  ;;  %v808_v21 = vld [vmem:[%s8885_s25 + $0x188] sm:$0xff]  ;;  %v4899_v39 = vld [vmem:[#allocation2 + $0x420] sm:$0xff]  ;;  %v1325_v47 = vld [vmem:[%s8891_s21 + $0x1b0] sm:$0xff] }
 0x191   : > { %5916 = vst [vmem:[#allocation2 + $0xbf0] sm:$0xff] %v5404_v52  ;;  %v4382_v7 = vsub.f32 %v2846_v5, %v7697_v60  ;;  %7712 = vpow2.f32 %v3413_v58  ;;  %v2850_v11 = vsub.f32 %v9778_v37, %v9780_v38  ;;  %v2851_v40 = vsub.f32 %v9782_v42, %v9784_v45  ;;  %v1326_v58 = vld [vmem:[%s8891_s21 + $0x1b8] sm:$0xff] }
 0x192   : > { %v7699_v30 = vpop.eup %7698  ;;  %v5405_v31 = vadd.f32 %v4893_v53, %v4381_v61  ;;  %v3417_v41 = vmul.f32 1.442695, %v1320_v59  ;;  %v2852_v17 = vsub.f32 %v9788_v54, %v9790_v55  ;;  %7714 = vpow2.f32 %v3415_v10  ;;  %v4900_v53 = vld [vmem:[#allocation2 + $0x940] sm:$0xff] }
 0x193   : > { %v7701_v12 = vpop.eup %7700  ;;  %v5406_v13 = vadd.f32 %v4894_v0, %v4382_v7  ;;  %v4383_v14 = vsub.f32 %v2847_v24, %v7699_v30  ;;  %v9809_v19 = vadd.f32 1.0, %v1318_v35  ;;  %v9811_v20 = vmul.f32 %v806_v9, %v806_v9  ;;  %v4897_v24 = vld [vmem:[#allocation2 + $0x528] sm:$0xff]  ;;  %v811_v55 = vld [vmem:[%s8885_s25 + $0x1a0] sm:$0xff] }
 0x194   : > { %5917 = vst [vmem:[#allocation2 + $0x868] sm:$0xff] %v5405_v31  ;;  %v4384_v3 = vsub.f32 %v2848_v56, %v7701_v12  ;;  %7716 = vpow2.f32 %v3417_v41  ;;  %v2853_v48 = vsub.f32 %v9795_v2, %v9797_v8  ;;  %v9816_v49 = vadd.f32 1.0, %v1319_v50  ;;  %v812_v0 = vld [vmem:[%s8885_s25 + $0x1a8] sm:$0xff]  ;;  %v1327_v9 = vld [vmem:[%s8891_s21 + $0x1c0] sm:$0xff]  ;;  %v4901_v31 = vld [vmem:[#allocation2 + $0xed0] sm:$0xff] }
 0x195   : > { %5918 = vst [vmem:[#allocation2 + $0xe30] sm:$0xff] %v5406_v13  ;;  %v5407_v5 = vadd.f32 %v4895_v63, %v4383_v14  ;;  %v3419_v6 = vmul.f32 1.442695, %v1321_v62  ;;  %v9820_v56 = vmul.f32 %v807_v43, %v807_v43  ;;  %v9822_v57 = vadd.f32 1.0, %v1320_v59  ;;  %v4902_v14 = vld [vmem:[#allocation2 + $0x160] sm:$0xff]  ;;  %v814_v43 = vld [vmem:[%s8885_s25 + $0x1b8] sm:$0xff] }
 0x196   : > { %v7703_v22 = vpop.eup %7702  ;;  %v5408_v23 = vadd.f32 %v4896_v15, %v4384_v3  ;;  %v3421_v25 = vmul.f32 1.442695, %v1322_v44  ;;  %v9826_v32 = vmul.f32 %v808_v21, %v808_v21  ;;  %v9828_v33 = vadd.f32 1.0, %v1321_v62  ;;  %v1328_v62 = vld [vmem:[%s8891_s21 + $0x1c8] sm:$0xff] }
 0x197   : > { %v7705_v27 = vpop.eup %7704  ;;  %5919 = vst [vmem:[#allocation2 + $0xcd8] sm:$0xff] %v5407_v5  ;;  %v4385_v28 = vsub.f32 %v2849_v1, %v7703_v22  ;;  %7718 = vpow2.f32 %v3419_v6  ;;  %v9830_v35 = vmul.f32 %v809_v4, %v809_v4  ;;  %v3423_v36 = vmul.f32 1.442695, %v1323_v18  ;;  %v816_v6 = vld [vmem:[%s8885_s25 + $0x1c8] sm:$0xff]  ;;  %v1329_v22 = vld [vmem:[%s8891_s21 + $0x1d0] sm:$0xff] }
 0x198   : > { %5920 = vst [vmem:[#allocation2 + $0x18] sm:$0xff] %v5408_v23  ;;  %v4386_v34 = vsub.f32 %v2850_v11, %v7705_v27  ;;  %7720 = vpow2.f32 %v3421_v25  ;;  %v9832_v42 = vadd.f32 1.0, %v1322_v44  ;;  %v9834_v45 = vmul.f32 %v810_v16, %v810_v16  ;;  %v1330_v25 = vld [vmem:[%s8891_s21 + $0x1d8] sm:$0xff] }
 0x199   : > { %v7707_v37 = vpop.eup %7706  ;;  %v5409_v38 = vadd.f32 %v4897_v24, %v4385_v28  ;;  %v3425_v46 = vmul.f32 1.442695, %v1324_v26  ;;  %v2854_v54 = vsub.f32 %v9809_v19, %v9811_v20  ;;  %7722 = vpow2.f32 %v3423_v36  ;;  %v815_v19 = vld [vmem:[%s8885_s25 + $0x1c0] sm:$0xff] }
 0x19a   : > { %v7709_v50 = vpop.eup %7708  ;;  %v5410_v51 = vadd.f32 %v4898_v29, %v4386_v34  ;;  %v4387_v52 = vsub.f32 %v2851_v40, %v7707_v37  ;;  %v2855_v60 = vsub.f32 %v9816_v49, %v9820_v56  ;;  %v2856_v61 = vsub.f32 %v9822_v57, %v9826_v32  ;;  %v813_v40 = vld [vmem:[%s8885_s25 + $0x1b0] sm:$0xff] }
 0x19b   : > { %5921 = vst [vmem:[#allocation2 + $0x528] sm:$0xff] %v5409_v38  ;;  %v4388_v59 = vsub.f32 %v2852_v17, %v7709_v50  ;;  %7724 = vpow2.f32 %v3425_v46  ;;  %v2857_v2 = vsub.f32 %v9828_v33, %v9830_v35  ;;  %v9848_v7 = vadd.f32 1.0, %v1323_v18  ;;  %v4904_v57 = vld [vmem:[#allocation2 + $0x8b0] sm:$0xff]  ;;  %v1331_v35 = vld [vmem:[%s8891_s21 + $0x1e0] sm:$0xff]  ;;  %v1332_v46 = vld [vmem:[%s8891_s21 + $0x1e8] sm:$0xff] }
 0x19c   : > { %5922 = vst [vmem:[#allocation2 + $0xfd8] sm:$0xff] %v5410_v51  ;;  %v5411_v1 = vadd.f32 %v4899_v39, %v4387_v52  ;;  %v3427_v8 = vmul.f32 1.442695, %v1325_v47  ;;  %v2858_v63 = vsub.f32 %v9832_v42, %v9834_v45  ;;  %v9853_v11 = vmul.f32 %v811_v55, %v811_v55  ;;  %v4905_v38 = vld [vmem:[#allocation2 + $0x320] sm:$0xff] }
 0x19d   : > { %v7711_v10 = vpop.eup %7710  ;;  %v5412_v30 = vadd.f32 %v4900_v53, %v4388_v59  ;;  %v3429_v41 = vmul.f32 1.442695, %v1326_v58  ;;  %v9857_v15 = vadd.f32 1.0, %v1324_v26  ;;  %v9859_v17 = vmul.f32 %v812_v0, %v812_v0  ;;  %v4906_v51 = vld [vmem:[#allocation2 + $0x700] sm:$0xff]  ;;  %v818_v59 = vld [vmem:[%s8885_s25 + $0x1d8] sm:$0xff] }
 0x19e   : > { %v7713_v12 = vpop.eup %7712  ;;  %5923 = vst [vmem:[#allocation2 + $0x420] sm:$0xff] %v5411_v1  ;;  %v4389_v13 = vsub.f32 %v2853_v48, %v7711_v10  ;;  %7726 = vpow2.f32 %v3427_v8  ;;  %v9862_v3 = vadd.f32 1.0, %v1325_v47  ;;  %v3431_v20 = vmul.f32 1.442695, %v1327_v9  ;;  %v4903_v48 = vld [vmem:[#allocation2 + $0x8e8] sm:$0xff]  ;;  %v4907_v1 = vld [vmem:[#allocation2 + $0x5f8] sm:$0xff] }
 0x19f   : > { %5924 = vst [vmem:[#allocation2 + $0x940] sm:$0xff] %v5412_v30  ;;  %v4390_v44 = vsub.f32 %v2854_v54, %v7713_v12  ;;  %7728 = vpow2.f32 %v3429_v41  ;;  %v7715_v21 = vpop.eup %7714  ;;  %v9865_v49 = vmul.f32 %v813_v40, %v813_v40  ;;  %v9867_v4 = vadd.f32 1.0, %v1326_v58  ;;  %v817_v54 = vld [vmem:[%s8885_s25 + $0x1d0] sm:$0xff]  ;;  %v819_v8 = vld [vmem:[%s8885_s25 + $0x1e0] sm:$0xff]  ;;  %v820_v41 = vld [vmem:[%s8885_s25 + $0x1e8] sm:$0xff] }
 0x1a0   : > { %v5413_v5 = vadd.f32 %v4901_v31, %v4389_v13  ;;  %v3433_v18 = vmul.f32 1.442695, %v1328_v62  ;;  %v4391_v56 = vsub.f32 %v2855_v60, %v7715_v21  ;;  %v9871_v16 = vmul.f32 %v814_v43, %v814_v43  ;;  %v1333_v10 = vld [vmem:[%s8891_s21 + $0x1f0] sm:$0xff] }
 0x1a1   : > { %v7717_v23 = vpop.eup %7716  ;;  %v5414_v24 = vadd.f32 %v4902_v14, %v4390_v44  ;;  %7730 = vpow2.f32 %v3431_v20  ;;  %v9874_v27 = vadd.f32 1.0, %v1327_v9  ;;  %v9876_v28 = vmul.f32 %v815_v19, %v815_v19  ;;  %v821_v44 = vld [vmem:[%s8885_s25 + $0x1f0] sm:$0xff]  ;;  %v1335_v19 = vld [vmem:[%s8891_s21 + $0x200] sm:$0xff] }
 0x1a2   : > { %5925 = vst [vmem:[#allocation2 + $0xed0] sm:$0xff] %v5413_v5  ;;  %v4392_v26 = vsub.f32 %v2856_v61, %v7717_v23  ;;  %7732 = vpow2.f32 %v3433_v18  ;;  %v5415_v29 = vadd.f32 %v4903_v48, %v4391_v56  ;;  %v9878_v32 = vadd.f32 1.0, %v1328_v62  ;;  %v1334_v62 = vld [vmem:[%s8891_s21 + $0x1f8] sm:$0xff]  ;;  %v4909_v5 = vld [vmem:[#allocation2 + $0x630] sm:$0xff]  ;;  %v4910_v23 = vld [vmem:[#allocation2 + $0x7a8] sm:$0xff] }
 0x1a3   : > { %5926 = vst [vmem:[#allocation2 + $0x160] sm:$0xff] %v5414_v24  ;;  %v9880_v33 = vmul.f32 %v816_v6, %v816_v6  ;;  %v3435_v34 = vmul.f32 1.442695, %v1329_v22  ;;  %v2859_v39 = vsub.f32 %v9848_v7, %v9853_v11  ;;  %v2860_v42 = vsub.f32 %v9857_v15, %v9859_v17  ;;  %v4908_v11 = vld [vmem:[#allocation2 + $0x620] sm:$0xff]  ;;  %v1336_v6 = vld [vmem:[%s8891_s21 + $0x208] sm:$0xff] }
 0x1a4   : > { %v7719_v36 = vpop.eup %7718  ;;  %v5416_v37 = vadd.f32 %v4904_v57, %v4392_v26  ;;  %v3437_v45 = vmul.f32 1.442695, %v1330_v25  ;;  %5927 = vst [vmem:[#allocation2 + $0x8e8] sm:$0xff] %v5415_v29  ;;  %v2861_v52 = vsub.f32 %v9862_v3, %v9865_v49  ;;  %v2862_v53 = vsub.f32 %v9867_v4, %v9871_v16  ;;  %v4911_v29 = vld [vmem:[#allocation2 + $0x70] sm:$0xff] }
 0x1a5   : > { %v7721_v47 = vpop.eup %7720  ;;  %v4393_v50 = vsub.f32 %v2857_v2, %v7719_v36  ;;  %7734 = vpow2.f32 %v3435_v34  ;;  %v2863_v58 = vsub.f32 %v9874_v27, %v9876_v28  ;;  %v3439_v60 = vmul.f32 1.442695, %v1331_v35 }
 0x1a6   : > { %5928 = vst [vmem:[#allocation2 + $0x8b0] sm:$0xff] %v5416_v37  ;;  %v4394_v55 = vsub.f32 %v2858_v63, %v7721_v47  ;;  %7736 = vpow2.f32 %v3437_v45  ;;  %v7723_v61 = vpop.eup %7722  ;;  %v2864_v2 = vsub.f32 %v9878_v32, %v9880_v33  ;;  %v9898_v7 = vadd.f32 1.0, %v1329_v22  ;;  %v823_v45 = vld [vmem:[%s8885_s25 + $0x200] sm:$0xff] }
 0x1a7   : > { %v5417_v0 = vadd.f32 %v4905_v38, %v4393_v50  ;;  %v3441_v9 = vmul.f32 1.442695, %v1332_v46  ;;  %v4395_v63 = vsub.f32 %v2859_v39, %v7723_v61  ;;  %v9902_v40 = vmul.f32 %v817_v54, %v817_v54  ;;  %v4912_v39 = vld [vmem:[#allocation2 + $0x678] sm:$0xff] }
 0x1a8   : > { %v7725_v30 = vpop.eup %7724  ;;  %v5418_v31 = vadd.f32 %v4906_v51, %v4394_v55  ;;  %7738 = vpow2.f32 %v3439_v60  ;;  %v9906_v13 = vadd.f32 1.0, %v1330_v25  ;;  %v9908_v14 = vmul.f32 %v818_v59, %v818_v59  ;;  %v822_v25 = vld [vmem:[%s8885_s25 + $0x1f8] sm:$0xff]  ;;  %v1339_v60 = vld [vmem:[%s8891_s21 + $0x220] sm:$0xff] }
 0x1a9   : > { %5929 = vst [vmem:[#allocation2 + $0x320] sm:$0xff] %v5417_v0  ;;  %v4396_v12 = vsub.f32 %v2860_v42, %v7725_v30  ;;  %7740 = vpow2.f32 %v3441_v9  ;;  %v5419_v15 = vadd.f32 %v4907_v1, %v4395_v63  ;;  %v9910_v17 = vadd.f32 1.0, %v1331_v35  ;;  %v1337_v35 = vld [vmem:[%s8891_s21 + $0x210] sm:$0xff]  ;;  %v4913_v1 = vld [vmem:[#allocation2 + $0xa88] sm:$0xff]  ;;  %v4914_v63 = vld [vmem:[#allocation2 + $0xb80] sm:$0xff] }
 0x1aa   : > { %5930 = vst [vmem:[#allocation2 + $0x700] sm:$0xff] %v5418_v31  ;;  %v9912_v43 = vmul.f32 %v819_v8, %v819_v8  ;;  %v3443_v3 = vmul.f32 1.442695, %v1333_v10  ;;  %v9916_v48 = vadd.f32 1.0, %v1332_v46  ;;  %v9918_v49 = vmul.f32 %v820_v41, %v820_v41  ;;  %v1338_v46 = vld [vmem:[%s8891_s21 + $0x218] sm:$0xff] }
 0x1ab   : > { %v7727_v20 = vpop.eup %7726  ;;  %v5420_v21 = vadd.f32 %v4908_v11, %v4396_v12  ;;  %v3445_v4 = vmul.f32 1.442695, %v1334_v62  ;;  %5931 = vst [vmem:[#allocation2 + $0x5f8] sm:$0xff] %v5419_v15  ;;  %v2865_v24 = vsub.f32 %v9898_v7, %v9902_v40  ;;  %v9923_v56 = vadd.f32 1.0, %v1333_v10  ;;  %v826_v8 = vld [vmem:[%s8885_s25 + $0x218] sm:$0xff]  ;;  %v1340_v10 = vld [vmem:[%s8891_s21 + $0x228] sm:$0xff] }
 0x1ac   : > { %v7729_v18 = vpop.eup %7728  ;;  %v4397_v22 = vsub.f32 %v2861_v52, %v7727_v20  ;;  %7742 = vpow2.f32 %v3443_v3  ;;  %v9925_v16 = vmul.f32 %v821_v44, %v821_v44  ;;  %v3447_v26 = vmul.f32 1.442695, %v1335_v19  ;;  %v824_v52 = vld [vmem:[%s8885_s25 + $0x208] sm:$0xff]  ;;  %v4915_v15 = vld [vmem:[#allocation2 + $0xc58] sm:$0xff]  ;;  %v1341_v3 = vld [vmem:[%s8891_s21 + $0x230] sm:$0xff] }
 0x1ad   : > { %5932 = vst [vmem:[#allocation2 + $0x620] sm:$0xff] %v5420_v21  ;;  %v4398_v57 = vsub.f32 %v2862_v53, %v7729_v18  ;;  %7744 = vpow2.f32 %v3445_v4  ;;  %v2866_v32 = vsub.f32 %v9906_v13, %v9908_v14  ;;  %v2867_v33 = vsub.f32 %v9910_v17, %v9912_v43  ;;  %v1342_v4 = vld [vmem:[%s8891_s21 + $0x238] sm:$0xff] }
 0x1ae   : > { %v7731_v27 = vpop.eup %7730  ;;  %v5421_v28 = vadd.f32 %v4909_v5, %v4397_v22  ;;  %v3449_v34 = vmul.f32 1.442695, %v1336_v6  ;;  %v2868_v42 = vsub.f32 %v9916_v48, %v9918_v49  ;;  %7746 = vpow2.f32 %v3447_v26  ;;  %v4916_v5 = vld [vmem:[#allocation2 + $0x8d8] sm:$0xff]  ;;  %v827_v49 = vld [vmem:[%s8885_s25 + $0x220] sm:$0xff] }
 0x1af   : > { %v7733_v36 = vpop.eup %7732  ;;  %v5422_v37 = vadd.f32 %v4910_v23, %v4398_v57  ;;  %v4399_v38 = vsub.f32 %v2863_v58, %v7731_v27  ;;  %v9937_v50 = vadd.f32 1.0, %v1334_v62  ;;  %v9939_v51 = vmul.f32 %v822_v25, %v822_v25  ;;  %v825_v58 = vld [vmem:[%s8885_s25 + $0x210] sm:$0xff]  ;;  %v828_v23 = vld [vmem:[%s8885_s25 + $0x228] sm:$0xff]  ;;  %v1343_v25 = vld [vmem:[%s8891_s21 + $0x240] sm:$0xff] }
 0x1b0   : > { %5933 = vst [vmem:[#allocation2 + $0x630] sm:$0xff] %v5421_v28  ;;  %v4400_v47 = vsub.f32 %v2864_v2, %v7733_v36  ;;  %7748 = vpow2.f32 %v3449_v34  ;;  %v2869_v54 = vsub.f32 %v9923_v56, %v9925_v16  ;;  %v9944_v55 = vadd.f32 1.0, %v1335_v19  ;;  %v4917_v28 = vld [vmem:[#allocation2 + $0x9d8] sm:$0xff] }
 0x1b1   : > { %5934 = vst [vmem:[#allocation2 + $0x7a8] sm:$0xff] %v5422_v37  ;;  %v5423_v53 = vadd.f32 %v4911_v29, %v4399_v38  ;;  %v3451_v59 = vmul.f32 1.442695, %v1337_v35  ;;  %v9948_v2 = vmul.f32 %v823_v45, %v823_v45  ;;  %v9950_v7 = vadd.f32 1.0, %v1336_v6  ;;  %v4918_v38 = vld [vmem:[#allocation2 + $0x800] sm:$0xff]  ;;  %v830_v45 = vld [vmem:[%s8885_s25 + $0x238] sm:$0xff] }
 0x1b2   : > { %v7735_v61 = vpop.eup %7734  ;;  %v5424_v0 = vadd.f32 %v4912_v39, %v4400_v47  ;;  %v3453_v9 = vmul.f32 1.442695, %v1338_v46  ;;  %v9954_v11 = vmul.f32 %v824_v52, %v824_v52  ;;  %v9956_v40 = vadd.f32 1.0, %v1337_v35  ;;  %v1344_v35 = vld [vmem:[%s8891_s21 + $0x248] sm:$0xff] }
 0x1b3   : > { %v7737_v30 = vpop.eup %7736  ;;  %5935 = vst [vmem:[#allocation2 + $0x70] sm:$0xff] %v5423_v53  ;;  %v4401_v31 = vsub.f32 %v2865_v24, %v7735_v61  ;;  %7750 = vpow2.f32 %v3451_v59  ;;  %v9958_v62 = vmul.f32 %v825_v58, %v825_v58  ;;  %v3455_v12 = vmul.f32 1.442695, %v1339_v60  ;;  %v832_v59 = vld [vmem:[%s8885_s25 + $0x248] sm:$0xff]  ;;  %v1345_v61 = vld [vmem:[%s8891_s21 + $0x250] sm:$0xff] }
 0x1b4   : > { %5936 = vst [vmem:[#allocation2 + $0x678] sm:$0xff] %v5424_v0  ;;  %v4402_v41 = vsub.f32 %v2866_v32, %v7737_v30  ;;  %7752 = vpow2.f32 %v3453_v9  ;;  %v9960_v17 = vadd.f32 1.0, %v1338_v46  ;;  %v9962_v43 = vmul.f32 %v826_v8, %v826_v8  ;;  %v1346_v9 = vld [vmem:[%s8891_s21 + $0x258] sm:$0xff] }
 0x1b5   : > { %v7739_v13 = vpop.eup %7738  ;;  %v5425_v14 = vadd.f32 %v4913_v1, %v4401_v31  ;;  %v3457_v44 = vmul.f32 1.442695, %v1340_v10  ;;  %v2870_v48 = vsub.f32 %v9937_v50, %v9939_v51  ;;  %7754 = vpow2.f32 %v3455_v12  ;;  %v831_v50 = vld [vmem:[%s8885_s25 + $0x240] sm:$0xff] }
 0x1b6   : > { %v7741_v19 = vpop.eup %7740  ;;  %v5426_v20 = vadd.f32 %v4914_v63, %v4402_v41  ;;  %v4403_v21 = vsub.f32 %v2867_v33, %v7739_v13  ;;  %v2871_v18 = vsub.f32 %v9944_v55, %v9948_v2  ;;  %v2872_v22 = vsub.f32 %v9950_v7, %v9954_v11  ;;  %v829_v33 = vld [vmem:[%s8885_s25 + $0x230] sm:$0xff] }
 0x1b7   : > { %5937 = vst [vmem:[#allocation2 + $0xa88] sm:$0xff] %v5425_v14  ;;  %v4404_v6 = vsub.f32 %v2868_v42, %v7741_v19  ;;  %7756 = vpow2.f32 %v3457_v44  ;;  %v2873_v56 = vsub.f32 %v9956_v40, %v9958_v62  ;;  %v9976_v57 = vadd.f32 1.0, %v1339_v60  ;;  %v4920_v7 = vld [vmem:[#allocation2 + $0x6f0] sm:$0xff]  ;;  %v1347_v62 = vld [vmem:[%s8891_s21 + $0x260] sm:$0xff]  ;;  %v4921_v14 = vld [vmem:[#allocation2 + $0xbe8] sm:$0xff] }
 0x1b8   : > { %5938 = vst [vmem:[#allocation2 + $0xb80] sm:$0xff] %v5426_v20  ;;  %v5427_v24 = vadd.f32 %v4915_v15, %v4403_v21  ;;  %v3459_v16 = vmul.f32 1.442695, %v1341_v3  ;;  %v2874_v29 = vsub.f32 %v9960_v17, %v9962_v43  ;;  %v9981_v32 = vmul.f32 %v827_v49, %v827_v49  ;;  %v1348_v44 = vld [vmem:[%s8891_s21 + $0x268] sm:$0xff]  ;;  %v4922_v20 = vld [vmem:[#allocation2 + $0xd30] sm:$0xff] }
 0x1b9   : > { %v7743_v26 = vpop.eup %7742  ;;  %v5428_v27 = vadd.f32 %v4916_v5, %v4404_v6  ;;  %v3461_v34 = vmul.f32 1.442695, %v1342_v4  ;;  %v9985_v39 = vadd.f32 1.0, %v1340_v10  ;;  %v9987_v42 = vmul.f32 %v828_v23, %v828_v23  ;;  %v834_v6 = vld [vmem:[%s8885_s25 + $0x258] sm:$0xff] }
 0x1ba   : > { %v7745_v36 = vpop.eup %7744  ;;  %5939 = vst [vmem:[#allocation2 + $0xc58] sm:$0xff] %v5427_v24  ;;  %v4405_v37 = vsub.f32 %v2869_v54, %v7743_v26  ;;  %7758 = vpow2.f32 %v3459_v16  ;;  %v9990_v47 = vadd.f32 1.0, %v1341_v3  ;;  %v3463_v51 = vmul.f32 1.442695, %v1343_v25  ;;  %v4919_v54 = vld [vmem:[#allocation2 + $0xe68] sm:$0xff]  ;;  %v4923_v24 = vld [vmem:[#allocation2 + $0x358] sm:$0xff] }
 0x1bb   : > { %5940 = vst [vmem:[#allocation2 + $0x8d8] sm:$0xff] %v5428_v27  ;;  %v4406_v46 = vsub.f32 %v2870_v48, %v7745_v36  ;;  %7760 = vpow2.f32 %v3461_v34  ;;  %v7747_v52 = vpop.eup %7746  ;;  %v9993_v55 = vmul.f32 %v829_v33, %v829_v33  ;;  %v9995_v58 = vadd.f32 1.0, %v1342_v4  ;;  %v833_v48 = vld [vmem:[%s8885_s25 + $0x250] sm:$0xff]  ;;  %v835_v16 = vld [vmem:[%s8885_s25 + $0x260] sm:$0xff]  ;;  %v836_v34 = vld [vmem:[%s8885_s25 + $0x268] sm:$0xff] }
 0x1bc   : > { %v5429_v53 = vadd.f32 %v4917_v28, %v4405_v37  ;;  %v3465_v60 = vmul.f32 1.442695, %v1344_v35  ;;  %v4407_v2 = vsub.f32 %v2871_v18, %v7747_v52  ;;  %v9999_v8 = vmul.f32 %v830_v45, %v830_v45  ;;  %v1349_v26 = vld [vmem:[%s8891_s21 + $0x270] sm:$0xff] }
 0x1bd   : > { %v7749_v0 = vpop.eup %7748  ;;  %v5430_v1 = vadd.f32 %v4918_v38, %v4406_v46  ;;  %7762 = vpow2.f32 %v3463_v51  ;;  %v10002_v30 = vadd.f32 1.0, %v1343_v25  ;;  %v10004_v31 = vmul.f32 %v831_v50, %v831_v50  ;;  %v837_v46 = vld [vmem:[%s8885_s25 + $0x270] sm:$0xff]  ;;  %v1351_v50 = vld [vmem:[%s8891_s21 + $0x280] sm:$0xff] }
 0x1be   : > { %5941 = vst [vmem:[#allocation2 + $0x9d8] sm:$0xff] %v5429_v53  ;;  %v4408_v10 = vsub.f32 %v2872_v22, %v7749_v0  ;;  %7764 = vpow2.f32 %v3465_v60  ;;  %v5431_v63 = vadd.f32 %v4919_v54, %v4407_v2  ;;  %v10006_v11 = vadd.f32 1.0, %v1344_v35  ;;  %v1350_v35 = vld [vmem:[%s8891_s21 + $0x278] sm:$0xff]  ;;  %v4925_v53 = vld [vmem:[#allocation2 + $0x488] sm:$0xff]  ;;  %v4926_v0 = vld [vmem:[#allocation2 + $0xd60] sm:$0xff] }
 0x1bf   : > { %5942 = vst [vmem:[#allocation2 + $0x800] sm:$0xff] %v5430_v1  ;;  %v10008_v40 = vmul.f32 %v832_v59, %v832_v59  ;;  %v3467_v41 = vmul.f32 1.442695, %v1345_v61  ;;  %v2875_v15 = vsub.f32 %v9976_v57, %v9981_v32  ;;  %v2876_v17 = vsub.f32 %v9985_v39, %v9987_v42  ;;  %v4924_v32 = vld [vmem:[#allocation2 + $0x490] sm:$0xff]  ;;  %v1352_v59 = vld [vmem:[%s8891_s21 + $0x288] sm:$0xff] }
 0x1c0   : > { %v7751_v12 = vpop.eup %7750  ;;  %v5432_v13 = vadd.f32 %v4920_v7, %v4408_v10  ;;  %v3469_v43 = vmul.f32 1.442695, %v1346_v9  ;;  %5943 = vst [vmem:[#allocation2 + $0xe68] sm:$0xff] %v5431_v63  ;;  %v2877_v21 = vsub.f32 %v9990_v47, %v9993_v55  ;;  %v2878_v5 = vsub.f32 %v9995_v58, %v9999_v8  ;;  %v4927_v63 = vld [vmem:[#allocation2 + $0xbd8] sm:$0xff] }
 0x1c1   : > { %v7753_v3 = vpop.eup %7752  ;;  %v4409_v19 = vsub.f32 %v2873_v56, %v7751_v12  ;;  %7766 = vpow2.f32 %v3467_v41  ;;  %v2879_v4 = vsub.f32 %v10002_v30, %v10004_v31  ;;  %v3471_v18 = vmul.f32 1.442695, %v1347_v62 }
 0x1c2   : > { %5944 = vst [vmem:[#allocation2 + $0x6f0] sm:$0xff] %v5432_v13  ;;  %v4410_v49 = vsub.f32 %v2874_v29, %v7753_v3  ;;  %7768 = vpow2.f32 %v3469_v43  ;;  %v7755_v22 = vpop.eup %7754  ;;  %v2880_v56 = vsub.f32 %v10006_v11, %v10008_v40  ;;  %v10026_v57 = vadd.f32 1.0, %v1345_v61  ;;  %v839_v43 = vld [vmem:[%s8885_s25 + $0x280] sm:$0xff] }
 0x1c3   : > { %v5433_v23 = vadd.f32 %v4921_v14, %v4409_v19  ;;  %v3473_v25 = vmul.f32 1.442695, %v1348_v44  ;;  %v4411_v29 = vsub.f32 %v2875_v15, %v7755_v22  ;;  %v10030_v33 = vmul.f32 %v833_v48, %v833_v48  ;;  %v4928_v15 = vld [vmem:[#allocation2 + $0x580] sm:$0xff] }
 0x1c4   : > { %v7757_v27 = vpop.eup %7756  ;;  %v5434_v28 = vadd.f32 %v4922_v20, %v4410_v49  ;;  %7770 = vpow2.f32 %v3471_v18  ;;  %v10034_v37 = vadd.f32 1.0, %v1346_v9  ;;  %v10036_v38 = vmul.f32 %v834_v6, %v834_v6  ;;  %v838_v9 = vld [vmem:[%s8885_s25 + $0x278] sm:$0xff]  ;;  %v1355_v18 = vld [vmem:[%s8891_s21 + $0x2a0] sm:$0xff] }
 0x1c5   : > { %5945 = vst [vmem:[#allocation2 + $0xbe8] sm:$0xff] %v5433_v23  ;;  %v4412_v36 = vsub.f32 %v2876_v17, %v7757_v27  ;;  %7772 = vpow2.f32 %v3473_v25  ;;  %v5435_v39 = vadd.f32 %v4923_v24, %v4411_v29  ;;  %v10038_v42 = vadd.f32 1.0, %v1347_v62  ;;  %v1353_v62 = vld [vmem:[%s8891_s21 + $0x290] sm:$0xff]  ;;  %v4929_v24 = vld [vmem:[#allocation2 + $0x208] sm:$0xff]  ;;  %v4930_v29 = vld [vmem:[#allocation2 + $0x158] sm:$0xff] }
 0x1c6   : > { %5946 = vst [vmem:[#allocation2 + $0xd30] sm:$0xff] %v5434_v28  ;;  %v10040_v45 = vmul.f32 %v835_v16, %v835_v16  ;;  %v3475_v47 = vmul.f32 1.442695, %v1349_v26  ;;  %v10044_v54 = vadd.f32 1.0, %v1348_v44  ;;  %v10046_v55 = vmul.f32 %v836_v34, %v836_v34  ;;  %v1354_v44 = vld [vmem:[%s8891_s21 + $0x298] sm:$0xff] }
 0x1c7   : > { %v7759_v51 = vpop.eup %7758  ;;  %v5436_v52 = vadd.f32 %v4924_v32, %v4412_v36  ;;  %v3477_v58 = vmul.f32 1.442695, %v1350_v35  ;;  %5947 = vst [vmem:[#allocation2 + $0x358] sm:$0xff] %v5435_v39  ;;  %v2881_v1 = vsub.f32 %v10026_v57, %v10030_v33  ;;  %v10051_v2 = vadd.f32 1.0, %v1349_v26  ;;  %v842_v16 = vld [vmem:[%s8885_s25 + $0x298] sm:$0xff]  ;;  %v1356_v26 = vld [vmem:[%s8891_s21 + $0x2a8] sm:$0xff] }
 0x1c8   : > { %v7761_v60 = vpop.eup %7760  ;;  %v4413_v61 = vsub.f32 %v2877_v21, %v7759_v51  ;;  %7774 = vpow2.f32 %v3475_v47  ;;  %v10053_v8 = vmul.f32 %v837_v46, %v837_v46  ;;  %v3479_v10 = vmul.f32 1.442695, %v1351_v50  ;;  %v840_v21 = vld [vmem:[%s8885_s25 + $0x288] sm:$0xff]  ;;  %v1357_v47 = vld [vmem:[%s8891_s21 + $0x2b0] sm:$0xff] }
 0x1c9   : > { %5948 = vst [vmem:[#allocation2 + $0x490] sm:$0xff] %v5436_v52  ;;  %v4414_v7 = vsub.f32 %v2878_v5, %v7761_v60  ;;  %7776 = vpow2.f32 %v3477_v58  ;;  %v2882_v11 = vsub.f32 %v10034_v37, %v10036_v38  ;;  %v2883_v40 = vsub.f32 %v10038_v42, %v10040_v45  ;;  %v4931_v39 = vld [vmem:[#allocation2 + $0xec8] sm:$0xff]  ;;  %v1358_v58 = vld [vmem:[%s8891_s21 + $0x2b8] sm:$0xff] }
 0x1ca   : > { %v7763_v30 = vpop.eup %7762  ;;  %v5437_v31 = vadd.f32 %v4925_v53, %v4413_v61  ;;  %v3481_v41 = vmul.f32 1.442695, %v1352_v59  ;;  %v2884_v17 = vsub.f32 %v10044_v54, %v10046_v55  ;;  %7778 = vpow2.f32 %v3479_v10  ;;  %v4932_v53 = vld [vmem:[#allocation2 + $0xdb0] sm:$0xff]  ;;  %v843_v55 = vld [vmem:[%s8885_s25 + $0x2a0] sm:$0xff] }
 0x1cb   : > { %v7765_v12 = vpop.eup %7764  ;;  %v5438_v13 = vadd.f32 %v4926_v0, %v4414_v7  ;;  %v4415_v14 = vsub.f32 %v2879_v4, %v7763_v30  ;;  %v10065_v19 = vadd.f32 1.0, %v1350_v35  ;;  %v10067_v20 = vmul.f32 %v838_v9, %v838_v9  ;;  %v841_v4 = vld [vmem:[%s8885_s25 + $0x290] sm:$0xff]  ;;  %v844_v0 = vld [vmem:[%s8885_s25 + $0x2a8] sm:$0xff]  ;;  %v1359_v9 = vld [vmem:[%s8891_s21 + $0x2c0] sm:$0xff] }
 0x1cc   : > { %5949 = vst [vmem:[#allocation2 + $0x488] sm:$0xff] %v5437_v31  ;;  %v4416_v3 = vsub.f32 %v2880_v56, %v7765_v12  ;;  %7780 = vpow2.f32 %v3481_v41  ;;  %v2885_v48 = vsub.f32 %v10051_v2, %v10053_v8  ;;  %v10072_v49 = vadd.f32 1.0, %v1351_v50  ;;  %v4933_v31 = vld [vmem:[#allocation2 + $0x660] sm:$0xff] }
 0x1cd   : > { %5950 = vst [vmem:[#allocation2 + $0xd60] sm:$0xff] %v5438_v13  ;;  %v5439_v5 = vadd.f32 %v4927_v63, %v4415_v14  ;;  %v3483_v6 = vmul.f32 1.442695, %v1353_v62  ;;  %v10076_v56 = vmul.f32 %v839_v43, %v839_v43  ;;  %v10078_v57 = vadd.f32 1.0, %v1352_v59  ;;  %v4934_v14 = vld [vmem:[#allocation2 + $0x6d8] sm:$0xff] }
 0x1ce   : > { %v7767_v22 = vpop.eup %7766  ;;  %v5440_v23 = vadd.f32 %v4928_v15, %v4416_v3  ;;  %v3485_v25 = vmul.f32 1.442695, %v1354_v44  ;;  %v10082_v32 = vmul.f32 %v840_v21, %v840_v21  ;;  %v10084_v33 = vadd.f32 1.0, %v1353_v62  ;;  %v1360_v62 = vld [vmem:[%s8891_s21 + $0x2c8] sm:$0xff]  ;;  %v846_v43 = vld [vmem:[%s8885_s25 + $0x2b8] sm:$0xff] }
 0x1cf   : > { %v7769_v27 = vpop.eup %7768  ;;  %5951 = vst [vmem:[#allocation2 + $0xbd8] sm:$0xff] %v5439_v5  ;;  %v4417_v28 = vsub.f32 %v2881_v1, %v7767_v22  ;;  %7782 = vpow2.f32 %v3483_v6  ;;  %v10086_v35 = vmul.f32 %v841_v4, %v841_v4  ;;  %v3487_v36 = vmul.f32 1.442695, %v1355_v18  ;;  %v848_v6 = vld [vmem:[%s8885_s25 + $0x2c8] sm:$0xff]  ;;  %v1361_v22 = vld [vmem:[%s8891_s21 + $0x2d0] sm:$0xff] }
 0x1d0   : > { %5952 = vst [vmem:[#allocation2 + $0x580] sm:$0xff] %v5440_v23  ;;  %v4418_v34 = vsub.f32 %v2882_v11, %v7769_v27  ;;  %7784 = vpow2.f32 %v3485_v25  ;;  %v10088_v42 = vadd.f32 1.0, %v1354_v44  ;;  %v10090_v45 = vmul.f32 %v842_v16, %v842_v16  ;;  %v1362_v25 = vld [vmem:[%s8891_s21 + $0x2d8] sm:$0xff] }
 0x1d1   : > { %v7771_v37 = vpop.eup %7770  ;;  %v5441_v38 = vadd.f32 %v4929_v24, %v4417_v28  ;;  %v3489_v46 = vmul.f32 1.442695, %v1356_v26  ;;  %v2886_v54 = vsub.f32 %v10065_v19, %v10067_v20  ;;  %7786 = vpow2.f32 %v3487_v36  ;;  %v847_v19 = vld [vmem:[%s8885_s25 + $0x2c0] sm:$0xff] }
 0x1d2   : > { %v7773_v50 = vpop.eup %7772  ;;  %v5442_v51 = vadd.f32 %v4930_v29, %v4418_v34  ;;  %v4419_v52 = vsub.f32 %v2883_v40, %v7771_v37  ;;  %v2887_v60 = vsub.f32 %v10072_v49, %v10076_v56  ;;  %v2888_v61 = vsub.f32 %v10078_v57, %v10082_v32  ;;  %v845_v40 = vld [vmem:[%s8885_s25 + $0x2b0] sm:$0xff]  ;;  %v4936_v57 = vld [vmem:[#allocation2 + $0xf38] sm:$0xff] }
 0x1d3   : > { %5953 = vst [vmem:[#allocation2 + $0x208] sm:$0xff] %v5441_v38  ;;  %v4420_v59 = vsub.f32 %v2884_v17, %v7773_v50  ;;  %7788 = vpow2.f32 %v3489_v46  ;;  %v2889_v2 = vsub.f32 %v10084_v33, %v10086_v35  ;;  %v10104_v7 = vadd.f32 1.0, %v1355_v18  ;;  %v1363_v35 = vld [vmem:[%s8891_s21 + $0x2e0] sm:$0xff]  ;;  %v4937_v38 = vld [vmem:[#allocation2 + $0x98] sm:$0xff]  ;;  %v1364_v46 = vld [vmem:[%s8891_s21 + $0x2e8] sm:$0xff] }
 0x1d4   : > { %5954 = vst [vmem:[#allocation2 + $0x158] sm:$0xff] %v5442_v51  ;;  %v5443_v1 = vadd.f32 %v4931_v39, %v4419_v52  ;;  %v3491_v8 = vmul.f32 1.442695, %v1357_v47  ;;  %v2890_v63 = vsub.f32 %v10088_v42, %v10090_v45  ;;  %v10109_v11 = vmul.f32 %v843_v55, %v843_v55  ;;  %v4938_v51 = vld [vmem:[#allocation2 + $0xa48] sm:$0xff] }
 0x1d5   : > { %v7775_v10 = vpop.eup %7774  ;;  %v5444_v30 = vadd.f32 %v4932_v53, %v4420_v59  ;;  %v3493_v41 = vmul.f32 1.442695, %v1358_v58  ;;  %v10113_v15 = vadd.f32 1.0, %v1356_v26  ;;  %v10115_v17 = vmul.f32 %v844_v0, %v844_v0  ;;  %v850_v59 = vld [vmem:[%s8885_s25 + $0x2d8] sm:$0xff] }
 0x1d6   : > { %v7777_v12 = vpop.eup %7776  ;;  %5955 = vst [vmem:[#allocation2 + $0xec8] sm:$0xff] %v5443_v1  ;;  %v4421_v13 = vsub.f32 %v2885_v48, %v7775_v10  ;;  %7790 = vpow2.f32 %v3491_v8  ;;  %v10118_v3 = vadd.f32 1.0, %v1357_v47  ;;  %v3495_v20 = vmul.f32 1.442695, %v1359_v9  ;;  %v4935_v48 = vld [vmem:[#allocation2 + $0xbc8] sm:$0xff]  ;;  %v4939_v1 = vld [vmem:[#allocation2 + $0x1b8] sm:$0xff] }
 0x1d7   : > { %5956 = vst [vmem:[#allocation2 + $0xdb0] sm:$0xff] %v5444_v30  ;;  %v4422_v44 = vsub.f32 %v2886_v54, %v7777_v12  ;;  %7792 = vpow2.f32 %v3493_v41  ;;  %v7779_v21 = vpop.eup %7778  ;;  %v10121_v49 = vmul.f32 %v845_v40, %v845_v40  ;;  %v10123_v4 = vadd.f32 1.0, %v1358_v58  ;;  %v849_v54 = vld [vmem:[%s8885_s25 + $0x2d0] sm:$0xff]  ;;  %v851_v8 = vld [vmem:[%s8885_s25 + $0x2e0] sm:$0xff]  ;;  %v852_v41 = vld [vmem:[%s8885_s25 + $0x2e8] sm:$0xff] }
 0x1d8   : > { %v5445_v5 = vadd.f32 %v4933_v31, %v4421_v13  ;;  %v3497_v18 = vmul.f32 1.442695, %v1360_v62  ;;  %v4423_v56 = vsub.f32 %v2887_v60, %v7779_v21  ;;  %v10127_v16 = vmul.f32 %v846_v43, %v846_v43  ;;  %v1365_v10 = vld [vmem:[%s8891_s21 + $0x2f0] sm:$0xff] }
 0x1d9   : > { %v7781_v23 = vpop.eup %7780  ;;  %v5446_v24 = vadd.f32 %v4934_v14, %v4422_v44  ;;  %7794 = vpow2.f32 %v3495_v20  ;;  %v10130_v27 = vadd.f32 1.0, %v1359_v9  ;;  %v10132_v28 = vmul.f32 %v847_v19, %v847_v19  ;;  %v853_v44 = vld [vmem:[%s8885_s25 + $0x2f0] sm:$0xff]  ;;  %v1367_v19 = vld [vmem:[%s8891_s21 + $0x300] sm:$0xff] }
 0x1da   : > { %5957 = vst [vmem:[#allocation2 + $0x660] sm:$0xff] %v5445_v5  ;;  %v4424_v26 = vsub.f32 %v2888_v61, %v7781_v23  ;;  %7796 = vpow2.f32 %v3497_v18  ;;  %v5447_v29 = vadd.f32 %v4935_v48, %v4423_v56  ;;  %v10134_v32 = vadd.f32 1.0, %v1360_v62  ;;  %v1366_v62 = vld [vmem:[%s8891_s21 + $0x2f8] sm:$0xff]  ;;  %v4941_v5 = vld [vmem:[#allocation2 + $0x650] sm:$0xff] }
 0x1db   : > { %5958 = vst [vmem:[#allocation2 + $0x6d8] sm:$0xff] %v5446_v24  ;;  %v10136_v33 = vmul.f32 %v848_v6, %v848_v6  ;;  %v3499_v34 = vmul.f32 1.442695, %v1361_v22  ;;  %v2891_v39 = vsub.f32 %v10104_v7, %v10109_v11  ;;  %v2892_v42 = vsub.f32 %v10113_v15, %v10115_v17  ;;  %v4940_v11 = vld [vmem:[#allocation2 + $0x188] sm:$0xff]  ;;  %v4942_v23 = vld [vmem:[#allocation2 + $0x90] sm:$0xff] }
 0x1dc   : > { %v7783_v36 = vpop.eup %7782  ;;  %v5448_v37 = vadd.f32 %v4936_v57, %v4424_v26  ;;  %v3501_v45 = vmul.f32 1.442695, %v1362_v25  ;;  %5959 = vst [vmem:[#allocation2 + $0xbc8] sm:$0xff] %v5447_v29  ;;  %v2893_v52 = vsub.f32 %v10118_v3, %v10121_v49  ;;  %v2894_v53 = vsub.f32 %v10123_v4, %v10127_v16  ;;  %v1368_v6 = vld [vmem:[%s8891_s21 + $0x308] sm:$0xff]  ;;  %v4943_v29 = vld [vmem:[#allocation2 + $0xdf0] sm:$0xff] }
 0x1dd   : > { %v7785_v47 = vpop.eup %7784  ;;  %v4425_v50 = vsub.f32 %v2889_v2, %v7783_v36  ;;  %7798 = vpow2.f32 %v3499_v34  ;;  %v2895_v58 = vsub.f32 %v10130_v27, %v10132_v28  ;;  %v3503_v60 = vmul.f32 1.442695, %v1363_v35 }
 0x1de   : > { %5960 = vst [vmem:[#allocation2 + $0xf38] sm:$0xff] %v5448_v37  ;;  %v4426_v55 = vsub.f32 %v2890_v63, %v7785_v47  ;;  %7800 = vpow2.f32 %v3501_v45  ;;  %v7787_v61 = vpop.eup %7786  ;;  %v2896_v2 = vsub.f32 %v10134_v32, %v10136_v33  ;;  %v10154_v7 = vadd.f32 1.0, %v1361_v22  ;;  %v855_v45 = vld [vmem:[%s8885_s25 + $0x300] sm:$0xff] }
 0x1df   : > { %v5449_v0 = vadd.f32 %v4937_v38, %v4425_v50  ;;  %v3505_v9 = vmul.f32 1.442695, %v1364_v46  ;;  %v4427_v63 = vsub.f32 %v2891_v39, %v7787_v61  ;;  %v10158_v40 = vmul.f32 %v849_v54, %v849_v54  ;;  %v4944_v39 = vld [vmem:[#allocation2 + $0x9b0] sm:$0xff] }
 0x1e0   : > { %v7789_v30 = vpop.eup %7788  ;;  %v5450_v31 = vadd.f32 %v4938_v51, %v4426_v55  ;;  %7802 = vpow2.f32 %v3503_v60  ;;  %v10162_v13 = vadd.f32 1.0, %v1362_v25  ;;  %v10164_v14 = vmul.f32 %v850_v59, %v850_v59  ;;  %v854_v25 = vld [vmem:[%s8885_s25 + $0x2f8] sm:$0xff]  ;;  %v1371_v60 = vld [vmem:[%s8891_s21 + $0x320] sm:$0xff] }
 0x1e1   : > { %5961 = vst [vmem:[#allocation2 + $0x98] sm:$0xff] %v5449_v0  ;;  %v4428_v12 = vsub.f32 %v2892_v42, %v7789_v30  ;;  %7804 = vpow2.f32 %v3505_v9  ;;  %v5451_v15 = vadd.f32 %v4939_v1, %v4427_v63  ;;  %v10166_v17 = vadd.f32 1.0, %v1363_v35  ;;  %v1369_v35 = vld [vmem:[%s8891_s21 + $0x310] sm:$0xff]  ;;  %v4945_v1 = vld [vmem:[#allocation2 + $0x180] sm:$0xff]  ;;  %v4946_v63 = vld [vmem:[#allocation2 + $0x288] sm:$0xff] }
 0x1e2   : > { %5962 = vst [vmem:[#allocation2 + $0xa48] sm:$0xff] %v5450_v31  ;;  %v10168_v43 = vmul.f32 %v851_v8, %v851_v8  ;;  %v3507_v3 = vmul.f32 1.442695, %v1365_v10  ;;  %v10172_v48 = vadd.f32 1.0, %v1364_v46  ;;  %v10174_v49 = vmul.f32 %v852_v41, %v852_v41  ;;  %v1370_v46 = vld [vmem:[%s8891_s21 + $0x318] sm:$0xff] }
 0x1e3   : > { %v7791_v20 = vpop.eup %7790  ;;  %v5452_v21 = vadd.f32 %v4940_v11, %v4428_v12  ;;  %v3509_v4 = vmul.f32 1.442695, %v1366_v62  ;;  %5963 = vst [vmem:[#allocation2 + $0x1b8] sm:$0xff] %v5451_v15  ;;  %v2897_v24 = vsub.f32 %v10154_v7, %v10158_v40  ;;  %v10179_v56 = vadd.f32 1.0, %v1365_v10  ;;  %v858_v8 = vld [vmem:[%s8885_s25 + $0x318] sm:$0xff]  ;;  %v1372_v10 = vld [vmem:[%s8891_s21 + $0x328] sm:$0xff] }
 0x1e4   : > { %v7793_v18 = vpop.eup %7792  ;;  %v4429_v22 = vsub.f32 %v2893_v52, %v7791_v20  ;;  %7806 = vpow2.f32 %v3507_v3  ;;  %v10181_v16 = vmul.f32 %v853_v44, %v853_v44  ;;  %v3511_v26 = vmul.f32 1.442695, %v1367_v19  ;;  %v856_v52 = vld [vmem:[%s8885_s25 + $0x308] sm:$0xff]  ;;  %v4947_v15 = vld [vmem:[#allocation2 + $0x8e0] sm:$0xff]  ;;  %v1373_v3 = vld [vmem:[%s8891_s21 + $0x330] sm:$0xff] }
 0x1e5   : > { %5964 = vst [vmem:[#allocation2 + $0x188] sm:$0xff] %v5452_v21  ;;  %v4430_v57 = vsub.f32 %v2894_v53, %v7793_v18  ;;  %7808 = vpow2.f32 %v3509_v4  ;;  %v2898_v32 = vsub.f32 %v10162_v13, %v10164_v14  ;;  %v2899_v33 = vsub.f32 %v10166_v17, %v10168_v43  ;;  %v1374_v4 = vld [vmem:[%s8891_s21 + $0x338] sm:$0xff] }
 0x1e6   : > { %v7795_v27 = vpop.eup %7794  ;;  %v5453_v28 = vadd.f32 %v4941_v5, %v4429_v22  ;;  %v3513_v34 = vmul.f32 1.442695, %v1368_v6  ;;  %v2900_v42 = vsub.f32 %v10172_v48, %v10174_v49  ;;  %7810 = vpow2.f32 %v3511_v26  ;;  %v4948_v5 = vld [vmem:[#allocation2 + $0xc00] sm:$0xff] }
 0x1e7   : > { %v7797_v36 = vpop.eup %7796  ;;  %v5454_v37 = vadd.f32 %v4942_v23, %v4430_v57  ;;  %v4431_v38 = vsub.f32 %v2895_v58, %v7795_v27  ;;  %v10193_v50 = vadd.f32 1.0, %v1366_v62  ;;  %v10195_v51 = vmul.f32 %v854_v25, %v854_v25  ;;  %v857_v58 = vld [vmem:[%s8885_s25 + $0x310] sm:$0xff]  ;;  %v859_v49 = vld [vmem:[%s8885_s25 + $0x320] sm:$0xff]  ;;  %v860_v23 = vld [vmem:[%s8885_s25 + $0x328] sm:$0xff] }
 0x1e8   : > { %5965 = vst [vmem:[#allocation2 + $0x650] sm:$0xff] %v5453_v28  ;;  %v4432_v47 = vsub.f32 %v2896_v2, %v7797_v36  ;;  %7812 = vpow2.f32 %v3513_v34  ;;  %v2901_v54 = vsub.f32 %v10179_v56, %v10181_v16  ;;  %v10200_v55 = vadd.f32 1.0, %v1367_v19  ;;  %v1375_v25 = vld [vmem:[%s8891_s21 + $0x340] sm:$0xff]  ;;  %v4949_v28 = vld [vmem:[#allocation2 + $0x230] sm:$0xff] }
 0x1e9   : > { %5966 = vst [vmem:[#allocation2 + $0x90] sm:$0xff] %v5454_v37  ;;  %v5455_v53 = vadd.f32 %v4943_v29, %v4431_v38  ;;  %v3515_v59 = vmul.f32 1.442695, %v1369_v35  ;;  %v10204_v2 = vmul.f32 %v855_v45, %v855_v45  ;;  %v10206_v7 = vadd.f32 1.0, %v1368_v6  ;;  %v4950_v38 = vld [vmem:[#allocation2 + $0x2e0] sm:$0xff]  ;;  %v862_v45 = vld [vmem:[%s8885_s25 + $0x338] sm:$0xff] }
 0x1ea   : > { %v7799_v61 = vpop.eup %7798  ;;  %v5456_v0 = vadd.f32 %v4944_v39, %v4432_v47  ;;  %v3517_v9 = vmul.f32 1.442695, %v1370_v46  ;;  %v10210_v11 = vmul.f32 %v856_v52, %v856_v52  ;;  %v10212_v40 = vadd.f32 1.0, %v1369_v35  ;;  %v1376_v35 = vld [vmem:[%s8891_s21 + $0x348] sm:$0xff] }
 0x1eb   : > { %v7801_v30 = vpop.eup %7800  ;;  %5967 = vst [vmem:[#allocation2 + $0xdf0] sm:$0xff] %v5455_v53  ;;  %v4433_v31 = vsub.f32 %v2897_v24, %v7799_v61  ;;  %7814 = vpow2.f32 %v3515_v59  ;;  %v10214_v62 = vmul.f32 %v857_v58, %v857_v58  ;;  %v3519_v12 = vmul.f32 1.442695, %v1371_v60  ;;  %v864_v59 = vld [vmem:[%s8885_s25 + $0x348] sm:$0xff]  ;;  %v1377_v61 = vld [vmem:[%s8891_s21 + $0x350] sm:$0xff] }
 0x1ec   : > { %5968 = vst [vmem:[#allocation2 + $0x9b0] sm:$0xff] %v5456_v0  ;;  %v4434_v41 = vsub.f32 %v2898_v32, %v7801_v30  ;;  %7816 = vpow2.f32 %v3517_v9  ;;  %v10216_v17 = vadd.f32 1.0, %v1370_v46  ;;  %v10218_v43 = vmul.f32 %v858_v8, %v858_v8  ;;  %v1378_v9 = vld [vmem:[%s8891_s21 + $0x358] sm:$0xff] }
 0x1ed   : > { %v7803_v13 = vpop.eup %7802  ;;  %v5457_v14 = vadd.f32 %v4945_v1, %v4433_v31  ;;  %v3521_v44 = vmul.f32 1.442695, %v1372_v10  ;;  %v2902_v48 = vsub.f32 %v10193_v50, %v10195_v51  ;;  %7818 = vpow2.f32 %v3519_v12  ;;  %v863_v50 = vld [vmem:[%s8885_s25 + $0x340] sm:$0xff] }
 0x1ee   : > { %v7805_v19 = vpop.eup %7804  ;;  %v5458_v20 = vadd.f32 %v4946_v63, %v4434_v41  ;;  %v4435_v21 = vsub.f32 %v2899_v33, %v7803_v13  ;;  %v2903_v18 = vsub.f32 %v10200_v55, %v10204_v2  ;;  %v2904_v22 = vsub.f32 %v10206_v7, %v10210_v11  ;;  %v861_v33 = vld [vmem:[%s8885_s25 + $0x330] sm:$0xff]  ;;  %v4952_v7 = vld [vmem:[#allocation2 + $0x428] sm:$0xff] }
 0x1ef   : > { %5969 = vst [vmem:[#allocation2 + $0x180] sm:$0xff] %v5457_v14  ;;  %v4436_v6 = vsub.f32 %v2900_v42, %v7805_v19  ;;  %7820 = vpow2.f32 %v3521_v44  ;;  %v2905_v56 = vsub.f32 %v10212_v40, %v10214_v62  ;;  %v10232_v57 = vadd.f32 1.0, %v1371_v60  ;;  %v1379_v62 = vld [vmem:[%s8891_s21 + $0x360] sm:$0xff]  ;;  %v4953_v14 = vld [vmem:[#allocation2 + $0xe48] sm:$0xff] }
 0x1f0   : > { %5970 = vst [vmem:[#allocation2 + $0x288] sm:$0xff] %v5458_v20  ;;  %v5459_v24 = vadd.f32 %v4947_v15, %v4435_v21  ;;  %v3523_v16 = vmul.f32 1.442695, %v1373_v3  ;;  %v2906_v29 = vsub.f32 %v10216_v17, %v10218_v43  ;;  %v10237_v32 = vmul.f32 %v859_v49, %v859_v49  ;;  %v1380_v44 = vld [vmem:[%s8891_s21 + $0x368] sm:$0xff]  ;;  %v4954_v20 = vld [vmem:[#allocation2 + $0xe80] sm:$0xff] }
 0x1f1   : > { %v7807_v26 = vpop.eup %7806  ;;  %v5460_v27 = vadd.f32 %v4948_v5, %v4436_v6  ;;  %v3525_v34 = vmul.f32 1.442695, %v1374_v4  ;;  %v10241_v39 = vadd.f32 1.0, %v1372_v10  ;;  %v10243_v42 = vmul.f32 %v860_v23, %v860_v23  ;;  %v866_v6 = vld [vmem:[%s8885_s25 + $0x358] sm:$0xff] }
 0x1f2   : > { %v7809_v36 = vpop.eup %7808  ;;  %5971 = vst [vmem:[#allocation2 + $0x8e0] sm:$0xff] %v5459_v24  ;;  %v4437_v37 = vsub.f32 %v2901_v54, %v7807_v26  ;;  %7822 = vpow2.f32 %v3523_v16  ;;  %v10246_v47 = vadd.f32 1.0, %v1373_v3  ;;  %v3527_v51 = vmul.f32 1.442695, %v1375_v25  ;;  %v4951_v54 = vld [vmem:[#allocation2 + $0x708] sm:$0xff]  ;;  %v4955_v24 = vld [vmem:[#allocation2 + $0x250] sm:$0xff] }
 0x1f3   : > { %5972 = vst [vmem:[#allocation2 + $0xc00] sm:$0xff] %v5460_v27  ;;  %v4438_v46 = vsub.f32 %v2902_v48, %v7809_v36  ;;  %7824 = vpow2.f32 %v3525_v34  ;;  %v7811_v52 = vpop.eup %7810  ;;  %v10249_v55 = vmul.f32 %v861_v33, %v861_v33  ;;  %v10251_v58 = vadd.f32 1.0, %v1374_v4  ;;  %v865_v48 = vld [vmem:[%s8885_s25 + $0x350] sm:$0xff]  ;;  %v867_v16 = vld [vmem:[%s8885_s25 + $0x360] sm:$0xff]  ;;  %v868_v34 = vld [vmem:[%s8885_s25 + $0x368] sm:$0xff] }
 0x1f4   : > { %v5461_v53 = vadd.f32 %v4949_v28, %v4437_v37  ;;  %v3529_v60 = vmul.f32 1.442695, %v1376_v35  ;;  %v4439_v2 = vsub.f32 %v2903_v18, %v7811_v52  ;;  %v10255_v8 = vmul.f32 %v862_v45, %v862_v45  ;;  %v1381_v26 = vld [vmem:[%s8891_s21 + $0x370] sm:$0xff] }
 0x1f5   : > { %v7813_v0 = vpop.eup %7812  ;;  %v5462_v1 = vadd.f32 %v4950_v38, %v4438_v46  ;;  %7826 = vpow2.f32 %v3527_v51  ;;  %v10258_v30 = vadd.f32 1.0, %v1375_v25  ;;  %v10260_v31 = vmul.f32 %v863_v50, %v863_v50  ;;  %v869_v46 = vld [vmem:[%s8885_s25 + $0x370] sm:$0xff]  ;;  %v1383_v50 = vld [vmem:[%s8891_s21 + $0x380] sm:$0xff] }
 0x1f6   : > { %5973 = vst [vmem:[#allocation2 + $0x230] sm:$0xff] %v5461_v53  ;;  %v4440_v10 = vsub.f32 %v2904_v22, %v7813_v0  ;;  %7828 = vpow2.f32 %v3529_v60  ;;  %v5463_v63 = vadd.f32 %v4951_v54, %v4439_v2  ;;  %v10262_v11 = vadd.f32 1.0, %v1376_v35  ;;  %v1382_v35 = vld [vmem:[%s8891_s21 + $0x378] sm:$0xff]  ;;  %v4958_v0 = vld [vmem:[#allocation2 + $0xae0] sm:$0xff] }
 0x1f7   : > { %5974 = vst [vmem:[#allocation2 + $0x2e0] sm:$0xff] %v5462_v1  ;;  %v10264_v40 = vmul.f32 %v864_v59, %v864_v59  ;;  %v3531_v41 = vmul.f32 1.442695, %v1377_v61  ;;  %v2907_v15 = vsub.f32 %v10232_v57, %v10237_v32  ;;  %v2908_v17 = vsub.f32 %v10241_v39, %v10243_v42  ;;  %v4956_v32 = vld [vmem:[#allocation2 + $0x380] sm:$0xff]  ;;  %v4957_v53 = vld [vmem:[#allocation2 + $0xa58] sm:$0xff]  ;;  %v1384_v59 = vld [vmem:[%s8891_s21 + $0x388] sm:$0xff] }
 0x1f8   : > { %v7815_v12 = vpop.eup %7814  ;;  %v5464_v13 = vadd.f32 %v4952_v7, %v4440_v10  ;;  %v3533_v43 = vmul.f32 1.442695, %v1378_v9  ;;  %5975 = vst [vmem:[#allocation2 + $0x708] sm:$0xff] %v5463_v63  ;;  %v2909_v21 = vsub.f32 %v10246_v47, %v10249_v55  ;;  %v2910_v5 = vsub.f32 %v10251_v58, %v10255_v8  ;;  %v4959_v63 = vld [vmem:[#allocation2 + $0xea8] sm:$0xff] }
 0x1f9   : > { %v7817_v3 = vpop.eup %7816  ;;  %v4441_v19 = vsub.f32 %v2905_v56, %v7815_v12  ;;  %7830 = vpow2.f32 %v3531_v41  ;;  %v2911_v4 = vsub.f32 %v10258_v30, %v10260_v31  ;;  %v3535_v18 = vmul.f32 1.442695, %v1379_v62 }
 0x1fa   : > { %5976 = vst [vmem:[#allocation2 + $0x428] sm:$0xff] %v5464_v13  ;;  %v4442_v49 = vsub.f32 %v2906_v29, %v7817_v3  ;;  %7832 = vpow2.f32 %v3533_v43  ;;  %v7819_v22 = vpop.eup %7818  ;;  %v2912_v56 = vsub.f32 %v10262_v11, %v10264_v40  ;;  %v10282_v57 = vadd.f32 1.0, %v1377_v61  ;;  %v871_v43 = vld [vmem:[%s8885_s25 + $0x380] sm:$0xff] }
 0x1fb   : > { %v5465_v23 = vadd.f32 %v4953_v14, %v4441_v19  ;;  %v3537_v25 = vmul.f32 1.442695, %v1380_v44  ;;  %v4443_v29 = vsub.f32 %v2907_v15, %v7819_v22  ;;  %v10286_v33 = vmul.f32 %v865_v48, %v865_v48  ;;  %v4960_v15 = vld [vmem:[#allocation2 + $0x9c0] sm:$0xff] }
 0x1fc   : > { %v7821_v27 = vpop.eup %7820  ;;  %v5466_v28 = vadd.f32 %v4954_v20, %v4442_v49  ;;  %7834 = vpow2.f32 %v3535_v18  ;;  %v10290_v37 = vadd.f32 1.0, %v1378_v9  ;;  %v10292_v38 = vmul.f32 %v866_v6, %v866_v6  ;;  %v870_v9 = vld [vmem:[%s8885_s25 + $0x378] sm:$0xff]  ;;  %v1387_v18 = vld [vmem:[%s8891_s21 + $0x3a0] sm:$0xff] }
 0x1fd   : > { %5977 = vst [vmem:[#allocation2 + $0xe48] sm:$0xff] %v5465_v23  ;;  %v4444_v36 = vsub.f32 %v2908_v17, %v7821_v27  ;;  %7836 = vpow2.f32 %v3537_v25  ;;  %v5467_v39 = vadd.f32 %v4955_v24, %v4443_v29  ;;  %v10294_v42 = vadd.f32 1.0, %v1379_v62  ;;  %v1385_v62 = vld [vmem:[%s8891_s21 + $0x390] sm:$0xff]  ;;  %v4961_v24 = vld [vmem:[#allocation2 + $0x418] sm:$0xff] }
 0x1fe   : > { %5978 = vst [vmem:[#allocation2 + $0xe80] sm:$0xff] %v5466_v28  ;;  %v10296_v45 = vmul.f32 %v867_v16, %v867_v16  ;;  %v3539_v47 = vmul.f32 1.442695, %v1381_v26  ;;  %v10300_v54 = vadd.f32 1.0, %v1380_v44  ;;  %v10302_v55 = vmul.f32 %v868_v34, %v868_v34  ;;  %v1386_v44 = vld [vmem:[%s8891_s21 + $0x398] sm:$0xff]  ;;  %v4962_v29 = vld [vmem:[#allocation2 + $0x410] sm:$0xff] }
 0x1ff   : > { %v7823_v51 = vpop.eup %7822  ;;  %v5468_v52 = vadd.f32 %v4956_v32, %v4444_v36  ;;  %v3541_v58 = vmul.f32 1.442695, %v1382_v35  ;;  %5979 = vst [vmem:[#allocation2 + $0x250] sm:$0xff] %v5467_v39  ;;  %v2913_v1 = vsub.f32 %v10282_v57, %v10286_v33  ;;  %v10307_v2 = vadd.f32 1.0, %v1381_v26  ;;  %v874_v16 = vld [vmem:[%s8885_s25 + $0x398] sm:$0xff]  ;;  %v1388_v26 = vld [vmem:[%s8891_s21 + $0x3a8] sm:$0xff] }
 0x200   : > { %v7825_v60 = vpop.eup %7824  ;;  %v4445_v61 = vsub.f32 %v2909_v21, %v7823_v51  ;;  %7838 = vpow2.f32 %v3539_v47  ;;  %v10309_v8 = vmul.f32 %v869_v46, %v869_v46  ;;  %v3543_v10 = vmul.f32 1.442695, %v1383_v50  ;;  %v872_v21 = vld [vmem:[%s8885_s25 + $0x388] sm:$0xff]  ;;  %v4963_v39 = vld [vmem:[#allocation2 + $0x760] sm:$0xff]  ;;  %v1389_v47 = vld [vmem:[%s8891_s21 + $0x3b0] sm:$0xff] }
 0x201   : > { %5980 = vst [vmem:[#allocation2 + $0x380] sm:$0xff] %v5468_v52  ;;  %v4446_v7 = vsub.f32 %v2910_v5, %v7825_v60  ;;  %7840 = vpow2.f32 %v3541_v58  ;;  %v2914_v11 = vsub.f32 %v10290_v37, %v10292_v38  ;;  %v2915_v40 = vsub.f32 %v10294_v42, %v10296_v45  ;;  %v1390_v58 = vld [vmem:[%s8891_s21 + $0x3b8] sm:$0xff] }
 0x202   : > { %v7827_v30 = vpop.eup %7826  ;;  %v5469_v31 = vadd.f32 %v4957_v53, %v4445_v61  ;;  %v3545_v41 = vmul.f32 1.442695, %v1384_v59  ;;  %v2916_v17 = vsub.f32 %v10300_v54, %v10302_v55  ;;  %7842 = vpow2.f32 %v3543_v10  ;;  %v4964_v53 = vld [vmem:[#allocation2 + $0x9e0] sm:$0xff] }
 0x203   : > { %v7829_v12 = vpop.eup %7828  ;;  %v5470_v13 = vadd.f32 %v4958_v0, %v4446_v7  ;;  %v4447_v14 = vsub.f32 %v2911_v4, %v7827_v30  ;;  %v10321_v19 = vadd.f32 1.0, %v1382_v35  ;;  %v10323_v20 = vmul.f32 %v870_v9, %v870_v9  ;;  %v873_v4 = vld [vmem:[%s8885_s25 + $0x390] sm:$0xff]  ;;  %v875_v55 = vld [vmem:[%s8885_s25 + $0x3a0] sm:$0xff]  ;;  %v876_v0 = vld [vmem:[%s8885_s25 + $0x3a8] sm:$0xff] }
 0x204   : > { %5981 = vst [vmem:[#allocation2 + $0xa58] sm:$0xff] %v5469_v31  ;;  %v4448_v3 = vsub.f32 %v2912_v56, %v7829_v12  ;;  %7844 = vpow2.f32 %v3545_v41  ;;  %v2917_v48 = vsub.f32 %v10307_v2, %v10309_v8  ;;  %v10328_v49 = vadd.f32 1.0, %v1383_v50  ;;  %v1391_v9 = vld [vmem:[%s8891_s21 + $0x3c0] sm:$0xff] }
 0x205   : > { %5982 = vst [vmem:[#allocation2 + $0xae0] sm:$0xff] %v5470_v13  ;;  %v5471_v5 = vadd.f32 %v4959_v63, %v4447_v14  ;;  %v3547_v6 = vmul.f32 1.442695, %v1385_v62  ;;  %v10332_v56 = vmul.f32 %v871_v43, %v871_v43  ;;  %v10334_v57 = vadd.f32 1.0, %v1384_v59  ;;  %v4965_v31 = vld [vmem:[#allocation2 + $0x100] sm:$0xff]  ;;  %v4966_v14 = vld [vmem:[#allocation2 + $0x78] sm:$0xff] }
 0x206   : > { %v7831_v22 = vpop.eup %7830  ;;  %v5472_v23 = vadd.f32 %v4960_v15, %v4448_v3  ;;  %v3549_v25 = vmul.f32 1.442695, %v1386_v44  ;;  %v10338_v32 = vmul.f32 %v872_v21, %v872_v21  ;;  %v10340_v33 = vadd.f32 1.0, %v1385_v62  ;;  %v1392_v62 = vld [vmem:[%s8891_s21 + $0x3c8] sm:$0xff]  ;;  %v878_v43 = vld [vmem:[%s8885_s25 + $0x3b8] sm:$0xff] }
 0x207   : > { %v7833_v27 = vpop.eup %7832  ;;  %5983 = vst [vmem:[#allocation2 + $0xea8] sm:$0xff] %v5471_v5  ;;  %v4449_v28 = vsub.f32 %v2913_v1, %v7831_v22  ;;  %7846 = vpow2.f32 %v3547_v6  ;;  %v10342_v35 = vmul.f32 %v873_v4, %v873_v4  ;;  %v3551_v36 = vmul.f32 1.442695, %v1387_v18  ;;  %v880_v6 = vld [vmem:[%s8885_s25 + $0x3c8] sm:$0xff]  ;;  %v1393_v22 = vld [vmem:[%s8891_s21 + $0x3d0] sm:$0xff] }
 0x208   : > { %5984 = vst [vmem:[#allocation2 + $0x9c0] sm:$0xff] %v5472_v23  ;;  %v4450_v34 = vsub.f32 %v2914_v11, %v7833_v27  ;;  %7848 = vpow2.f32 %v3549_v25  ;;  %v10344_v42 = vadd.f32 1.0, %v1386_v44  ;;  %v10346_v45 = vmul.f32 %v874_v16, %v874_v16  ;;  %v1394_v25 = vld [vmem:[%s8891_s21 + $0x3d8] sm:$0xff] }
 0x209   : > { %v7835_v37 = vpop.eup %7834  ;;  %v5473_v38 = vadd.f32 %v4961_v24, %v4449_v28  ;;  %v3553_v46 = vmul.f32 1.442695, %v1388_v26  ;;  %v2918_v54 = vsub.f32 %v10321_v19, %v10323_v20  ;;  %7850 = vpow2.f32 %v3551_v36  ;;  %v879_v19 = vld [vmem:[%s8885_s25 + $0x3c0] sm:$0xff] }
 0x20a   : > { %v7837_v50 = vpop.eup %7836  ;;  %v5474_v51 = vadd.f32 %v4962_v29, %v4450_v34  ;;  %v4451_v52 = vsub.f32 %v2915_v40, %v7835_v37  ;;  %v2919_v60 = vsub.f32 %v10328_v49, %v10332_v56  ;;  %v2920_v61 = vsub.f32 %v10334_v57, %v10338_v32  ;;  %v877_v40 = vld [vmem:[%s8885_s25 + $0x3b0] sm:$0xff]  ;;  %v4968_v57 = vld [vmem:[#allocation2 + $0x438] sm:$0xff] }
 0x20b   : > { %5985 = vst [vmem:[#allocation2 + $0x418] sm:$0xff] %v5473_v38  ;;  %v4452_v59 = vsub.f32 %v2916_v17, %v7837_v50  ;;  %7852 = vpow2.f32 %v3553_v46  ;;  %v2921_v2 = vsub.f32 %v10340_v33, %v10342_v35  ;;  %v10360_v7 = vadd.f32 1.0, %v1387_v18  ;;  %v1395_v35 = vld [vmem:[%s8891_s21 + $0x3e0] sm:$0xff]  ;;  %v4969_v38 = vld [vmem:[#allocation2 + $0xca8] sm:$0xff] }
 0x20c   : > { %5986 = vst [vmem:[#allocation2 + $0x410] sm:$0xff] %v5474_v51  ;;  %v5475_v1 = vadd.f32 %v4963_v39, %v4451_v52  ;;  %v3555_v8 = vmul.f32 1.442695, %v1389_v47  ;;  %v2922_v63 = vsub.f32 %v10344_v42, %v10346_v45  ;;  %v10365_v11 = vmul.f32 %v875_v55, %v875_v55  ;;  %v1396_v46 = vld [vmem:[%s8891_s21 + $0x3e8] sm:$0xff]  ;;  %v4970_v51 = vld [vmem:[#allocation2 + $0xaf8] sm:$0xff] }
 0x20d   : > { %v7839_v10 = vpop.eup %7838  ;;  %v5476_v30 = vadd.f32 %v4964_v53, %v4452_v59  ;;  %v3557_v41 = vmul.f32 1.442695, %v1390_v58  ;;  %v10369_v15 = vadd.f32 1.0, %v1388_v26  ;;  %v10371_v17 = vmul.f32 %v876_v0, %v876_v0  ;;  %v882_v59 = vld [vmem:[%s8885_s25 + $0x3d8] sm:$0xff] }
 0x20e   : > { %v7841_v12 = vpop.eup %7840  ;;  %5987 = vst [vmem:[#allocation2 + $0x760] sm:$0xff] %v5475_v1  ;;  %v4453_v13 = vsub.f32 %v2917_v48, %v7839_v10  ;;  %7854 = vpow2.f32 %v3555_v8  ;;  %v10374_v3 = vadd.f32 1.0, %v1389_v47  ;;  %v3559_v20 = vmul.f32 1.442695, %v1391_v9  ;;  %v4967_v48 = vld [vmem:[#allocation2 + $0xec0] sm:$0xff]  ;;  %v4971_v1 = vld [vmem:[#allocation2 + $0xa28] sm:$0xff] }
 0x20f   : > { %5988 = vst [vmem:[#allocation2 + $0x9e0] sm:$0xff] %v5476_v30  ;;  %v4454_v44 = vsub.f32 %v2918_v54, %v7841_v12  ;;  %7856 = vpow2.f32 %v3557_v41  ;;  %v7843_v21 = vpop.eup %7842  ;;  %v10377_v49 = vmul.f32 %v877_v40, %v877_v40  ;;  %v10379_v4 = vadd.f32 1.0, %v1390_v58  ;;  %v881_v54 = vld [vmem:[%s8885_s25 + $0x3d0] sm:$0xff]  ;;  %v883_v8 = vld [vmem:[%s8885_s25 + $0x3e0] sm:$0xff]  ;;  %v884_v41 = vld [vmem:[%s8885_s25 + $0x3e8] sm:$0xff] }
 0x210   : > { %v5477_v5 = vadd.f32 %v4965_v31, %v4453_v13  ;;  %v3561_v18 = vmul.f32 1.442695, %v1392_v62  ;;  %v4455_v56 = vsub.f32 %v2919_v60, %v7843_v21  ;;  %v10383_v16 = vmul.f32 %v878_v43, %v878_v43  ;;  %v1397_v10 = vld [vmem:[%s8891_s21 + $0x3f0] sm:$0xff] }
 0x211   : > { %v7845_v23 = vpop.eup %7844  ;;  %v5478_v24 = vadd.f32 %v4966_v14, %v4454_v44  ;;  %7858 = vpow2.f32 %v3559_v20  ;;  %v10386_v27 = vadd.f32 1.0, %v1391_v9  ;;  %v10388_v28 = vmul.f32 %v879_v19, %v879_v19  ;;  %v885_v44 = vld [vmem:[%s8885_s25 + $0x3f0] sm:$0xff]  ;;  %v1399_v19 = vld [vmem:[%s8891_s21 + $0x400] sm:$0xff] }
 0x212   : > { %5989 = vst [vmem:[#allocation2 + $0x100] sm:$0xff] %v5477_v5  ;;  %v4456_v26 = vsub.f32 %v2920_v61, %v7845_v23  ;;  %7860 = vpow2.f32 %v3561_v18  ;;  %v5479_v29 = vadd.f32 %v4967_v48, %v4455_v56  ;;  %v10390_v32 = vadd.f32 1.0, %v1392_v62  ;;  %v1398_v62 = vld [vmem:[%s8891_s21 + $0x3f8] sm:$0xff]  ;;  %v4973_v5 = vld [vmem:[#allocation2 + $0xd50] sm:$0xff] }
 0x213   : > { %5990 = vst [vmem:[#allocation2 + $0x78] sm:$0xff] %v5478_v24  ;;  %v10392_v33 = vmul.f32 %v880_v6, %v880_v6  ;;  %v3563_v34 = vmul.f32 1.442695, %v1393_v22  ;;  %v2923_v39 = vsub.f32 %v10360_v7, %v10365_v11  ;;  %v2924_v42 = vsub.f32 %v10369_v15, %v10371_v17  ;;  %v4972_v11 = vld [vmem:[#allocation2 + $0xa20] sm:$0xff]  ;;  %v1400_v6 = vld [vmem:[%s8891_s21 + $0x408] sm:$0xff]  ;;  %v4974_v23 = vld [vmem:[#allocation2 + $0xbb8] sm:$0xff] }
 0x214   : > { %v7847_v36 = vpop.eup %7846  ;;  %v5480_v37 = vadd.f32 %v4968_v57, %v4456_v26  ;;  %v3565_v45 = vmul.f32 1.442695, %v1394_v25  ;;  %5991 = vst [vmem:[#allocation2 + $0xec0] sm:$0xff] %v5479_v29  ;;  %v2925_v52 = vsub.f32 %v10374_v3, %v10377_v49  ;;  %v2926_v53 = vsub.f32 %v10379_v4, %v10383_v16  ;;  %v4975_v29 = vld [vmem:[#allocation2 + $0x3d8] sm:$0xff] }
 0x215   : > { %v7849_v47 = vpop.eup %7848  ;;  %v4457_v50 = vsub.f32 %v2921_v2, %v7847_v36  ;;  %7862 = vpow2.f32 %v3563_v34  ;;  %v2927_v58 = vsub.f32 %v10386_v27, %v10388_v28  ;;  %v3567_v60 = vmul.f32 1.442695, %v1395_v35 }
 0x216   : > { %5992 = vst [vmem:[#allocation2 + $0x438] sm:$0xff] %v5480_v37  ;;  %v4458_v55 = vsub.f32 %v2922_v63, %v7849_v47  ;;  %7864 = vpow2.f32 %v3565_v45  ;;  %v7851_v61 = vpop.eup %7850  ;;  %v2928_v2 = vsub.f32 %v10390_v32, %v10392_v33  ;;  %v10410_v7 = vadd.f32 1.0, %v1393_v22  ;;  %v887_v45 = vld [vmem:[%s8885_s25 + $0x400] sm:$0xff] }
 0x217   : > { %v5481_v0 = vadd.f32 %v4969_v38, %v4457_v50  ;;  %v3569_v9 = vmul.f32 1.442695, %v1396_v46  ;;  %v4459_v63 = vsub.f32 %v2923_v39, %v7851_v61  ;;  %v10414_v40 = vmul.f32 %v881_v54, %v881_v54  ;;  %v4976_v39 = vld [vmem:[#allocation2 + $0x5e0] sm:$0xff] }
 0x218   : > { %v7853_v30 = vpop.eup %7852  ;;  %v5482_v31 = vadd.f32 %v4970_v51, %v4458_v55  ;;  %7866 = vpow2.f32 %v3567_v60  ;;  %v10418_v13 = vadd.f32 1.0, %v1394_v25  ;;  %v10420_v14 = vmul.f32 %v882_v59, %v882_v59  ;;  %v886_v25 = vld [vmem:[%s8885_s25 + $0x3f8] sm:$0xff]  ;;  %v1403_v60 = vld [vmem:[%s8891_s21 + $0x420] sm:$0xff] }
 0x219   : > { %5993 = vst [vmem:[#allocation2 + $0xca8] sm:$0xff] %v5481_v0  ;;  %v4460_v12 = vsub.f32 %v2924_v42, %v7853_v30  ;;  %7868 = vpow2.f32 %v3569_v9  ;;  %v5483_v15 = vadd.f32 %v4971_v1, %v4459_v63  ;;  %v10422_v17 = vadd.f32 1.0, %v1395_v35  ;;  %v1401_v35 = vld [vmem:[%s8891_s21 + $0x410] sm:$0xff]  ;;  %v4977_v1 = vld [vmem:[#allocation2 + $0x980] sm:$0xff] }
 0x21a   : > { %5994 = vst [vmem:[#allocation2 + $0xaf8] sm:$0xff] %v5482_v31  ;;  %v10424_v43 = vmul.f32 %v883_v8, %v883_v8  ;;  %v3571_v3 = vmul.f32 1.442695, %v1397_v10  ;;  %v10428_v48 = vadd.f32 1.0, %v1396_v46  ;;  %v10430_v49 = vmul.f32 %v884_v41, %v884_v41  ;;  %v1402_v46 = vld [vmem:[%s8891_s21 + $0x418] sm:$0xff]  ;;  %v4978_v63 = vld [vmem:[#allocation2 + $0x990] sm:$0xff] }
 0x21b   : > { %v7855_v20 = vpop.eup %7854  ;;  %v5484_v21 = vadd.f32 %v4972_v11, %v4460_v12  ;;  %v3573_v4 = vmul.f32 1.442695, %v1398_v62  ;;  %5995 = vst [vmem:[#allocation2 + $0xa28] sm:$0xff] %v5483_v15  ;;  %v2929_v24 = vsub.f32 %v10410_v7, %v10414_v40  ;;  %v10435_v56 = vadd.f32 1.0, %v1397_v10  ;;  %v890_v8 = vld [vmem:[%s8885_s25 + $0x418] sm:$0xff]  ;;  %v1404_v10 = vld [vmem:[%s8891_s21 + $0x428] sm:$0xff] }
 0x21c   : > { %v7857_v18 = vpop.eup %7856  ;;  %v4461_v22 = vsub.f32 %v2925_v52, %v7855_v20  ;;  %7870 = vpow2.f32 %v3571_v3  ;;  %v10437_v16 = vmul.f32 %v885_v44, %v885_v44  ;;  %v3575_v26 = vmul.f32 1.442695, %v1399_v19  ;;  %v888_v52 = vld [vmem:[%s8885_s25 + $0x408] sm:$0xff]  ;;  %v4979_v15 = vld [vmem:[#allocation2 + $0xb10] sm:$0xff] }
 0x21d   : > { %5996 = vst [vmem:[#allocation2 + $0xa20] sm:$0xff] %v5484_v21  ;;  %v4462_v57 = vsub.f32 %v2926_v53, %v7857_v18  ;;  %7872 = vpow2.f32 %v3573_v4  ;;  %v2930_v32 = vsub.f32 %v10418_v13, %v10420_v14  ;;  %v2931_v33 = vsub.f32 %v10422_v17, %v10424_v43  ;;  %v1405_v3 = vld [vmem:[%s8891_s21 + $0x430] sm:$0xff]  ;;  %v1406_v4 = vld [vmem:[%s8891_s21 + $0x438] sm:$0xff] }
 0x21e   : > { %v7859_v27 = vpop.eup %7858  ;;  %v5485_v28 = vadd.f32 %v4973_v5, %v4461_v22  ;;  %v3577_v34 = vmul.f32 1.442695, %v1400_v6  ;;  %v2932_v42 = vsub.f32 %v10428_v48, %v10430_v49  ;;  %7874 = vpow2.f32 %v3575_v26  ;;  %v4980_v5 = vld [vmem:[#allocation2 + $0x960] sm:$0xff] }
 0x21f   : > { %v7861_v36 = vpop.eup %7860  ;;  %v5486_v37 = vadd.f32 %v4974_v23, %v4462_v57  ;;  %v4463_v38 = vsub.f32 %v2927_v58, %v7859_v27  ;;  %v10449_v50 = vadd.f32 1.0, %v1398_v62  ;;  %v10451_v51 = vmul.f32 %v886_v25, %v886_v25  ;;  %v889_v58 = vld [vmem:[%s8885_s25 + $0x410] sm:$0xff]  ;;  %v891_v49 = vld [vmem:[%s8885_s25 + $0x420] sm:$0xff]  ;;  %v892_v23 = vld [vmem:[%s8885_s25 + $0x428] sm:$0xff] }
 0x220   : > { %5997 = vst [vmem:[#allocation2 + $0xd50] sm:$0xff] %v5485_v28  ;;  %v4464_v47 = vsub.f32 %v2928_v2, %v7861_v36  ;;  %7876 = vpow2.f32 %v3577_v34  ;;  %v2933_v54 = vsub.f32 %v10435_v56, %v10437_v16  ;;  %v10456_v55 = vadd.f32 1.0, %v1399_v19  ;;  %v1407_v25 = vld [vmem:[%s8891_s21 + $0x440] sm:$0xff]  ;;  %v4981_v28 = vld [vmem:[#allocation2 + $0x310] sm:$0xff] }
 0x221   : > { %5998 = vst [vmem:[#allocation2 + $0xbb8] sm:$0xff] %v5486_v37  ;;  %v5487_v53 = vadd.f32 %v4975_v29, %v4463_v38  ;;  %v3579_v59 = vmul.f32 1.442695, %v1401_v35  ;;  %v10460_v2 = vmul.f32 %v887_v45, %v887_v45  ;;  %v10462_v7 = vadd.f32 1.0, %v1400_v6  ;;  %v4982_v38 = vld [vmem:[#allocation2 + $0xd8] sm:$0xff] }
 0x222   : > { %v7863_v61 = vpop.eup %7862  ;;  %v5488_v0 = vadd.f32 %v4976_v39, %v4464_v47  ;;  %v3581_v9 = vmul.f32 1.442695, %v1402_v46  ;;  %v10466_v11 = vmul.f32 %v888_v52, %v888_v52  ;;  %v10468_v40 = vadd.f32 1.0, %v1401_v35  ;;  %v1408_v35 = vld [vmem:[%s8891_s21 + $0x448] sm:$0xff]  ;;  %v894_v45 = vld [vmem:[%s8885_s25 + $0x438] sm:$0xff] }
 0x223   : > { %v7865_v30 = vpop.eup %7864  ;;  %5999 = vst [vmem:[#allocation2 + $0x3d8] sm:$0xff] %v5487_v53  ;;  %v4465_v31 = vsub.f32 %v2929_v24, %v7863_v61  ;;  %7878 = vpow2.f32 %v3579_v59  ;;  %v10470_v62 = vmul.f32 %v889_v58, %v889_v58  ;;  %v3583_v12 = vmul.f32 1.442695, %v1403_v60  ;;  %v896_v59 = vld [vmem:[%s8885_s25 + $0x448] sm:$0xff]  ;;  %v1409_v61 = vld [vmem:[%s8891_s21 + $0x450] sm:$0xff] }
 0x224   : > { %6000 = vst [vmem:[#allocation2 + $0x5e0] sm:$0xff] %v5488_v0  ;;  %v4466_v41 = vsub.f32 %v2930_v32, %v7865_v30  ;;  %7880 = vpow2.f32 %v3581_v9  ;;  %v10472_v17 = vadd.f32 1.0, %v1402_v46  ;;  %v10474_v43 = vmul.f32 %v890_v8, %v890_v8  ;;  %v1410_v9 = vld [vmem:[%s8891_s21 + $0x458] sm:$0xff] }
 0x225   : > { %v7867_v13 = vpop.eup %7866  ;;  %v5489_v14 = vadd.f32 %v4977_v1, %v4465_v31  ;;  %v3585_v44 = vmul.f32 1.442695, %v1404_v10  ;;  %v2934_v48 = vsub.f32 %v10449_v50, %v10451_v51  ;;  %7882 = vpow2.f32 %v3583_v12  ;;  %v895_v50 = vld [vmem:[%s8885_s25 + $0x440] sm:$0xff] }
 0x226   : > { %v7869_v19 = vpop.eup %7868  ;;  %v5490_v20 = vadd.f32 %v4978_v63, %v4466_v41  ;;  %v4467_v21 = vsub.f32 %v2931_v33, %v7867_v13  ;;  %v2935_v18 = vsub.f32 %v10456_v55, %v10460_v2  ;;  %v2936_v22 = vsub.f32 %v10462_v7, %v10466_v11  ;;  %v893_v33 = vld [vmem:[%s8885_s25 + $0x430] sm:$0xff]  ;;  %v4984_v7 = vld [vmem:[#allocation2 + $0xac8] sm:$0xff] }
 0x227   : > { %6001 = vst [vmem:[#allocation2 + $0x980] sm:$0xff] %v5489_v14  ;;  %v4468_v6 = vsub.f32 %v2932_v42, %v7869_v19  ;;  %7884 = vpow2.f32 %v3585_v44  ;;  %v2937_v56 = vsub.f32 %v10468_v40, %v10470_v62  ;;  %v10488_v57 = vadd.f32 1.0, %v1403_v60  ;;  %v1411_v62 = vld [vmem:[%s8891_s21 + $0x460] sm:$0xff]  ;;  %v1412_v44 = vld [vmem:[%s8891_s21 + $0x468] sm:$0xff] }
 0x228   : > { %6002 = vst [vmem:[#allocation2 + $0x990] sm:$0xff] %v5490_v20  ;;  %v5491_v24 = vadd.f32 %v4979_v15, %v4467_v21  ;;  %v3587_v16 = vmul.f32 1.442695, %v1405_v3  ;;  %v2938_v29 = vsub.f32 %v10472_v17, %v10474_v43  ;;  %v10493_v32 = vmul.f32 %v891_v49, %v891_v49  ;;  %v4985_v14 = vld [vmem:[#allocation2 + $0x820] sm:$0xff]  ;;  %v4986_v20 = vld [vmem:[#allocation2 + $0x8c8] sm:$0xff] }
 0x229   : > { %v7871_v26 = vpop.eup %7870  ;;  %v5492_v27 = vadd.f32 %v4980_v5, %v4468_v6  ;;  %v3589_v34 = vmul.f32 1.442695, %v1406_v4  ;;  %v10497_v39 = vadd.f32 1.0, %v1404_v10  ;;  %v10499_v42 = vmul.f32 %v892_v23, %v892_v23  ;;  %v898_v6 = vld [vmem:[%s8885_s25 + $0x458] sm:$0xff] }
 0x22a   : > { %v7873_v36 = vpop.eup %7872  ;;  %6003 = vst [vmem:[#allocation2 + $0xb10] sm:$0xff] %v5491_v24  ;;  %v4469_v37 = vsub.f32 %v2933_v54, %v7871_v26  ;;  %7886 = vpow2.f32 %v3587_v16  ;;  %v10502_v47 = vadd.f32 1.0, %v1405_v3  ;;  %v3591_v51 = vmul.f32 1.442695, %v1407_v25  ;;  %v4983_v54 = vld [vmem:[#allocation2 + $0x1c0] sm:$0xff]  ;;  %v1413_v26 = vld [vmem:[%s8891_s21 + $0x470] sm:$0xff] }
 0x22b   : > { %6004 = vst [vmem:[#allocation2 + $0x960] sm:$0xff] %v5492_v27  ;;  %v4470_v46 = vsub.f32 %v2934_v48, %v7873_v36  ;;  %7888 = vpow2.f32 %v3589_v34  ;;  %v7875_v52 = vpop.eup %7874  ;;  %v10505_v55 = vmul.f32 %v893_v33, %v893_v33  ;;  %v10507_v58 = vadd.f32 1.0, %v1406_v4  ;;  %v897_v48 = vld [vmem:[%s8885_s25 + $0x450] sm:$0xff]  ;;  %v4987_v24 = vld [vmem:[#allocation2 + $0xe20] sm:$0xff]  ;;  %v900_v34 = vld [vmem:[%s8885_s25 + $0x468] sm:$0xff] }
 0x22c   : > { %v5493_v53 = vadd.f32 %v4981_v28, %v4469_v37  ;;  %v3593_v60 = vmul.f32 1.442695, %v1408_v35  ;;  %v4471_v2 = vsub.f32 %v2935_v18, %v7875_v52  ;;  %v10511_v8 = vmul.f32 %v894_v45, %v894_v45  ;;  %v899_v16 = vld [vmem:[%s8885_s25 + $0x460] sm:$0xff] }
 0x22d   : > { %v7877_v0 = vpop.eup %7876  ;;  %v5494_v1 = vadd.f32 %v4982_v38, %v4470_v46  ;;  %7890 = vpow2.f32 %v3591_v51  ;;  %v10514_v30 = vadd.f32 1.0, %v1407_v25  ;;  %v10516_v31 = vmul.f32 %v895_v50, %v895_v50  ;;  %v901_v46 = vld [vmem:[%s8885_s25 + $0x470] sm:$0xff]  ;;  %v1415_v50 = vld [vmem:[%s8891_s21 + $0x480] sm:$0xff] }
 0x22e   : > { %6005 = vst [vmem:[#allocation2 + $0x310] sm:$0xff] %v5493_v53  ;;  %v4472_v10 = vsub.f32 %v2936_v22, %v7877_v0  ;;  %7892 = vpow2.f32 %v3593_v60  ;;  %v5495_v63 = vadd.f32 %v4983_v54, %v4471_v2  ;;  %v10518_v11 = vadd.f32 1.0, %v1408_v35  ;;  %v1414_v35 = vld [vmem:[%s8891_s21 + $0x478] sm:$0xff]  ;;  %v4990_v0 = vld [vmem:[#allocation2 + $0xc80] sm:$0xff] }
 0x22f   : > { %6006 = vst [vmem:[#allocation2 + $0xd8] sm:$0xff] %v5494_v1  ;;  %v10520_v40 = vmul.f32 %v896_v59, %v896_v59  ;;  %v3595_v41 = vmul.f32 1.442695, %v1409_v61  ;;  %v2939_v15 = vsub.f32 %v10488_v57, %v10493_v32  ;;  %v2940_v17 = vsub.f32 %v10497_v39, %v10499_v42  ;;  %v4988_v32 = vld [vmem:[#allocation2 + $0xb60] sm:$0xff]  ;;  %v4989_v53 = vld [vmem:[#allocation2 + $0xed8] sm:$0xff]  ;;  %v1416_v59 = vld [vmem:[%s8891_s21 + $0x488] sm:$0xff] }
 0x230   : > { %v7879_v12 = vpop.eup %7878  ;;  %v5496_v13 = vadd.f32 %v4984_v7, %v4472_v10  ;;  %v3597_v43 = vmul.f32 1.442695, %v1410_v9  ;;  %6007 = vst [vmem:[#allocation2 + $0x1c0] sm:$0xff] %v5495_v63  ;;  %v2941_v21 = vsub.f32 %v10502_v47, %v10505_v55  ;;  %v2942_v5 = vsub.f32 %v10507_v58, %v10511_v8  ;;  %v4991_v63 = vld [vmem:[#allocation2 + $0x950] sm:$0xff] }
 0x231   : > { %v7881_v3 = vpop.eup %7880  ;;  %v4473_v19 = vsub.f32 %v2937_v56, %v7879_v12  ;;  %7894 = vpow2.f32 %v3595_v41  ;;  %v2943_v4 = vsub.f32 %v10514_v30, %v10516_v31  ;;  %v3599_v18 = vmul.f32 1.442695, %v1411_v62 }
 0x232   : > { %6008 = vst [vmem:[#allocation2 + $0xac8] sm:$0xff] %v5496_v13  ;;  %v4474_v49 = vsub.f32 %v2938_v29, %v7881_v3  ;;  %7896 = vpow2.f32 %v3597_v43  ;;  %v7883_v22 = vpop.eup %7882  ;;  %v2944_v56 = vsub.f32 %v10518_v11, %v10520_v40  ;;  %v10538_v57 = vadd.f32 1.0, %v1409_v61  ;;  %v903_v43 = vld [vmem:[%s8885_s25 + $0x480] sm:$0xff] }
 0x233   : > { %v5497_v23 = vadd.f32 %v4985_v14, %v4473_v19  ;;  %v3601_v25 = vmul.f32 1.442695, %v1412_v44  ;;  %v4475_v29 = vsub.f32 %v2939_v15, %v7883_v22  ;;  %v10542_v33 = vmul.f32 %v897_v48, %v897_v48  ;;  %v4992_v15 = vld [vmem:[#allocation2 + $0x698] sm:$0xff] }
 0x234   : > { %v7885_v27 = vpop.eup %7884  ;;  %v5498_v28 = vadd.f32 %v4986_v20, %v4474_v49  ;;  %7898 = vpow2.f32 %v3599_v18  ;;  %v10546_v37 = vadd.f32 1.0, %v1410_v9  ;;  %v10548_v38 = vmul.f32 %v898_v6, %v898_v6  ;;  %v902_v9 = vld [vmem:[%s8885_s25 + $0x478] sm:$0xff]  ;;  %v1419_v18 = vld [vmem:[%s8891_s21 + $0x4a0] sm:$0xff] }
 0x235   : > { %6009 = vst [vmem:[#allocation2 + $0x820] sm:$0xff] %v5497_v23  ;;  %v4476_v36 = vsub.f32 %v2940_v17, %v7885_v27  ;;  %7900 = vpow2.f32 %v3601_v25  ;;  %v5499_v39 = vadd.f32 %v4987_v24, %v4475_v29  ;;  %v10550_v42 = vadd.f32 1.0, %v1411_v62  ;;  %v1417_v62 = vld [vmem:[%s8891_s21 + $0x490] sm:$0xff]  ;;  %v4994_v29 = vld [vmem:[#allocation2 + $0xf18] sm:$0xff] }
 0x236   : > { %6010 = vst [vmem:[#allocation2 + $0x8c8] sm:$0xff] %v5498_v28  ;;  %v10552_v45 = vmul.f32 %v899_v16, %v899_v16  ;;  %v3603_v47 = vmul.f32 1.442695, %v1413_v26  ;;  %v10556_v54 = vadd.f32 1.0, %v1412_v44  ;;  %v10558_v55 = vmul.f32 %v900_v34, %v900_v34  ;;  %v1418_v44 = vld [vmem:[%s8891_s21 + $0x498] sm:$0xff]  ;;  %v4993_v24 = vld [vmem:[#allocation2 + $0x2d0] sm:$0xff] }
 0x237   : > { %v7887_v51 = vpop.eup %7886  ;;  %v5500_v52 = vadd.f32 %v4988_v32, %v4476_v36  ;;  %v3605_v58 = vmul.f32 1.442695, %v1414_v35  ;;  %6011 = vst [vmem:[#allocation2 + $0xe20] sm:$0xff] %v5499_v39  ;;  %v2945_v1 = vsub.f32 %v10538_v57, %v10542_v33  ;;  %v10563_v2 = vadd.f32 1.0, %v1413_v26  ;;  %v906_v16 = vld [vmem:[%s8885_s25 + $0x498] sm:$0xff]  ;;  %v1420_v26 = vld [vmem:[%s8891_s21 + $0x4a8] sm:$0xff] }
 0x238   : > { %v7889_v60 = vpop.eup %7888  ;;  %v4477_v61 = vsub.f32 %v2941_v21, %v7887_v51  ;;  %7902 = vpow2.f32 %v3603_v47  ;;  %v10565_v8 = vmul.f32 %v901_v46, %v901_v46  ;;  %v3607_v10 = vmul.f32 1.442695, %v1415_v50  ;;  %v904_v21 = vld [vmem:[%s8885_s25 + $0x488] sm:$0xff]  ;;  %v4995_v39 = vld [vmem:[#allocation2 + $0xb90] sm:$0xff] }
 0x239   : > { %6012 = vst [vmem:[#allocation2 + $0xb60] sm:$0xff] %v5500_v52  ;;  %v4478_v7 = vsub.f32 %v2942_v5, %v7889_v60  ;;  %7904 = vpow2.f32 %v3605_v58  ;;  %v2946_v11 = vsub.f32 %v10546_v37, %v10548_v38  ;;  %v2947_v40 = vsub.f32 %v10550_v42, %v10552_v45  ;;  %v1421_v47 = vld [vmem:[%s8891_s21 + $0x4b0] sm:$0xff]  ;;  %v1422_v58 = vld [vmem:[%s8891_s21 + $0x4b8] sm:$0xff] }
 0x23a   : > { %v7891_v30 = vpop.eup %7890  ;;  %v5501_v31 = vadd.f32 %v4989_v53, %v4477_v61  ;;  %v3609_v41 = vmul.f32 1.442695, %v1416_v59  ;;  %v2948_v17 = vsub.f32 %v10556_v54, %v10558_v55  ;;  %7906 = vpow2.f32 %v3607_v10  ;;  %v4996_v53 = vld [vmem:[#allocation2 + $0x458] sm:$0xff]  ;;  %v907_v55 = vld [vmem:[%s8885_s25 + $0x4a0] sm:$0xff] }
 0x23b   : > { %v7893_v12 = vpop.eup %7892  ;;  %v5502_v13 = vadd.f32 %v4990_v0, %v4478_v7  ;;  %v4479_v14 = vsub.f32 %v2943_v4, %v7891_v30  ;;  %v10577_v19 = vadd.f32 1.0, %v1414_v35  ;;  %v10579_v20 = vmul.f32 %v902_v9, %v902_v9  ;;  %v905_v4 = vld [vmem:[%s8885_s25 + $0x490] sm:$0xff]  ;;  %v908_v0 = vld [vmem:[%s8885_s25 + $0x4a8] sm:$0xff]  ;;  %v1423_v9 = vld [vmem:[%s8891_s21 + $0x4c0] sm:$0xff] }
 0x23c   : > { %6013 = vst [vmem:[#allocation2 + $0xed8] sm:$0xff] %v5501_v31  ;;  %v4480_v3 = vsub.f32 %v2944_v56, %v7893_v12  ;;  %7908 = vpow2.f32 %v3609_v41  ;;  %v2949_v48 = vsub.f32 %v10563_v2, %v10565_v8  ;;  %v10584_v49 = vadd.f32 1.0, %v1415_v50  ;;  %v4997_v31 = vld [vmem:[#allocation2 + $0xf20] sm:$0xff] }
 0x23d   : > { %6014 = vst [vmem:[#allocation2 + $0xc80] sm:$0xff] %v5502_v13  ;;  %v5503_v5 = vadd.f32 %v4991_v63, %v4479_v14  ;;  %v3611_v6 = vmul.f32 1.442695, %v1417_v62  ;;  %v10588_v56 = vmul.f32 %v903_v43, %v903_v43  ;;  %v10590_v57 = vadd.f32 1.0, %v1416_v59  ;;  %v4998_v14 = vld [vmem:[#allocation2 + $0x8] sm:$0xff]  ;;  %v910_v43 = vld [vmem:[%s8885_s25 + $0x4b8] sm:$0xff] }
 0x23e   : > { %v7895_v22 = vpop.eup %7894  ;;  %v5504_v23 = vadd.f32 %v4992_v15, %v4480_v3  ;;  %v3613_v25 = vmul.f32 1.442695, %v1418_v44  ;;  %v10594_v32 = vmul.f32 %v904_v21, %v904_v21  ;;  %v10596_v33 = vadd.f32 1.0, %v1417_v62  ;;  %v1424_v62 = vld [vmem:[%s8891_s21 + $0x4c8] sm:$0xff] }
 0x23f   : > { %v7897_v27 = vpop.eup %7896  ;;  %6015 = vst [vmem:[#allocation2 + $0x950] sm:$0xff] %v5503_v5  ;;  %v4481_v28 = vsub.f32 %v2945_v1, %v7895_v22  ;;  %7910 = vpow2.f32 %v3611_v6  ;;  %v10598_v35 = vmul.f32 %v905_v4, %v905_v4  ;;  %v3615_v36 = vmul.f32 1.442695, %v1419_v18  ;;  %v912_v6 = vld [vmem:[%s8885_s25 + $0x4c8] sm:$0xff]  ;;  %v1425_v22 = vld [vmem:[%s8891_s21 + $0x4d0] sm:$0xff] }
 0x240   : > { %6016 = vst [vmem:[#allocation2 + $0x698] sm:$0xff] %v5504_v23  ;;  %v4482_v34 = vsub.f32 %v2946_v11, %v7897_v27  ;;  %7912 = vpow2.f32 %v3613_v25  ;;  %v10600_v42 = vadd.f32 1.0, %v1418_v44  ;;  %v10602_v45 = vmul.f32 %v906_v16, %v906_v16  ;;  %v1426_v25 = vld [vmem:[%s8891_s21 + $0x4d8] sm:$0xff] }
 0x241   : > { %v7899_v37 = vpop.eup %7898  ;;  %v5505_v38 = vadd.f32 %v4993_v24, %v4481_v28  ;;  %v3617_v46 = vmul.f32 1.442695, %v1420_v26  ;;  %v2950_v54 = vsub.f32 %v10577_v19, %v10579_v20  ;;  %7914 = vpow2.f32 %v3615_v36  ;;  %v911_v19 = vld [vmem:[%s8885_s25 + $0x4c0] sm:$0xff] }
 0x242   : > { %v7901_v50 = vpop.eup %7900  ;;  %v5506_v51 = vadd.f32 %v4994_v29, %v4482_v34  ;;  %v4483_v52 = vsub.f32 %v2947_v40, %v7899_v37  ;;  %v2951_v60 = vsub.f32 %v10584_v49, %v10588_v56  ;;  %v2952_v61 = vsub.f32 %v10590_v57, %v10594_v32  ;;  %v909_v40 = vld [vmem:[%s8885_s25 + $0x4b0] sm:$0xff]  ;;  %v5000_v57 = vld [vmem:[#allocation2 + $0xd48] sm:$0xff] }
 0x243   : > { %6017 = vst [vmem:[#allocation2 + $0x2d0] sm:$0xff] %v5505_v38  ;;  %v4484_v59 = vsub.f32 %v2948_v17, %v7901_v50  ;;  %7916 = vpow2.f32 %v3617_v46  ;;  %v2953_v2 = vsub.f32 %v10596_v33, %v10598_v35  ;;  %v10616_v7 = vadd.f32 1.0, %v1419_v18  ;;  %v1427_v35 = vld [vmem:[%s8891_s21 + $0x4e0] sm:$0xff]  ;;  %v5001_v38 = vld [vmem:[#allocation2 + $0x7b8] sm:$0xff]  ;;  %v1428_v46 = vld [vmem:[%s8891_s21 + $0x4e8] sm:$0xff] }
 0x244   : > { %6018 = vst [vmem:[#allocation2 + $0xf18] sm:$0xff] %v5506_v51  ;;  %v5507_v1 = vadd.f32 %v4995_v39, %v4483_v52  ;;  %v3619_v8 = vmul.f32 1.442695, %v1421_v47  ;;  %v2954_v63 = vsub.f32 %v10600_v42, %v10602_v45  ;;  %v10621_v11 = vmul.f32 %v907_v55, %v907_v55  ;;  %v5002_v51 = vld [vmem:[#allocation2 + $0x6b0] sm:$0xff] }
 0x245   : > { %v7903_v10 = vpop.eup %7902  ;;  %v5508_v30 = vadd.f32 %v4996_v53, %v4484_v59  ;;  %v3621_v41 = vmul.f32 1.442695, %v1422_v58  ;;  %v10625_v15 = vadd.f32 1.0, %v1420_v26  ;;  %v10627_v17 = vmul.f32 %v908_v0, %v908_v0  ;;  %v914_v59 = vld [vmem:[%s8885_s25 + $0x4d8] sm:$0xff] }
 0x246   : > { %v7905_v12 = vpop.eup %7904  ;;  %6019 = vst [vmem:[#allocation2 + $0xb90] sm:$0xff] %v5507_v1  ;;  %v4485_v13 = vsub.f32 %v2949_v48, %v7903_v10  ;;  %7918 = vpow2.f32 %v3619_v8  ;;  %v10630_v3 = vadd.f32 1.0, %v1421_v47  ;;  %v3623_v20 = vmul.f32 1.442695, %v1423_v9  ;;  %v4999_v48 = vld [vmem:[#allocation2 + $0xc40] sm:$0xff]  ;;  %v5003_v1 = vld [vmem:[#allocation2 + $0x3d0] sm:$0xff] }
 0x247   : > { %6020 = vst [vmem:[#allocation2 + $0x458] sm:$0xff] %v5508_v30  ;;  %v4486_v44 = vsub.f32 %v2950_v54, %v7905_v12  ;;  %7920 = vpow2.f32 %v3621_v41  ;;  %v7907_v21 = vpop.eup %7906  ;;  %v10633_v49 = vmul.f32 %v909_v40, %v909_v40  ;;  %v10635_v4 = vadd.f32 1.0, %v1422_v58  ;;  %v913_v54 = vld [vmem:[%s8885_s25 + $0x4d0] sm:$0xff]  ;;  %v915_v8 = vld [vmem:[%s8885_s25 + $0x4e0] sm:$0xff]  ;;  %v916_v41 = vld [vmem:[%s8885_s25 + $0x4e8] sm:$0xff] }
 0x248   : > { %v5509_v5 = vadd.f32 %v4997_v31, %v4485_v13  ;;  %v3625_v18 = vmul.f32 1.442695, %v1424_v62  ;;  %v4487_v56 = vsub.f32 %v2951_v60, %v7907_v21  ;;  %v10639_v16 = vmul.f32 %v910_v43, %v910_v43  ;;  %v1429_v10 = vld [vmem:[%s8891_s21 + $0x4f0] sm:$0xff] }
 0x249   : > { %v7909_v23 = vpop.eup %7908  ;;  %v5510_v24 = vadd.f32 %v4998_v14, %v4486_v44  ;;  %7922 = vpow2.f32 %v3623_v20  ;;  %v10642_v27 = vadd.f32 1.0, %v1423_v9  ;;  %v10644_v28 = vmul.f32 %v911_v19, %v911_v19  ;;  %v917_v44 = vld [vmem:[%s8885_s25 + $0x4f0] sm:$0xff]  ;;  %v1431_v19 = vld [vmem:[%s8891_s21 + $0x500] sm:$0xff] }
 0x24a   : > { %6021 = vst [vmem:[#allocation2 + $0xf20] sm:$0xff] %v5509_v5  ;;  %v4488_v26 = vsub.f32 %v2952_v61, %v7909_v23  ;;  %7924 = vpow2.f32 %v3625_v18  ;;  %v5511_v29 = vadd.f32 %v4999_v48, %v4487_v56  ;;  %v10646_v32 = vadd.f32 1.0, %v1424_v62  ;;  %v1430_v62 = vld [vmem:[%s8891_s21 + $0x4f8] sm:$0xff]  ;;  %v5005_v5 = vld [vmem:[#allocation2 + $0xd00] sm:$0xff] }
 0x24b   : > { %6022 = vst [vmem:[#allocation2 + $0x8] sm:$0xff] %v5510_v24  ;;  %v10648_v33 = vmul.f32 %v912_v6, %v912_v6  ;;  %v3627_v34 = vmul.f32 1.442695, %v1425_v22  ;;  %v2955_v39 = vsub.f32 %v10616_v7, %v10621_v11  ;;  %v2956_v42 = vsub.f32 %v10625_v15, %v10627_v17  ;;  %v5004_v11 = vld [vmem:[#allocation2 + $0x228] sm:$0xff]  ;;  %v5006_v23 = vld [vmem:[#allocation2 + $0x498] sm:$0xff] }
 0x24c   : > { %v7911_v36 = vpop.eup %7910  ;;  %v5512_v37 = vadd.f32 %v5000_v57, %v4488_v26  ;;  %v3629_v45 = vmul.f32 1.442695, %v1426_v25  ;;  %6023 = vst [vmem:[#allocation2 + $0xc40] sm:$0xff] %v5511_v29  ;;  %v2957_v52 = vsub.f32 %v10630_v3, %v10633_v49  ;;  %v2958_v53 = vsub.f32 %v10635_v4, %v10639_v16  ;;  %v1432_v6 = vld [vmem:[%s8891_s21 + $0x508] sm:$0xff] }
 0x24d   : > { %v7913_v47 = vpop.eup %7912  ;;  %v4489_v50 = vsub.f32 %v2953_v2, %v7911_v36  ;;  %7926 = vpow2.f32 %v3627_v34  ;;  %v2959_v58 = vsub.f32 %v10642_v27, %v10644_v28  ;;  %v3631_v60 = vmul.f32 1.442695, %v1427_v35  ;;  %v5007_v29 = vld [vmem:[#allocation2 + $0x688] sm:$0xff] }
 0x24e   : > { %6024 = vst [vmem:[#allocation2 + $0xd48] sm:$0xff] %v5512_v37  ;;  %v4490_v55 = vsub.f32 %v2954_v63, %v7913_v47  ;;  %7928 = vpow2.f32 %v3629_v45  ;;  %v7915_v61 = vpop.eup %7914  ;;  %v2960_v2 = vsub.f32 %v10646_v32, %v10648_v33  ;;  %v10666_v7 = vadd.f32 1.0, %v1425_v22  ;;  %v919_v45 = vld [vmem:[%s8885_s25 + $0x500] sm:$0xff] }
 0x24f   : > { %v5513_v0 = vadd.f32 %v5001_v38, %v4489_v50  ;;  %v3633_v9 = vmul.f32 1.442695, %v1428_v46  ;;  %v4491_v63 = vsub.f32 %v2955_v39, %v7915_v61  ;;  %v10670_v40 = vmul.f32 %v913_v54, %v913_v54  ;;  %v5008_v39 = vld [vmem:[#allocation2 + $0x5c0] sm:$0xff] }
 0x250   : > { %v7917_v30 = vpop.eup %7916  ;;  %v5514_v31 = vadd.f32 %v5002_v51, %v4490_v55  ;;  %7930 = vpow2.f32 %v3631_v60  ;;  %v10674_v13 = vadd.f32 1.0, %v1426_v25  ;;  %v10676_v14 = vmul.f32 %v914_v59, %v914_v59  ;;  %v918_v25 = vld [vmem:[%s8885_s25 + $0x4f8] sm:$0xff]  ;;  %v1435_v60 = vld [vmem:[%s8891_s21 + $0x520] sm:$0xff] }
 0x251   : > { %6025 = vst [vmem:[#allocation2 + $0x7b8] sm:$0xff] %v5513_v0  ;;  %v4492_v12 = vsub.f32 %v2956_v42, %v7917_v30  ;;  %7932 = vpow2.f32 %v3633_v9  ;;  %v5515_v15 = vadd.f32 %v5003_v1, %v4491_v63  ;;  %v10678_v17 = vadd.f32 1.0, %v1427_v35  ;;  %v1433_v35 = vld [vmem:[%s8891_s21 + $0x510] sm:$0xff]  ;;  %v5009_v1 = vld [vmem:[#allocation2 + $0x858] sm:$0xff] }
 0x252   : > { %6026 = vst [vmem:[#allocation2 + $0x6b0] sm:$0xff] %v5514_v31  ;;  %v10680_v43 = vmul.f32 %v915_v8, %v915_v8  ;;  %v3635_v3 = vmul.f32 1.442695, %v1429_v10  ;;  %v10684_v48 = vadd.f32 1.0, %v1428_v46  ;;  %v10686_v49 = vmul.f32 %v916_v41, %v916_v41  ;;  %v1434_v46 = vld [vmem:[%s8891_s21 + $0x518] sm:$0xff] }
 0x253   : > { %v7919_v20 = vpop.eup %7918  ;;  %v5516_v21 = vadd.f32 %v5004_v11, %v4492_v12  ;;  %v3637_v4 = vmul.f32 1.442695, %v1430_v62  ;;  %6027 = vst [vmem:[#allocation2 + $0x3d0] sm:$0xff] %v5515_v15  ;;  %v2961_v24 = vsub.f32 %v10666_v7, %v10670_v40  ;;  %v10691_v56 = vadd.f32 1.0, %v1429_v10  ;;  %v922_v8 = vld [vmem:[%s8885_s25 + $0x518] sm:$0xff]  ;;  %v1436_v10 = vld [vmem:[%s8891_s21 + $0x528] sm:$0xff] }
 0x254   : > { %v7921_v18 = vpop.eup %7920  ;;  %v4493_v22 = vsub.f32 %v2957_v52, %v7919_v20  ;;  %7934 = vpow2.f32 %v3635_v3  ;;  %v10693_v16 = vmul.f32 %v917_v44, %v917_v44  ;;  %v3639_v26 = vmul.f32 1.442695, %v1431_v19  ;;  %v920_v52 = vld [vmem:[%s8885_s25 + $0x508] sm:$0xff]  ;;  %v5010_v63 = vld [vmem:[#allocation2 + $0x478] sm:$0xff]  ;;  %v1437_v3 = vld [vmem:[%s8891_s21 + $0x530] sm:$0xff] }
 0x255   : > { %6028 = vst [vmem:[#allocation2 + $0x228] sm:$0xff] %v5516_v21  ;;  %v4494_v57 = vsub.f32 %v2958_v53, %v7921_v18  ;;  %7936 = vpow2.f32 %v3637_v4  ;;  %v2962_v32 = vsub.f32 %v10674_v13, %v10676_v14  ;;  %v2963_v33 = vsub.f32 %v10678_v17, %v10680_v43  ;;  %v5011_v15 = vld [vmem:[#allocation2 + $0x6f8] sm:$0xff] }
 0x256   : > { %v7923_v27 = vpop.eup %7922  ;;  %v5517_v28 = vadd.f32 %v5005_v5, %v4493_v22  ;;  %v3641_v34 = vmul.f32 1.442695, %v1432_v6  ;;  %v2964_v42 = vsub.f32 %v10684_v48, %v10686_v49  ;;  %7938 = vpow2.f32 %v3639_v26  ;;  %v5012_v5 = vld [vmem:[#allocation2 + $0xc70] sm:$0xff]  ;;  %v923_v49 = vld [vmem:[%s8885_s25 + $0x520] sm:$0xff]  ;;  %v1438_v4 = vld [vmem:[%s8891_s21 + $0x538] sm:$0xff] }
 0x257   : > { %v7925_v36 = vpop.eup %7924  ;;  %v5518_v37 = vadd.f32 %v5006_v23, %v4494_v57  ;;  %v4495_v38 = vsub.f32 %v2959_v58, %v7923_v27  ;;  %v10705_v50 = vadd.f32 1.0, %v1430_v62  ;;  %v10707_v51 = vmul.f32 %v918_v25, %v918_v25  ;;  %v921_v58 = vld [vmem:[%s8885_s25 + $0x510] sm:$0xff]  ;;  %v924_v23 = vld [vmem:[%s8885_s25 + $0x528] sm:$0xff]  ;;  %v1439_v25 = vld [vmem:[%s8891_s21 + $0x540] sm:$0xff] }
 0x258   : > { %6029 = vst [vmem:[#allocation2 + $0xd00] sm:$0xff] %v5517_v28  ;;  %v4496_v47 = vsub.f32 %v2960_v2, %v7925_v36  ;;  %7940 = vpow2.f32 %v3641_v34  ;;  %v2965_v54 = vsub.f32 %v10691_v56, %v10693_v16  ;;  %v10712_v55 = vadd.f32 1.0, %v1431_v19  ;;  %v5013_v28 = vld [vmem:[#allocation2 + $0x780] sm:$0xff] }
 0x259   : > { %6030 = vst [vmem:[#allocation2 + $0x498] sm:$0xff] %v5518_v37  ;;  %v5519_v53 = vadd.f32 %v5007_v29, %v4495_v38  ;;  %v3643_v59 = vmul.f32 1.442695, %v1433_v35  ;;  %v10716_v2 = vmul.f32 %v919_v45, %v919_v45  ;;  %v10718_v7 = vadd.f32 1.0, %v1432_v6  ;;  %v5014_v38 = vld [vmem:[#allocation2 + $0x1f8] sm:$0xff] }
 0x25a   : > { %v7927_v61 = vpop.eup %7926  ;;  %v5520_v0 = vadd.f32 %v5008_v39, %v4496_v47  ;;  %v3645_v9 = vmul.f32 1.442695, %v1434_v46  ;;  %v10722_v11 = vmul.f32 %v920_v52, %v920_v52  ;;  %v10724_v40 = vadd.f32 1.0, %v1433_v35  ;;  %v1440_v35 = vld [vmem:[%s8891_s21 + $0x548] sm:$0xff]  ;;  %v926_v45 = vld [vmem:[%s8885_s25 + $0x538] sm:$0xff] }
 0x25b   : > { %v7929_v30 = vpop.eup %7928  ;;  %6031 = vst [vmem:[#allocation2 + $0x688] sm:$0xff] %v5519_v53  ;;  %v4497_v31 = vsub.f32 %v2961_v24, %v7927_v61  ;;  %7942 = vpow2.f32 %v3643_v59  ;;  %v10726_v62 = vmul.f32 %v921_v58, %v921_v58  ;;  %v3647_v12 = vmul.f32 1.442695, %v1435_v60  ;;  %v928_v59 = vld [vmem:[%s8885_s25 + $0x548] sm:$0xff]  ;;  %v1441_v61 = vld [vmem:[%s8891_s21 + $0x550] sm:$0xff] }
 0x25c   : > { %6032 = vst [vmem:[#allocation2 + $0x5c0] sm:$0xff] %v5520_v0  ;;  %v4498_v41 = vsub.f32 %v2962_v32, %v7929_v30  ;;  %7944 = vpow2.f32 %v3645_v9  ;;  %v10728_v17 = vadd.f32 1.0, %v1434_v46  ;;  %v10730_v43 = vmul.f32 %v922_v8, %v922_v8  ;;  %v1442_v9 = vld [vmem:[%s8891_s21 + $0x558] sm:$0xff] }
 0x25d   : > { %v7931_v13 = vpop.eup %7930  ;;  %v5521_v14 = vadd.f32 %v5009_v1, %v4497_v31  ;;  %v3649_v44 = vmul.f32 1.442695, %v1436_v10  ;;  %v2966_v48 = vsub.f32 %v10705_v50, %v10707_v51  ;;  %7946 = vpow2.f32 %v3647_v12  ;;  %v927_v50 = vld [vmem:[%s8885_s25 + $0x540] sm:$0xff] }
 0x25e   : > { %v7933_v19 = vpop.eup %7932  ;;  %v5522_v20 = vadd.f32 %v5010_v63, %v4498_v41  ;;  %v4499_v21 = vsub.f32 %v2963_v33, %v7931_v13  ;;  %v2967_v18 = vsub.f32 %v10712_v55, %v10716_v2  ;;  %v2968_v22 = vsub.f32 %v10718_v7, %v10722_v11  ;;  %v925_v33 = vld [vmem:[%s8885_s25 + $0x530] sm:$0xff]  ;;  %v5016_v7 = vld [vmem:[#allocation2 + $0x788] sm:$0xff] }
 0x25f   : > { %6033 = vst [vmem:[#allocation2 + $0x858] sm:$0xff] %v5521_v14  ;;  %v4500_v6 = vsub.f32 %v2964_v42, %v7933_v19  ;;  %7948 = vpow2.f32 %v3649_v44  ;;  %v2969_v56 = vsub.f32 %v10724_v40, %v10726_v62  ;;  %v10744_v57 = vadd.f32 1.0, %v1435_v60  ;;  %v1443_v62 = vld [vmem:[%s8891_s21 + $0x560] sm:$0xff]  ;;  %v5017_v14 = vld [vmem:[#allocation2 + $0x4b8] sm:$0xff]  ;;  %v1444_v44 = vld [vmem:[%s8891_s21 + $0x568] sm:$0xff] }
 0x260   : > { %6034 = vst [vmem:[#allocation2 + $0x478] sm:$0xff] %v5522_v20  ;;  %v5523_v24 = vadd.f32 %v5011_v15, %v4499_v21  ;;  %v3651_v16 = vmul.f32 1.442695, %v1437_v3  ;;  %v2970_v29 = vsub.f32 %v10728_v17, %v10730_v43  ;;  %v10749_v32 = vmul.f32 %v923_v49, %v923_v49  ;;  %v5018_v20 = vld [vmem:[#allocation2 + $0x4c8] sm:$0xff] }
 0x261   : > { %v7935_v26 = vpop.eup %7934  ;;  %v5524_v27 = vadd.f32 %v5012_v5, %v4500_v6  ;;  %v3653_v34 = vmul.f32 1.442695, %v1438_v4  ;;  %v10753_v39 = vadd.f32 1.0, %v1436_v10  ;;  %v10755_v42 = vmul.f32 %v924_v23, %v924_v23  ;;  %v930_v6 = vld [vmem:[%s8885_s25 + $0x558] sm:$0xff] }
 0x262   : > { %v7937_v36 = vpop.eup %7936  ;;  %6035 = vst [vmem:[#allocation2 + $0x6f8] sm:$0xff] %v5523_v24  ;;  %v4501_v37 = vsub.f32 %v2965_v54, %v7935_v26  ;;  %7950 = vpow2.f32 %v3651_v16  ;;  %v10758_v47 = vadd.f32 1.0, %v1437_v3  ;;  %v3655_v51 = vmul.f32 1.442695, %v1439_v25  ;;  %v5015_v54 = vld [vmem:[#allocation2 + $0xbc0] sm:$0xff]  ;;  %v5019_v24 = vld [vmem:[#allocation2 + $0x38] sm:$0xff] }
 0x263   : > { %6036 = vst [vmem:[#allocation2 + $0xc70] sm:$0xff] %v5524_v27  ;;  %v4502_v46 = vsub.f32 %v2966_v48, %v7937_v36  ;;  %7952 = vpow2.f32 %v3653_v34  ;;  %v7939_v52 = vpop.eup %7938  ;;  %v10761_v55 = vmul.f32 %v925_v33, %v925_v33  ;;  %v10763_v58 = vadd.f32 1.0, %v1438_v4  ;;  %v929_v48 = vld [vmem:[%s8885_s25 + $0x550] sm:$0xff]  ;;  %v931_v16 = vld [vmem:[%s8885_s25 + $0x560] sm:$0xff]  ;;  %v932_v34 = vld [vmem:[%s8885_s25 + $0x568] sm:$0xff] }
 0x264   : > { %v5525_v53 = vadd.f32 %v5013_v28, %v4501_v37  ;;  %v3657_v60 = vmul.f32 1.442695, %v1440_v35  ;;  %v4503_v2 = vsub.f32 %v2967_v18, %v7939_v52  ;;  %v10767_v8 = vmul.f32 %v926_v45, %v926_v45  ;;  %v1445_v26 = vld [vmem:[%s8891_s21 + $0x570] sm:$0xff] }
 0x265   : > { %v7941_v0 = vpop.eup %7940  ;;  %v5526_v1 = vadd.f32 %v5014_v38, %v4502_v46  ;;  %7954 = vpow2.f32 %v3655_v51  ;;  %v10770_v30 = vadd.f32 1.0, %v1439_v25  ;;  %v10772_v31 = vmul.f32 %v927_v50, %v927_v50  ;;  %v933_v46 = vld [vmem:[%s8885_s25 + $0x570] sm:$0xff]  ;;  %v1447_v50 = vld [vmem:[%s8891_s21 + $0x580] sm:$0xff] }
 0x266   : > { %6037 = vst [vmem:[#allocation2 + $0x780] sm:$0xff] %v5525_v53  ;;  %v4504_v10 = vsub.f32 %v2968_v22, %v7941_v0  ;;  %7956 = vpow2.f32 %v3657_v60  ;;  %v5527_v63 = vadd.f32 %v5015_v54, %v4503_v2  ;;  %v10774_v11 = vadd.f32 1.0, %v1440_v35  ;;  %v1446_v35 = vld [vmem:[%s8891_s21 + $0x578] sm:$0xff]  ;;  %v5021_v53 = vld [vmem:[#allocation2 + $0x7c8] sm:$0xff]  ;;  %v5022_v0 = vld [vmem:[#allocation2 + $0xd90] sm:$0xff] }
 0x267   : > { %6038 = vst [vmem:[#allocation2 + $0x1f8] sm:$0xff] %v5526_v1  ;;  %v10776_v40 = vmul.f32 %v928_v59, %v928_v59  ;;  %v3659_v41 = vmul.f32 1.442695, %v1441_v61  ;;  %v2971_v15 = vsub.f32 %v10744_v57, %v10749_v32  ;;  %v2972_v17 = vsub.f32 %v10753_v39, %v10755_v42  ;;  %v5020_v32 = vld [vmem:[#allocation2 + $0x3b0] sm:$0xff]  ;;  %v1448_v59 = vld [vmem:[%s8891_s21 + $0x588] sm:$0xff] }
 0x268   : > { %v7943_v12 = vpop.eup %7942  ;;  %v5528_v13 = vadd.f32 %v5016_v7, %v4504_v10  ;;  %v3661_v43 = vmul.f32 1.442695, %v1442_v9  ;;  %6039 = vst [vmem:[#allocation2 + $0xbc0] sm:$0xff] %v5527_v63  ;;  %v2973_v21 = vsub.f32 %v10758_v47, %v10761_v55  ;;  %v2974_v5 = vsub.f32 %v10763_v58, %v10767_v8  ;;  %v5023_v63 = vld [vmem:[#allocation2 + $0xba8] sm:$0xff] }
 0x269   : > { %v7945_v3 = vpop.eup %7944  ;;  %v4505_v19 = vsub.f32 %v2969_v56, %v7943_v12  ;;  %7958 = vpow2.f32 %v3659_v41  ;;  %v2975_v4 = vsub.f32 %v10770_v30, %v10772_v31  ;;  %v3663_v18 = vmul.f32 1.442695, %v1443_v62 }
 0x26a   : > { %6040 = vst [vmem:[#allocation2 + $0x788] sm:$0xff] %v5528_v13  ;;  %v4506_v49 = vsub.f32 %v2970_v29, %v7945_v3  ;;  %7960 = vpow2.f32 %v3661_v43  ;;  %v7947_v22 = vpop.eup %7946  ;;  %v2976_v56 = vsub.f32 %v10774_v11, %v10776_v40  ;;  %v10794_v57 = vadd.f32 1.0, %v1441_v61  ;;  %v935_v43 = vld [vmem:[%s8885_s25 + $0x580] sm:$0xff] }
 0x26b   : > { %v5529_v23 = vadd.f32 %v5017_v14, %v4505_v19  ;;  %v3665_v25 = vmul.f32 1.442695, %v1444_v44  ;;  %v4507_v29 = vsub.f32 %v2971_v15, %v7947_v22  ;;  %v10798_v33 = vmul.f32 %v929_v48, %v929_v48  ;;  %v5024_v15 = vld [vmem:[#allocation2 + $0x9c8] sm:$0xff] }
 0x26c   : > { %v7949_v27 = vpop.eup %7948  ;;  %v5530_v28 = vadd.f32 %v5018_v20, %v4506_v49  ;;  %7962 = vpow2.f32 %v3663_v18  ;;  %v10802_v37 = vadd.f32 1.0, %v1442_v9  ;;  %v10804_v38 = vmul.f32 %v930_v6, %v930_v6  ;;  %v934_v9 = vld [vmem:[%s8885_s25 + $0x578] sm:$0xff]  ;;  %v1451_v18 = vld [vmem:[%s8891_s21 + $0x5a0] sm:$0xff] }
 0x26d   : > { %6041 = vst [vmem:[#allocation2 + $0x4b8] sm:$0xff] %v5529_v23  ;;  %v4508_v36 = vsub.f32 %v2972_v17, %v7949_v27  ;;  %7964 = vpow2.f32 %v3665_v25  ;;  %v5531_v39 = vadd.f32 %v5019_v24, %v4507_v29  ;;  %v10806_v42 = vadd.f32 1.0, %v1443_v62  ;;  %v1449_v62 = vld [vmem:[%s8891_s21 + $0x590] sm:$0xff] }
 0x26e   : > { %6042 = vst [vmem:[#allocation2 + $0x4c8] sm:$0xff] %v5530_v28  ;;  %v10808_v45 = vmul.f32 %v931_v16, %v931_v16  ;;  %v3667_v47 = vmul.f32 1.442695, %v1445_v26  ;;  %v10812_v54 = vadd.f32 1.0, %v1444_v44  ;;  %v10814_v55 = vmul.f32 %v932_v34, %v932_v34  ;;  %v1450_v44 = vld [vmem:[%s8891_s21 + $0x598] sm:$0xff]  ;;  %v5025_v24 = vld [vmem:[#allocation2 + $0x2f0] sm:$0xff] }
 0x26f   : > { %v7951_v51 = vpop.eup %7950  ;;  %v5532_v52 = vadd.f32 %v5020_v32, %v4508_v36  ;;  %v3669_v58 = vmul.f32 1.442695, %v1446_v35  ;;  %6043 = vst [vmem:[#allocation2 + $0x38] sm:$0xff] %v5531_v39  ;;  %v2977_v1 = vsub.f32 %v10794_v57, %v10798_v33  ;;  %v10819_v2 = vadd.f32 1.0, %v1445_v26  ;;  %v938_v16 = vld [vmem:[%s8885_s25 + $0x598] sm:$0xff]  ;;  %v1452_v26 = vld [vmem:[%s8891_s21 + $0x5a8] sm:$0xff] }
 0x270   : > { %v7953_v60 = vpop.eup %7952  ;;  %v4509_v61 = vsub.f32 %v2973_v21, %v7951_v51  ;;  %7966 = vpow2.f32 %v3667_v47  ;;  %v10821_v8 = vmul.f32 %v933_v46, %v933_v46  ;;  %v3671_v10 = vmul.f32 1.442695, %v1447_v50  ;;  %v936_v21 = vld [vmem:[%s8885_s25 + $0x588] sm:$0xff]  ;;  %v5026_v29 = vld [vmem:[#allocation2 + $0x5d0] sm:$0xff]  ;;  %v5027_v39 = vld [vmem:[#allocation2 + $0xfe0] sm:$0xff] }
 0x271   : > { %6044 = vst [vmem:[#allocation2 + $0x3b0] sm:$0xff] %v5532_v52  ;;  %v4510_v7 = vsub.f32 %v2974_v5, %v7953_v60  ;;  %7968 = vpow2.f32 %v3669_v58  ;;  %v2978_v11 = vsub.f32 %v10802_v37, %v10804_v38  ;;  %v2979_v40 = vsub.f32 %v10806_v42, %v10808_v45  ;;  %v1453_v47 = vld [vmem:[%s8891_s21 + $0x5b0] sm:$0xff]  ;;  %v1454_v58 = vld [vmem:[%s8891_s21 + $0x5b8] sm:$0xff] }
 0x272   : > { %v7955_v30 = vpop.eup %7954  ;;  %v5533_v31 = vadd.f32 %v5021_v53, %v4509_v61  ;;  %v3673_v41 = vmul.f32 1.442695, %v1448_v59  ;;  %v2980_v17 = vsub.f32 %v10812_v54, %v10814_v55  ;;  %7970 = vpow2.f32 %v3671_v10  ;;  %v5028_v53 = vld [vmem:[#allocation2 + $0xb98] sm:$0xff]  ;;  %v939_v55 = vld [vmem:[%s8885_s25 + $0x5a0] sm:$0xff] }
 0x273   : > { %v7957_v12 = vpop.eup %7956  ;;  %v5534_v13 = vadd.f32 %v5022_v0, %v4510_v7  ;;  %v4511_v14 = vsub.f32 %v2975_v4, %v7955_v30  ;;  %v10833_v19 = vadd.f32 1.0, %v1446_v35  ;;  %v10835_v20 = vmul.f32 %v934_v9, %v934_v9  ;;  %v937_v4 = vld [vmem:[%s8885_s25 + $0x590] sm:$0xff]  ;;  %v940_v0 = vld [vmem:[%s8885_s25 + $0x5a8] sm:$0xff]  ;;  %v1455_v9 = vld [vmem:[%s8891_s21 + $0x5c0] sm:$0xff] }
 0x274   : > { %6045 = vst [vmem:[#allocation2 + $0x7c8] sm:$0xff] %v5533_v31  ;;  %v4512_v3 = vsub.f32 %v2976_v56, %v7957_v12  ;;  %7972 = vpow2.f32 %v3673_v41  ;;  %v2981_v48 = vsub.f32 %v10819_v2, %v10821_v8  ;;  %v10840_v49 = vadd.f32 1.0, %v1447_v50  ;;  %v5029_v31 = vld [vmem:[#allocation2 + $0x840] sm:$0xff] }
 0x275   : > { %6046 = vst [vmem:[#allocation2 + $0xd90] sm:$0xff] %v5534_v13  ;;  %v5535_v5 = vadd.f32 %v5023_v63, %v4511_v14  ;;  %v3675_v6 = vmul.f32 1.442695, %v1449_v62  ;;  %v10844_v56 = vmul.f32 %v935_v43, %v935_v43  ;;  %v10846_v57 = vadd.f32 1.0, %v1448_v59  ;;  %v5030_v14 = vld [vmem:[#allocation2 + $0x768] sm:$0xff]  ;;  %v942_v43 = vld [vmem:[%s8885_s25 + $0x5b8] sm:$0xff] }
 0x276   : > { %v7959_v22 = vpop.eup %7958  ;;  %v5536_v23 = vadd.f32 %v5024_v15, %v4512_v3  ;;  %v3677_v25 = vmul.f32 1.442695, %v1450_v44  ;;  %v10850_v32 = vmul.f32 %v936_v21, %v936_v21  ;;  %v10852_v33 = vadd.f32 1.0, %v1449_v62  ;;  %v1456_v62 = vld [vmem:[%s8891_s21 + $0x5c8] sm:$0xff] }
 0x277   : > { %v7961_v27 = vpop.eup %7960  ;;  %6047 = vst [vmem:[#allocation2 + $0xba8] sm:$0xff] %v5535_v5  ;;  %v4513_v28 = vsub.f32 %v2977_v1, %v7959_v22  ;;  %7974 = vpow2.f32 %v3675_v6  ;;  %v10854_v35 = vmul.f32 %v937_v4, %v937_v4  ;;  %v3679_v36 = vmul.f32 1.442695, %v1451_v18  ;;  %v944_v6 = vld [vmem:[%s8885_s25 + $0x5c8] sm:$0xff]  ;;  %v1457_v22 = vld [vmem:[%s8891_s21 + $0x5d0] sm:$0xff] }
 0x278   : > { %6048 = vst [vmem:[#allocation2 + $0x9c8] sm:$0xff] %v5536_v23  ;;  %v4514_v34 = vsub.f32 %v2978_v11, %v7961_v27  ;;  %7976 = vpow2.f32 %v3677_v25  ;;  %v10856_v42 = vadd.f32 1.0, %v1450_v44  ;;  %v10858_v45 = vmul.f32 %v938_v16, %v938_v16  ;;  %v1458_v25 = vld [vmem:[%s8891_s21 + $0x5d8] sm:$0xff] }
 0x279   : > { %v7963_v37 = vpop.eup %7962  ;;  %v5537_v38 = vadd.f32 %v5025_v24, %v4513_v28  ;;  %v3681_v46 = vmul.f32 1.442695, %v1452_v26  ;;  %v2982_v54 = vsub.f32 %v10833_v19, %v10835_v20  ;;  %7978 = vpow2.f32 %v3679_v36  ;;  %v943_v19 = vld [vmem:[%s8885_s25 + $0x5c0] sm:$0xff] }
 0x27a   : > { %v7965_v50 = vpop.eup %7964  ;;  %v5538_v51 = vadd.f32 %v5026_v29, %v4514_v34  ;;  %v4515_v52 = vsub.f32 %v2979_v40, %v7963_v37  ;;  %v2983_v60 = vsub.f32 %v10840_v49, %v10844_v56  ;;  %v2984_v61 = vsub.f32 %v10846_v57, %v10850_v32  ;;  %v941_v40 = vld [vmem:[%s8885_s25 + $0x5b0] sm:$0xff] }
 0x27b   : > { %6049 = vst [vmem:[#allocation2 + $0x2f0] sm:$0xff] %v5537_v38  ;;  %v4516_v59 = vsub.f32 %v2980_v17, %v7965_v50  ;;  %7980 = vpow2.f32 %v3681_v46  ;;  %v2985_v2 = vsub.f32 %v10852_v33, %v10854_v35  ;;  %v10872_v7 = vadd.f32 1.0, %v1451_v18  ;;  %v5032_v57 = vld [vmem:[#allocation2 + $0xb30] sm:$0xff]  ;;  %v1459_v35 = vld [vmem:[%s8891_s21 + $0x5e0] sm:$0xff]  ;;  %v5033_v38 = vld [vmem:[#allocation2 + $0x9f8] sm:$0xff] }
 0x27c   : > { %6050 = vst [vmem:[#allocation2 + $0x5d0] sm:$0xff] %v5538_v51  ;;  %v5539_v1 = vadd.f32 %v5027_v39, %v4515_v52  ;;  %v3683_v8 = vmul.f32 1.442695, %v1453_v47  ;;  %v2986_v63 = vsub.f32 %v10856_v42, %v10858_v45  ;;  %v10877_v11 = vmul.f32 %v939_v55, %v939_v55  ;;  %v1460_v46 = vld [vmem:[%s8891_s21 + $0x5e8] sm:$0xff]  ;;  %v5034_v51 = vld [vmem:[#allocation2 + $0x138] sm:$0xff] }
 0x27d   : > { %v7967_v10 = vpop.eup %7966  ;;  %v5540_v30 = vadd.f32 %v5028_v53, %v4516_v59  ;;  %v3685_v41 = vmul.f32 1.442695, %v1454_v58  ;;  %v10881_v15 = vadd.f32 1.0, %v1452_v26  ;;  %v10883_v17 = vmul.f32 %v940_v0, %v940_v0  ;;  %v946_v59 = vld [vmem:[%s8885_s25 + $0x5d8] sm:$0xff] }
 0x27e   : > { %v7969_v12 = vpop.eup %7968  ;;  %6051 = vst [vmem:[#allocation2 + $0xfe0] sm:$0xff] %v5539_v1  ;;  %v4517_v13 = vsub.f32 %v2981_v48, %v7967_v10  ;;  %7982 = vpow2.f32 %v3683_v8  ;;  %v10886_v3 = vadd.f32 1.0, %v1453_v47  ;;  %v3687_v20 = vmul.f32 1.442695, %v1455_v9  ;;  %v5031_v48 = vld [vmem:[#allocation2 + $0x568] sm:$0xff]  ;;  %v5035_v1 = vld [vmem:[#allocation2 + $0xf00] sm:$0xff] }
 0x27f   : > { %6052 = vst [vmem:[#allocation2 + $0xb98] sm:$0xff] %v5540_v30  ;;  %v4518_v44 = vsub.f32 %v2982_v54, %v7969_v12  ;;  %7984 = vpow2.f32 %v3685_v41  ;;  %v7971_v21 = vpop.eup %7970  ;;  %v10889_v49 = vmul.f32 %v941_v40, %v941_v40  ;;  %v10891_v4 = vadd.f32 1.0, %v1454_v58  ;;  %v945_v54 = vld [vmem:[%s8885_s25 + $0x5d0] sm:$0xff]  ;;  %v947_v8 = vld [vmem:[%s8885_s25 + $0x5e0] sm:$0xff]  ;;  %v948_v41 = vld [vmem:[%s8885_s25 + $0x5e8] sm:$0xff] }
 0x280   : > { %v5541_v5 = vadd.f32 %v5029_v31, %v4517_v13  ;;  %v3689_v18 = vmul.f32 1.442695, %v1456_v62  ;;  %v4519_v56 = vsub.f32 %v2983_v60, %v7971_v21  ;;  %v10895_v16 = vmul.f32 %v942_v43, %v942_v43  ;;  %v1461_v10 = vld [vmem:[%s8891_s21 + $0x5f0] sm:$0xff] }
 0x281   : > { %v7973_v23 = vpop.eup %7972  ;;  %v5542_v24 = vadd.f32 %v5030_v14, %v4518_v44  ;;  %7986 = vpow2.f32 %v3687_v20  ;;  %v10898_v27 = vadd.f32 1.0, %v1455_v9  ;;  %v10900_v28 = vmul.f32 %v943_v19, %v943_v19  ;;  %v949_v44 = vld [vmem:[%s8885_s25 + $0x5f0] sm:$0xff]  ;;  %v1463_v19 = vld [vmem:[%s8891_s21 + $0x600] sm:$0xff] }
 0x282   : > { %6053 = vst [vmem:[#allocation2 + $0x840] sm:$0xff] %v5541_v5  ;;  %v4520_v26 = vsub.f32 %v2984_v61, %v7973_v23  ;;  %7988 = vpow2.f32 %v3689_v18  ;;  %v5543_v29 = vadd.f32 %v5031_v48, %v4519_v56  ;;  %v10902_v32 = vadd.f32 1.0, %v1456_v62  ;;  %v1462_v62 = vld [vmem:[%s8891_s21 + $0x5f8] sm:$0xff]  ;;  %v5037_v5 = vld [vmem:[#allocation2 + $0xe00] sm:$0xff]  ;;  %v5038_v23 = vld [vmem:[#allocation2 + $0xc28] sm:$0xff] }
 0x283   : > { %6054 = vst [vmem:[#allocation2 + $0x768] sm:$0xff] %v5542_v24  ;;  %v10904_v33 = vmul.f32 %v944_v6, %v944_v6  ;;  %v3691_v34 = vmul.f32 1.442695, %v1457_v22  ;;  %v2987_v39 = vsub.f32 %v10872_v7, %v10877_v11  ;;  %v2988_v42 = vsub.f32 %v10881_v15, %v10883_v17  ;;  %v5036_v11 = vld [vmem:[#allocation2 + $0xd08] sm:$0xff] }
 0x284   : > { %v7975_v36 = vpop.eup %7974  ;;  %v5544_v37 = vadd.f32 %v5032_v57, %v4520_v26  ;;  %v3693_v45 = vmul.f32 1.442695, %v1458_v25  ;;  %6055 = vst [vmem:[#allocation2 + $0x568] sm:$0xff] %v5543_v29  ;;  %v2989_v52 = vsub.f32 %v10886_v3, %v10889_v49  ;;  %v2990_v53 = vsub.f32 %v10891_v4, %v10895_v16  ;;  %v1464_v6 = vld [vmem:[%s8891_s21 + $0x608] sm:$0xff]  ;;  %v5039_v29 = vld [vmem:[#allocation2 + $0x6e0] sm:$0xff] }
 0x285   : > { %v7977_v47 = vpop.eup %7976  ;;  %v4521_v50 = vsub.f32 %v2985_v2, %v7975_v36  ;;  %7990 = vpow2.f32 %v3691_v34  ;;  %v2991_v58 = vsub.f32 %v10898_v27, %v10900_v28  ;;  %v3695_v60 = vmul.f32 1.442695, %v1459_v35 }
 0x286   : > { %6056 = vst [vmem:[#allocation2 + $0xb30] sm:$0xff] %v5544_v37  ;;  %v4522_v55 = vsub.f32 %v2986_v63, %v7977_v47  ;;  %7992 = vpow2.f32 %v3693_v45  ;;  %v7979_v61 = vpop.eup %7978  ;;  %v2992_v2 = vsub.f32 %v10902_v32, %v10904_v33  ;;  %v10922_v7 = vadd.f32 1.0, %v1457_v22  ;;  %v951_v45 = vld [vmem:[%s8885_s25 + $0x600] sm:$0xff] }
 0x287   : > { %v5545_v0 = vadd.f32 %v5033_v38, %v4521_v50  ;;  %v3697_v9 = vmul.f32 1.442695, %v1460_v46  ;;  %v4523_v63 = vsub.f32 %v2987_v39, %v7979_v61  ;;  %v10926_v40 = vmul.f32 %v945_v54, %v945_v54  ;;  %v5040_v39 = vld [vmem:[#allocation2 + $0x970] sm:$0xff] }
 0x288   : > { %v7981_v30 = vpop.eup %7980  ;;  %v5546_v31 = vadd.f32 %v5034_v51, %v4522_v55  ;;  %7994 = vpow2.f32 %v3695_v60  ;;  %v10930_v13 = vadd.f32 1.0, %v1458_v25  ;;  %v10932_v14 = vmul.f32 %v946_v59, %v946_v59  ;;  %v950_v25 = vld [vmem:[%s8885_s25 + $0x5f8] sm:$0xff]  ;;  %v1467_v60 = vld [vmem:[%s8891_s21 + $0x620] sm:$0xff] }
 0x289   : > { %6057 = vst [vmem:[#allocation2 + $0x9f8] sm:$0xff] %v5545_v0  ;;  %v4524_v12 = vsub.f32 %v2988_v42, %v7981_v30  ;;  %7996 = vpow2.f32 %v3697_v9  ;;  %v5547_v15 = vadd.f32 %v5035_v1, %v4523_v63  ;;  %v10934_v17 = vadd.f32 1.0, %v1459_v35  ;;  %v1465_v35 = vld [vmem:[%s8891_s21 + $0x610] sm:$0xff]  ;;  %v5041_v1 = vld [vmem:[#allocation2 + $0x628] sm:$0xff] }
 0x28a   : > { %6058 = vst [vmem:[#allocation2 + $0x138] sm:$0xff] %v5546_v31  ;;  %v10936_v43 = vmul.f32 %v947_v8, %v947_v8  ;;  %v3699_v3 = vmul.f32 1.442695, %v1461_v10  ;;  %v10940_v48 = vadd.f32 1.0, %v1460_v46  ;;  %v10942_v49 = vmul.f32 %v948_v41, %v948_v41  ;;  %v1466_v46 = vld [vmem:[%s8891_s21 + $0x618] sm:$0xff]  ;;  %v5042_v63 = vld [vmem:[#allocation2 + $0xb50] sm:$0xff] }
 0x28b   : > { %v7983_v20 = vpop.eup %7982  ;;  %v5548_v21 = vadd.f32 %v5036_v11, %v4524_v12  ;;  %v3701_v4 = vmul.f32 1.442695, %v1462_v62  ;;  %6059 = vst [vmem:[#allocation2 + $0xf00] sm:$0xff] %v5547_v15  ;;  %v2993_v24 = vsub.f32 %v10922_v7, %v10926_v40  ;;  %v10947_v56 = vadd.f32 1.0, %v1461_v10  ;;  %v954_v8 = vld [vmem:[%s8885_s25 + $0x618] sm:$0xff]  ;;  %v1468_v10 = vld [vmem:[%s8891_s21 + $0x628] sm:$0xff] }
 0x28c   : > { %v7985_v18 = vpop.eup %7984  ;;  %v4525_v22 = vsub.f32 %v2989_v52, %v7983_v20  ;;  %7998 = vpow2.f32 %v3699_v3  ;;  %v10949_v16 = vmul.f32 %v949_v44, %v949_v44  ;;  %v3703_v26 = vmul.f32 1.442695, %v1463_v19  ;;  %v952_v52 = vld [vmem:[%s8885_s25 + $0x608] sm:$0xff]  ;;  %v5043_v15 = vld [vmem:[#allocation2 + $0x920] sm:$0xff]  ;;  %v1469_v3 = vld [vmem:[%s8891_s21 + $0x630] sm:$0xff] }
 0x28d   : > { %6060 = vst [vmem:[#allocation2 + $0xd08] sm:$0xff] %v5548_v21  ;;  %v4526_v57 = vsub.f32 %v2990_v53, %v7985_v18  ;;  %8000 = vpow2.f32 %v3701_v4  ;;  %v2994_v32 = vsub.f32 %v10930_v13, %v10932_v14  ;;  %v2995_v33 = vsub.f32 %v10934_v17, %v10936_v43  ;;  %v1470_v4 = vld [vmem:[%s8891_s21 + $0x638] sm:$0xff] }
 0x28e   : > { %v7987_v27 = vpop.eup %7986  ;;  %v5549_v28 = vadd.f32 %v5037_v5, %v4525_v22  ;;  %v3705_v34 = vmul.f32 1.442695, %v1464_v6  ;;  %v2996_v42 = vsub.f32 %v10940_v48, %v10942_v49  ;;  %8002 = vpow2.f32 %v3703_v26  ;;  %v5044_v5 = vld [vmem:[#allocation2 + $0xef8] sm:$0xff]  ;;  %v955_v49 = vld [vmem:[%s8885_s25 + $0x620] sm:$0xff] }
 0x28f   : > { %v7989_v36 = vpop.eup %7988  ;;  %v5550_v37 = vadd.f32 %v5038_v23, %v4526_v57  ;;  %v4527_v38 = vsub.f32 %v2991_v58, %v7987_v27  ;;  %v10961_v50 = vadd.f32 1.0, %v1462_v62  ;;  %v10963_v51 = vmul.f32 %v950_v25, %v950_v25  ;;  %v953_v58 = vld [vmem:[%s8885_s25 + $0x610] sm:$0xff]  ;;  %v956_v23 = vld [vmem:[%s8885_s25 + $0x628] sm:$0xff]  ;;  %v1471_v25 = vld [vmem:[%s8891_s21 + $0x640] sm:$0xff] }
 0x290   : > { %6061 = vst [vmem:[#allocation2 + $0xe00] sm:$0xff] %v5549_v28  ;;  %v4528_v47 = vsub.f32 %v2992_v2, %v7989_v36  ;;  %8004 = vpow2.f32 %v3705_v34  ;;  %v2997_v54 = vsub.f32 %v10947_v56, %v10949_v16  ;;  %v10968_v55 = vadd.f32 1.0, %v1463_v19  ;;  %v5045_v28 = vld [vmem:[#allocation2 + $0x370] sm:$0xff] }
 0x291   : > { %6062 = vst [vmem:[#allocation2 + $0xc28] sm:$0xff] %v5550_v37  ;;  %v5551_v53 = vadd.f32 %v5039_v29, %v4527_v38  ;;  %v3707_v59 = vmul.f32 1.442695, %v1465_v35  ;;  %v10972_v2 = vmul.f32 %v951_v45, %v951_v45  ;;  %v10974_v7 = vadd.f32 1.0, %v1464_v6  ;;  %v5046_v38 = vld [vmem:[#allocation2 + $0x2e8] sm:$0xff]  ;;  %v958_v45 = vld [vmem:[%s8885_s25 + $0x638] sm:$0xff] }
 0x292   : > { %v7991_v61 = vpop.eup %7990  ;;  %v5552_v0 = vadd.f32 %v5040_v39, %v4528_v47  ;;  %v3709_v9 = vmul.f32 1.442695, %v1466_v46  ;;  %v10978_v11 = vmul.f32 %v952_v52, %v952_v52  ;;  %v10980_v40 = vadd.f32 1.0, %v1465_v35  ;;  %v1472_v35 = vld [vmem:[%s8891_s21 + $0x648] sm:$0xff] }
 0x293   : > { %v7993_v30 = vpop.eup %7992  ;;  %6063 = vst [vmem:[#allocation2 + $0x6e0] sm:$0xff] %v5551_v53  ;;  %v4529_v31 = vsub.f32 %v2993_v24, %v7991_v61  ;;  %8006 = vpow2.f32 %v3707_v59  ;;  %v10982_v62 = vmul.f32 %v953_v58, %v953_v58  ;;  %v3711_v12 = vmul.f32 1.442695, %v1467_v60  ;;  %v960_v59 = vld [vmem:[%s8885_s25 + $0x648] sm:$0xff]  ;;  %v1473_v61 = vld [vmem:[%s8891_s21 + $0x650] sm:$0xff] }
 0x294   : > { %6064 = vst [vmem:[#allocation2 + $0x970] sm:$0xff] %v5552_v0  ;;  %v4530_v41 = vsub.f32 %v2994_v32, %v7993_v30  ;;  %8008 = vpow2.f32 %v3709_v9  ;;  %v10984_v17 = vadd.f32 1.0, %v1466_v46  ;;  %v10986_v43 = vmul.f32 %v954_v8, %v954_v8  ;;  %v1474_v9 = vld [vmem:[%s8891_s21 + $0x658] sm:$0xff] }
 0x295   : > { %v7995_v13 = vpop.eup %7994  ;;  %v5553_v14 = vadd.f32 %v5041_v1, %v4529_v31  ;;  %v3713_v44 = vmul.f32 1.442695, %v1468_v10  ;;  %v2998_v48 = vsub.f32 %v10961_v50, %v10963_v51  ;;  %8010 = vpow2.f32 %v3711_v12  ;;  %v959_v50 = vld [vmem:[%s8885_s25 + $0x640] sm:$0xff] }
 0x296   : > { %v7997_v19 = vpop.eup %7996  ;;  %v5554_v20 = vadd.f32 %v5042_v63, %v4530_v41  ;;  %v4531_v21 = vsub.f32 %v2995_v33, %v7995_v13  ;;  %v2999_v18 = vsub.f32 %v10968_v55, %v10972_v2  ;;  %v3000_v22 = vsub.f32 %v10974_v7, %v10978_v11  ;;  %v957_v33 = vld [vmem:[%s8885_s25 + $0x630] sm:$0xff]  ;;  %v5048_v7 = vld [vmem:[#allocation2 + $0xe0] sm:$0xff] }
 0x297   : > { %6065 = vst [vmem:[#allocation2 + $0x628] sm:$0xff] %v5553_v14  ;;  %v4532_v6 = vsub.f32 %v2996_v42, %v7997_v19  ;;  %8012 = vpow2.f32 %v3713_v44  ;;  %v3001_v56 = vsub.f32 %v10980_v40, %v10982_v62  ;;  %v11000_v57 = vadd.f32 1.0, %v1467_v60  ;;  %v1475_v62 = vld [vmem:[%s8891_s21 + $0x660] sm:$0xff]  ;;  %v1476_v44 = vld [vmem:[%s8891_s21 + $0x668] sm:$0xff] }
 0x298   : > { %6066 = vst [vmem:[#allocation2 + $0xb50] sm:$0xff] %v5554_v20  ;;  %v5555_v24 = vadd.f32 %v5043_v15, %v4531_v21  ;;  %v3715_v16 = vmul.f32 1.442695, %v1469_v3  ;;  %v3002_v29 = vsub.f32 %v10984_v17, %v10986_v43  ;;  %v11005_v32 = vmul.f32 %v955_v49, %v955_v49  ;;  %v5049_v14 = vld [vmem:[#allocation2 + $0x1e0] sm:$0xff]  ;;  %v5050_v20 = vld [vmem:[#allocation2 + $0xf90] sm:$0xff] }
 0x299   : > { %v7999_v26 = vpop.eup %7998  ;;  %v5556_v27 = vadd.f32 %v5044_v5, %v4532_v6  ;;  %v3717_v34 = vmul.f32 1.442695, %v1470_v4  ;;  %v11009_v39 = vadd.f32 1.0, %v1468_v10  ;;  %v11011_v42 = vmul.f32 %v956_v23, %v956_v23  ;;  %v962_v6 = vld [vmem:[%s8885_s25 + $0x658] sm:$0xff] }
 0x29a   : > { %v8001_v36 = vpop.eup %8000  ;;  %6067 = vst [vmem:[#allocation2 + $0x920] sm:$0xff] %v5555_v24  ;;  %v4533_v37 = vsub.f32 %v2997_v54, %v7999_v26  ;;  %8014 = vpow2.f32 %v3715_v16  ;;  %v11014_v47 = vadd.f32 1.0, %v1469_v3  ;;  %v3719_v51 = vmul.f32 1.442695, %v1471_v25  ;;  %v5047_v54 = vld [vmem:[#allocation2 + $0x398] sm:$0xff]  ;;  %v5051_v24 = vld [vmem:[#allocation2 + $0x270] sm:$0xff] }
 0x29b   : > { %6068 = vst [vmem:[#allocation2 + $0xef8] sm:$0xff] %v5556_v27  ;;  %v4534_v46 = vsub.f32 %v2998_v48, %v8001_v36  ;;  %8016 = vpow2.f32 %v3717_v34  ;;  %v8003_v52 = vpop.eup %8002  ;;  %v11017_v55 = vmul.f32 %v957_v33, %v957_v33  ;;  %v11019_v58 = vadd.f32 1.0, %v1470_v4  ;;  %v961_v48 = vld [vmem:[%s8885_s25 + $0x650] sm:$0xff]  ;;  %v963_v16 = vld [vmem:[%s8885_s25 + $0x660] sm:$0xff]  ;;  %v964_v34 = vld [vmem:[%s8885_s25 + $0x668] sm:$0xff] }
 0x29c   : > { %v5557_v53 = vadd.f32 %v5045_v28, %v4533_v37  ;;  %v3721_v60 = vmul.f32 1.442695, %v1472_v35  ;;  %v4535_v2 = vsub.f32 %v2999_v18, %v8003_v52  ;;  %v11023_v8 = vmul.f32 %v958_v45, %v958_v45  ;;  %v1477_v26 = vld [vmem:[%s8891_s21 + $0x670] sm:$0xff] }
 0x29d   : > { %v8005_v0 = vpop.eup %8004  ;;  %v5558_v1 = vadd.f32 %v5046_v38, %v4534_v46  ;;  %8018 = vpow2.f32 %v3719_v51  ;;  %v11026_v30 = vadd.f32 1.0, %v1471_v25  ;;  %v11028_v31 = vmul.f32 %v959_v50, %v959_v50  ;;  %v965_v46 = vld [vmem:[%s8885_s25 + $0x670] sm:$0xff]  ;;  %v1479_v50 = vld [vmem:[%s8891_s21 + $0x680] sm:$0xff] }
 0x29e   : > { %6069 = vst [vmem:[#allocation2 + $0x370] sm:$0xff] %v5557_v53  ;;  %v4536_v10 = vsub.f32 %v3000_v22, %v8005_v0  ;;  %8020 = vpow2.f32 %v3721_v60  ;;  %v5559_v63 = vadd.f32 %v5047_v54, %v4535_v2  ;;  %v11030_v11 = vadd.f32 1.0, %v1472_v35  ;;  %v1478_v35 = vld [vmem:[%s8891_s21 + $0x678] sm:$0xff]  ;;  %v5054_v0 = vld [vmem:[#allocation2 + $0x750] sm:$0xff] }
 0x29f   : > { %6070 = vst [vmem:[#allocation2 + $0x2e8] sm:$0xff] %v5558_v1  ;;  %v11032_v40 = vmul.f32 %v960_v59, %v960_v59  ;;  %v3723_v41 = vmul.f32 1.442695, %v1473_v61  ;;  %v3003_v15 = vsub.f32 %v11000_v57, %v11005_v32  ;;  %v3004_v17 = vsub.f32 %v11009_v39, %v11011_v42  ;;  %v5052_v32 = vld [vmem:[#allocation2 + $0x8f8] sm:$0xff]  ;;  %v1480_v59 = vld [vmem:[%s8891_s21 + $0x688] sm:$0xff] }
 0x2a0   : > { %v8007_v12 = vpop.eup %8006  ;;  %v5560_v13 = vadd.f32 %v5048_v7, %v4536_v10  ;;  %v3725_v43 = vmul.f32 1.442695, %v1474_v9  ;;  %6071 = vst [vmem:[#allocation2 + $0x398] sm:$0xff] %v5559_v63  ;;  %v3005_v21 = vsub.f32 %v11014_v47, %v11017_v55  ;;  %v3006_v5 = vsub.f32 %v11019_v58, %v11023_v8  ;;  %v5053_v53 = vld [vmem:[#allocation2 + $0x598] sm:$0xff]  ;;  %v5055_v63 = vld [vmem:[#allocation2 + $0xb08] sm:$0xff] }
 0x2a1   : > { %v8009_v3 = vpop.eup %8008  ;;  %v4537_v19 = vsub.f32 %v3001_v56, %v8007_v12  ;;  %8022 = vpow2.f32 %v3723_v41  ;;  %v3007_v4 = vsub.f32 %v11026_v30, %v11028_v31  ;;  %v3727_v18 = vmul.f32 1.442695, %v1475_v62 }
 0x2a2   : > { %6072 = vst [vmem:[#allocation2 + $0xe0] sm:$0xff] %v5560_v13  ;;  %v4538_v49 = vsub.f32 %v3002_v29, %v8009_v3  ;;  %8024 = vpow2.f32 %v3725_v43  ;;  %v8011_v22 = vpop.eup %8010  ;;  %v3008_v56 = vsub.f32 %v11030_v11, %v11032_v40  ;;  %v11050_v57 = vadd.f32 1.0, %v1473_v61  ;;  %v967_v43 = vld [vmem:[%s8885_s25 + $0x680] sm:$0xff] }
 0x2a3   : > { %v5561_v23 = vadd.f32 %v5049_v14, %v4537_v19  ;;  %v3729_v25 = vmul.f32 1.442695, %v1476_v44  ;;  %v4539_v29 = vsub.f32 %v3003_v15, %v8011_v22  ;;  %v11054_v33 = vmul.f32 %v961_v48, %v961_v48  ;;  %v5056_v15 = vld [vmem:[#allocation2 + $0xde8] sm:$0xff] }
 0x2a4   : > { %v8013_v27 = vpop.eup %8012  ;;  %v5562_v28 = vadd.f32 %v5050_v20, %v4538_v49  ;;  %8026 = vpow2.f32 %v3727_v18  ;;  %v11058_v37 = vadd.f32 1.0, %v1474_v9  ;;  %v11060_v38 = vmul.f32 %v962_v6, %v962_v6  ;;  %v966_v9 = vld [vmem:[%s8885_s25 + $0x678] sm:$0xff]  ;;  %v1483_v18 = vld [vmem:[%s8891_s21 + $0x6a0] sm:$0xff] }
 0x2a5   : > { %6073 = vst [vmem:[#allocation2 + $0x1e0] sm:$0xff] %v5561_v23  ;;  %v4540_v36 = vsub.f32 %v3004_v17, %v8013_v27  ;;  %8028 = vpow2.f32 %v3729_v25  ;;  %v5563_v39 = vadd.f32 %v5051_v24, %v4539_v29  ;;  %v11062_v42 = vadd.f32 1.0, %v1475_v62  ;;  %v1481_v62 = vld [vmem:[%s8891_s21 + $0x690] sm:$0xff]  ;;  %v5057_v24 = vld [vmem:[#allocation2 + $0x308] sm:$0xff] }
 0x2a6   : > { %6074 = vst [vmem:[#allocation2 + $0xf90] sm:$0xff] %v5562_v28  ;;  %v11064_v45 = vmul.f32 %v963_v16, %v963_v16  ;;  %v3731_v47 = vmul.f32 1.442695, %v1477_v26  ;;  %v11068_v54 = vadd.f32 1.0, %v1476_v44  ;;  %v11070_v55 = vmul.f32 %v964_v34, %v964_v34  ;;  %v1482_v44 = vld [vmem:[%s8891_s21 + $0x698] sm:$0xff]  ;;  %v5058_v29 = vld [vmem:[#allocation2 + $0x9a8] sm:$0xff] }
 0x2a7   : > { %v8015_v51 = vpop.eup %8014  ;;  %v5564_v52 = vadd.f32 %v5052_v32, %v4540_v36  ;;  %v3733_v58 = vmul.f32 1.442695, %v1478_v35  ;;  %6075 = vst [vmem:[#allocation2 + $0x270] sm:$0xff] %v5563_v39  ;;  %v3009_v1 = vsub.f32 %v11050_v57, %v11054_v33  ;;  %v11075_v2 = vadd.f32 1.0, %v1477_v26  ;;  %v970_v16 = vld [vmem:[%s8885_s25 + $0x698] sm:$0xff]  ;;  %v1484_v26 = vld [vmem:[%s8891_s21 + $0x6a8] sm:$0xff] }
 0x2a8   : > { %v8017_v60 = vpop.eup %8016  ;;  %v4541_v61 = vsub.f32 %v3005_v21, %v8015_v51  ;;  %8030 = vpow2.f32 %v3731_v47  ;;  %v11077_v8 = vmul.f32 %v965_v46, %v965_v46  ;;  %v3735_v10 = vmul.f32 1.442695, %v1479_v50  ;;  %v968_v21 = vld [vmem:[%s8885_s25 + $0x688] sm:$0xff]  ;;  %v5059_v39 = vld [vmem:[#allocation2 + $0xe98] sm:$0xff]  ;;  %v1485_v47 = vld [vmem:[%s8891_s21 + $0x6b0] sm:$0xff] }
 0x2a9   : > { %6076 = vst [vmem:[#allocation2 + $0x8f8] sm:$0xff] %v5564_v52  ;;  %v4542_v7 = vsub.f32 %v3006_v5, %v8017_v60  ;;  %8032 = vpow2.f32 %v3733_v58  ;;  %v3010_v11 = vsub.f32 %v11058_v37, %v11060_v38  ;;  %v3011_v40 = vsub.f32 %v11062_v42, %v11064_v45  ;;  %v1486_v58 = vld [vmem:[%s8891_s21 + $0x6b8] sm:$0xff] }
 0x2aa   : > { %v8019_v30 = vpop.eup %8018  ;;  %v5565_v31 = vadd.f32 %v5053_v53, %v4541_v61  ;;  %v3737_v41 = vmul.f32 1.442695, %v1480_v59  ;;  %v3012_v17 = vsub.f32 %v11068_v54, %v11070_v55  ;;  %8034 = vpow2.f32 %v3735_v10  ;;  %v5060_v53 = vld [vmem:[#allocation2 + $0x268] sm:$0xff]  ;;  %v971_v55 = vld [vmem:[%s8885_s25 + $0x6a0] sm:$0xff] }
 0x2ab   : > { %v8021_v12 = vpop.eup %8020  ;;  %v5566_v13 = vadd.f32 %v5054_v0, %v4542_v7  ;;  %v4543_v14 = vsub.f32 %v3007_v4, %v8019_v30  ;;  %v11089_v19 = vadd.f32 1.0, %v1478_v35  ;;  %v11091_v20 = vmul.f32 %v966_v9, %v966_v9  ;;  %v969_v4 = vld [vmem:[%s8885_s25 + $0x690] sm:$0xff]  ;;  %v972_v0 = vld [vmem:[%s8885_s25 + $0x6a8] sm:$0xff]  ;;  %v1487_v9 = vld [vmem:[%s8891_s21 + $0x6c0] sm:$0xff] }
 0x2ac   : > { %6077 = vst [vmem:[#allocation2 + $0x598] sm:$0xff] %v5565_v31  ;;  %v4544_v3 = vsub.f32 %v3008_v56, %v8021_v12  ;;  %8036 = vpow2.f32 %v3737_v41  ;;  %v3013_v48 = vsub.f32 %v11075_v2, %v11077_v8  ;;  %v11096_v49 = vadd.f32 1.0, %v1479_v50  ;;  %v5061_v31 = vld [vmem:[#allocation2 + $0x610] sm:$0xff] }
 0x2ad   : > { %6078 = vst [vmem:[#allocation2 + $0x750] sm:$0xff] %v5566_v13  ;;  %v5567_v5 = vadd.f32 %v5055_v63, %v4543_v14  ;;  %v3739_v6 = vmul.f32 1.442695, %v1481_v62  ;;  %v11100_v56 = vmul.f32 %v967_v43, %v967_v43  ;;  %v11102_v57 = vadd.f32 1.0, %v1480_v59  ;;  %v5062_v14 = vld [vmem:[#allocation2 + $0x50] sm:$0xff]  ;;  %v974_v43 = vld [vmem:[%s8885_s25 + $0x6b8] sm:$0xff] }
 0x2ae   : > { %v8023_v22 = vpop.eup %8022  ;;  %v5568_v23 = vadd.f32 %v5056_v15, %v4544_v3  ;;  %v3741_v25 = vmul.f32 1.442695, %v1482_v44  ;;  %v11106_v32 = vmul.f32 %v968_v21, %v968_v21  ;;  %v11108_v33 = vadd.f32 1.0, %v1481_v62  ;;  %v1488_v62 = vld [vmem:[%s8891_s21 + $0x6c8] sm:$0xff] }
 0x2af   : > { %v8025_v27 = vpop.eup %8024  ;;  %6079 = vst [vmem:[#allocation2 + $0xb08] sm:$0xff] %v5567_v5  ;;  %v4545_v28 = vsub.f32 %v3009_v1, %v8023_v22  ;;  %8038 = vpow2.f32 %v3739_v6  ;;  %v11110_v35 = vmul.f32 %v969_v4, %v969_v4  ;;  %v3743_v36 = vmul.f32 1.442695, %v1483_v18  ;;  %v976_v6 = vld [vmem:[%s8885_s25 + $0x6c8] sm:$0xff]  ;;  %v1489_v22 = vld [vmem:[%s8891_s21 + $0x6d0] sm:$0xff] }
 0x2b0   : > { %6080 = vst [vmem:[#allocation2 + $0xde8] sm:$0xff] %v5568_v23  ;;  %v4546_v34 = vsub.f32 %v3010_v11, %v8025_v27  ;;  %8040 = vpow2.f32 %v3741_v25  ;;  %v11112_v42 = vadd.f32 1.0, %v1482_v44  ;;  %v11114_v45 = vmul.f32 %v970_v16, %v970_v16  ;;  %v1490_v25 = vld [vmem:[%s8891_s21 + $0x6d8] sm:$0xff] }
 0x2b1   : > { %v8027_v37 = vpop.eup %8026  ;;  %v5569_v38 = vadd.f32 %v5057_v24, %v4545_v28  ;;  %v3745_v46 = vmul.f32 1.442695, %v1484_v26  ;;  %v3014_v54 = vsub.f32 %v11089_v19, %v11091_v20  ;;  %8042 = vpow2.f32 %v3743_v36  ;;  %v975_v19 = vld [vmem:[%s8885_s25 + $0x6c0] sm:$0xff] }
 0x2b2   : > { %v8029_v50 = vpop.eup %8028  ;;  %v5570_v51 = vadd.f32 %v5058_v29, %v4546_v34  ;;  %v4547_v52 = vsub.f32 %v3011_v40, %v8027_v37  ;;  %v3015_v60 = vsub.f32 %v11096_v49, %v11100_v56  ;;  %v3016_v61 = vsub.f32 %v11102_v57, %v11106_v32  ;;  %v973_v40 = vld [vmem:[%s8885_s25 + $0x6b0] sm:$0xff]  ;;  %v5064_v57 = vld [vmem:[#allocation2 + $0xa60] sm:$0xff] }
 0x2b3   : > { %6081 = vst [vmem:[#allocation2 + $0x308] sm:$0xff] %v5569_v38  ;;  %v4548_v59 = vsub.f32 %v3012_v17, %v8029_v50  ;;  %8044 = vpow2.f32 %v3745_v46  ;;  %v3017_v2 = vsub.f32 %v11108_v33, %v11110_v35  ;;  %v11128_v7 = vadd.f32 1.0, %v1483_v18  ;;  %v1491_v35 = vld [vmem:[%s8891_s21 + $0x6e0] sm:$0xff]  ;;  %v5065_v38 = vld [vmem:[#allocation2 + $0x470] sm:$0xff]  ;;  %v1492_v46 = vld [vmem:[%s8891_s21 + $0x6e8] sm:$0xff] }
 0x2b4   : > { %6082 = vst [vmem:[#allocation2 + $0x9a8] sm:$0xff] %v5570_v51  ;;  %v5571_v1 = vadd.f32 %v5059_v39, %v4547_v52  ;;  %v3747_v8 = vmul.f32 1.442695, %v1485_v47  ;;  %v3018_v63 = vsub.f32 %v11112_v42, %v11114_v45  ;;  %v11133_v11 = vmul.f32 %v971_v55, %v971_v55  ;;  %v5066_v51 = vld [vmem:[#allocation2 + $0x928] sm:$0xff] }
 0x2b5   : > { %v8031_v10 = vpop.eup %8030  ;;  %v5572_v30 = vadd.f32 %v5060_v53, %v4548_v59  ;;  %v3749_v41 = vmul.f32 1.442695, %v1486_v58  ;;  %v11137_v15 = vadd.f32 1.0, %v1484_v26  ;;  %v11139_v17 = vmul.f32 %v972_v0, %v972_v0  ;;  %v978_v59 = vld [vmem:[%s8885_s25 + $0x6d8] sm:$0xff] }
 0x2b6   : > { %v8033_v12 = vpop.eup %8032  ;;  %6083 = vst [vmem:[#allocation2 + $0xe98] sm:$0xff] %v5571_v1  ;;  %v4549_v13 = vsub.f32 %v3013_v48, %v8031_v10  ;;  %8046 = vpow2.f32 %v3747_v8  ;;  %v11142_v3 = vadd.f32 1.0, %v1485_v47  ;;  %v3751_v20 = vmul.f32 1.442695, %v1487_v9  ;;  %v5063_v48 = vld [vmem:[#allocation2 + $0x6d0] sm:$0xff]  ;;  %v5067_v1 = vld [vmem:[#allocation2 + $0x8a0] sm:$0xff] }
 0x2b7   : > { %6084 = vst [vmem:[#allocation2 + $0x268] sm:$0xff] %v5572_v30  ;;  %v4550_v44 = vsub.f32 %v3014_v54, %v8033_v12  ;;  %8048 = vpow2.f32 %v3749_v41  ;;  %v8035_v21 = vpop.eup %8034  ;;  %v11145_v49 = vmul.f32 %v973_v40, %v973_v40  ;;  %v11147_v4 = vadd.f32 1.0, %v1486_v58  ;;  %v977_v54 = vld [vmem:[%s8885_s25 + $0x6d0] sm:$0xff]  ;;  %v979_v8 = vld [vmem:[%s8885_s25 + $0x6e0] sm:$0xff]  ;;  %v980_v41 = vld [vmem:[%s8885_s25 + $0x6e8] sm:$0xff] }
 0x2b8   : > { %v5573_v5 = vadd.f32 %v5061_v31, %v4549_v13  ;;  %v3753_v18 = vmul.f32 1.442695, %v1488_v62  ;;  %v4551_v56 = vsub.f32 %v3015_v60, %v8035_v21  ;;  %v11151_v16 = vmul.f32 %v974_v43, %v974_v43  ;;  %v1493_v10 = vld [vmem:[%s8891_s21 + $0x6f0] sm:$0xff] }
 0x2b9   : > { %v8037_v23 = vpop.eup %8036  ;;  %v5574_v24 = vadd.f32 %v5062_v14, %v4550_v44  ;;  %8050 = vpow2.f32 %v3751_v20  ;;  %v11154_v27 = vadd.f32 1.0, %v1487_v9  ;;  %v11156_v28 = vmul.f32 %v975_v19, %v975_v19  ;;  %v981_v44 = vld [vmem:[%s8885_s25 + $0x6f0] sm:$0xff]  ;;  %v1495_v19 = vld [vmem:[%s8891_s21 + $0x700] sm:$0xff] }
 0x2ba   : > { %6085 = vst [vmem:[#allocation2 + $0x610] sm:$0xff] %v5573_v5  ;;  %v4552_v26 = vsub.f32 %v3016_v61, %v8037_v23  ;;  %8052 = vpow2.f32 %v3753_v18  ;;  %v5575_v29 = vadd.f32 %v5063_v48, %v4551_v56  ;;  %v11158_v32 = vadd.f32 1.0, %v1488_v62  ;;  %v1494_v62 = vld [vmem:[%s8891_s21 + $0x6f8] sm:$0xff]  ;;  %v5069_v5 = vld [vmem:[#allocation2 + $0xb68] sm:$0xff] }
 0x2bb   : > { %6086 = vst [vmem:[#allocation2 + $0x50] sm:$0xff] %v5574_v24  ;;  %v11160_v33 = vmul.f32 %v976_v6, %v976_v6  ;;  %v3755_v34 = vmul.f32 1.442695, %v1489_v22  ;;  %v3019_v39 = vsub.f32 %v11128_v7, %v11133_v11  ;;  %v3020_v42 = vsub.f32 %v11137_v15, %v11139_v17  ;;  %v5068_v11 = vld [vmem:[#allocation2 + $0xe88] sm:$0xff] }
 0x2bc   : > { %v8039_v36 = vpop.eup %8038  ;;  %v5576_v37 = vadd.f32 %v5064_v57, %v4552_v26  ;;  %v3757_v45 = vmul.f32 1.442695, %v1490_v25  ;;  %6087 = vst [vmem:[#allocation2 + $0x6d0] sm:$0xff] %v5575_v29  ;;  %v3021_v52 = vsub.f32 %v11142_v3, %v11145_v49  ;;  %v3022_v53 = vsub.f32 %v11147_v4, %v11151_v16  ;;  %v1496_v6 = vld [vmem:[%s8891_s21 + $0x708] sm:$0xff]  ;;  %v5071_v29 = vld [vmem:[#allocation2 + $0xe50] sm:$0xff] }
 0x2bd   : > { %v8041_v47 = vpop.eup %8040  ;;  %v4553_v50 = vsub.f32 %v3017_v2, %v8039_v36  ;;  %8054 = vpow2.f32 %v3755_v34  ;;  %v3023_v58 = vsub.f32 %v11154_v27, %v11156_v28  ;;  %v3759_v60 = vmul.f32 1.442695, %v1491_v35  ;;  %v5070_v23 = vld [vmem:[#allocation2 + $0x6a8] sm:$0xff] }
 0x2be   : > { %6088 = vst [vmem:[#allocation2 + $0xa60] sm:$0xff] %v5576_v37  ;;  %v4554_v55 = vsub.f32 %v3018_v63, %v8041_v47  ;;  %8056 = vpow2.f32 %v3757_v45  ;;  %v8043_v61 = vpop.eup %8042  ;;  %v3024_v2 = vsub.f32 %v11158_v32, %v11160_v33  ;;  %v11178_v7 = vadd.f32 1.0, %v1489_v22  ;;  %v983_v45 = vld [vmem:[%s8885_s25 + $0x700] sm:$0xff] }
 0x2bf   : > { %v5577_v0 = vadd.f32 %v5065_v38, %v4553_v50  ;;  %v3761_v9 = vmul.f32 1.442695, %v1492_v46  ;;  %v4555_v63 = vsub.f32 %v3019_v39, %v8043_v61  ;;  %v11182_v40 = vmul.f32 %v977_v54, %v977_v54  ;;  %v5072_v39 = vld [vmem:[#allocation2 + $0x7c0] sm:$0xff] }
 0x2c0   : > { %v8045_v30 = vpop.eup %8044  ;;  %v5578_v31 = vadd.f32 %v5066_v51, %v4554_v55  ;;  %8058 = vpow2.f32 %v3759_v60  ;;  %v11186_v13 = vadd.f32 1.0, %v1490_v25  ;;  %v11188_v14 = vmul.f32 %v978_v59, %v978_v59  ;;  %v982_v25 = vld [vmem:[%s8885_s25 + $0x6f8] sm:$0xff]  ;;  %v1499_v60 = vld [vmem:[%s8891_s21 + $0x720] sm:$0xff] }
 0x2c1   : > { %6089 = vst [vmem:[#allocation2 + $0x470] sm:$0xff] %v5577_v0  ;;  %v4556_v12 = vsub.f32 %v3020_v42, %v8045_v30  ;;  %8060 = vpow2.f32 %v3761_v9  ;;  %v5579_v15 = vadd.f32 %v5067_v1, %v4555_v63  ;;  %v11190_v17 = vadd.f32 1.0, %v1491_v35  ;;  %v1497_v35 = vld [vmem:[%s8891_s21 + $0x710] sm:$0xff]  ;;  %v5074_v63 = vld [vmem:[#allocation2 + $0xc38] sm:$0xff] }
 0x2c2   : > { %6090 = vst [vmem:[#allocation2 + $0x928] sm:$0xff] %v5578_v31  ;;  %v11192_v43 = vmul.f32 %v979_v8, %v979_v8  ;;  %v3763_v3 = vmul.f32 1.442695, %v1493_v10  ;;  %v11196_v48 = vadd.f32 1.0, %v1492_v46  ;;  %v11198_v49 = vmul.f32 %v980_v41, %v980_v41  ;;  %v1498_v46 = vld [vmem:[%s8891_s21 + $0x718] sm:$0xff]  ;;  %v5073_v1 = vld [vmem:[#allocation2 + $0xe90] sm:$0xff] }
 0x2c3   : > { %v8047_v20 = vpop.eup %8046  ;;  %v5580_v21 = vadd.f32 %v5068_v11, %v4556_v12  ;;  %v3765_v4 = vmul.f32 1.442695, %v1494_v62  ;;  %6091 = vst [vmem:[#allocation2 + $0x8a0] sm:$0xff] %v5579_v15  ;;  %v3025_v24 = vsub.f32 %v11178_v7, %v11182_v40  ;;  %v11203_v56 = vadd.f32 1.0, %v1493_v10  ;;  %v986_v8 = vld [vmem:[%s8885_s25 + $0x718] sm:$0xff]  ;;  %v1500_v10 = vld [vmem:[%s8891_s21 + $0x728] sm:$0xff] }
 0x2c4   : > { %v8049_v18 = vpop.eup %8048  ;;  %v4557_v22 = vsub.f32 %v3021_v52, %v8047_v20  ;;  %8062 = vpow2.f32 %v3763_v3  ;;  %v11205_v16 = vmul.f32 %v981_v44, %v981_v44  ;;  %v3767_v26 = vmul.f32 1.442695, %v1495_v19  ;;  %v984_v52 = vld [vmem:[%s8885_s25 + $0x708] sm:$0xff]  ;;  %v5075_v15 = vld [vmem:[#allocation2 + $0xb8] sm:$0xff]  ;;  %v1501_v3 = vld [vmem:[%s8891_s21 + $0x730] sm:$0xff] }
 0x2c5   : > { %6092 = vst [vmem:[#allocation2 + $0xe88] sm:$0xff] %v5580_v21  ;;  %v4558_v57 = vsub.f32 %v3022_v53, %v8049_v18  ;;  %8064 = vpow2.f32 %v3765_v4  ;;  %v3026_v32 = vsub.f32 %v11186_v13, %v11188_v14  ;;  %v3027_v33 = vsub.f32 %v11190_v17, %v11192_v43  ;;  %v1502_v4 = vld [vmem:[%s8891_s21 + $0x738] sm:$0xff] }
 0x2c6   : > { %v8051_v27 = vpop.eup %8050  ;;  %v5581_v28 = vadd.f32 %v5069_v5, %v4557_v22  ;;  %v3769_v34 = vmul.f32 1.442695, %v1496_v6  ;;  %v3028_v42 = vsub.f32 %v11196_v48, %v11198_v49  ;;  %8066 = vpow2.f32 %v3767_v26  ;;  %v5076_v5 = vld [vmem:[#allocation2 + $0xc48] sm:$0xff]  ;;  %v987_v49 = vld [vmem:[%s8885_s25 + $0x720] sm:$0xff] }
 0x2c7   : > { %v8053_v36 = vpop.eup %8052  ;;  %v5582_v37 = vadd.f32 %v5070_v23, %v4558_v57  ;;  %v4559_v38 = vsub.f32 %v3023_v58, %v8051_v27  ;;  %v11217_v50 = vadd.f32 1.0, %v1494_v62  ;;  %v11219_v51 = vmul.f32 %v982_v25, %v982_v25  ;;  %v985_v58 = vld [vmem:[%s8885_s25 + $0x710] sm:$0xff]  ;;  %v988_v23 = vld [vmem:[%s8885_s25 + $0x728] sm:$0xff]  ;;  %v1503_v25 = vld [vmem:[%s8891_s21 + $0x740] sm:$0xff] }
 0x2c8   : > { %6093 = vst [vmem:[#allocation2 + $0xb68] sm:$0xff] %v5581_v28  ;;  %v4560_v47 = vsub.f32 %v3024_v2, %v8053_v36  ;;  %8068 = vpow2.f32 %v3769_v34  ;;  %v3029_v54 = vsub.f32 %v11203_v56, %v11205_v16  ;;  %v11224_v55 = vadd.f32 1.0, %v1495_v19  ;;  %v5077_v28 = vld [vmem:[#allocation2 + $0xb20] sm:$0xff] }
 0x2c9   : > { %6094 = vst [vmem:[#allocation2 + $0x6a8] sm:$0xff] %v5582_v37  ;;  %v5583_v53 = vadd.f32 %v5071_v29, %v4559_v38  ;;  %v3771_v59 = vmul.f32 1.442695, %v1497_v35  ;;  %v11228_v2 = vmul.f32 %v983_v45, %v983_v45  ;;  %v11230_v7 = vadd.f32 1.0, %v1496_v6  ;;  %v5078_v38 = vld [vmem:[#allocation2 + $0x30] sm:$0xff]  ;;  %v990_v45 = vld [vmem:[%s8885_s25 + $0x738] sm:$0xff] }
 0x2ca   : > { %v8055_v61 = vpop.eup %8054  ;;  %v5584_v0 = vadd.f32 %v5072_v39, %v4560_v47  ;;  %v3773_v9 = vmul.f32 1.442695, %v1498_v46  ;;  %v11234_v11 = vmul.f32 %v984_v52, %v984_v52  ;;  %v11236_v40 = vadd.f32 1.0, %v1497_v35  ;;  %v1504_v35 = vld [vmem:[%s8891_s21 + $0x748] sm:$0xff] }
 0x2cb   : > { %v8057_v30 = vpop.eup %8056  ;;  %6095 = vst [vmem:[#allocation2 + $0xe50] sm:$0xff] %v5583_v53  ;;  %v4561_v31 = vsub.f32 %v3025_v24, %v8055_v61  ;;  %8070 = vpow2.f32 %v3771_v59  ;;  %v11238_v62 = vmul.f32 %v985_v58, %v985_v58  ;;  %v3775_v12 = vmul.f32 1.442695, %v1499_v60  ;;  %v992_v59 = vld [vmem:[%s8885_s25 + $0x748] sm:$0xff]  ;;  %v1505_v61 = vld [vmem:[%s8891_s21 + $0x750] sm:$0xff] }
 0x2cc   : > { %6096 = vst [vmem:[#allocation2 + $0x7c0] sm:$0xff] %v5584_v0  ;;  %v4562_v41 = vsub.f32 %v3026_v32, %v8057_v30  ;;  %8072 = vpow2.f32 %v3773_v9  ;;  %v11240_v17 = vadd.f32 1.0, %v1498_v46  ;;  %v11242_v43 = vmul.f32 %v986_v8, %v986_v8  ;;  %v1506_v9 = vld [vmem:[%s8891_s21 + $0x758] sm:$0xff] }
 0x2cd   : > { %v8059_v13 = vpop.eup %8058  ;;  %v5585_v14 = vadd.f32 %v5073_v1, %v4561_v31  ;;  %v3777_v44 = vmul.f32 1.442695, %v1500_v10  ;;  %v3030_v48 = vsub.f32 %v11217_v50, %v11219_v51  ;;  %8074 = vpow2.f32 %v3775_v12  ;;  %v991_v50 = vld [vmem:[%s8885_s25 + $0x740] sm:$0xff] }
 0x2ce   : > { %v8061_v19 = vpop.eup %8060  ;;  %v5586_v20 = vadd.f32 %v5074_v63, %v4562_v41  ;;  %v4563_v21 = vsub.f32 %v3027_v33, %v8059_v13  ;;  %v3031_v18 = vsub.f32 %v11224_v55, %v11228_v2  ;;  %v3032_v22 = vsub.f32 %v11230_v7, %v11234_v11  ;;  %v989_v33 = vld [vmem:[%s8885_s25 + $0x730] sm:$0xff]  ;;  %v5080_v7 = vld [vmem:[#allocation2 + $0x2b8] sm:$0xff] }
 0x2cf   : > { %6097 = vst [vmem:[#allocation2 + $0xe90] sm:$0xff] %v5585_v14  ;;  %v4564_v6 = vsub.f32 %v3028_v42, %v8061_v19  ;;  %8076 = vpow2.f32 %v3777_v44  ;;  %v3033_v56 = vsub.f32 %v11236_v40, %v11238_v62  ;;  %v11256_v57 = vadd.f32 1.0, %v1499_v60  ;;  %v1507_v62 = vld [vmem:[%s8891_s21 + $0x760] sm:$0xff]  ;;  %v5081_v14 = vld [vmem:[#allocation2 + $0x2a8] sm:$0xff] }
 0x2d0   : > { %6098 = vst [vmem:[#allocation2 + $0xc38] sm:$0xff] %v5586_v20  ;;  %v5587_v24 = vadd.f32 %v5075_v15, %v4563_v21  ;;  %v3779_v16 = vmul.f32 1.442695, %v1501_v3  ;;  %v3034_v29 = vsub.f32 %v11240_v17, %v11242_v43  ;;  %v11261_v32 = vmul.f32 %v987_v49, %v987_v49  ;;  %v1508_v44 = vld [vmem:[%s8891_s21 + $0x768] sm:$0xff]  ;;  %v5082_v20 = vld [vmem:[#allocation2 + $0xf78] sm:$0xff] }
 0x2d1   : > { %v8063_v26 = vpop.eup %8062  ;;  %v5588_v27 = vadd.f32 %v5076_v5, %v4564_v6  ;;  %v3781_v34 = vmul.f32 1.442695, %v1502_v4  ;;  %v11265_v39 = vadd.f32 1.0, %v1500_v10  ;;  %v11267_v42 = vmul.f32 %v988_v23, %v988_v23  ;;  %v994_v6 = vld [vmem:[%s8885_s25 + $0x758] sm:$0xff] }
 0x2d2   : > { %v8065_v36 = vpop.eup %8064  ;;  %6099 = vst [vmem:[#allocation2 + $0xb8] sm:$0xff] %v5587_v24  ;;  %v4565_v37 = vsub.f32 %v3029_v54, %v8063_v26  ;;  %8078 = vpow2.f32 %v3779_v16  ;;  %v11270_v47 = vadd.f32 1.0, %v1501_v3  ;;  %v3783_v51 = vmul.f32 1.442695, %v1503_v25  ;;  %v5079_v54 = vld [vmem:[#allocation2 + $0xc8] sm:$0xff]  ;;  %v5083_v24 = vld [vmem:[#allocation2 + $0x210] sm:$0xff] }
 0x2d3   : > { %6100 = vst [vmem:[#allocation2 + $0xc48] sm:$0xff] %v5588_v27  ;;  %v4566_v46 = vsub.f32 %v3030_v48, %v8065_v36  ;;  %8080 = vpow2.f32 %v3781_v34  ;;  %v8067_v52 = vpop.eup %8066  ;;  %v11273_v55 = vmul.f32 %v989_v33, %v989_v33  ;;  %v11275_v58 = vadd.f32 1.0, %v1502_v4  ;;  %v993_v48 = vld [vmem:[%s8885_s25 + $0x750] sm:$0xff]  ;;  %v995_v16 = vld [vmem:[%s8885_s25 + $0x760] sm:$0xff]  ;;  %v996_v34 = vld [vmem:[%s8885_s25 + $0x768] sm:$0xff] }
 0x2d4   : > { %v5589_v53 = vadd.f32 %v5077_v28, %v4565_v37  ;;  %v3785_v60 = vmul.f32 1.442695, %v1504_v35  ;;  %v4567_v2 = vsub.f32 %v3031_v18, %v8067_v52  ;;  %v11279_v8 = vmul.f32 %v990_v45, %v990_v45  ;;  %v1509_v26 = vld [vmem:[%s8891_s21 + $0x770] sm:$0xff] }
 0x2d5   : > { %v8069_v0 = vpop.eup %8068  ;;  %v5590_v1 = vadd.f32 %v5078_v38, %v4566_v46  ;;  %8082 = vpow2.f32 %v3783_v51  ;;  %v11282_v30 = vadd.f32 1.0, %v1503_v25  ;;  %v11284_v31 = vmul.f32 %v991_v50, %v991_v50  ;;  %v997_v46 = vld [vmem:[%s8885_s25 + $0x770] sm:$0xff]  ;;  %v1511_v50 = vld [vmem:[%s8891_s21 + $0x780] sm:$0xff] }
 0x2d6   : > { %6101 = vst [vmem:[#allocation2 + $0xb20] sm:$0xff] %v5589_v53  ;;  %v4568_v10 = vsub.f32 %v3032_v22, %v8069_v0  ;;  %8084 = vpow2.f32 %v3785_v60  ;;  %v5591_v63 = vadd.f32 %v5079_v54, %v4567_v2  ;;  %v11286_v11 = vadd.f32 1.0, %v1504_v35  ;;  %v1510_v35 = vld [vmem:[%s8891_s21 + $0x778] sm:$0xff]  ;;  %v5085_v53 = vld [vmem:[#allocation2 + $0xc88] sm:$0xff] }
 0x2d7   : > { %6102 = vst [vmem:[#allocation2 + $0x30] sm:$0xff] %v5590_v1  ;;  %v11288_v40 = vmul.f32 %v992_v59, %v992_v59  ;;  %v3787_v41 = vmul.f32 1.442695, %v1505_v61  ;;  %v3035_v15 = vsub.f32 %v11256_v57, %v11261_v32  ;;  %v3036_v17 = vsub.f32 %v11265_v39, %v11267_v42  ;;  %v5084_v32 = vld [vmem:[#allocation2 + $0x998] sm:$0xff]  ;;  %v1512_v59 = vld [vmem:[%s8891_s21 + $0x788] sm:$0xff] }
 0x2d8   : > { %v8071_v12 = vpop.eup %8070  ;;  %v5592_v13 = vadd.f32 %v5080_v7, %v4568_v10  ;;  %v3789_v43 = vmul.f32 1.442695, %v1506_v9  ;;  %6103 = vst [vmem:[#allocation2 + $0xc8] sm:$0xff] %v5591_v63  ;;  %v3037_v21 = vsub.f32 %v11270_v47, %v11273_v55  ;;  %v3038_v5 = vsub.f32 %v11275_v58, %v11279_v8  ;;  %v5086_v0 = vld [vmem:[#allocation2 + $0xab8] sm:$0xff]  ;;  %v5087_v63 = vld [vmem:[#allocation2 + $0x5a8] sm:$0xff] }
 0x2d9   : > { %v8073_v3 = vpop.eup %8072  ;;  %v4569_v19 = vsub.f32 %v3033_v56, %v8071_v12  ;;  %8086 = vpow2.f32 %v3787_v41  ;;  %v3039_v4 = vsub.f32 %v11282_v30, %v11284_v31  ;;  %v3791_v18 = vmul.f32 1.442695, %v1507_v62 }
 0x2da   : > { %6104 = vst [vmem:[#allocation2 + $0x2b8] sm:$0xff] %v5592_v13  ;;  %v4570_v49 = vsub.f32 %v3034_v29, %v8073_v3  ;;  %8088 = vpow2.f32 %v3789_v43  ;;  %v8075_v22 = vpop.eup %8074  ;;  %v3040_v56 = vsub.f32 %v11286_v11, %v11288_v40  ;;  %v11306_v57 = vadd.f32 1.0, %v1505_v61  ;;  %v999_v43 = vld [vmem:[%s8885_s25 + $0x780] sm:$0xff] }
 0x2db   : > { %v5593_v23 = vadd.f32 %v5081_v14, %v4569_v19  ;;  %v3793_v25 = vmul.f32 1.442695, %v1508_v44  ;;  %v4571_v29 = vsub.f32 %v3035_v15, %v8075_v22  ;;  %v11310_v33 = vmul.f32 %v993_v48, %v993_v48  ;;  %v5088_v15 = vld [vmem:[#allocation2 + $0x668] sm:$0xff] }
 0x2dc   : > { %v8077_v27 = vpop.eup %8076  ;;  %v5594_v28 = vadd.f32 %v5082_v20, %v4570_v49  ;;  %8090 = vpow2.f32 %v3791_v18  ;;  %v11314_v37 = vadd.f32 1.0, %v1506_v9  ;;  %v11316_v38 = vmul.f32 %v994_v6, %v994_v6  ;;  %v998_v9 = vld [vmem:[%s8885_s25 + $0x778] sm:$0xff]  ;;  %v1515_v18 = vld [vmem:[%s8891_s21 + $0x7a0] sm:$0xff] }
 0x2dd   : > { %6105 = vst [vmem:[#allocation2 + $0x2a8] sm:$0xff] %v5593_v23  ;;  %v4572_v36 = vsub.f32 %v3036_v17, %v8077_v27  ;;  %8092 = vpow2.f32 %v3793_v25  ;;  %v5595_v39 = vadd.f32 %v5083_v24, %v4571_v29  ;;  %v11318_v42 = vadd.f32 1.0, %v1507_v62  ;;  %v1513_v62 = vld [vmem:[%s8891_s21 + $0x790] sm:$0xff]  ;;  %v5089_v24 = vld [vmem:[#allocation2 + $0xb18] sm:$0xff]  ;;  %v5090_v29 = vld [vmem:[#allocation2 + $0x468] sm:$0xff] }
 0x2de   : > { %6106 = vst [vmem:[#allocation2 + $0xf78] sm:$0xff] %v5594_v28  ;;  %v11320_v45 = vmul.f32 %v995_v16, %v995_v16  ;;  %v3795_v47 = vmul.f32 1.442695, %v1509_v26  ;;  %v11324_v54 = vadd.f32 1.0, %v1508_v44  ;;  %v11326_v55 = vmul.f32 %v996_v34, %v996_v34  ;;  %v1514_v44 = vld [vmem:[%s8891_s21 + $0x798] sm:$0xff] }
 0x2df   : > { %v8079_v51 = vpop.eup %8078  ;;  %v5596_v52 = vadd.f32 %v5084_v32, %v4572_v36  ;;  %v3797_v58 = vmul.f32 1.442695, %v1510_v35  ;;  %6107 = vst [vmem:[#allocation2 + $0x210] sm:$0xff] %v5595_v39  ;;  %v3041_v1 = vsub.f32 %v11306_v57, %v11310_v33  ;;  %v11331_v2 = vadd.f32 1.0, %v1509_v26  ;;  %v1002_v16 = vld [vmem:[%s8885_s25 + $0x798] sm:$0xff]  ;;  %v1516_v26 = vld [vmem:[%s8891_s21 + $0x7a8] sm:$0xff] }
 0x2e0   : > { %v8081_v60 = vpop.eup %8080  ;;  %v4573_v61 = vsub.f32 %v3037_v21, %v8079_v51  ;;  %8094 = vpow2.f32 %v3795_v47  ;;  %v11333_v8 = vmul.f32 %v997_v46, %v997_v46  ;;  %v3799_v10 = vmul.f32 1.442695, %v1511_v50  ;;  %v1000_v21 = vld [vmem:[%s8885_s25 + $0x788] sm:$0xff]  ;;  %v5091_v39 = vld [vmem:[#allocation2 + $0x578] sm:$0xff]  ;;  %v1517_v47 = vld [vmem:[%s8891_s21 + $0x7b0] sm:$0xff] }
 0x2e1   : > { %6108 = vst [vmem:[#allocation2 + $0x998] sm:$0xff] %v5596_v52  ;;  %v4574_v7 = vsub.f32 %v3038_v5, %v8081_v60  ;;  %8096 = vpow2.f32 %v3797_v58  ;;  %v3042_v11 = vsub.f32 %v11314_v37, %v11316_v38  ;;  %v3043_v40 = vsub.f32 %v11318_v42, %v11320_v45  ;;  %v1518_v58 = vld [vmem:[%s8891_s21 + $0x7b8] sm:$0xff] }
 0x2e2   : > { %v8083_v30 = vpop.eup %8082  ;;  %v5597_v31 = vadd.f32 %v5085_v53, %v4573_v61  ;;  %v3801_v41 = vmul.f32 1.442695, %v1512_v59  ;;  %v3044_v17 = vsub.f32 %v11324_v54, %v11326_v55  ;;  %8098 = vpow2.f32 %v3799_v10  ;;  %v5092_v53 = vld [vmem:[#allocation2 + $0x600] sm:$0xff] }
 0x2e3   : > { %v8085_v12 = vpop.eup %8084  ;;  %v5598_v13 = vadd.f32 %v5086_v0, %v4574_v7  ;;  %v4575_v14 = vsub.f32 %v3039_v4, %v8083_v30  ;;  %v11345_v19 = vadd.f32 1.0, %v1510_v35  ;;  %v11347_v20 = vmul.f32 %v998_v9, %v998_v9  ;;  %v1001_v4 = vld [vmem:[%s8885_s25 + $0x790] sm:$0xff]  ;;  %v1003_v55 = vld [vmem:[%s8885_s25 + $0x7a0] sm:$0xff]  ;;  %v1004_v0 = vld [vmem:[%s8885_s25 + $0x7a8] sm:$0xff] }
 0x2e4   : > { %6109 = vst [vmem:[#allocation2 + $0xc88] sm:$0xff] %v5597_v31  ;;  %v4576_v3 = vsub.f32 %v3040_v56, %v8085_v12  ;;  %8100 = vpow2.f32 %v3801_v41  ;;  %v3045_v48 = vsub.f32 %v11331_v2, %v11333_v8  ;;  %v11352_v49 = vadd.f32 1.0, %v1511_v50  ;;  %v1519_v9 = vld [vmem:[%s8891_s21 + $0x7c0] sm:$0xff]  ;;  %v5093_v31 = vld [vmem:[#allocation2 + $0x570] sm:$0xff] }
 0x2e5   : > { %6110 = vst [vmem:[#allocation2 + $0xab8] sm:$0xff] %v5598_v13  ;;  %v5599_v5 = vadd.f32 %v5087_v63, %v4575_v14  ;;  %v3803_v6 = vmul.f32 1.442695, %v1513_v62  ;;  %v11356_v56 = vmul.f32 %v999_v43, %v999_v43  ;;  %v11358_v57 = vadd.f32 1.0, %v1512_v59  ;;  %v5094_v14 = vld [vmem:[#allocation2 + $0xb40] sm:$0xff]  ;;  %v1006_v43 = vld [vmem:[%s8885_s25 + $0x7b8] sm:$0xff] }
 0x2e6   : > { %v8087_v22 = vpop.eup %8086  ;;  %v5600_v23 = vadd.f32 %v5088_v15, %v4576_v3  ;;  %v3805_v25 = vmul.f32 1.442695, %v1514_v44  ;;  %v11362_v32 = vmul.f32 %v1000_v21, %v1000_v21  ;;  %v11364_v33 = vadd.f32 1.0, %v1513_v62  ;;  %v1520_v62 = vld [vmem:[%s8891_s21 + $0x7c8] sm:$0xff] }
 0x2e7   : > { %v8089_v27 = vpop.eup %8088  ;;  %6111 = vst [vmem:[#allocation2 + $0x5a8] sm:$0xff] %v5599_v5  ;;  %v4577_v28 = vsub.f32 %v3041_v1, %v8087_v22  ;;  %8102 = vpow2.f32 %v3803_v6  ;;  %v11366_v35 = vmul.f32 %v1001_v4, %v1001_v4  ;;  %v3807_v36 = vmul.f32 1.442695, %v1515_v18  ;;  %v1008_v6 = vld [vmem:[%s8885_s25 + $0x7c8] sm:$0xff]  ;;  %v1521_v22 = vld [vmem:[%s8891_s21 + $0x7d0] sm:$0xff] }
 0x2e8   : > { %6112 = vst [vmem:[#allocation2 + $0x668] sm:$0xff] %v5600_v23  ;;  %v4578_v34 = vsub.f32 %v3042_v11, %v8089_v27  ;;  %8104 = vpow2.f32 %v3805_v25  ;;  %v11368_v42 = vadd.f32 1.0, %v1514_v44  ;;  %v11370_v45 = vmul.f32 %v1002_v16, %v1002_v16  ;;  %v1522_v25 = vld [vmem:[%s8891_s21 + $0x7d8] sm:$0xff] }
 0x2e9   : > { %v8091_v37 = vpop.eup %8090  ;;  %v5601_v38 = vadd.f32 %v5089_v24, %v4577_v28  ;;  %v3809_v46 = vmul.f32 1.442695, %v1516_v26  ;;  %v3046_v54 = vsub.f32 %v11345_v19, %v11347_v20  ;;  %8106 = vpow2.f32 %v3807_v36  ;;  %v1007_v19 = vld [vmem:[%s8885_s25 + $0x7c0] sm:$0xff] }
 0x2ea   : > { %v8093_v50 = vpop.eup %8092  ;;  %v5602_v51 = vadd.f32 %v5090_v29, %v4578_v34  ;;  %v4579_v52 = vsub.f32 %v3043_v40, %v8091_v37  ;;  %v3047_v60 = vsub.f32 %v11352_v49, %v11356_v56  ;;  %v3048_v61 = vsub.f32 %v11358_v57, %v11362_v32  ;;  %v1005_v40 = vld [vmem:[%s8885_s25 + $0x7b0] sm:$0xff]  ;;  %v5096_v57 = vld [vmem:[#allocation2 + $0x838] sm:$0xff] }
 0x2eb   : > { %6113 = vst [vmem:[#allocation2 + $0xb18] sm:$0xff] %v5601_v38  ;;  %v4580_v59 = vsub.f32 %v3044_v17, %v8093_v50  ;;  %8108 = vpow2.f32 %v3809_v46  ;;  %v3049_v2 = vsub.f32 %v11364_v33, %v11366_v35  ;;  %v11384_v7 = vadd.f32 1.0, %v1515_v18  ;;  %v1523_v35 = vld [vmem:[%s8891_s21 + $0x7e0] sm:$0xff]  ;;  %v5097_v38 = vld [vmem:[#allocation2 + $0xcb8] sm:$0xff]  ;;  %v1524_v46 = vld [vmem:[%s8891_s21 + $0x7e8] sm:$0xff] }
 0x2ec   : > { %6114 = vst [vmem:[#allocation2 + $0x468] sm:$0xff] %v5602_v51  ;;  %v5603_v1 = vadd.f32 %v5091_v39, %v4579_v52  ;;  %v3811_v8 = vmul.f32 1.442695, %v1517_v47  ;;  %v3050_v63 = vsub.f32 %v11368_v42, %v11370_v45  ;;  %v11389_v11 = vmul.f32 %v1003_v55, %v1003_v55  ;;  %v5098_v51 = vld [vmem:[#allocation2 + $0xe28] sm:$0xff] }
 0x2ed   : > { %v8095_v10 = vpop.eup %8094  ;;  %v5604_v30 = vadd.f32 %v5092_v53, %v4580_v59  ;;  %v3813_v41 = vmul.f32 1.442695, %v1518_v58  ;;  %v11393_v15 = vadd.f32 1.0, %v1516_v26  ;;  %v11395_v17 = vmul.f32 %v1004_v0, %v1004_v0  ;;  %v1010_v59 = vld [vmem:[%s8885_s25 + $0x7d8] sm:$0xff] }
 0x2ee   : > { %v8097_v12 = vpop.eup %8096  ;;  %6115 = vst [vmem:[#allocation2 + $0x578] sm:$0xff] %v5603_v1  ;;  %v4581_v13 = vsub.f32 %v3045_v48, %v8095_v10  ;;  %8110 = vpow2.f32 %v3811_v8  ;;  %v11398_v3 = vadd.f32 1.0, %v1517_v47  ;;  %v3815_v20 = vmul.f32 1.442695, %v1519_v9  ;;  %v5095_v48 = vld [vmem:[#allocation2 + $0x170] sm:$0xff]  ;;  %v5099_v1 = vld [vmem:[#allocation2 + $0x500] sm:$0xff] }
 0x2ef   : > { %6116 = vst [vmem:[#allocation2 + $0x600] sm:$0xff] %v5604_v30  ;;  %v4582_v44 = vsub.f32 %v3046_v54, %v8097_v12  ;;  %8112 = vpow2.f32 %v3813_v41  ;;  %v8099_v21 = vpop.eup %8098  ;;  %v11401_v49 = vmul.f32 %v1005_v40, %v1005_v40  ;;  %v11403_v4 = vadd.f32 1.0, %v1518_v58  ;;  %v1009_v54 = vld [vmem:[%s8885_s25 + $0x7d0] sm:$0xff]  ;;  %v1011_v8 = vld [vmem:[%s8885_s25 + $0x7e0] sm:$0xff]  ;;  %v1012_v41 = vld [vmem:[%s8885_s25 + $0x7e8] sm:$0xff] }
 0x2f0   : > { %v5605_v5 = vadd.f32 %v5093_v31, %v4581_v13  ;;  %v3817_v18 = vmul.f32 1.442695, %v1520_v62  ;;  %v4583_v56 = vsub.f32 %v3047_v60, %v8099_v21  ;;  %v11407_v16 = vmul.f32 %v1006_v43, %v1006_v43  ;;  %v1525_v10 = vld [vmem:[%s8891_s21 + $0x7f0] sm:$0xff] }
 0x2f1   : > { %v8101_v23 = vpop.eup %8100  ;;  %v5606_v24 = vadd.f32 %v5094_v14, %v4582_v44  ;;  %8114 = vpow2.f32 %v3815_v20  ;;  %v11410_v27 = vadd.f32 1.0, %v1519_v9  ;;  %v11412_v28 = vmul.f32 %v1007_v19, %v1007_v19  ;;  %v1013_v44 = vld [vmem:[%s8885_s25 + $0x7f0] sm:$0xff]  ;;  %v1527_v19 = vld [vmem:[%s8891_s21 + $0x800] sm:$0xff] }
 0x2f2   : > { %6117 = vst [vmem:[#allocation2 + $0x570] sm:$0xff] %v5605_v5  ;;  %v4584_v26 = vsub.f32 %v3048_v61, %v8101_v23  ;;  %8116 = vpow2.f32 %v3817_v18  ;;  %v5607_v29 = vadd.f32 %v5095_v48, %v4583_v56  ;;  %v11414_v32 = vadd.f32 1.0, %v1520_v62  ;;  %v1526_v62 = vld [vmem:[%s8891_s21 + $0x7f8] sm:$0xff]  ;;  %v5101_v5 = vld [vmem:[#allocation2 + $0x8c0] sm:$0xff]  ;;  %v5102_v23 = vld [vmem:[#allocation2 + $0xe08] sm:$0xff] }
 0x2f3   : > { %6118 = vst [vmem:[#allocation2 + $0xb40] sm:$0xff] %v5606_v24  ;;  %v11416_v33 = vmul.f32 %v1008_v6, %v1008_v6  ;;  %v3819_v34 = vmul.f32 1.442695, %v1521_v22  ;;  %v3051_v39 = vsub.f32 %v11384_v7, %v11389_v11  ;;  %v3052_v42 = vsub.f32 %v11393_v15, %v11395_v17  ;;  %v5100_v11 = vld [vmem:[#allocation2 + $0xe60] sm:$0xff]  ;;  %v1528_v6 = vld [vmem:[%s8891_s21 + $0x808] sm:$0xff] }
 0x2f4   : > { %v8103_v36 = vpop.eup %8102  ;;  %v5608_v37 = vadd.f32 %v5096_v57, %v4584_v26  ;;  %v3821_v45 = vmul.f32 1.442695, %v1522_v25  ;;  %6119 = vst [vmem:[#allocation2 + $0x170] sm:$0xff] %v5607_v29  ;;  %v3053_v52 = vsub.f32 %v11398_v3, %v11401_v49  ;;  %v3054_v53 = vsub.f32 %v11403_v4, %v11407_v16  ;;  %v5103_v29 = vld [vmem:[#allocation2 + $0xb58] sm:$0xff] }
 0x2f5   : > { %v8105_v47 = vpop.eup %8104  ;;  %v4585_v50 = vsub.f32 %v3049_v2, %v8103_v36  ;;  %8118 = vpow2.f32 %v3819_v34  ;;  %v3055_v58 = vsub.f32 %v11410_v27, %v11412_v28  ;;  %v3823_v60 = vmul.f32 1.442695, %v1523_v35 }
 0x2f6   : > { %6120 = vst [vmem:[#allocation2 + $0x838] sm:$0xff] %v5608_v37  ;;  %v4586_v55 = vsub.f32 %v3050_v63, %v8105_v47  ;;  %8120 = vpow2.f32 %v3821_v45  ;;  %v8107_v61 = vpop.eup %8106  ;;  %v3056_v2 = vsub.f32 %v11414_v32, %v11416_v33  ;;  %v11434_v7 = vadd.f32 1.0, %v1521_v22  ;;  %v1015_v45 = vld [vmem:[%s8885_s25 + $0x800] sm:$0xff] }
 0x2f7   : > { %v5609_v0 = vadd.f32 %v5097_v38, %v4585_v50  ;;  %v3825_v9 = vmul.f32 1.442695, %v1524_v46  ;;  %v4587_v63 = vsub.f32 %v3051_v39, %v8107_v61  ;;  %v11438_v40 = vmul.f32 %v1009_v54, %v1009_v54  ;;  %v5104_v39 = vld [vmem:[#allocation2 + $0x618] sm:$0xff] }
 0x2f8   : > { %v8109_v30 = vpop.eup %8108  ;;  %v5610_v31 = vadd.f32 %v5098_v51, %v4586_v55  ;;  %8122 = vpow2.f32 %v3823_v60  ;;  %v11442_v13 = vadd.f32 1.0, %v1522_v25  ;;  %v11444_v14 = vmul.f32 %v1010_v59, %v1010_v59  ;;  %v1014_v25 = vld [vmem:[%s8885_s25 + $0x7f8] sm:$0xff]  ;;  %v1531_v60 = vld [vmem:[%s8891_s21 + $0x820] sm:$0xff] }
 0x2f9   : > { %6121 = vst [vmem:[#allocation2 + $0xcb8] sm:$0xff] %v5609_v0  ;;  %v4588_v12 = vsub.f32 %v3052_v42, %v8109_v30  ;;  %8124 = vpow2.f32 %v3825_v9  ;;  %v5611_v15 = vadd.f32 %v5099_v1, %v4587_v63  ;;  %v11446_v17 = vadd.f32 1.0, %v1523_v35  ;;  %v1529_v35 = vld [vmem:[%s8891_s21 + $0x810] sm:$0xff]  ;;  %v5105_v1 = vld [vmem:[#allocation2 + $0x200] sm:$0xff] }
 0x2fa   : > { %6122 = vst [vmem:[#allocation2 + $0xe28] sm:$0xff] %v5610_v31  ;;  %v11448_v43 = vmul.f32 %v1011_v8, %v1011_v8  ;;  %v3827_v3 = vmul.f32 1.442695, %v1525_v10  ;;  %v11452_v48 = vadd.f32 1.0, %v1524_v46  ;;  %v11454_v49 = vmul.f32 %v1012_v41, %v1012_v41  ;;  %v1530_v46 = vld [vmem:[%s8891_s21 + $0x818] sm:$0xff]  ;;  %v5106_v63 = vld [vmem:[#allocation2 + $0x5b0] sm:$0xff] }
 0x2fb   : > { %v8111_v20 = vpop.eup %8110  ;;  %v5612_v21 = vadd.f32 %v5100_v11, %v4588_v12  ;;  %v3829_v4 = vmul.f32 1.442695, %v1526_v62  ;;  %6123 = vst [vmem:[#allocation2 + $0x500] sm:$0xff] %v5611_v15  ;;  %v3057_v24 = vsub.f32 %v11434_v7, %v11438_v40  ;;  %v11459_v56 = vadd.f32 1.0, %v1525_v10  ;;  %v1018_v8 = vld [vmem:[%s8885_s25 + $0x818] sm:$0xff]  ;;  %v1532_v10 = vld [vmem:[%s8891_s21 + $0x828] sm:$0xff] }
 0x2fc   : > { %v8113_v18 = vpop.eup %8112  ;;  %v4589_v22 = vsub.f32 %v3053_v52, %v8111_v20  ;;  %8126 = vpow2.f32 %v3827_v3  ;;  %v11461_v16 = vmul.f32 %v1013_v44, %v1013_v44  ;;  %v3831_v26 = vmul.f32 1.442695, %v1527_v19  ;;  %v1016_v52 = vld [vmem:[%s8885_s25 + $0x808] sm:$0xff]  ;;  %v5107_v15 = vld [vmem:[#allocation2 + $0x140] sm:$0xff]  ;;  %v1533_v3 = vld [vmem:[%s8891_s21 + $0x830] sm:$0xff] }
 0x2fd   : > { %6124 = vst [vmem:[#allocation2 + $0xe60] sm:$0xff] %v5612_v21  ;;  %v4590_v57 = vsub.f32 %v3054_v53, %v8113_v18  ;;  %8128 = vpow2.f32 %v3829_v4  ;;  %v3058_v32 = vsub.f32 %v11442_v13, %v11444_v14  ;;  %v3059_v33 = vsub.f32 %v11446_v17, %v11448_v43  ;;  %v1534_v4 = vld [vmem:[%s8891_s21 + $0x838] sm:$0xff] }
 0x2fe   : > { %v8115_v27 = vpop.eup %8114  ;;  %v5613_v28 = vadd.f32 %v5101_v5, %v4589_v22  ;;  %v3833_v34 = vmul.f32 1.442695, %v1528_v6  ;;  %v3060_v42 = vsub.f32 %v11452_v48, %v11454_v49  ;;  %8130 = vpow2.f32 %v3831_v26  ;;  %v5108_v5 = vld [vmem:[#allocation2 + $0xc0] sm:$0xff] }
 0x2ff   : > { %v8117_v36 = vpop.eup %8116  ;;  %v5614_v37 = vadd.f32 %v5102_v23, %v4590_v57  ;;  %v4591_v38 = vsub.f32 %v3055_v58, %v8115_v27  ;;  %v11473_v50 = vadd.f32 1.0, %v1526_v62  ;;  %v11475_v51 = vmul.f32 %v1014_v25, %v1014_v25  ;;  %v1017_v58 = vld [vmem:[%s8885_s25 + $0x810] sm:$0xff]  ;;  %v1019_v49 = vld [vmem:[%s8885_s25 + $0x820] sm:$0xff]  ;;  %v1020_v23 = vld [vmem:[%s8885_s25 + $0x828] sm:$0xff] }
 0x300   : > { %6125 = vst [vmem:[#allocation2 + $0x8c0] sm:$0xff] %v5613_v28  ;;  %v4592_v47 = vsub.f32 %v3056_v2, %v8117_v36  ;;  %8132 = vpow2.f32 %v3833_v34  ;;  %v3061_v54 = vsub.f32 %v11459_v56, %v11461_v16  ;;  %v11480_v55 = vadd.f32 1.0, %v1527_v19  ;;  %v1535_v25 = vld [vmem:[%s8891_s21 + $0x840] sm:$0xff] }
 0x301   : > { %6126 = vst [vmem:[#allocation2 + $0xe08] sm:$0xff] %v5614_v37  ;;  %v5615_v53 = vadd.f32 %v5103_v29, %v4591_v38  ;;  %v3835_v59 = vmul.f32 1.442695, %v1529_v35  ;;  %v11484_v2 = vmul.f32 %v1015_v45, %v1015_v45  ;;  %v11486_v7 = vadd.f32 1.0, %v1528_v6  ;;  %v5109_v28 = vld [vmem:[#allocation2 + $0xba0] sm:$0xff]  ;;  %v5110_v38 = vld [vmem:[#allocation2 + $0xd0] sm:$0xff] }
 0x302   : > { %v8119_v61 = vpop.eup %8118  ;;  %v5616_v0 = vadd.f32 %v5104_v39, %v4592_v47  ;;  %v3837_v9 = vmul.f32 1.442695, %v1530_v46  ;;  %v11490_v11 = vmul.f32 %v1016_v52, %v1016_v52  ;;  %v11492_v40 = vadd.f32 1.0, %v1529_v35  ;;  %v1536_v35 = vld [vmem:[%s8891_s21 + $0x848] sm:$0xff]  ;;  %v1022_v45 = vld [vmem:[%s8885_s25 + $0x838] sm:$0xff] }
 0x303   : > { %v8121_v30 = vpop.eup %8120  ;;  %6127 = vst [vmem:[#allocation2 + $0xb58] sm:$0xff] %v5615_v53  ;;  %v4593_v31 = vsub.f32 %v3057_v24, %v8119_v61  ;;  %8134 = vpow2.f32 %v3835_v59  ;;  %v11494_v62 = vmul.f32 %v1017_v58, %v1017_v58  ;;  %v3839_v12 = vmul.f32 1.442695, %v1531_v60  ;;  %v1024_v59 = vld [vmem:[%s8885_s25 + $0x848] sm:$0xff]  ;;  %v1537_v61 = vld [vmem:[%s8891_s21 + $0x850] sm:$0xff] }
 0x304   : > { %6128 = vst [vmem:[#allocation2 + $0x618] sm:$0xff] %v5616_v0  ;;  %v4594_v41 = vsub.f32 %v3058_v32, %v8121_v30  ;;  %8136 = vpow2.f32 %v3837_v9  ;;  %v11496_v17 = vadd.f32 1.0, %v1530_v46  ;;  %v11498_v43 = vmul.f32 %v1018_v8, %v1018_v8  ;;  %v1538_v9 = vld [vmem:[%s8891_s21 + $0x858] sm:$0xff] }
 0x305   : > { %v8123_v13 = vpop.eup %8122  ;;  %v5617_v14 = vadd.f32 %v5105_v1, %v4593_v31  ;;  %v3841_v44 = vmul.f32 1.442695, %v1532_v10  ;;  %v3062_v48 = vsub.f32 %v11473_v50, %v11475_v51  ;;  %8138 = vpow2.f32 %v3839_v12  ;;  %v1023_v50 = vld [vmem:[%s8885_s25 + $0x840] sm:$0xff] }
 0x306   : > { %v8125_v19 = vpop.eup %8124  ;;  %v5618_v20 = vadd.f32 %v5106_v63, %v4594_v41  ;;  %v4595_v21 = vsub.f32 %v3059_v33, %v8123_v13  ;;  %v3063_v18 = vsub.f32 %v11480_v55, %v11484_v2  ;;  %v3064_v22 = vsub.f32 %v11486_v7, %v11490_v11  ;;  %v1021_v33 = vld [vmem:[%s8885_s25 + $0x830] sm:$0xff]  ;;  %v5112_v7 = vld [vmem:[#allocation2 + $0x448] sm:$0xff] }
 0x307   : > { %6129 = vst [vmem:[#allocation2 + $0x200] sm:$0xff] %v5617_v14  ;;  %v4596_v6 = vsub.f32 %v3060_v42, %v8125_v19  ;;  %8140 = vpow2.f32 %v3841_v44  ;;  %v3065_v56 = vsub.f32 %v11492_v40, %v11494_v62  ;;  %v11512_v57 = vadd.f32 1.0, %v1531_v60  ;;  %v1539_v62 = vld [vmem:[%s8891_s21 + $0x860] sm:$0xff]  ;;  %v1540_v44 = vld [vmem:[%s8891_s21 + $0x868] sm:$0xff] }
 0x308   : > { %6130 = vst [vmem:[#allocation2 + $0x5b0] sm:$0xff] %v5618_v20  ;;  %v5619_v24 = vadd.f32 %v5107_v15, %v4595_v21  ;;  %v3843_v16 = vmul.f32 1.442695, %v1533_v3  ;;  %v3066_v29 = vsub.f32 %v11496_v17, %v11498_v43  ;;  %v11517_v32 = vmul.f32 %v1019_v49, %v1019_v49  ;;  %v5113_v14 = vld [vmem:[#allocation2 + $0x5a0] sm:$0xff] }
 0x309   : > { %v8127_v26 = vpop.eup %8126  ;;  %v5620_v27 = vadd.f32 %v5108_v5, %v4596_v6  ;;  %v3845_v34 = vmul.f32 1.442695, %v1534_v4  ;;  %v11521_v39 = vadd.f32 1.0, %v1532_v10  ;;  %v11523_v42 = vmul.f32 %v1020_v23, %v1020_v23  ;;  %v5114_v20 = vld [vmem:[#allocation2 + $0xc60] sm:$0xff]  ;;  %v1026_v6 = vld [vmem:[%s8885_s25 + $0x858] sm:$0xff] }
 0x30a   : > { %v8129_v36 = vpop.eup %8128  ;;  %6131 = vst [vmem:[#allocation2 + $0x140] sm:$0xff] %v5619_v24  ;;  %v4597_v37 = vsub.f32 %v3061_v54, %v8127_v26  ;;  %8142 = vpow2.f32 %v3843_v16  ;;  %v11526_v47 = vadd.f32 1.0, %v1533_v3  ;;  %v3847_v51 = vmul.f32 1.442695, %v1535_v25  ;;  %v5111_v54 = vld [vmem:[#allocation2 + $0xd70] sm:$0xff]  ;;  %v5115_v24 = vld [vmem:[#allocation2 + $0x360] sm:$0xff] }
 0x30b   : > { %6132 = vst [vmem:[#allocation2 + $0xc0] sm:$0xff] %v5620_v27  ;;  %v4598_v46 = vsub.f32 %v3062_v48, %v8129_v36  ;;  %8144 = vpow2.f32 %v3845_v34  ;;  %v8131_v52 = vpop.eup %8130  ;;  %v11529_v55 = vmul.f32 %v1021_v33, %v1021_v33  ;;  %v11531_v58 = vadd.f32 1.0, %v1534_v4  ;;  %v1025_v48 = vld [vmem:[%s8885_s25 + $0x850] sm:$0xff]  ;;  %v1027_v16 = vld [vmem:[%s8885_s25 + $0x860] sm:$0xff]  ;;  %v1028_v34 = vld [vmem:[%s8885_s25 + $0x868] sm:$0xff] }
 0x30c   : > { %v5621_v53 = vadd.f32 %v5109_v28, %v4597_v37  ;;  %v3849_v60 = vmul.f32 1.442695, %v1536_v35  ;;  %v4599_v2 = vsub.f32 %v3063_v18, %v8131_v52  ;;  %v11535_v8 = vmul.f32 %v1022_v45, %v1022_v45  ;;  %v1541_v26 = vld [vmem:[%s8891_s21 + $0x870] sm:$0xff] }
 0x30d   : > { %v8133_v0 = vpop.eup %8132  ;;  %v5622_v1 = vadd.f32 %v5110_v38, %v4598_v46  ;;  %8146 = vpow2.f32 %v3847_v51  ;;  %v11538_v30 = vadd.f32 1.0, %v1535_v25  ;;  %v11540_v31 = vmul.f32 %v1023_v50, %v1023_v50  ;;  %v1029_v46 = vld [vmem:[%s8885_s25 + $0x870] sm:$0xff]  ;;  %v1543_v50 = vld [vmem:[%s8891_s21 + $0x880] sm:$0xff] }
 0x30e   : > { %6133 = vst [vmem:[#allocation2 + $0xba0] sm:$0xff] %v5621_v53  ;;  %v4600_v10 = vsub.f32 %v3064_v22, %v8133_v0  ;;  %8148 = vpow2.f32 %v3849_v60  ;;  %v5623_v63 = vadd.f32 %v5111_v54, %v4599_v2  ;;  %v11542_v11 = vadd.f32 1.0, %v1536_v35  ;;  %v1542_v35 = vld [vmem:[%s8891_s21 + $0x878] sm:$0xff]  ;;  %v5118_v0 = vld [vmem:[#allocation2 + $0x690] sm:$0xff] }
 0x30f   : > { %6134 = vst [vmem:[#allocation2 + $0xd0] sm:$0xff] %v5622_v1  ;;  %v11544_v40 = vmul.f32 %v1024_v59, %v1024_v59  ;;  %v3851_v41 = vmul.f32 1.442695, %v1537_v61  ;;  %v3067_v15 = vsub.f32 %v11512_v57, %v11517_v32  ;;  %v3068_v17 = vsub.f32 %v11521_v39, %v11523_v42  ;;  %v5116_v32 = vld [vmem:[#allocation2 + $0xde0] sm:$0xff]  ;;  %v5117_v53 = vld [vmem:[#allocation2 + $0x118] sm:$0xff]  ;;  %v1544_v59 = vld [vmem:[%s8891_s21 + $0x888] sm:$0xff] }
 0x310   : > { %v8135_v12 = vpop.eup %8134  ;;  %v5624_v13 = vadd.f32 %v5112_v7, %v4600_v10  ;;  %v3853_v43 = vmul.f32 1.442695, %v1538_v9  ;;  %6135 = vst [vmem:[#allocation2 + $0xd70] sm:$0xff] %v5623_v63  ;;  %v3069_v21 = vsub.f32 %v11526_v47, %v11529_v55  ;;  %v3070_v5 = vsub.f32 %v11531_v58, %v11535_v8  ;;  %v5119_v63 = vld [vmem:[#allocation2 + $0xb48] sm:$0xff] }
 0x311   : > { %v8137_v3 = vpop.eup %8136  ;;  %v4601_v19 = vsub.f32 %v3065_v56, %v8135_v12  ;;  %8150 = vpow2.f32 %v3851_v41  ;;  %v3071_v4 = vsub.f32 %v11538_v30, %v11540_v31  ;;  %v3855_v18 = vmul.f32 1.442695, %v1539_v62 }
 0x312   : > { %6136 = vst [vmem:[#allocation2 + $0x448] sm:$0xff] %v5624_v13  ;;  %v4602_v49 = vsub.f32 %v3066_v29, %v8137_v3  ;;  %8152 = vpow2.f32 %v3853_v43  ;;  %v8139_v22 = vpop.eup %8138  ;;  %v3072_v56 = vsub.f32 %v11542_v11, %v11544_v40  ;;  %v11562_v57 = vadd.f32 1.0, %v1537_v61  ;;  %v1031_v43 = vld [vmem:[%s8885_s25 + $0x880] sm:$0xff] }
 0x313   : > { %v5625_v23 = vadd.f32 %v5113_v14, %v4601_v19  ;;  %v3857_v25 = vmul.f32 1.442695, %v1540_v44  ;;  %v4603_v29 = vsub.f32 %v3067_v15, %v8139_v22  ;;  %v11566_v33 = vmul.f32 %v1025_v48, %v1025_v48  ;;  %v5120_v15 = vld [vmem:[#allocation2 + $0xeb0] sm:$0xff] }
 0x314   : > { %v8141_v27 = vpop.eup %8140  ;;  %v5626_v28 = vadd.f32 %v5114_v20, %v4602_v49  ;;  %8154 = vpow2.f32 %v3855_v18  ;;  %v11570_v37 = vadd.f32 1.0, %v1538_v9  ;;  %v11572_v38 = vmul.f32 %v1026_v6, %v1026_v6  ;;  %v1030_v9 = vld [vmem:[%s8885_s25 + $0x878] sm:$0xff]  ;;  %v1547_v18 = vld [vmem:[%s8891_s21 + $0x8a0] sm:$0xff] }
 0x315   : > { %6137 = vst [vmem:[#allocation2 + $0x5a0] sm:$0xff] %v5625_v23  ;;  %v4604_v36 = vsub.f32 %v3068_v17, %v8141_v27  ;;  %8156 = vpow2.f32 %v3857_v25  ;;  %v5627_v39 = vadd.f32 %v5115_v24, %v4603_v29  ;;  %v11574_v42 = vadd.f32 1.0, %v1539_v62  ;;  %v1545_v62 = vld [vmem:[%s8891_s21 + $0x890] sm:$0xff]  ;;  %v5121_v24 = vld [vmem:[#allocation2 + $0x860] sm:$0xff]  ;;  %v5122_v29 = vld [vmem:[#allocation2 + $0xcc8] sm:$0xff] }
 0x316   : > { %6138 = vst [vmem:[#allocation2 + $0xc60] sm:$0xff] %v5626_v28  ;;  %v11576_v45 = vmul.f32 %v1027_v16, %v1027_v16  ;;  %v3859_v47 = vmul.f32 1.442695, %v1541_v26  ;;  %v11580_v54 = vadd.f32 1.0, %v1540_v44  ;;  %v11582_v55 = vmul.f32 %v1028_v34, %v1028_v34  ;;  %v1546_v44 = vld [vmem:[%s8891_s21 + $0x898] sm:$0xff] }
 0x317   : > { %v8143_v51 = vpop.eup %8142  ;;  %v5628_v52 = vadd.f32 %v5116_v32, %v4604_v36  ;;  %v3861_v58 = vmul.f32 1.442695, %v1542_v35  ;;  %6139 = vst [vmem:[#allocation2 + $0x360] sm:$0xff] %v5627_v39  ;;  %v3073_v1 = vsub.f32 %v11562_v57, %v11566_v33  ;;  %v11587_v2 = vadd.f32 1.0, %v1541_v26  ;;  %v1034_v16 = vld [vmem:[%s8885_s25 + $0x898] sm:$0xff]  ;;  %v1548_v26 = vld [vmem:[%s8891_s21 + $0x8a8] sm:$0xff] }
 0x318   : > { %v8145_v60 = vpop.eup %8144  ;;  %v4605_v61 = vsub.f32 %v3069_v21, %v8143_v51  ;;  %8158 = vpow2.f32 %v3859_v47  ;;  %v11589_v8 = vmul.f32 %v1029_v46, %v1029_v46  ;;  %v3863_v10 = vmul.f32 1.442695, %v1543_v50  ;;  %v1032_v21 = vld [vmem:[%s8885_s25 + $0x888] sm:$0xff]  ;;  %v5123_v39 = vld [vmem:[#allocation2 + $0xff8] sm:$0xff]  ;;  %v1549_v47 = vld [vmem:[%s8891_s21 + $0x8b0] sm:$0xff] }
 0x319   : > { %6140 = vst [vmem:[#allocation2 + $0xde0] sm:$0xff] %v5628_v52  ;;  %v4606_v7 = vsub.f32 %v3070_v5, %v8145_v60  ;;  %8160 = vpow2.f32 %v3861_v58  ;;  %v3074_v11 = vsub.f32 %v11570_v37, %v11572_v38  ;;  %v3075_v40 = vsub.f32 %v11574_v42, %v11576_v45  ;;  %v1550_v58 = vld [vmem:[%s8891_s21 + $0x8b8] sm:$0xff] }
 0x31a   : > { %v8147_v30 = vpop.eup %8146  ;;  %v5629_v31 = vadd.f32 %v5117_v53, %v4605_v61  ;;  %v3865_v41 = vmul.f32 1.442695, %v1544_v59  ;;  %v3076_v17 = vsub.f32 %v11580_v54, %v11582_v55  ;;  %8162 = vpow2.f32 %v3863_v10  ;;  %v5124_v53 = vld [vmem:[#allocation2 + $0x758] sm:$0xff]  ;;  %v1035_v55 = vld [vmem:[%s8885_s25 + $0x8a0] sm:$0xff] }
 0x31b   : > { %v8149_v12 = vpop.eup %8148  ;;  %v5630_v13 = vadd.f32 %v5118_v0, %v4606_v7  ;;  %v4607_v14 = vsub.f32 %v3071_v4, %v8147_v30  ;;  %v11601_v19 = vadd.f32 1.0, %v1542_v35  ;;  %v11603_v20 = vmul.f32 %v1030_v9, %v1030_v9  ;;  %v1033_v4 = vld [vmem:[%s8885_s25 + $0x890] sm:$0xff]  ;;  %v1036_v0 = vld [vmem:[%s8885_s25 + $0x8a8] sm:$0xff]  ;;  %v1551_v9 = vld [vmem:[%s8891_s21 + $0x8c0] sm:$0xff] }
 0x31c   : > { %6141 = vst [vmem:[#allocation2 + $0x118] sm:$0xff] %v5629_v31  ;;  %v4608_v3 = vsub.f32 %v3072_v56, %v8149_v12  ;;  %8164 = vpow2.f32 %v3865_v41  ;;  %v3077_v48 = vsub.f32 %v11587_v2, %v11589_v8  ;;  %v11608_v49 = vadd.f32 1.0, %v1543_v50  ;;  %v5125_v31 = vld [vmem:[#allocation2 + $0x590] sm:$0xff] }
 0x31d   : > { %6142 = vst [vmem:[#allocation2 + $0x690] sm:$0xff] %v5630_v13  ;;  %v5631_v5 = vadd.f32 %v5119_v63, %v4607_v14  ;;  %v3867_v6 = vmul.f32 1.442695, %v1545_v62  ;;  %v11612_v56 = vmul.f32 %v1031_v43, %v1031_v43  ;;  %v11614_v57 = vadd.f32 1.0, %v1544_v59  ;;  %v5126_v14 = vld [vmem:[#allocation2 + $0xb00] sm:$0xff]  ;;  %v1038_v43 = vld [vmem:[%s8885_s25 + $0x8b8] sm:$0xff] }
 0x31e   : > { %v8151_v22 = vpop.eup %8150  ;;  %v5632_v23 = vadd.f32 %v5120_v15, %v4608_v3  ;;  %v3869_v25 = vmul.f32 1.442695, %v1546_v44  ;;  %v11618_v32 = vmul.f32 %v1032_v21, %v1032_v21  ;;  %v11620_v33 = vadd.f32 1.0, %v1545_v62  ;;  %v1552_v62 = vld [vmem:[%s8891_s21 + $0x8c8] sm:$0xff] }
 0x31f   : > { %v8153_v27 = vpop.eup %8152  ;;  %6143 = vst [vmem:[#allocation2 + $0xb48] sm:$0xff] %v5631_v5  ;;  %v4609_v28 = vsub.f32 %v3073_v1, %v8151_v22  ;;  %8166 = vpow2.f32 %v3867_v6  ;;  %v11622_v35 = vmul.f32 %v1033_v4, %v1033_v4  ;;  %v3871_v36 = vmul.f32 1.442695, %v1547_v18  ;;  %v1040_v6 = vld [vmem:[%s8885_s25 + $0x8c8] sm:$0xff]  ;;  %v1553_v22 = vld [vmem:[%s8891_s21 + $0x8d0] sm:$0xff] }
 0x320   : > { %6144 = vst [vmem:[#allocation2 + $0xeb0] sm:$0xff] %v5632_v23  ;;  %v4610_v34 = vsub.f32 %v3074_v11, %v8153_v27  ;;  %8168 = vpow2.f32 %v3869_v25  ;;  %v11624_v42 = vadd.f32 1.0, %v1546_v44  ;;  %v11626_v45 = vmul.f32 %v1034_v16, %v1034_v16  ;;  %v1554_v25 = vld [vmem:[%s8891_s21 + $0x8d8] sm:$0xff] }
 0x321   : > { %v8155_v37 = vpop.eup %8154  ;;  %v5633_v38 = vadd.f32 %v5121_v24, %v4609_v28  ;;  %v3873_v46 = vmul.f32 1.442695, %v1548_v26  ;;  %v3078_v54 = vsub.f32 %v11601_v19, %v11603_v20  ;;  %8170 = vpow2.f32 %v3871_v36  ;;  %v1039_v19 = vld [vmem:[%s8885_s25 + $0x8c0] sm:$0xff] }
 0x322   : > { %v8157_v50 = vpop.eup %8156  ;;  %v5634_v51 = vadd.f32 %v5122_v29, %v4610_v34  ;;  %v4611_v52 = vsub.f32 %v3075_v40, %v8155_v37  ;;  %v3079_v60 = vsub.f32 %v11608_v49, %v11612_v56  ;;  %v3080_v61 = vsub.f32 %v11614_v57, %v11618_v32  ;;  %v1037_v40 = vld [vmem:[%s8885_s25 + $0x8b0] sm:$0xff]  ;;  %v5128_v57 = vld [vmem:[#allocation2 + $0xee8] sm:$0xff] }
 0x323   : > { %6145 = vst [vmem:[#allocation2 + $0x860] sm:$0xff] %v5633_v38  ;;  %v4612_v59 = vsub.f32 %v3076_v17, %v8157_v50  ;;  %8172 = vpow2.f32 %v3873_v46  ;;  %v3081_v2 = vsub.f32 %v11620_v33, %v11622_v35  ;;  %v11640_v7 = vadd.f32 1.0, %v1547_v18  ;;  %v1555_v35 = vld [vmem:[%s8891_s21 + $0x8e0] sm:$0xff]  ;;  %v5129_v38 = vld [vmem:[#allocation2 + $0x848] sm:$0xff] }
 0x324   : > { %6146 = vst [vmem:[#allocation2 + $0xcc8] sm:$0xff] %v5634_v51  ;;  %v5635_v1 = vadd.f32 %v5123_v39, %v4611_v52  ;;  %v3875_v8 = vmul.f32 1.442695, %v1549_v47  ;;  %v3082_v63 = vsub.f32 %v11624_v42, %v11626_v45  ;;  %v11645_v11 = vmul.f32 %v1035_v55, %v1035_v55  ;;  %v1556_v46 = vld [vmem:[%s8891_s21 + $0x8e8] sm:$0xff]  ;;  %v5130_v51 = vld [vmem:[#allocation2 + $0xe78] sm:$0xff] }
 0x325   : > { %v8159_v10 = vpop.eup %8158  ;;  %v5636_v30 = vadd.f32 %v5124_v53, %v4612_v59  ;;  %v3877_v41 = vmul.f32 1.442695, %v1550_v58  ;;  %v11649_v15 = vadd.f32 1.0, %v1548_v26  ;;  %v11651_v17 = vmul.f32 %v1036_v0, %v1036_v0  ;;  %v1042_v59 = vld [vmem:[%s8885_s25 + $0x8d8] sm:$0xff] }
 0x326   : > { %v8161_v12 = vpop.eup %8160  ;;  %6147 = vst [vmem:[#allocation2 + $0xff8] sm:$0xff] %v5635_v1  ;;  %v4613_v13 = vsub.f32 %v3077_v48, %v8159_v10  ;;  %8174 = vpow2.f32 %v3875_v8  ;;  %v11654_v3 = vadd.f32 1.0, %v1549_v47  ;;  %v3879_v20 = vmul.f32 1.442695, %v1551_v9  ;;  %v5127_v48 = vld [vmem:[#allocation2 + $0x6c8] sm:$0xff]  ;;  %v5131_v1 = vld [vmem:[#allocation2 + $0x640] sm:$0xff] }
 0x327   : > { %6148 = vst [vmem:[#allocation2 + $0x758] sm:$0xff] %v5636_v30  ;;  %v4614_v44 = vsub.f32 %v3078_v54, %v8161_v12  ;;  %8176 = vpow2.f32 %v3877_v41  ;;  %v8163_v21 = vpop.eup %8162  ;;  %v11657_v49 = vmul.f32 %v1037_v40, %v1037_v40  ;;  %v11659_v4 = vadd.f32 1.0, %v1550_v58  ;;  %v1041_v54 = vld [vmem:[%s8885_s25 + $0x8d0] sm:$0xff]  ;;  %v1043_v8 = vld [vmem:[%s8885_s25 + $0x8e0] sm:$0xff]  ;;  %v1044_v41 = vld [vmem:[%s8885_s25 + $0x8e8] sm:$0xff] }
 0x328   : > { %v5637_v5 = vadd.f32 %v5125_v31, %v4613_v13  ;;  %v3881_v18 = vmul.f32 1.442695, %v1552_v62  ;;  %v4615_v56 = vsub.f32 %v3079_v60, %v8163_v21  ;;  %v11663_v16 = vmul.f32 %v1038_v43, %v1038_v43  ;;  %v1557_v10 = vld [vmem:[%s8891_s21 + $0x8f0] sm:$0xff] }
 0x329   : > { %v8165_v23 = vpop.eup %8164  ;;  %v5638_v24 = vadd.f32 %v5126_v14, %v4614_v44  ;;  %8178 = vpow2.f32 %v3879_v20  ;;  %v11666_v27 = vadd.f32 1.0, %v1551_v9  ;;  %v11668_v28 = vmul.f32 %v1039_v19, %v1039_v19  ;;  %v1045_v44 = vld [vmem:[%s8885_s25 + $0x8f0] sm:$0xff]  ;;  %v1559_v19 = vld [vmem:[%s8891_s21 + $0x900] sm:$0xff] }
 0x32a   : > { %6149 = vst [vmem:[#allocation2 + $0x590] sm:$0xff] %v5637_v5  ;;  %v4616_v26 = vsub.f32 %v3080_v61, %v8165_v23  ;;  %8180 = vpow2.f32 %v3881_v18  ;;  %v5639_v29 = vadd.f32 %v5127_v48, %v4615_v56  ;;  %v11670_v32 = vadd.f32 1.0, %v1552_v62  ;;  %v1558_v62 = vld [vmem:[%s8891_s21 + $0x8f8] sm:$0xff] }
 0x32b   : > { %6150 = vst [vmem:[#allocation2 + $0xb00] sm:$0xff] %v5638_v24  ;;  %v11672_v33 = vmul.f32 %v1040_v6, %v1040_v6  ;;  %v3883_v34 = vmul.f32 1.442695, %v1553_v22  ;;  %v3083_v39 = vsub.f32 %v11640_v7, %v11645_v11  ;;  %v3084_v42 = vsub.f32 %v11649_v15, %v11651_v17  ;;  %v5132_v11 = vld [vmem:[#allocation2 + $0x258] sm:$0xff]  ;;  %v1560_v6 = vld [vmem:[%s8891_s21 + $0x908] sm:$0xff] }
 0x32c   : > { %v8167_v36 = vpop.eup %8166  ;;  %v5640_v37 = vadd.f32 %v5128_v57, %v4616_v26  ;;  %v3885_v45 = vmul.f32 1.442695, %v1554_v25  ;;  %6151 = vst [vmem:[#allocation2 + $0x6c8] sm:$0xff] %v5639_v29  ;;  %v3085_v52 = vsub.f32 %v11654_v3, %v11657_v49  ;;  %v3086_v53 = vsub.f32 %v11659_v4, %v11663_v16  ;;  %v5133_v5 = vld [vmem:[#allocation2 + $0x7f8] sm:$0xff]  ;;  %v5135_v29 = vld [vmem:[#allocation2 + $0x648] sm:$0xff] }
 0x32d   : > { %v8169_v47 = vpop.eup %8168  ;;  %v4617_v50 = vsub.f32 %v3081_v2, %v8167_v36  ;;  %8182 = vpow2.f32 %v3883_v34  ;;  %v3087_v58 = vsub.f32 %v11666_v27, %v11668_v28  ;;  %v3887_v60 = vmul.f32 1.442695, %v1555_v35  ;;  %v5134_v23 = vld [vmem:[#allocation2 + $0x278] sm:$0xff] }
 0x32e   : > { %6152 = vst [vmem:[#allocation2 + $0xee8] sm:$0xff] %v5640_v37  ;;  %v4618_v55 = vsub.f32 %v3082_v63, %v8169_v47  ;;  %8184 = vpow2.f32 %v3885_v45  ;;  %v8171_v61 = vpop.eup %8170  ;;  %v3088_v2 = vsub.f32 %v11670_v32, %v11672_v33  ;;  %v11690_v7 = vadd.f32 1.0, %v1553_v22  ;;  %v1047_v45 = vld [vmem:[%s8885_s25 + $0x900] sm:$0xff] }
 0x32f   : > { %v5641_v0 = vadd.f32 %v5129_v38, %v4617_v50  ;;  %v3889_v9 = vmul.f32 1.442695, %v1556_v46  ;;  %v4619_v63 = vsub.f32 %v3083_v39, %v8171_v61  ;;  %v11694_v40 = vmul.f32 %v1041_v54, %v1041_v54  ;;  %v5136_v39 = vld [vmem:[#allocation2 + $0x120] sm:$0xff] }
 0x330   : > { %v8173_v30 = vpop.eup %8172  ;;  %v5642_v31 = vadd.f32 %v5130_v51, %v4618_v55  ;;  %8186 = vpow2.f32 %v3887_v60  ;;  %v11698_v13 = vadd.f32 1.0, %v1554_v25  ;;  %v11700_v14 = vmul.f32 %v1042_v59, %v1042_v59  ;;  %v1046_v25 = vld [vmem:[%s8885_s25 + $0x8f8] sm:$0xff]  ;;  %v1563_v60 = vld [vmem:[%s8891_s21 + $0x920] sm:$0xff] }
 0x331   : > { %6153 = vst [vmem:[#allocation2 + $0x848] sm:$0xff] %v5641_v0  ;;  %v4620_v12 = vsub.f32 %v3084_v42, %v8173_v30  ;;  %8188 = vpow2.f32 %v3889_v9  ;;  %v5643_v15 = vadd.f32 %v5131_v1, %v4619_v63  ;;  %v11702_v17 = vadd.f32 1.0, %v1555_v35  ;;  %v1561_v35 = vld [vmem:[%s8891_s21 + $0x910] sm:$0xff]  ;;  %v5138_v63 = vld [vmem:[#allocation2 + $0x718] sm:$0xff] }
 0x332   : > { %6154 = vst [vmem:[#allocation2 + $0xe78] sm:$0xff] %v5642_v31  ;;  %v11704_v43 = vmul.f32 %v1043_v8, %v1043_v8  ;;  %v3891_v3 = vmul.f32 1.442695, %v1557_v10  ;;  %v11708_v48 = vadd.f32 1.0, %v1556_v46  ;;  %v11710_v49 = vmul.f32 %v1044_v41, %v1044_v41  ;;  %v1562_v46 = vld [vmem:[%s8891_s21 + $0x918] sm:$0xff]  ;;  %v5137_v1 = vld [vmem:[#allocation2 + $0x330] sm:$0xff] }
 0x333   : > { %v8175_v20 = vpop.eup %8174  ;;  %v5644_v21 = vadd.f32 %v5132_v11, %v4620_v12  ;;  %v3893_v4 = vmul.f32 1.442695, %v1558_v62  ;;  %6155 = vst [vmem:[#allocation2 + $0x640] sm:$0xff] %v5643_v15  ;;  %v3089_v24 = vsub.f32 %v11690_v7, %v11694_v40  ;;  %v11715_v56 = vadd.f32 1.0, %v1557_v10  ;;  %v1050_v8 = vld [vmem:[%s8885_s25 + $0x918] sm:$0xff]  ;;  %v1564_v10 = vld [vmem:[%s8891_s21 + $0x928] sm:$0xff] }
 0x334   : > { %v8177_v18 = vpop.eup %8176  ;;  %v4621_v22 = vsub.f32 %v3085_v52, %v8175_v20  ;;  %8190 = vpow2.f32 %v3891_v3  ;;  %v11717_v16 = vmul.f32 %v1045_v44, %v1045_v44  ;;  %v3895_v26 = vmul.f32 1.442695, %v1559_v19  ;;  %v1048_v52 = vld [vmem:[%s8885_s25 + $0x908] sm:$0xff]  ;;  %v1565_v3 = vld [vmem:[%s8891_s21 + $0x930] sm:$0xff] }
 0x335   : > { %6156 = vst [vmem:[#allocation2 + $0x258] sm:$0xff] %v5644_v21  ;;  %v4622_v57 = vsub.f32 %v3086_v53, %v8177_v18  ;;  %8192 = vpow2.f32 %v3893_v4  ;;  %v3090_v32 = vsub.f32 %v11698_v13, %v11700_v14  ;;  %v3091_v33 = vsub.f32 %v11702_v17, %v11704_v43  ;;  %v5139_v15 = vld [vmem:[#allocation2 + $0x968] sm:$0xff]  ;;  %v1566_v4 = vld [vmem:[%s8891_s21 + $0x938] sm:$0xff] }
 0x336   : > { %v8179_v27 = vpop.eup %8178  ;;  %v5645_v28 = vadd.f32 %v5133_v5, %v4621_v22  ;;  %v3897_v34 = vmul.f32 1.442695, %v1560_v6  ;;  %v3092_v42 = vsub.f32 %v11708_v48, %v11710_v49  ;;  %8194 = vpow2.f32 %v3895_v26  ;;  %v5140_v5 = vld [vmem:[#allocation2 + $0x7f0] sm:$0xff]  ;;  %v1051_v49 = vld [vmem:[%s8885_s25 + $0x920] sm:$0xff] }
 0x337   : > { %v8181_v36 = vpop.eup %8180  ;;  %v5646_v37 = vadd.f32 %v5134_v23, %v4622_v57  ;;  %v4623_v38 = vsub.f32 %v3087_v58, %v8179_v27  ;;  %v11729_v50 = vadd.f32 1.0, %v1558_v62  ;;  %v11731_v51 = vmul.f32 %v1046_v25, %v1046_v25  ;;  %v1049_v58 = vld [vmem:[%s8885_s25 + $0x910] sm:$0xff]  ;;  %v1052_v23 = vld [vmem:[%s8885_s25 + $0x928] sm:$0xff]  ;;  %v1567_v25 = vld [vmem:[%s8891_s21 + $0x940] sm:$0xff] }
 0x338   : > { %6157 = vst [vmem:[#allocation2 + $0x7f8] sm:$0xff] %v5645_v28  ;;  %v4624_v47 = vsub.f32 %v3088_v2, %v8181_v36  ;;  %8196 = vpow2.f32 %v3897_v34  ;;  %v3093_v54 = vsub.f32 %v11715_v56, %v11717_v16  ;;  %v11736_v55 = vadd.f32 1.0, %v1559_v19  ;;  %v5141_v28 = vld [vmem:[#allocation2 + $0x2f8] sm:$0xff] }
 0x339   : > { %6158 = vst [vmem:[#allocation2 + $0x278] sm:$0xff] %v5646_v37  ;;  %v5647_v53 = vadd.f32 %v5135_v29, %v4623_v38  ;;  %v3899_v59 = vmul.f32 1.442695, %v1561_v35  ;;  %v11740_v2 = vmul.f32 %v1047_v45, %v1047_v45  ;;  %v11742_v7 = vadd.f32 1.0, %v1560_v6  ;;  %v5142_v38 = vld [vmem:[#allocation2 + $0xc20] sm:$0xff]  ;;  %v1054_v45 = vld [vmem:[%s8885_s25 + $0x938] sm:$0xff] }
 0x33a   : > { %v8183_v61 = vpop.eup %8182  ;;  %v5648_v0 = vadd.f32 %v5136_v39, %v4624_v47  ;;  %v3901_v9 = vmul.f32 1.442695, %v1562_v46  ;;  %v11746_v11 = vmul.f32 %v1048_v52, %v1048_v52  ;;  %v11748_v40 = vadd.f32 1.0, %v1561_v35  ;;  %v1568_v35 = vld [vmem:[%s8891_s21 + $0x948] sm:$0xff] }
 0x33b   : > { %v8185_v30 = vpop.eup %8184  ;;  %6159 = vst [vmem:[#allocation2 + $0x648] sm:$0xff] %v5647_v53  ;;  %v4625_v31 = vsub.f32 %v3089_v24, %v8183_v61  ;;  %8198 = vpow2.f32 %v3899_v59  ;;  %v11750_v62 = vmul.f32 %v1049_v58, %v1049_v58  ;;  %v3903_v12 = vmul.f32 1.442695, %v1563_v60  ;;  %v1056_v59 = vld [vmem:[%s8885_s25 + $0x948] sm:$0xff]  ;;  %v1569_v61 = vld [vmem:[%s8891_s21 + $0x950] sm:$0xff] }
 0x33c   : > { %6160 = vst [vmem:[#allocation2 + $0x120] sm:$0xff] %v5648_v0  ;;  %v4626_v41 = vsub.f32 %v3090_v32, %v8185_v30  ;;  %8200 = vpow2.f32 %v3901_v9  ;;  %v11752_v17 = vadd.f32 1.0, %v1562_v46  ;;  %v11754_v43 = vmul.f32 %v1050_v8, %v1050_v8  ;;  %v1570_v9 = vld [vmem:[%s8891_s21 + $0x958] sm:$0xff] }
 0x33d   : > { %v8187_v13 = vpop.eup %8186  ;;  %v5649_v14 = vadd.f32 %v5137_v1, %v4625_v31  ;;  %v3905_v44 = vmul.f32 1.442695, %v1564_v10  ;;  %v3094_v48 = vsub.f32 %v11729_v50, %v11731_v51  ;;  %8202 = vpow2.f32 %v3903_v12  ;;  %v1055_v50 = vld [vmem:[%s8885_s25 + $0x940] sm:$0xff] }
 0x33e   : > { %v8189_v19 = vpop.eup %8188  ;;  %v5650_v20 = vadd.f32 %v5138_v63, %v4626_v41  ;;  %v4627_v21 = vsub.f32 %v3091_v33, %v8187_v13  ;;  %v3095_v18 = vsub.f32 %v11736_v55, %v11740_v2  ;;  %v3096_v22 = vsub.f32 %v11742_v7, %v11746_v11  ;;  %v1053_v33 = vld [vmem:[%s8885_s25 + $0x930] sm:$0xff]  ;;  %v5144_v7 = vld [vmem:[#allocation2 + $0xe8] sm:$0xff] }
 0x33f   : > { %6161 = vst [vmem:[#allocation2 + $0x330] sm:$0xff] %v5649_v14  ;;  %v4628_v6 = vsub.f32 %v3092_v42, %v8189_v19  ;;  %8204 = vpow2.f32 %v3905_v44  ;;  %v3097_v56 = vsub.f32 %v11748_v40, %v11750_v62  ;;  %v11768_v57 = vadd.f32 1.0, %v1563_v60  ;;  %v1571_v62 = vld [vmem:[%s8891_s21 + $0x960] sm:$0xff]  ;;  %v5145_v14 = vld [vmem:[#allocation2 + $0xfd0] sm:$0xff]  ;;  %v1572_v44 = vld [vmem:[%s8891_s21 + $0x968] sm:$0xff] }
 0x340   : > { %6162 = vst [vmem:[#allocation2 + $0x718] sm:$0xff] %v5650_v20  ;;  %v5651_v24 = vadd.f32 %v5139_v15, %v4627_v21  ;;  %v3907_v16 = vmul.f32 1.442695, %v1565_v3  ;;  %v3098_v29 = vsub.f32 %v11752_v17, %v11754_v43  ;;  %v11773_v32 = vmul.f32 %v1051_v49, %v1051_v49  ;;  %v5146_v20 = vld [vmem:[#allocation2 + $0x8a8] sm:$0xff] }
 0x341   : > { %v8191_v26 = vpop.eup %8190  ;;  %v5652_v27 = vadd.f32 %v5140_v5, %v4628_v6  ;;  %v3909_v34 = vmul.f32 1.442695, %v1566_v4  ;;  %v11777_v39 = vadd.f32 1.0, %v1564_v10  ;;  %v11779_v42 = vmul.f32 %v1052_v23, %v1052_v23  ;;  %v1058_v6 = vld [vmem:[%s8885_s25 + $0x958] sm:$0xff] }
 0x342   : > { %v8193_v36 = vpop.eup %8192  ;;  %6163 = vst [vmem:[#allocation2 + $0x968] sm:$0xff] %v5651_v24  ;;  %v4629_v37 = vsub.f32 %v3093_v54, %v8191_v26  ;;  %8206 = vpow2.f32 %v3907_v16  ;;  %v11782_v47 = vadd.f32 1.0, %v1565_v3  ;;  %v3911_v51 = vmul.f32 1.442695, %v1567_v25  ;;  %v5143_v54 = vld [vmem:[#allocation2] sm:$0xff]  ;;  %v5147_v24 = vld [vmem:[#allocation2 + $0xad8] sm:$0xff] }
 0x343   : > { %6164 = vst [vmem:[#allocation2 + $0x7f0] sm:$0xff] %v5652_v27  ;;  %v4630_v46 = vsub.f32 %v3094_v48, %v8193_v36  ;;  %8208 = vpow2.f32 %v3909_v34  ;;  %v8195_v52 = vpop.eup %8194  ;;  %v11785_v55 = vmul.f32 %v1053_v33, %v1053_v33  ;;  %v11787_v58 = vadd.f32 1.0, %v1566_v4  ;;  %v1057_v48 = vld [vmem:[%s8885_s25 + $0x950] sm:$0xff]  ;;  %v1059_v16 = vld [vmem:[%s8885_s25 + $0x960] sm:$0xff]  ;;  %v1060_v34 = vld [vmem:[%s8885_s25 + $0x968] sm:$0xff] }
 0x344   : > { %v5653_v53 = vadd.f32 %v5141_v28, %v4629_v37  ;;  %v3913_v60 = vmul.f32 1.442695, %v1568_v35  ;;  %v4631_v2 = vsub.f32 %v3095_v18, %v8195_v52  ;;  %v11791_v8 = vmul.f32 %v1054_v45, %v1054_v45  ;;  %v1573_v26 = vld [vmem:[%s8891_s21 + $0x970] sm:$0xff] }
 0x345   : > { %v8197_v0 = vpop.eup %8196  ;;  %v5654_v1 = vadd.f32 %v5142_v38, %v4630_v46  ;;  %8210 = vpow2.f32 %v3911_v51  ;;  %v11794_v30 = vadd.f32 1.0, %v1567_v25  ;;  %v11796_v31 = vmul.f32 %v1055_v50, %v1055_v50  ;;  %v1061_v46 = vld [vmem:[%s8885_s25 + $0x970] sm:$0xff]  ;;  %v1575_v50 = vld [vmem:[%s8891_s21 + $0x980] sm:$0xff] }
 0x346   : > { %6165 = vst [vmem:[#allocation2 + $0x2f8] sm:$0xff] %v5653_v53  ;;  %v4632_v10 = vsub.f32 %v3096_v22, %v8197_v0  ;;  %8212 = vpow2.f32 %v3913_v60  ;;  %v5655_v63 = vadd.f32 %v5143_v54, %v4631_v2  ;;  %v11798_v11 = vadd.f32 1.0, %v1568_v35  ;;  %v1574_v35 = vld [vmem:[%s8891_s21 + $0x978] sm:$0xff]  ;;  %v5149_v53 = vld [vmem:[#allocation2 + $0x80] sm:$0xff]  ;;  %v5150_v0 = vld [vmem:[#allocation2 + $0xda8] sm:$0xff] }
 0x347   : > { %6166 = vst [vmem:[#allocation2 + $0xc20] sm:$0xff] %v5654_v1  ;;  %v11800_v40 = vmul.f32 %v1056_v59, %v1056_v59  ;;  %v3915_v41 = vmul.f32 1.442695, %v1569_v61  ;;  %v3099_v15 = vsub.f32 %v11768_v57, %v11773_v32  ;;  %v3100_v17 = vsub.f32 %v11777_v39, %v11779_v42  ;;  %v5148_v32 = vld [vmem:[#allocation2 + $0x878] sm:$0xff]  ;;  %v1576_v59 = vld [vmem:[%s8891_s21 + $0x988] sm:$0xff] }
 0x348   : > { %v8199_v12 = vpop.eup %8198  ;;  %v5656_v13 = vadd.f32 %v5144_v7, %v4632_v10  ;;  %v3917_v43 = vmul.f32 1.442695, %v1570_v9  ;;  %6167 = vst [vmem:[#allocation2] sm:$0xff] %v5655_v63  ;;  %v3101_v21 = vsub.f32 %v11782_v47, %v11785_v55  ;;  %v3102_v5 = vsub.f32 %v11787_v58, %v11791_v8  ;;  %v5151_v63 = vld [vmem:[#allocation2 + $0x670] sm:$0xff] }
 0x349   : > { %v8201_v3 = vpop.eup %8200  ;;  %v4633_v19 = vsub.f32 %v3097_v56, %v8199_v12  ;;  %8214 = vpow2.f32 %v3915_v41  ;;  %v3103_v4 = vsub.f32 %v11794_v30, %v11796_v31  ;;  %v3919_v18 = vmul.f32 1.442695, %v1571_v62 }
 0x34a   : > { %6168 = vst [vmem:[#allocation2 + $0xe8] sm:$0xff] %v5656_v13  ;;  %v4634_v49 = vsub.f32 %v3098_v29, %v8201_v3  ;;  %8216 = vpow2.f32 %v3917_v43  ;;  %v8203_v22 = vpop.eup %8202  ;;  %v3104_v56 = vsub.f32 %v11798_v11, %v11800_v40  ;;  %v11818_v57 = vadd.f32 1.0, %v1569_v61  ;;  %v1063_v43 = vld [vmem:[%s8885_s25 + $0x980] sm:$0xff] }
 0x34b   : > { %v5657_v23 = vadd.f32 %v5145_v14, %v4633_v19  ;;  %v3921_v25 = vmul.f32 1.442695, %v1572_v44  ;;  %v4635_v29 = vsub.f32 %v3099_v15, %v8203_v22  ;;  %v11822_v33 = vmul.f32 %v1057_v48, %v1057_v48  ;;  %v5152_v15 = vld [vmem:[#allocation2 + $0xda0] sm:$0xff] }
 0x34c   : > { %v8205_v27 = vpop.eup %8204  ;;  %v5658_v28 = vadd.f32 %v5146_v20, %v4634_v49  ;;  %8218 = vpow2.f32 %v3919_v18  ;;  %v11826_v37 = vadd.f32 1.0, %v1570_v9  ;;  %v11828_v38 = vmul.f32 %v1058_v6, %v1058_v6  ;;  %v1062_v9 = vld [vmem:[%s8885_s25 + $0x978] sm:$0xff]  ;;  %v1579_v18 = vld [vmem:[%s8891_s21 + $0x9a0] sm:$0xff] }
 0x34d   : > { %6169 = vst [vmem:[#allocation2 + $0xfd0] sm:$0xff] %v5657_v23  ;;  %v4636_v36 = vsub.f32 %v3100_v17, %v8205_v27  ;;  %8220 = vpow2.f32 %v3921_v25  ;;  %v5659_v39 = vadd.f32 %v5147_v24, %v4635_v29  ;;  %v11830_v42 = vadd.f32 1.0, %v1571_v62  ;;  %v1577_v62 = vld [vmem:[%s8891_s21 + $0x990] sm:$0xff]  ;;  %v5154_v29 = vld [vmem:[#allocation2 + $0x20] sm:$0xff] }
 0x34e   : > { %6170 = vst [vmem:[#allocation2 + $0x8a8] sm:$0xff] %v5658_v28  ;;  %v11832_v45 = vmul.f32 %v1059_v16, %v1059_v16  ;;  %v3923_v47 = vmul.f32 1.442695, %v1573_v26  ;;  %v11836_v54 = vadd.f32 1.0, %v1572_v44  ;;  %v11838_v55 = vmul.f32 %v1060_v34, %v1060_v34  ;;  %v1578_v44 = vld [vmem:[%s8891_s21 + $0x998] sm:$0xff]  ;;  %v5153_v24 = vld [vmem:[#allocation2 + $0x530] sm:$0xff] }
 0x34f   : > { %v8207_v51 = vpop.eup %8206  ;;  %v5660_v52 = vadd.f32 %v5148_v32, %v4636_v36  ;;  %v3925_v58 = vmul.f32 1.442695, %v1574_v35  ;;  %6171 = vst [vmem:[#allocation2 + $0xad8] sm:$0xff] %v5659_v39  ;;  %v3105_v1 = vsub.f32 %v11818_v57, %v11822_v33  ;;  %v11843_v2 = vadd.f32 1.0, %v1573_v26  ;;  %v1066_v16 = vld [vmem:[%s8885_s25 + $0x998] sm:$0xff]  ;;  %v1580_v26 = vld [vmem:[%s8891_s21 + $0x9a8] sm:$0xff] }
 0x350   : > { %v8209_v60 = vpop.eup %8208  ;;  %v4637_v61 = vsub.f32 %v3101_v21, %v8207_v51  ;;  %8222 = vpow2.f32 %v3923_v47  ;;  %v11845_v8 = vmul.f32 %v1061_v46, %v1061_v46  ;;  %v3927_v10 = vmul.f32 1.442695, %v1575_v50  ;;  %v1064_v21 = vld [vmem:[%s8885_s25 + $0x988] sm:$0xff]  ;;  %v5155_v39 = vld [vmem:[#allocation2 + $0xf70] sm:$0xff] }
 0x351   : > { %6172 = vst [vmem:[#allocation2 + $0x878] sm:$0xff] %v5660_v52  ;;  %v4638_v7 = vsub.f32 %v3102_v5, %v8209_v60  ;;  %8224 = vpow2.f32 %v3925_v58  ;;  %v3106_v11 = vsub.f32 %v11826_v37, %v11828_v38  ;;  %v3107_v40 = vsub.f32 %v11830_v42, %v11832_v45  ;;  %v1581_v47 = vld [vmem:[%s8891_s21 + $0x9b0] sm:$0xff]  ;;  %v1582_v58 = vld [vmem:[%s8891_s21 + $0x9b8] sm:$0xff] }
 0x352   : > { %v8211_v30 = vpop.eup %8210  ;;  %v5661_v31 = vadd.f32 %v5149_v53, %v4637_v61  ;;  %v3929_v41 = vmul.f32 1.442695, %v1576_v59  ;;  %v3108_v17 = vsub.f32 %v11836_v54, %v11838_v55  ;;  %8226 = vpow2.f32 %v3927_v10  ;;  %v5156_v53 = vld [vmem:[#allocation2 + $0xeb8] sm:$0xff]  ;;  %v1067_v55 = vld [vmem:[%s8885_s25 + $0x9a0] sm:$0xff] }
 0x353   : > { %v8213_v12 = vpop.eup %8212  ;;  %v5662_v13 = vadd.f32 %v5150_v0, %v4638_v7  ;;  %v4639_v14 = vsub.f32 %v3103_v4, %v8211_v30  ;;  %v11857_v19 = vadd.f32 1.0, %v1574_v35  ;;  %v11859_v20 = vmul.f32 %v1062_v9, %v1062_v9  ;;  %v1065_v4 = vld [vmem:[%s8885_s25 + $0x990] sm:$0xff]  ;;  %v1068_v0 = vld [vmem:[%s8885_s25 + $0x9a8] sm:$0xff]  ;;  %v1583_v9 = vld [vmem:[%s8891_s21 + $0x9c0] sm:$0xff] }
 0x354   : > { %6173 = vst [vmem:[#allocation2 + $0x80] sm:$0xff] %v5661_v31  ;;  %v4640_v3 = vsub.f32 %v3104_v56, %v8213_v12  ;;  %8228 = vpow2.f32 %v3929_v41  ;;  %v3109_v48 = vsub.f32 %v11843_v2, %v11845_v8  ;;  %v11864_v49 = vadd.f32 1.0, %v1575_v50  ;;  %v5157_v31 = vld [vmem:[#allocation2 + $0x88] sm:$0xff] }
 0x355   : > { %6174 = vst [vmem:[#allocation2 + $0xda8] sm:$0xff] %v5662_v13  ;;  %v5663_v5 = vadd.f32 %v5151_v63, %v4639_v14  ;;  %v3931_v6 = vmul.f32 1.442695, %v1577_v62  ;;  %v11868_v56 = vmul.f32 %v1063_v43, %v1063_v43  ;;  %v11870_v57 = vadd.f32 1.0, %v1576_v59  ;;  %v5158_v14 = vld [vmem:[#allocation2 + $0x318] sm:$0xff] }
 0x356   : > { %v8215_v22 = vpop.eup %8214  ;;  %v5664_v23 = vadd.f32 %v5152_v15, %v4640_v3  ;;  %v3933_v25 = vmul.f32 1.442695, %v1578_v44  ;;  %v11874_v32 = vmul.f32 %v1064_v21, %v1064_v21  ;;  %v11876_v33 = vadd.f32 1.0, %v1577_v62  ;;  %v1584_v62 = vld [vmem:[%s8891_s21 + $0x9c8] sm:$0xff]  ;;  %v1070_v43 = vld [vmem:[%s8885_s25 + $0x9b8] sm:$0xff] }
 0x357   : > { %v8217_v27 = vpop.eup %8216  ;;  %6175 = vst [vmem:[#allocation2 + $0x670] sm:$0xff] %v5663_v5  ;;  %v4641_v28 = vsub.f32 %v3105_v1, %v8215_v22  ;;  %8230 = vpow2.f32 %v3931_v6  ;;  %v11878_v35 = vmul.f32 %v1065_v4, %v1065_v4  ;;  %v3935_v36 = vmul.f32 1.442695, %v1579_v18  ;;  %v1072_v6 = vld [vmem:[%s8885_s25 + $0x9c8] sm:$0xff]  ;;  %v1585_v22 = vld [vmem:[%s8891_s21 + $0x9d0] sm:$0xff] }
 0x358   : > { %6176 = vst [vmem:[#allocation2 + $0xda0] sm:$0xff] %v5664_v23  ;;  %v4642_v34 = vsub.f32 %v3106_v11, %v8217_v27  ;;  %8232 = vpow2.f32 %v3933_v25  ;;  %v11880_v42 = vadd.f32 1.0, %v1578_v44  ;;  %v11882_v45 = vmul.f32 %v1066_v16, %v1066_v16  ;;  %v1586_v25 = vld [vmem:[%s8891_s21 + $0x9d8] sm:$0xff] }
 0x359   : > { %v8219_v37 = vpop.eup %8218  ;;  %v5665_v38 = vadd.f32 %v5153_v24, %v4641_v28  ;;  %v3937_v46 = vmul.f32 1.442695, %v1580_v26  ;;  %v3110_v54 = vsub.f32 %v11857_v19, %v11859_v20  ;;  %8234 = vpow2.f32 %v3935_v36  ;;  %v1071_v19 = vld [vmem:[%s8885_s25 + $0x9c0] sm:$0xff] }
 0x35a   : > { %v8221_v50 = vpop.eup %8220  ;;  %v5666_v51 = vadd.f32 %v5154_v29, %v4642_v34  ;;  %v4643_v52 = vsub.f32 %v3107_v40, %v8219_v37  ;;  %v3111_v60 = vsub.f32 %v11864_v49, %v11868_v56  ;;  %v3112_v61 = vsub.f32 %v11870_v57, %v11874_v32  ;;  %v1069_v40 = vld [vmem:[%s8885_s25 + $0x9b0] sm:$0xff] }
 0x35b   : > { %6177 = vst [vmem:[#allocation2 + $0x530] sm:$0xff] %v5665_v38  ;;  %v4644_v59 = vsub.f32 %v3108_v17, %v8221_v50  ;;  %8236 = vpow2.f32 %v3937_v46  ;;  %v3113_v2 = vsub.f32 %v11876_v33, %v11878_v35  ;;  %v11896_v7 = vadd.f32 1.0, %v1579_v18  ;;  %v5160_v57 = vld [vmem:[#allocation2 + $0x430] sm:$0xff]  ;;  %v1587_v35 = vld [vmem:[%s8891_s21 + $0x9e0] sm:$0xff]  ;;  %v5161_v38 = vld [vmem:[#allocation2 + $0x8b8] sm:$0xff] }
 0x35c   : > { %6178 = vst [vmem:[#allocation2 + $0x20] sm:$0xff] %v5666_v51  ;;  %v5667_v1 = vadd.f32 %v5155_v39, %v4643_v52  ;;  %v3939_v8 = vmul.f32 1.442695, %v1581_v47  ;;  %v3114_v63 = vsub.f32 %v11880_v42, %v11882_v45  ;;  %v11901_v11 = vmul.f32 %v1067_v55, %v1067_v55  ;;  %v1588_v46 = vld [vmem:[%s8891_s21 + $0x9e8] sm:$0xff]  ;;  %v5162_v51 = vld [vmem:[#allocation2 + $0x4b0] sm:$0xff] }
 0x35d   : > { %v8223_v10 = vpop.eup %8222  ;;  %v5668_v30 = vadd.f32 %v5156_v53, %v4644_v59  ;;  %v3941_v41 = vmul.f32 1.442695, %v1582_v58  ;;  %v11905_v15 = vadd.f32 1.0, %v1580_v26  ;;  %v11907_v17 = vmul.f32 %v1068_v0, %v1068_v0  ;;  %v1074_v59 = vld [vmem:[%s8885_s25 + $0x9d8] sm:$0xff] }
 0x35e   : > { %v8225_v12 = vpop.eup %8224  ;;  %6179 = vst [vmem:[#allocation2 + $0xf70] sm:$0xff] %v5667_v1  ;;  %v4645_v13 = vsub.f32 %v3109_v48, %v8223_v10  ;;  %8238 = vpow2.f32 %v3939_v8  ;;  %v11910_v3 = vadd.f32 1.0, %v1581_v47  ;;  %v3943_v20 = vmul.f32 1.442695, %v1583_v9  ;;  %v5159_v48 = vld [vmem:[#allocation2 + $0x520] sm:$0xff]  ;;  %v5163_v1 = vld [vmem:[#allocation2 + $0xa38] sm:$0xff] }
 0x35f   : > { %6180 = vst [vmem:[#allocation2 + $0xeb8] sm:$0xff] %v5668_v30  ;;  %v4646_v44 = vsub.f32 %v3110_v54, %v8225_v12  ;;  %8240 = vpow2.f32 %v3941_v41  ;;  %v8227_v21 = vpop.eup %8226  ;;  %v11913_v49 = vmul.f32 %v1069_v40, %v1069_v40  ;;  %v11915_v4 = vadd.f32 1.0, %v1582_v58  ;;  %v1073_v54 = vld [vmem:[%s8885_s25 + $0x9d0] sm:$0xff]  ;;  %v1075_v8 = vld [vmem:[%s8885_s25 + $0x9e0] sm:$0xff]  ;;  %v1076_v41 = vld [vmem:[%s8885_s25 + $0x9e8] sm:$0xff] }
 0x360   : > { %v5669_v5 = vadd.f32 %v5157_v31, %v4645_v13  ;;  %v3945_v18 = vmul.f32 1.442695, %v1584_v62  ;;  %v4647_v56 = vsub.f32 %v3111_v60, %v8227_v21  ;;  %v11919_v16 = vmul.f32 %v1070_v43, %v1070_v43  ;;  %v1589_v10 = vld [vmem:[%s8891_s21 + $0x9f0] sm:$0xff] }
 0x361   : > { %v8229_v23 = vpop.eup %8228  ;;  %v5670_v24 = vadd.f32 %v5158_v14, %v4646_v44  ;;  %8242 = vpow2.f32 %v3943_v20  ;;  %v11922_v27 = vadd.f32 1.0, %v1583_v9  ;;  %v11924_v28 = vmul.f32 %v1071_v19, %v1071_v19  ;;  %v1077_v44 = vld [vmem:[%s8885_s25 + $0x9f0] sm:$0xff]  ;;  %v1591_v19 = vld [vmem:[%s8891_s21 + $0xa00] sm:$0xff] }
 0x362   : > { %6181 = vst [vmem:[#allocation2 + $0x88] sm:$0xff] %v5669_v5  ;;  %v4648_v26 = vsub.f32 %v3112_v61, %v8229_v23  ;;  %8244 = vpow2.f32 %v3945_v18  ;;  %v5671_v29 = vadd.f32 %v5159_v48, %v4647_v56  ;;  %v11926_v32 = vadd.f32 1.0, %v1584_v62  ;;  %v1590_v62 = vld [vmem:[%s8891_s21 + $0x9f8] sm:$0xff]  ;;  %v5165_v5 = vld [vmem:[#allocation2 + $0xd80] sm:$0xff] }
 0x363   : > { %6182 = vst [vmem:[#allocation2 + $0x318] sm:$0xff] %v5670_v24  ;;  %v11928_v33 = vmul.f32 %v1072_v6, %v1072_v6  ;;  %v3947_v34 = vmul.f32 1.442695, %v1585_v22  ;;  %v3115_v39 = vsub.f32 %v11896_v7, %v11901_v11  ;;  %v3116_v42 = vsub.f32 %v11905_v15, %v11907_v17  ;;  %v5164_v11 = vld [vmem:[#allocation2 + $0x588] sm:$0xff]  ;;  %v5166_v23 = vld [vmem:[#allocation2 + $0xa0] sm:$0xff] }
 0x364   : > { %v8231_v36 = vpop.eup %8230  ;;  %v5672_v37 = vadd.f32 %v5160_v57, %v4648_v26  ;;  %v3949_v45 = vmul.f32 1.442695, %v1586_v25  ;;  %6183 = vst [vmem:[#allocation2 + $0x520] sm:$0xff] %v5671_v29  ;;  %v3117_v52 = vsub.f32 %v11910_v3, %v11913_v49  ;;  %v3118_v53 = vsub.f32 %v11915_v4, %v11919_v16  ;;  %v1592_v6 = vld [vmem:[%s8891_s21 + $0xa08] sm:$0xff]  ;;  %v5167_v29 = vld [vmem:[#allocation2 + $0x550] sm:$0xff] }
 0x365   : > { %v8233_v47 = vpop.eup %8232  ;;  %v4649_v50 = vsub.f32 %v3113_v2, %v8231_v36  ;;  %8246 = vpow2.f32 %v3947_v34  ;;  %v3119_v58 = vsub.f32 %v11922_v27, %v11924_v28  ;;  %v3951_v60 = vmul.f32 1.442695, %v1587_v35 }
 0x366   : > { %6184 = vst [vmem:[#allocation2 + $0x430] sm:$0xff] %v5672_v37  ;;  %v4650_v55 = vsub.f32 %v3114_v63, %v8233_v47  ;;  %8248 = vpow2.f32 %v3949_v45  ;;  %v8235_v61 = vpop.eup %8234  ;;  %v3120_v2 = vsub.f32 %v11926_v32, %v11928_v33  ;;  %v11946_v7 = vadd.f32 1.0, %v1585_v22  ;;  %v1079_v45 = vld [vmem:[%s8885_s25 + $0xa00] sm:$0xff] }
 0x367   : > { %v5673_v0 = vadd.f32 %v5161_v38, %v4649_v50  ;;  %v3953_v9 = vmul.f32 1.442695, %v1588_v46  ;;  %v4651_v63 = vsub.f32 %v3115_v39, %v8235_v61  ;;  %v11950_v40 = vmul.f32 %v1073_v54, %v1073_v54  ;;  %v5168_v39 = vld [vmem:[#allocation2 + $0xf98] sm:$0xff] }
 0x368   : > { %v8237_v30 = vpop.eup %8236  ;;  %v5674_v31 = vadd.f32 %v5162_v51, %v4650_v55  ;;  %8250 = vpow2.f32 %v3951_v60  ;;  %v11954_v13 = vadd.f32 1.0, %v1586_v25  ;;  %v11956_v14 = vmul.f32 %v1074_v59, %v1074_v59  ;;  %v1078_v25 = vld [vmem:[%s8885_s25 + $0x9f8] sm:$0xff]  ;;  %v1595_v60 = vld [vmem:[%s8891_s21 + $0xa20] sm:$0xff] }
 0x369   : > { %6185 = vst [vmem:[#allocation2 + $0x8b8] sm:$0xff] %v5673_v0  ;;  %v4652_v12 = vsub.f32 %v3116_v42, %v8237_v30  ;;  %8252 = vpow2.f32 %v3953_v9  ;;  %v5675_v15 = vadd.f32 %v5163_v1, %v4651_v63  ;;  %v11958_v17 = vadd.f32 1.0, %v1587_v35  ;;  %v1593_v35 = vld [vmem:[%s8891_s21 + $0xa10] sm:$0xff]  ;;  %v5169_v1 = vld [vmem:[#allocation2 + $0x4f8] sm:$0xff]  ;;  %v5170_v63 = vld [vmem:[#allocation2 + $0xce0] sm:$0xff] }
 0x36a   : > { %6186 = vst [vmem:[#allocation2 + $0x4b0] sm:$0xff] %v5674_v31  ;;  %v11960_v43 = vmul.f32 %v1075_v8, %v1075_v8  ;;  %v3955_v3 = vmul.f32 1.442695, %v1589_v10  ;;  %v11964_v48 = vadd.f32 1.0, %v1588_v46  ;;  %v11966_v49 = vmul.f32 %v1076_v41, %v1076_v41  ;;  %v1594_v46 = vld [vmem:[%s8891_s21 + $0xa18] sm:$0xff] }
 0x36b   : > { %v8239_v20 = vpop.eup %8238  ;;  %v5676_v21 = vadd.f32 %v5164_v11, %v4652_v12  ;;  %v3957_v4 = vmul.f32 1.442695, %v1590_v62  ;;  %6187 = vst [vmem:[#allocation2 + $0xa38] sm:$0xff] %v5675_v15  ;;  %v3121_v24 = vsub.f32 %v11946_v7, %v11950_v40  ;;  %v11971_v56 = vadd.f32 1.0, %v1589_v10  ;;  %v1082_v8 = vld [vmem:[%s8885_s25 + $0xa18] sm:$0xff]  ;;  %v1596_v10 = vld [vmem:[%s8891_s21 + $0xa28] sm:$0xff] }
 0x36c   : > { %v8241_v18 = vpop.eup %8240  ;;  %v4653_v22 = vsub.f32 %v3117_v52, %v8239_v20  ;;  %8254 = vpow2.f32 %v3955_v3  ;;  %v11973_v16 = vmul.f32 %v1077_v44, %v1077_v44  ;;  %v3959_v26 = vmul.f32 1.442695, %v1591_v19  ;;  %v1080_v52 = vld [vmem:[%s8885_s25 + $0xa08] sm:$0xff]  ;;  %v1597_v3 = vld [vmem:[%s8891_s21 + $0xa30] sm:$0xff] }
 0x36d   : > { %6188 = vst [vmem:[#allocation2 + $0x588] sm:$0xff] %v5676_v21  ;;  %v4654_v57 = vsub.f32 %v3118_v53, %v8241_v18  ;;  %8256 = vpow2.f32 %v3957_v4  ;;  %v3122_v32 = vsub.f32 %v11954_v13, %v11956_v14  ;;  %v3123_v33 = vsub.f32 %v11958_v17, %v11960_v43  ;;  %v5171_v15 = vld [vmem:[#allocation2 + $0xfc8] sm:$0xff]  ;;  %v1598_v4 = vld [vmem:[%s8891_s21 + $0xa38] sm:$0xff] }
 0x36e   : > { %v8243_v27 = vpop.eup %8242  ;;  %v5677_v28 = vadd.f32 %v5165_v5, %v4653_v22  ;;  %v3961_v34 = vmul.f32 1.442695, %v1592_v6  ;;  %v3124_v42 = vsub.f32 %v11964_v48, %v11966_v49  ;;  %8258 = vpow2.f32 %v3959_v26  ;;  %v5172_v5 = vld [vmem:[#allocation2 + $0xf48] sm:$0xff]  ;;  %v1083_v49 = vld [vmem:[%s8885_s25 + $0xa20] sm:$0xff] }
 0x36f   : > { %v8245_v36 = vpop.eup %8244  ;;  %v5678_v37 = vadd.f32 %v5166_v23, %v4654_v57  ;;  %v4655_v38 = vsub.f32 %v3119_v58, %v8243_v27  ;;  %v11985_v50 = vadd.f32 1.0, %v1590_v62  ;;  %v11987_v51 = vmul.f32 %v1078_v25, %v1078_v25  ;;  %v1081_v58 = vld [vmem:[%s8885_s25 + $0xa10] sm:$0xff]  ;;  %v1084_v23 = vld [vmem:[%s8885_s25 + $0xa28] sm:$0xff]  ;;  %v1599_v25 = vld [vmem:[%s8891_s21 + $0xa40] sm:$0xff] }
 0x370   : > { %6189 = vst [vmem:[#allocation2 + $0xd80] sm:$0xff] %v5677_v28  ;;  %v4656_v47 = vsub.f32 %v3120_v2, %v8245_v36  ;;  %8260 = vpow2.f32 %v3961_v34  ;;  %v3125_v54 = vsub.f32 %v11971_v56, %v11973_v16  ;;  %v11992_v55 = vadd.f32 1.0, %v1591_v19  ;;  %v5173_v28 = vld [vmem:[#allocation2 + $0x828] sm:$0xff] }
 0x371   : > { %6190 = vst [vmem:[#allocation2 + $0xa0] sm:$0xff] %v5678_v37  ;;  %v5679_v53 = vadd.f32 %v5167_v29, %v4655_v38  ;;  %v3963_v59 = vmul.f32 1.442695, %v1593_v35  ;;  %v11996_v2 = vmul.f32 %v1079_v45, %v1079_v45  ;;  %v11998_v7 = vadd.f32 1.0, %v1592_v6  ;;  %v5174_v38 = vld [vmem:[#allocation2 + $0xe40] sm:$0xff]  ;;  %v1086_v45 = vld [vmem:[%s8885_s25 + $0xa38] sm:$0xff] }
 0x372   : > { %v8247_v61 = vpop.eup %8246  ;;  %v5680_v0 = vadd.f32 %v5168_v39, %v4656_v47  ;;  %v3965_v9 = vmul.f32 1.442695, %v1594_v46  ;;  %v12002_v11 = vmul.f32 %v1080_v52, %v1080_v52  ;;  %v12004_v40 = vadd.f32 1.0, %v1593_v35  ;;  %v1600_v35 = vld [vmem:[%s8891_s21 + $0xa48] sm:$0xff] }
 0x373   : > { %v8249_v30 = vpop.eup %8248  ;;  %6191 = vst [vmem:[#allocation2 + $0x550] sm:$0xff] %v5679_v53  ;;  %v4657_v31 = vsub.f32 %v3121_v24, %v8247_v61  ;;  %8262 = vpow2.f32 %v3963_v59  ;;  %v12006_v62 = vmul.f32 %v1081_v58, %v1081_v58  ;;  %v3967_v12 = vmul.f32 1.442695, %v1595_v60  ;;  %v1088_v59 = vld [vmem:[%s8885_s25 + $0xa48] sm:$0xff]  ;;  %v1601_v61 = vld [vmem:[%s8891_s21 + $0xa50] sm:$0xff] }
 0x374   : > { %6192 = vst [vmem:[#allocation2 + $0xf98] sm:$0xff] %v5680_v0  ;;  %v4658_v41 = vsub.f32 %v3122_v32, %v8249_v30  ;;  %8264 = vpow2.f32 %v3965_v9  ;;  %v12008_v17 = vadd.f32 1.0, %v1594_v46  ;;  %v12010_v43 = vmul.f32 %v1082_v8, %v1082_v8  ;;  %v1602_v9 = vld [vmem:[%s8891_s21 + $0xa58] sm:$0xff] }
 0x375   : > { %v8251_v13 = vpop.eup %8250  ;;  %v5681_v14 = vadd.f32 %v5169_v1, %v4657_v31  ;;  %v3969_v44 = vmul.f32 1.442695, %v1596_v10  ;;  %v3126_v48 = vsub.f32 %v11985_v50, %v11987_v51  ;;  %8266 = vpow2.f32 %v3967_v12  ;;  %v1087_v50 = vld [vmem:[%s8885_s25 + $0xa40] sm:$0xff] }
 0x376   : > { %v8253_v19 = vpop.eup %8252  ;;  %v5682_v20 = vadd.f32 %v5170_v63, %v4658_v41  ;;  %v4659_v21 = vsub.f32 %v3123_v33, %v8251_v13  ;;  %v3127_v18 = vsub.f32 %v11992_v55, %v11996_v2  ;;  %v3128_v22 = vsub.f32 %v11998_v7, %v12002_v11  ;;  %v1085_v33 = vld [vmem:[%s8885_s25 + $0xa30] sm:$0xff]  ;;  %v5176_v7 = vld [vmem:[#allocation2 + $0x3e0] sm:$0xff] }
 0x377   : > { %6193 = vst [vmem:[#allocation2 + $0x4f8] sm:$0xff] %v5681_v14  ;;  %v4660_v6 = vsub.f32 %v3124_v42, %v8253_v19  ;;  %8268 = vpow2.f32 %v3969_v44  ;;  %v3129_v56 = vsub.f32 %v12004_v40, %v12006_v62  ;;  %v12024_v57 = vadd.f32 1.0, %v1595_v60  ;;  %v1603_v62 = vld [vmem:[%s8891_s21 + $0xa60] sm:$0xff]  ;;  %v1604_v44 = vld [vmem:[%s8891_s21 + $0xa68] sm:$0xff] }
 0x378   : > { %6194 = vst [vmem:[#allocation2 + $0xce0] sm:$0xff] %v5682_v20  ;;  %v5683_v24 = vadd.f32 %v5171_v15, %v4659_v21  ;;  %v3971_v16 = vmul.f32 1.442695, %v1597_v3  ;;  %v3130_v29 = vsub.f32 %v12008_v17, %v12010_v43  ;;  %v12029_v32 = vmul.f32 %v1083_v49, %v1083_v49  ;;  %v5177_v14 = vld [vmem:[#allocation2 + $0xf80] sm:$0xff]  ;;  %v5178_v20 = vld [vmem:[#allocation2 + $0xf50] sm:$0xff] }
 0x379   : > { %v8255_v26 = vpop.eup %8254  ;;  %v5684_v27 = vadd.f32 %v5172_v5, %v4660_v6  ;;  %v3973_v34 = vmul.f32 1.442695, %v1598_v4  ;;  %v12033_v39 = vadd.f32 1.0, %v1596_v10  ;;  %v12035_v42 = vmul.f32 %v1084_v23, %v1084_v23  ;;  %v1090_v6 = vld [vmem:[%s8885_s25 + $0xa58] sm:$0xff] }
 0x37a   : > { %v8257_v36 = vpop.eup %8256  ;;  %6195 = vst [vmem:[#allocation2 + $0xfc8] sm:$0xff] %v5683_v24  ;;  %v4661_v37 = vsub.f32 %v3125_v54, %v8255_v26  ;;  %8270 = vpow2.f32 %v3971_v16  ;;  %v12038_v47 = vadd.f32 1.0, %v1597_v3  ;;  %v3975_v51 = vmul.f32 1.442695, %v1599_v25  ;;  %v5175_v54 = vld [vmem:[#allocation2 + $0x978] sm:$0xff]  ;;  %v5179_v24 = vld [vmem:[#allocation2 + $0x1b0] sm:$0xff] }
 0x37b   : > { %6196 = vst [vmem:[#allocation2 + $0xf48] sm:$0xff] %v5684_v27  ;;  %v4662_v46 = vsub.f32 %v3126_v48, %v8257_v36  ;;  %8272 = vpow2.f32 %v3973_v34  ;;  %v8259_v52 = vpop.eup %8258  ;;  %v12041_v55 = vmul.f32 %v1085_v33, %v1085_v33  ;;  %v12043_v58 = vadd.f32 1.0, %v1598_v4  ;;  %v1089_v48 = vld [vmem:[%s8885_s25 + $0xa50] sm:$0xff]  ;;  %v1091_v16 = vld [vmem:[%s8885_s25 + $0xa60] sm:$0xff]  ;;  %v1092_v34 = vld [vmem:[%s8885_s25 + $0xa68] sm:$0xff] }
 0x37c   : > { %v5685_v53 = vadd.f32 %v5173_v28, %v4661_v37  ;;  %v3977_v60 = vmul.f32 1.442695, %v1600_v35  ;;  %v4663_v2 = vsub.f32 %v3127_v18, %v8259_v52  ;;  %v12047_v8 = vmul.f32 %v1086_v45, %v1086_v45  ;;  %v1605_v26 = vld [vmem:[%s8891_s21 + $0xa70] sm:$0xff] }
 0x37d   : > { %v8261_v0 = vpop.eup %8260  ;;  %v5686_v1 = vadd.f32 %v5174_v38, %v4662_v46  ;;  %8274 = vpow2.f32 %v3975_v51  ;;  %v12050_v30 = vadd.f32 1.0, %v1599_v25  ;;  %v12052_v31 = vmul.f32 %v1087_v50, %v1087_v50  ;;  %v1093_v46 = vld [vmem:[%s8885_s25 + $0xa70] sm:$0xff]  ;;  %v1607_v50 = vld [vmem:[%s8891_s21 + $0xa80] sm:$0xff] }
 0x37e   : > { %6197 = vst [vmem:[#allocation2 + $0x828] sm:$0xff] %v5685_v53  ;;  %v4664_v10 = vsub.f32 %v3128_v22, %v8261_v0  ;;  %8276 = vpow2.f32 %v3977_v60  ;;  %v5687_v63 = vadd.f32 %v5175_v54, %v4663_v2  ;;  %v12054_v11 = vadd.f32 1.0, %v1600_v35  ;;  %v1606_v35 = vld [vmem:[%s8891_s21 + $0xa78] sm:$0xff]  ;;  %v5181_v53 = vld [vmem:[#allocation2 + $0xfb0] sm:$0xff] }
 0x37f   : > { %6198 = vst [vmem:[#allocation2 + $0xe40] sm:$0xff] %v5686_v1  ;;  %v12056_v40 = vmul.f32 %v1088_v59, %v1088_v59  ;;  %v3979_v41 = vmul.f32 1.442695, %v1601_v61  ;;  %v3131_v15 = vsub.f32 %v12024_v57, %v12029_v32  ;;  %v3132_v17 = vsub.f32 %v12033_v39, %v12035_v42  ;;  %v5180_v32 = vld [vmem:[#allocation2 + $0xdc0] sm:$0xff]  ;;  %v1608_v59 = vld [vmem:[%s8891_s21 + $0xa88] sm:$0xff]  ;;  %v5182_v0 = vld [vmem:[#allocation2 + $0xdb8] sm:$0xff] }
 0x380   : > { %v8263_v12 = vpop.eup %8262  ;;  %v5688_v13 = vadd.f32 %v5176_v7, %v4664_v10  ;;  %v3981_v43 = vmul.f32 1.442695, %v1602_v9  ;;  %6199 = vst [vmem:[#allocation2 + $0x978] sm:$0xff] %v5687_v63  ;;  %v3133_v21 = vsub.f32 %v12038_v47, %v12041_v55  ;;  %v3134_v5 = vsub.f32 %v12043_v58, %v12047_v8  ;;  %v5183_v63 = vld [vmem:[#allocation2 + $0x350] sm:$0xff] }
 0x381   : > { %v8265_v3 = vpop.eup %8264  ;;  %v4665_v19 = vsub.f32 %v3129_v56, %v8263_v12  ;;  %8278 = vpow2.f32 %v3979_v41  ;;  %v3135_v4 = vsub.f32 %v12050_v30, %v12052_v31  ;;  %v3983_v18 = vmul.f32 1.442695, %v1603_v62 }
 0x382   : > { %6200 = vst [vmem:[#allocation2 + $0x3e0] sm:$0xff] %v5688_v13  ;;  %v4666_v49 = vsub.f32 %v3130_v29, %v8265_v3  ;;  %8280 = vpow2.f32 %v3981_v43  ;;  %v8267_v22 = vpop.eup %8266  ;;  %v3136_v56 = vsub.f32 %v12054_v11, %v12056_v40  ;;  %v12074_v57 = vadd.f32 1.0, %v1601_v61  ;;  %v1095_v43 = vld [vmem:[%s8885_s25 + $0xa80] sm:$0xff] }
 0x383   : > { %v5689_v23 = vadd.f32 %v5177_v14, %v4665_v19  ;;  %v3985_v25 = vmul.f32 1.442695, %v1604_v44  ;;  %v4667_v29 = vsub.f32 %v3131_v15, %v8267_v22  ;;  %v12078_v33 = vmul.f32 %v1089_v48, %v1089_v48  ;;  %v5184_v15 = vld [vmem:[#allocation2 + $0x388] sm:$0xff] }
 0x384   : > { %v8269_v27 = vpop.eup %8268  ;;  %v5690_v28 = vadd.f32 %v5178_v20, %v4666_v49  ;;  %8282 = vpow2.f32 %v3983_v18  ;;  %v12082_v37 = vadd.f32 1.0, %v1602_v9  ;;  %v12084_v38 = vmul.f32 %v1090_v6, %v1090_v6  ;;  %v1094_v9 = vld [vmem:[%s8885_s25 + $0xa78] sm:$0xff]  ;;  %v1611_v18 = vld [vmem:[%s8891_s21 + $0xaa0] sm:$0xff] }
 0x385   : > { %6201 = vst [vmem:[#allocation2 + $0xf80] sm:$0xff] %v5689_v23  ;;  %v4668_v36 = vsub.f32 %v3132_v17, %v8269_v27  ;;  %8284 = vpow2.f32 %v3985_v25  ;;  %v5691_v39 = vadd.f32 %v5179_v24, %v4667_v29  ;;  %v12086_v42 = vadd.f32 1.0, %v1603_v62  ;;  %v1609_v62 = vld [vmem:[%s8891_s21 + $0xa90] sm:$0xff]  ;;  %v5185_v24 = vld [vmem:[#allocation2 + $0xa78] sm:$0xff]  ;;  %v5186_v29 = vld [vmem:[#allocation2 + $0xcc0] sm:$0xff] }
 0x386   : > { %6202 = vst [vmem:[#allocation2 + $0xf50] sm:$0xff] %v5690_v28  ;;  %v12088_v45 = vmul.f32 %v1091_v16, %v1091_v16  ;;  %v3987_v47 = vmul.f32 1.442695, %v1605_v26  ;;  %v12092_v54 = vadd.f32 1.0, %v1604_v44  ;;  %v12094_v55 = vmul.f32 %v1092_v34, %v1092_v34  ;;  %v1610_v44 = vld [vmem:[%s8891_s21 + $0xa98] sm:$0xff] }
 0x387   : > { %v8271_v51 = vpop.eup %8270  ;;  %v5692_v52 = vadd.f32 %v5180_v32, %v4668_v36  ;;  %v3989_v58 = vmul.f32 1.442695, %v1606_v35  ;;  %6203 = vst [vmem:[#allocation2 + $0x1b0] sm:$0xff] %v5691_v39  ;;  %v3137_v1 = vsub.f32 %v12074_v57, %v12078_v33  ;;  %v12099_v2 = vadd.f32 1.0, %v1605_v26  ;;  %v1098_v16 = vld [vmem:[%s8885_s25 + $0xa98] sm:$0xff]  ;;  %v1612_v26 = vld [vmem:[%s8891_s21 + $0xaa8] sm:$0xff] }
 0x388   : > { %v8273_v60 = vpop.eup %8272  ;;  %v4669_v61 = vsub.f32 %v3133_v21, %v8271_v51  ;;  %8286 = vpow2.f32 %v3987_v47  ;;  %v12101_v8 = vmul.f32 %v1093_v46, %v1093_v46  ;;  %v3991_v10 = vmul.f32 1.442695, %v1607_v50  ;;  %v1096_v21 = vld [vmem:[%s8885_s25 + $0xa88] sm:$0xff]  ;;  %v5187_v39 = vld [vmem:[#allocation2 + $0xf40] sm:$0xff]  ;;  %v1613_v47 = vld [vmem:[%s8891_s21 + $0xab0] sm:$0xff] }
 0x389   : > { %6204 = vst [vmem:[#allocation2 + $0xdc0] sm:$0xff] %v5692_v52  ;;  %v4670_v7 = vsub.f32 %v3134_v5, %v8273_v60  ;;  %8288 = vpow2.f32 %v3989_v58  ;;  %v3138_v11 = vsub.f32 %v12082_v37, %v12084_v38  ;;  %v3139_v40 = vsub.f32 %v12086_v42, %v12088_v45  ;;  %v1614_v58 = vld [vmem:[%s8891_s21 + $0xab8] sm:$0xff] }
 0x38a   : > { %v8275_v30 = vpop.eup %8274  ;;  %v5693_v31 = vadd.f32 %v5181_v53, %v4669_v61  ;;  %v3993_v41 = vmul.f32 1.442695, %v1608_v59  ;;  %v3140_v17 = vsub.f32 %v12092_v54, %v12094_v55  ;;  %8290 = vpow2.f32 %v3991_v10  ;;  %v5188_v53 = vld [vmem:[#allocation2 + $0x908] sm:$0xff]  ;;  %v1099_v55 = vld [vmem:[%s8885_s25 + $0xaa0] sm:$0xff] }
 0x38b   : > { %v8277_v12 = vpop.eup %8276  ;;  %v5694_v13 = vadd.f32 %v5182_v0, %v4670_v7  ;;  %v4671_v14 = vsub.f32 %v3135_v4, %v8275_v30  ;;  %v12113_v19 = vadd.f32 1.0, %v1606_v35  ;;  %v12115_v20 = vmul.f32 %v1094_v9, %v1094_v9  ;;  %v1097_v4 = vld [vmem:[%s8885_s25 + $0xa90] sm:$0xff]  ;;  %v1100_v0 = vld [vmem:[%s8885_s25 + $0xaa8] sm:$0xff]  ;;  %v1615_v9 = vld [vmem:[%s8891_s21 + $0xac0] sm:$0xff] }
 0x38c   : > { %6205 = vst [vmem:[#allocation2 + $0xfb0] sm:$0xff] %v5693_v31  ;;  %v4672_v3 = vsub.f32 %v3136_v56, %v8277_v12  ;;  %8292 = vpow2.f32 %v3993_v41  ;;  %v3141_v48 = vsub.f32 %v12099_v2, %v12101_v8  ;;  %v12120_v49 = vadd.f32 1.0, %v1607_v50  ;;  %v5189_v31 = vld [vmem:[#allocation2 + $0xc10] sm:$0xff] }
 0x38d   : > { %6206 = vst [vmem:[#allocation2 + $0xdb8] sm:$0xff] %v5694_v13  ;;  %v5695_v5 = vadd.f32 %v5183_v63, %v4671_v14  ;;  %v3995_v6 = vmul.f32 1.442695, %v1609_v62  ;;  %v12124_v56 = vmul.f32 %v1095_v43, %v1095_v43  ;;  %v12126_v57 = vadd.f32 1.0, %v1608_v59  ;;  %v5190_v14 = vld [vmem:[#allocation2 + $0x1a0] sm:$0xff]  ;;  %v1102_v43 = vld [vmem:[%s8885_s25 + $0xab8] sm:$0xff] }
 0x38e   : > { %v8279_v22 = vpop.eup %8278  ;;  %v5696_v23 = vadd.f32 %v5184_v15, %v4672_v3  ;;  %v3997_v25 = vmul.f32 1.442695, %v1610_v44  ;;  %v12130_v32 = vmul.f32 %v1096_v21, %v1096_v21  ;;  %v12132_v33 = vadd.f32 1.0, %v1609_v62  ;;  %v1616_v62 = vld [vmem:[%s8891_s21 + $0xac8] sm:$0xff] }
 0x38f   : > { %v8281_v27 = vpop.eup %8280  ;;  %6207 = vst [vmem:[#allocation2 + $0x350] sm:$0xff] %v5695_v5  ;;  %v4673_v28 = vsub.f32 %v3137_v1, %v8279_v22  ;;  %8294 = vpow2.f32 %v3995_v6  ;;  %v12134_v35 = vmul.f32 %v1097_v4, %v1097_v4  ;;  %v3999_v36 = vmul.f32 1.442695, %v1611_v18  ;;  %v1104_v6 = vld [vmem:[%s8885_s25 + $0xac8] sm:$0xff]  ;;  %v1617_v22 = vld [vmem:[%s8891_s21 + $0xad0] sm:$0xff] }
 0x390   : > { %6208 = vst [vmem:[#allocation2 + $0x388] sm:$0xff] %v5696_v23  ;;  %v4674_v34 = vsub.f32 %v3138_v11, %v8281_v27  ;;  %8296 = vpow2.f32 %v3997_v25  ;;  %v12136_v42 = vadd.f32 1.0, %v1610_v44  ;;  %v12138_v45 = vmul.f32 %v1098_v16, %v1098_v16  ;;  %v1618_v25 = vld [vmem:[%s8891_s21 + $0xad8] sm:$0xff] }
 0x391   : > { %v8283_v37 = vpop.eup %8282  ;;  %v5697_v38 = vadd.f32 %v5185_v24, %v4673_v28  ;;  %v4001_v46 = vmul.f32 1.442695, %v1612_v26  ;;  %v3142_v54 = vsub.f32 %v12113_v19, %v12115_v20  ;;  %8298 = vpow2.f32 %v3999_v36  ;;  %v1103_v19 = vld [vmem:[%s8885_s25 + $0xac0] sm:$0xff] }
 0x392   : > { %v8285_v50 = vpop.eup %8284  ;;  %v5698_v51 = vadd.f32 %v5186_v29, %v4674_v34  ;;  %v4675_v52 = vsub.f32 %v3139_v40, %v8283_v37  ;;  %v3143_v60 = vsub.f32 %v12120_v49, %v12124_v56  ;;  %v3144_v61 = vsub.f32 %v12126_v57, %v12130_v32  ;;  %v1101_v40 = vld [vmem:[%s8885_s25 + $0xab0] sm:$0xff]  ;;  %v5192_v57 = vld [vmem:[#allocation2 + $0xfa0] sm:$0xff] }
 0x393   : > { %6209 = vst [vmem:[#allocation2 + $0xa78] sm:$0xff] %v5697_v38  ;;  %v4676_v59 = vsub.f32 %v3140_v17, %v8285_v50  ;;  %8300 = vpow2.f32 %v4001_v46  ;;  %v3145_v2 = vsub.f32 %v12132_v33, %v12134_v35  ;;  %v12152_v7 = vadd.f32 1.0, %v1611_v18  ;;  %v1619_v35 = vld [vmem:[%s8891_s21 + $0xae0] sm:$0xff]  ;;  %v5193_v38 = vld [vmem:[#allocation2 + $0xcb0] sm:$0xff]  ;;  %v1620_v46 = vld [vmem:[%s8891_s21 + $0xae8] sm:$0xff] }
 0x394   : > { %6210 = vst [vmem:[#allocation2 + $0xcc0] sm:$0xff] %v5698_v51  ;;  %v5699_v1 = vadd.f32 %v5187_v39, %v4675_v52  ;;  %v4003_v8 = vmul.f32 1.442695, %v1613_v47  ;;  %v3146_v63 = vsub.f32 %v12136_v42, %v12138_v45  ;;  %v12157_v11 = vmul.f32 %v1099_v55, %v1099_v55  ;;  %v5194_v51 = vld [vmem:[#allocation2 + $0x168] sm:$0xff] }
 0x395   : > { %v8287_v10 = vpop.eup %8286  ;;  %v5700_v30 = vadd.f32 %v5188_v53, %v4676_v59  ;;  %v4005_v41 = vmul.f32 1.442695, %v1614_v58  ;;  %v12161_v15 = vadd.f32 1.0, %v1612_v26  ;;  %v12163_v17 = vmul.f32 %v1100_v0, %v1100_v0  ;;  %v1106_v59 = vld [vmem:[%s8885_s25 + $0xad8] sm:$0xff] }
 0x396   : > { %v8289_v12 = vpop.eup %8288  ;;  %6211 = vst [vmem:[#allocation2 + $0xf40] sm:$0xff] %v5699_v1  ;;  %v4677_v13 = vsub.f32 %v3141_v48, %v8287_v10  ;;  %8302 = vpow2.f32 %v4003_v8  ;;  %v12166_v3 = vadd.f32 1.0, %v1613_v47  ;;  %v4007_v20 = vmul.f32 1.442695, %v1615_v9  ;;  %v5191_v48 = vld [vmem:[#allocation2 + $0x4d0] sm:$0xff]  ;;  %v5195_v1 = vld [vmem:[#allocation2 + $0xf28] sm:$0xff] }
 0x397   : > { %6212 = vst [vmem:[#allocation2 + $0x908] sm:$0xff] %v5700_v30  ;;  %v4678_v44 = vsub.f32 %v3142_v54, %v8289_v12  ;;  %8304 = vpow2.f32 %v4005_v41  ;;  %v8291_v21 = vpop.eup %8290  ;;  %v12169_v49 = vmul.f32 %v1101_v40, %v1101_v40  ;;  %v12171_v4 = vadd.f32 1.0, %v1614_v58  ;;  %v1105_v54 = vld [vmem:[%s8885_s25 + $0xad0] sm:$0xff]  ;;  %v1107_v8 = vld [vmem:[%s8885_s25 + $0xae0] sm:$0xff]  ;;  %v1108_v41 = vld [vmem:[%s8885_s25 + $0xae8] sm:$0xff] }
 0x398   : > { %v5701_v5 = vadd.f32 %v5189_v31, %v4677_v13  ;;  %v4009_v18 = vmul.f32 1.442695, %v1616_v62  ;;  %v4679_v56 = vsub.f32 %v3143_v60, %v8291_v21  ;;  %v12175_v16 = vmul.f32 %v1102_v43, %v1102_v43  ;;  %v1621_v10 = vld [vmem:[%s8891_s21 + $0xaf0] sm:$0xff] }
 0x399   : > { %v8293_v23 = vpop.eup %8292  ;;  %v5702_v24 = vadd.f32 %v5190_v14, %v4678_v44  ;;  %8306 = vpow2.f32 %v4007_v20  ;;  %v12178_v27 = vadd.f32 1.0, %v1615_v9  ;;  %v12180_v28 = vmul.f32 %v1103_v19, %v1103_v19  ;;  %v1109_v44 = vld [vmem:[%s8885_s25 + $0xaf0] sm:$0xff]  ;;  %v1623_v19 = vld [vmem:[%s8891_s21 + $0xb00] sm:$0xff] }
 0x39a   : > { %6213 = vst [vmem:[#allocation2 + $0xc10] sm:$0xff] %v5701_v5  ;;  %v4680_v26 = vsub.f32 %v3144_v61, %v8293_v23  ;;  %8308 = vpow2.f32 %v4009_v18  ;;  %v5703_v29 = vadd.f32 %v5191_v48, %v4679_v56  ;;  %v12182_v32 = vadd.f32 1.0, %v1616_v62  ;;  %v1622_v62 = vld [vmem:[%s8891_s21 + $0xaf8] sm:$0xff]  ;;  %v5197_v5 = vld [vmem:[#allocation2 + $0xdc8] sm:$0xff]  ;;  %v5198_v23 = vld [vmem:[#allocation2 + $0x560] sm:$0xff] }
 0x39b   : > { %6214 = vst [vmem:[#allocation2 + $0x1a0] sm:$0xff] %v5702_v24  ;;  %v12184_v33 = vmul.f32 %v1104_v6, %v1104_v6  ;;  %v4011_v34 = vmul.f32 1.442695, %v1617_v22  ;;  %v3147_v39 = vsub.f32 %v12152_v7, %v12157_v11  ;;  %v3148_v42 = vsub.f32 %v12161_v15, %v12163_v17  ;;  %v5196_v11 = vld [vmem:[#allocation2 + $0xf88] sm:$0xff] }
 0x39c   : > { %v8295_v36 = vpop.eup %8294  ;;  %v5704_v37 = vadd.f32 %v5192_v57, %v4680_v26  ;;  %v4013_v45 = vmul.f32 1.442695, %v1618_v25  ;;  %6215 = vst [vmem:[#allocation2 + $0x4d0] sm:$0xff] %v5703_v29  ;;  %v3149_v52 = vsub.f32 %v12166_v3, %v12169_v49  ;;  %v3150_v53 = vsub.f32 %v12171_v4, %v12175_v16  ;;  %v1624_v6 = vld [vmem:[%s8891_s21 + $0xb08] sm:$0xff] }
 0x39d   : > { %v8297_v47 = vpop.eup %8296  ;;  %v4681_v50 = vsub.f32 %v3145_v2, %v8295_v36  ;;  %8310 = vpow2.f32 %v4011_v34  ;;  %v3151_v58 = vsub.f32 %v12178_v27, %v12180_v28  ;;  %v4015_v60 = vmul.f32 1.442695, %v1619_v35  ;;  %v5199_v29 = vld [vmem:[#allocation2 + $0x888] sm:$0xff] }
 0x39e   : > { %6216 = vst [vmem:[#allocation2 + $0xfa0] sm:$0xff] %v5704_v37  ;;  %v4682_v55 = vsub.f32 %v3146_v63, %v8297_v47  ;;  %8312 = vpow2.f32 %v4013_v45  ;;  %v8299_v61 = vpop.eup %8298  ;;  %v3152_v2 = vsub.f32 %v12182_v32, %v12184_v33  ;;  %v12202_v7 = vadd.f32 1.0, %v1617_v22  ;;  %v1111_v45 = vld [vmem:[%s8885_s25 + $0xb00] sm:$0xff] }
 0x39f   : > { %v5705_v0 = vadd.f32 %v5193_v38, %v4681_v50  ;;  %v4017_v9 = vmul.f32 1.442695, %v1620_v46  ;;  %v4683_v63 = vsub.f32 %v3147_v39, %v8299_v61  ;;  %v12206_v40 = vmul.f32 %v1105_v54, %v1105_v54  ;;  %v5200_v39 = vld [vmem:[#allocation2 + $0x608] sm:$0xff] }
 0x3a0   : > { %v8301_v30 = vpop.eup %8300  ;;  %v5706_v31 = vadd.f32 %v5194_v51, %v4682_v55  ;;  %8314 = vpow2.f32 %v4015_v60  ;;  %v12210_v13 = vadd.f32 1.0, %v1618_v25  ;;  %v12212_v14 = vmul.f32 %v1106_v59, %v1106_v59  ;;  %v1110_v25 = vld [vmem:[%s8885_s25 + $0xaf8] sm:$0xff]  ;;  %v1627_v60 = vld [vmem:[%s8891_s21 + $0xb20] sm:$0xff] }
 0x3a1   : > { %6217 = vst [vmem:[#allocation2 + $0xcb0] sm:$0xff] %v5705_v0  ;;  %v4684_v12 = vsub.f32 %v3148_v42, %v8301_v30  ;;  %8316 = vpow2.f32 %v4017_v9  ;;  %v5707_v15 = vadd.f32 %v5195_v1, %v4683_v63  ;;  %v12214_v17 = vadd.f32 1.0, %v1619_v35  ;;  %v1625_v35 = vld [vmem:[%s8891_s21 + $0xb10] sm:$0xff]  ;;  %v5201_v1 = vld [vmem:[#allocation2 + $0x128] sm:$0xff]  ;;  %v5202_v63 = vld [vmem:[#allocation2 + $0x178] sm:$0xff] }
 0x3a2   : > { %6218 = vst [vmem:[#allocation2 + $0x168] sm:$0xff] %v5706_v31  ;;  %v12216_v43 = vmul.f32 %v1107_v8, %v1107_v8  ;;  %v4019_v3 = vmul.f32 1.442695, %v1621_v10  ;;  %v12220_v48 = vadd.f32 1.0, %v1620_v46  ;;  %v12222_v49 = vmul.f32 %v1108_v41, %v1108_v41  ;;  %v1626_v46 = vld [vmem:[%s8891_s21 + $0xb18] sm:$0xff] }
 0x3a3   : > { %v8303_v20 = vpop.eup %8302  ;;  %v5708_v21 = vadd.f32 %v5196_v11, %v4684_v12  ;;  %v4021_v4 = vmul.f32 1.442695, %v1622_v62  ;;  %6219 = vst [vmem:[#allocation2 + $0xf28] sm:$0xff] %v5707_v15  ;;  %v3153_v24 = vsub.f32 %v12202_v7, %v12206_v40  ;;  %v12227_v56 = vadd.f32 1.0, %v1621_v10  ;;  %v1114_v8 = vld [vmem:[%s8885_s25 + $0xb18] sm:$0xff]  ;;  %v1628_v10 = vld [vmem:[%s8891_s21 + $0xb28] sm:$0xff] }
 0x3a4   : > { %v8305_v18 = vpop.eup %8304  ;;  %v4685_v22 = vsub.f32 %v3149_v52, %v8303_v20  ;;  %8318 = vpow2.f32 %v4019_v3  ;;  %v12229_v16 = vmul.f32 %v1109_v44, %v1109_v44  ;;  %v4023_v26 = vmul.f32 1.442695, %v1623_v19  ;;  %v1112_v52 = vld [vmem:[%s8885_s25 + $0xb08] sm:$0xff]  ;;  %v5203_v15 = vld [vmem:[#allocation2 + $0xf8] sm:$0xff]  ;;  %v1629_v3 = vld [vmem:[%s8891_s21 + $0xb30] sm:$0xff] }
 0x3a5   : > { %6220 = vst [vmem:[#allocation2 + $0xf88] sm:$0xff] %v5708_v21  ;;  %v4686_v57 = vsub.f32 %v3150_v53, %v8305_v18  ;;  %8320 = vpow2.f32 %v4021_v4  ;;  %v3154_v32 = vsub.f32 %v12210_v13, %v12212_v14  ;;  %v3155_v33 = vsub.f32 %v12214_v17, %v12216_v43  ;;  %v1630_v4 = vld [vmem:[%s8891_s21 + $0xb38] sm:$0xff] }
 0x3a6   : > { %v8307_v27 = vpop.eup %8306  ;;  %v5709_v28 = vadd.f32 %v5197_v5, %v4685_v22  ;;  %v4025_v34 = vmul.f32 1.442695, %v1624_v6  ;;  %v3156_v42 = vsub.f32 %v12220_v48, %v12222_v49  ;;  %8322 = vpow2.f32 %v4023_v26  ;;  %v5204_v5 = vld [vmem:[#allocation2 + $0x8d0] sm:$0xff]  ;;  %v1115_v49 = vld [vmem:[%s8885_s25 + $0xb20] sm:$0xff] }
 0x3a7   : > { %v8309_v36 = vpop.eup %8308  ;;  %v5710_v37 = vadd.f32 %v5198_v23, %v4686_v57  ;;  %v4687_v38 = vsub.f32 %v3151_v58, %v8307_v27  ;;  %v12241_v50 = vadd.f32 1.0, %v1622_v62  ;;  %v12243_v51 = vmul.f32 %v1110_v25, %v1110_v25  ;;  %v1113_v58 = vld [vmem:[%s8885_s25 + $0xb10] sm:$0xff]  ;;  %v1116_v23 = vld [vmem:[%s8885_s25 + $0xb28] sm:$0xff]  ;;  %v1631_v25 = vld [vmem:[%s8891_s21 + $0xb40] sm:$0xff] }
 0x3a8   : > { %6221 = vst [vmem:[#allocation2 + $0xdc8] sm:$0xff] %v5709_v28  ;;  %v4688_v47 = vsub.f32 %v3152_v2, %v8309_v36  ;;  %8324 = vpow2.f32 %v4025_v34  ;;  %v3157_v54 = vsub.f32 %v12227_v56, %v12229_v16  ;;  %v12248_v55 = vadd.f32 1.0, %v1623_v19  ;;  %v5205_v28 = vld [vmem:[#allocation2 + $0x130] sm:$0xff] }
 0x3a9   : > { %6222 = vst [vmem:[#allocation2 + $0x560] sm:$0xff] %v5710_v37  ;;  %v5711_v53 = vadd.f32 %v5199_v29, %v4687_v38  ;;  %v4027_v59 = vmul.f32 1.442695, %v1625_v35  ;;  %v12252_v2 = vmul.f32 %v1111_v45, %v1111_v45  ;;  %v12254_v7 = vadd.f32 1.0, %v1624_v6  ;;  %v5206_v38 = vld [vmem:[#allocation2 + $0xa8] sm:$0xff]  ;;  %v1118_v45 = vld [vmem:[%s8885_s25 + $0xb38] sm:$0xff] }
 0x3aa   : > { %v8311_v61 = vpop.eup %8310  ;;  %v5712_v0 = vadd.f32 %v5200_v39, %v4688_v47  ;;  %v4029_v9 = vmul.f32 1.442695, %v1626_v46  ;;  %v12258_v11 = vmul.f32 %v1112_v52, %v1112_v52  ;;  %v12260_v40 = vadd.f32 1.0, %v1625_v35  ;;  %v1632_v35 = vld [vmem:[%s8891_s21 + $0xb48] sm:$0xff] }
 0x3ab   : > { %v8313_v30 = vpop.eup %8312  ;;  %6223 = vst [vmem:[#allocation2 + $0x888] sm:$0xff] %v5711_v53  ;;  %v4689_v31 = vsub.f32 %v3153_v24, %v8311_v61  ;;  %8326 = vpow2.f32 %v4027_v59  ;;  %v12262_v62 = vmul.f32 %v1113_v58, %v1113_v58  ;;  %v4031_v12 = vmul.f32 1.442695, %v1627_v60  ;;  %v1120_v59 = vld [vmem:[%s8885_s25 + $0xb48] sm:$0xff]  ;;  %v1633_v61 = vld [vmem:[%s8891_s21 + $0xb50] sm:$0xff] }
 0x3ac   : > { %6224 = vst [vmem:[#allocation2 + $0x608] sm:$0xff] %v5712_v0  ;;  %v4690_v41 = vsub.f32 %v3154_v32, %v8313_v30  ;;  %8328 = vpow2.f32 %v4029_v9  ;;  %v12264_v17 = vadd.f32 1.0, %v1626_v46  ;;  %v12266_v43 = vmul.f32 %v1114_v8, %v1114_v8  ;;  %v1634_v9 = vld [vmem:[%s8891_s21 + $0xb58] sm:$0xff] }
 0x3ad   : > { %v8315_v13 = vpop.eup %8314  ;;  %v5713_v14 = vadd.f32 %v5201_v1, %v4689_v31  ;;  %v4033_v44 = vmul.f32 1.442695, %v1628_v10  ;;  %v3158_v48 = vsub.f32 %v12241_v50, %v12243_v51  ;;  %8330 = vpow2.f32 %v4031_v12  ;;  %v1119_v50 = vld [vmem:[%s8885_s25 + $0xb40] sm:$0xff] }
 0x3ae   : > { %v8317_v19 = vpop.eup %8316  ;;  %v5714_v20 = vadd.f32 %v5202_v63, %v4690_v41  ;;  %v4691_v21 = vsub.f32 %v3155_v33, %v8315_v13  ;;  %v3159_v18 = vsub.f32 %v12248_v55, %v12252_v2  ;;  %v3160_v22 = vsub.f32 %v12254_v7, %v12258_v11  ;;  %v1117_v33 = vld [vmem:[%s8885_s25 + $0xb30] sm:$0xff]  ;;  %v5208_v7 = vld [vmem:[#allocation2 + $0xe58] sm:$0xff] }
 0x3af   : > { %6225 = vst [vmem:[#allocation2 + $0x128] sm:$0xff] %v5713_v14  ;;  %v4692_v6 = vsub.f32 %v3156_v42, %v8317_v19  ;;  %8332 = vpow2.f32 %v4033_v44  ;;  %v3161_v56 = vsub.f32 %v12260_v40, %v12262_v62  ;;  %v12280_v57 = vadd.f32 1.0, %v1627_v60  ;;  %v1635_v62 = vld [vmem:[%s8891_s21 + $0xb60] sm:$0xff]  ;;  %v5209_v14 = vld [vmem:[#allocation2 + $0x638] sm:$0xff]  ;;  %v1636_v44 = vld [vmem:[%s8891_s21 + $0xb68] sm:$0xff] }
 0x3b0   : > { %6226 = vst [vmem:[#allocation2 + $0x178] sm:$0xff] %v5714_v20  ;;  %v5715_v24 = vadd.f32 %v5203_v15, %v4691_v21  ;;  %v4035_v16 = vmul.f32 1.442695, %v1629_v3  ;;  %v3162_v29 = vsub.f32 %v12264_v17, %v12266_v43  ;;  %v12285_v32 = vmul.f32 %v1115_v49, %v1115_v49  ;;  %v5210_v20 = vld [vmem:[#allocation2 + $0x870] sm:$0xff] }
 0x3b1   : > { %v8319_v26 = vpop.eup %8318  ;;  %v5716_v27 = vadd.f32 %v5204_v5, %v4692_v6  ;;  %v4037_v34 = vmul.f32 1.442695, %v1630_v4  ;;  %v12289_v39 = vadd.f32 1.0, %v1628_v10  ;;  %v12291_v42 = vmul.f32 %v1116_v23, %v1116_v23  ;;  %v1122_v6 = vld [vmem:[%s8885_s25 + $0xb58] sm:$0xff] }
 0x3b2   : > { %v8321_v36 = vpop.eup %8320  ;;  %6227 = vst [vmem:[#allocation2 + $0xf8] sm:$0xff] %v5715_v24  ;;  %v4693_v37 = vsub.f32 %v3157_v54, %v8319_v26  ;;  %8334 = vpow2.f32 %v4035_v16  ;;  %v12294_v47 = vadd.f32 1.0, %v1629_v3  ;;  %v4039_v51 = vmul.f32 1.442695, %v1631_v25  ;;  %v5207_v54 = vld [vmem:[#allocation2 + $0x1d8] sm:$0xff]  ;;  %v5211_v24 = vld [vmem:[#allocation2 + $0xa40] sm:$0xff] }
 0x3b3   : > { %6228 = vst [vmem:[#allocation2 + $0x8d0] sm:$0xff] %v5716_v27  ;;  %v4694_v46 = vsub.f32 %v3158_v48, %v8321_v36  ;;  %8336 = vpow2.f32 %v4037_v34  ;;  %v8323_v52 = vpop.eup %8322  ;;  %v12297_v55 = vmul.f32 %v1117_v33, %v1117_v33  ;;  %v12299_v58 = vadd.f32 1.0, %v1630_v4  ;;  %v1121_v48 = vld [vmem:[%s8885_s25 + $0xb50] sm:$0xff]  ;;  %v1123_v16 = vld [vmem:[%s8885_s25 + $0xb60] sm:$0xff]  ;;  %v1124_v34 = vld [vmem:[%s8885_s25 + $0xb68] sm:$0xff] }
 0x3b4   : > { %v5717_v53 = vadd.f32 %v5205_v28, %v4693_v37  ;;  %v4041_v60 = vmul.f32 1.442695, %v1632_v35  ;;  %v4695_v2 = vsub.f32 %v3159_v18, %v8323_v52  ;;  %v12303_v8 = vmul.f32 %v1118_v45, %v1118_v45  ;;  %v1637_v26 = vld [vmem:[%s8891_s21 + $0xb70] sm:$0xff] }
 0x3b5   : > { %v8325_v0 = vpop.eup %8324  ;;  %v5718_v1 = vadd.f32 %v5206_v38, %v4694_v46  ;;  %8338 = vpow2.f32 %v4039_v51  ;;  %v12306_v30 = vadd.f32 1.0, %v1631_v25  ;;  %v12308_v31 = vmul.f32 %v1119_v50, %v1119_v50  ;;  %v1125_v46 = vld [vmem:[%s8885_s25 + $0xb70] sm:$0xff]  ;;  %v1639_v50 = vld [vmem:[%s8891_s21 + $0xb80] sm:$0xff] }
 0x3b6   : > { %6229 = vst [vmem:[#allocation2 + $0x130] sm:$0xff] %v5717_v53  ;;  %v4696_v10 = vsub.f32 %v3160_v22, %v8325_v0  ;;  %8340 = vpow2.f32 %v4041_v60  ;;  %v5719_v63 = vadd.f32 %v5207_v54, %v4695_v2  ;;  %v12310_v11 = vadd.f32 1.0, %v1632_v35  ;;  %v1638_v35 = vld [vmem:[%s8891_s21 + $0xb78] sm:$0xff]  ;;  %v5213_v53 = vld [vmem:[#allocation2 + $0xbe0] sm:$0xff]  ;;  %v5214_v0 = vld [vmem:[#allocation2 + $0xad0] sm:$0xff] }
 0x3b7   : > { %6230 = vst [vmem:[#allocation2 + $0xa8] sm:$0xff] %v5718_v1  ;;  %v12312_v40 = vmul.f32 %v1120_v59, %v1120_v59  ;;  %v4043_v41 = vmul.f32 1.442695, %v1633_v61  ;;  %v3163_v15 = vsub.f32 %v12280_v57, %v12285_v32  ;;  %v3164_v17 = vsub.f32 %v12289_v39, %v12291_v42  ;;  %v5212_v32 = vld [vmem:[#allocation2 + $0x958] sm:$0xff]  ;;  %v1640_v59 = vld [vmem:[%s8891_s21 + $0xb88] sm:$0xff] }
 0x3b8   : > { %v8327_v12 = vpop.eup %8326  ;;  %v5720_v13 = vadd.f32 %v5208_v7, %v4696_v10  ;;  %v4045_v43 = vmul.f32 1.442695, %v1634_v9  ;;  %6231 = vst [vmem:[#allocation2 + $0x1d8] sm:$0xff] %v5719_v63  ;;  %v3165_v21 = vsub.f32 %v12294_v47, %v12297_v55  ;;  %v3166_v5 = vsub.f32 %v12299_v58, %v12303_v8  ;;  %v5215_v63 = vld [vmem:[#allocation2 + $0xa18] sm:$0xff] }
 0x3b9   : > { %v8329_v3 = vpop.eup %8328  ;;  %v4697_v19 = vsub.f32 %v3161_v56, %v8327_v12  ;;  %8342 = vpow2.f32 %v4043_v41  ;;  %v3167_v4 = vsub.f32 %v12306_v30, %v12308_v31  ;;  %v4047_v18 = vmul.f32 1.442695, %v1635_v62 }
 0x3ba   : > { %6232 = vst [vmem:[#allocation2 + $0xe58] sm:$0xff] %v5720_v13  ;;  %v4698_v49 = vsub.f32 %v3162_v29, %v8329_v3  ;;  %8344 = vpow2.f32 %v4045_v43  ;;  %v8331_v22 = vpop.eup %8330  ;;  %v3168_v56 = vsub.f32 %v12310_v11, %v12312_v40  ;;  %v12330_v57 = vadd.f32 1.0, %v1633_v61  ;;  %v1127_v43 = vld [vmem:[%s8885_s25 + $0xb80] sm:$0xff] }
 0x3bb   : > { %v5721_v23 = vadd.f32 %v5209_v14, %v4697_v19  ;;  %v4049_v25 = vmul.f32 1.442695, %v1636_v44  ;;  %v4699_v29 = vsub.f32 %v3163_v15, %v8331_v22  ;;  %v12334_v33 = vmul.f32 %v1121_v48, %v1121_v48  ;;  %v5216_v15 = vld [vmem:[#allocation2 + $0x300] sm:$0xff] }
 0x3bc   : > { %v8333_v27 = vpop.eup %8332  ;;  %v5722_v28 = vadd.f32 %v5210_v20, %v4698_v49  ;;  %8346 = vpow2.f32 %v4047_v18  ;;  %v12338_v37 = vadd.f32 1.0, %v1634_v9  ;;  %v12340_v38 = vmul.f32 %v1122_v6, %v1122_v6  ;;  %v1126_v9 = vld [vmem:[%s8885_s25 + $0xb78] sm:$0xff]  ;;  %v1643_v18 = vld [vmem:[%s8891_s21 + $0xba0] sm:$0xff] }
 0x3bd   : > { %6233 = vst [vmem:[#allocation2 + $0x638] sm:$0xff] %v5721_v23  ;;  %v4700_v36 = vsub.f32 %v3164_v17, %v8333_v27  ;;  %8348 = vpow2.f32 %v4049_v25  ;;  %v5723_v39 = vadd.f32 %v5211_v24, %v4699_v29  ;;  %v12342_v42 = vadd.f32 1.0, %v1635_v62  ;;  %v1641_v62 = vld [vmem:[%s8891_s21 + $0xb90] sm:$0xff]  ;;  %v5218_v29 = vld [vmem:[#allocation2 + $0xd28] sm:$0xff] }
 0x3be   : > { %6234 = vst [vmem:[#allocation2 + $0x870] sm:$0xff] %v5722_v28  ;;  %v12344_v45 = vmul.f32 %v1123_v16, %v1123_v16  ;;  %v4051_v47 = vmul.f32 1.442695, %v1637_v26  ;;  %v12348_v54 = vadd.f32 1.0, %v1636_v44  ;;  %v12350_v55 = vmul.f32 %v1124_v34, %v1124_v34  ;;  %v1642_v44 = vld [vmem:[%s8891_s21 + $0xb98] sm:$0xff]  ;;  %v5217_v24 = vld [vmem:[#allocation2 + $0xa10] sm:$0xff] }
 0x3bf   : > { %v8335_v51 = vpop.eup %8334  ;;  %v5724_v52 = vadd.f32 %v5212_v32, %v4700_v36  ;;  %v4053_v58 = vmul.f32 1.442695, %v1638_v35  ;;  %6235 = vst [vmem:[#allocation2 + $0xa40] sm:$0xff] %v5723_v39  ;;  %v3169_v1 = vsub.f32 %v12330_v57, %v12334_v33  ;;  %v12355_v2 = vadd.f32 1.0, %v1637_v26  ;;  %v1130_v16 = vld [vmem:[%s8885_s25 + $0xb98] sm:$0xff]  ;;  %v1644_v26 = vld [vmem:[%s8891_s21 + $0xba8] sm:$0xff] }
 0x3c0   : > { %v8337_v60 = vpop.eup %8336  ;;  %v4701_v61 = vsub.f32 %v3165_v21, %v8335_v51  ;;  %8350 = vpow2.f32 %v4051_v47  ;;  %v12357_v8 = vmul.f32 %v1125_v46, %v1125_v46  ;;  %v4055_v10 = vmul.f32 1.442695, %v1639_v50  ;;  %v1128_v21 = vld [vmem:[%s8885_s25 + $0xb88] sm:$0xff]  ;;  %v5219_v39 = vld [vmem:[#allocation2 + $0x480] sm:$0xff]  ;;  %v1645_v47 = vld [vmem:[%s8891_s21 + $0xbb0] sm:$0xff] }
 0x3c1   : > { %6236 = vst [vmem:[#allocation2 + $0x958] sm:$0xff] %v5724_v52  ;;  %v4702_v7 = vsub.f32 %v3166_v5, %v8337_v60  ;;  %8352 = vpow2.f32 %v4053_v58  ;;  %v3170_v11 = vsub.f32 %v12338_v37, %v12340_v38  ;;  %v3171_v40 = vsub.f32 %v12342_v42, %v12344_v45  ;;  %v1646_v58 = vld [vmem:[%s8891_s21 + $0xbb8] sm:$0xff] }
 0x3c2   : > { %v8339_v30 = vpop.eup %8338  ;;  %v5725_v31 = vadd.f32 %v5213_v53, %v4701_v61  ;;  %v4057_v41 = vmul.f32 1.442695, %v1640_v59  ;;  %v3172_v17 = vsub.f32 %v12348_v54, %v12350_v55  ;;  %8354 = vpow2.f32 %v4055_v10  ;;  %v5220_v53 = vld [vmem:[#allocation2 + $0x240] sm:$0xff] }
 0x3c3   : > { %v8341_v12 = vpop.eup %8340  ;;  %v5726_v13 = vadd.f32 %v5214_v0, %v4702_v7  ;;  %v4703_v14 = vsub.f32 %v3167_v4, %v8339_v30  ;;  %v12369_v19 = vadd.f32 1.0, %v1638_v35  ;;  %v12371_v20 = vmul.f32 %v1126_v9, %v1126_v9  ;;  %v1129_v4 = vld [vmem:[%s8885_s25 + $0xb90] sm:$0xff]  ;;  %v1131_v55 = vld [vmem:[%s8885_s25 + $0xba0] sm:$0xff]  ;;  %v1132_v0 = vld [vmem:[%s8885_s25 + $0xba8] sm:$0xff] }
 0x3c4   : > { %6237 = vst [vmem:[#allocation2 + $0xbe0] sm:$0xff] %v5725_v31  ;;  %v4704_v3 = vsub.f32 %v3168_v56, %v8341_v12  ;;  %8356 = vpow2.f32 %v4057_v41  ;;  %v3173_v48 = vsub.f32 %v12355_v2, %v12357_v8  ;;  %v12376_v49 = vadd.f32 1.0, %v1639_v50  ;;  %v1647_v9 = vld [vmem:[%s8891_s21 + $0xbc0] sm:$0xff]  ;;  %v5221_v31 = vld [vmem:[#allocation2 + $0xcf0] sm:$0xff] }
 0x3c5   : > { %6238 = vst [vmem:[#allocation2 + $0xad0] sm:$0xff] %v5726_v13  ;;  %v5727_v5 = vadd.f32 %v5215_v63, %v4703_v14  ;;  %v4059_v6 = vmul.f32 1.442695, %v1641_v62  ;;  %v12380_v56 = vmul.f32 %v1127_v43, %v1127_v43  ;;  %v12382_v57 = vadd.f32 1.0, %v1640_v59  ;;  %v5222_v14 = vld [vmem:[#allocation2 + $0x48] sm:$0xff]  ;;  %v1134_v43 = vld [vmem:[%s8885_s25 + $0xbb8] sm:$0xff] }
 0x3c6   : > { %v8343_v22 = vpop.eup %8342  ;;  %v5728_v23 = vadd.f32 %v5216_v15, %v4704_v3  ;;  %v4061_v25 = vmul.f32 1.442695, %v1642_v44  ;;  %v12386_v32 = vmul.f32 %v1128_v21, %v1128_v21  ;;  %v12388_v33 = vadd.f32 1.0, %v1641_v62  ;;  %v1648_v62 = vld [vmem:[%s8891_s21 + $0xbc8] sm:$0xff] }
 0x3c7   : > { %v8345_v27 = vpop.eup %8344  ;;  %6239 = vst [vmem:[#allocation2 + $0xa18] sm:$0xff] %v5727_v5  ;;  %v4705_v28 = vsub.f32 %v3169_v1, %v8343_v22  ;;  %8358 = vpow2.f32 %v4059_v6  ;;  %v12390_v35 = vmul.f32 %v1129_v4, %v1129_v4  ;;  %v4063_v36 = vmul.f32 1.442695, %v1643_v18  ;;  %v1136_v6 = vld [vmem:[%s8885_s25 + $0xbc8] sm:$0xff]  ;;  %v1649_v22 = vld [vmem:[%s8891_s21 + $0xbd0] sm:$0xff] }
 0x3c8   : > { %6240 = vst [vmem:[#allocation2 + $0x300] sm:$0xff] %v5728_v23  ;;  %v4706_v34 = vsub.f32 %v3170_v11, %v8345_v27  ;;  %8360 = vpow2.f32 %v4061_v25  ;;  %v12392_v42 = vadd.f32 1.0, %v1642_v44  ;;  %v12394_v45 = vmul.f32 %v1130_v16, %v1130_v16  ;;  %v1650_v25 = vld [vmem:[%s8891_s21 + $0xbd8] sm:$0xff] }
 0x3c9   : > { %v8347_v37 = vpop.eup %8346  ;;  %v5729_v38 = vadd.f32 %v5217_v24, %v4705_v28  ;;  %v4065_v46 = vmul.f32 1.442695, %v1644_v26  ;;  %v3174_v54 = vsub.f32 %v12369_v19, %v12371_v20  ;;  %8362 = vpow2.f32 %v4063_v36  ;;  %v1135_v19 = vld [vmem:[%s8885_s25 + $0xbc0] sm:$0xff] }
 0x3ca   : > { %v8349_v50 = vpop.eup %8348  ;;  %v5730_v51 = vadd.f32 %v5218_v29, %v4706_v34  ;;  %v4707_v52 = vsub.f32 %v3171_v40, %v8347_v37  ;;  %v3175_v60 = vsub.f32 %v12376_v49, %v12380_v56  ;;  %v3176_v61 = vsub.f32 %v12382_v57, %v12386_v32  ;;  %v1133_v40 = vld [vmem:[%s8885_s25 + $0xbb0] sm:$0xff]  ;;  %v5224_v57 = vld [vmem:[#allocation2 + $0x220] sm:$0xff] }
 0x3cb   : > { %6241 = vst [vmem:[#allocation2 + $0xa10] sm:$0xff] %v5729_v38  ;;  %v4708_v59 = vsub.f32 %v3172_v17, %v8349_v50  ;;  %8364 = vpow2.f32 %v4065_v46  ;;  %v3177_v2 = vsub.f32 %v12388_v33, %v12390_v35  ;;  %v12408_v7 = vadd.f32 1.0, %v1643_v18  ;;  %v1651_v35 = vld [vmem:[%s8891_s21 + $0xbe0] sm:$0xff]  ;;  %v5225_v38 = vld [vmem:[#allocation2 + $0x890] sm:$0xff]  ;;  %v1652_v46 = vld [vmem:[%s8891_s21 + $0xbe8] sm:$0xff] }
 0x3cc   : > { %6242 = vst [vmem:[#allocation2 + $0xd28] sm:$0xff] %v5730_v51  ;;  %v5731_v1 = vadd.f32 %v5219_v39, %v4707_v52  ;;  %v4067_v8 = vmul.f32 1.442695, %v1645_v47  ;;  %v3178_v63 = vsub.f32 %v12392_v42, %v12394_v45  ;;  %v12413_v11 = vmul.f32 %v1131_v55, %v1131_v55  ;;  %v5226_v51 = vld [vmem:[#allocation2 + $0x3b8] sm:$0xff] }
 0x3cd   : > { %v8351_v10 = vpop.eup %8350  ;;  %v5732_v30 = vadd.f32 %v5220_v53, %v4708_v59  ;;  %v4069_v41 = vmul.f32 1.442695, %v1646_v58  ;;  %v12417_v15 = vadd.f32 1.0, %v1644_v26  ;;  %v12419_v17 = vmul.f32 %v1132_v0, %v1132_v0  ;;  %v1138_v59 = vld [vmem:[%s8885_s25 + $0xbd8] sm:$0xff] }
 0x3ce   : > { %v8353_v12 = vpop.eup %8352  ;;  %6243 = vst [vmem:[#allocation2 + $0x480] sm:$0xff] %v5731_v1  ;;  %v4709_v13 = vsub.f32 %v3173_v48, %v8351_v10  ;;  %8366 = vpow2.f32 %v4067_v8  ;;  %v12422_v3 = vadd.f32 1.0, %v1645_v47  ;;  %v4071_v20 = vmul.f32 1.442695, %v1647_v9  ;;  %v5223_v48 = vld [vmem:[#allocation2 + $0x4e8] sm:$0xff]  ;;  %v1139_v8 = vld [vmem:[%s8885_s25 + $0xbe0] sm:$0xff] }
 0x3cf   : > { %6244 = vst [vmem:[#allocation2 + $0x240] sm:$0xff] %v5732_v30  ;;  %v4710_v44 = vsub.f32 %v3174_v54, %v8353_v12  ;;  %8368 = vpow2.f32 %v4069_v41  ;;  %v8355_v21 = vpop.eup %8354  ;;  %v12425_v49 = vmul.f32 %v1133_v40, %v1133_v40  ;;  %v12427_v4 = vadd.f32 1.0, %v1646_v58  ;;  %v1137_v54 = vld [vmem:[%s8885_s25 + $0xbd0] sm:$0xff]  ;;  %v5227_v1 = vld [vmem:[#allocation2 + $0x3e8] sm:$0xff] }
 0x3d0   : > { %v5733_v5 = vadd.f32 %v5221_v31, %v4709_v13  ;;  %v4073_v18 = vmul.f32 1.442695, %v1648_v62  ;;  %v4711_v56 = vsub.f32 %v3175_v60, %v8355_v21  ;;  %v12431_v16 = vmul.f32 %v1134_v43, %v1134_v43  ;;  %v1653_v10 = vld [vmem:[%s8891_s21 + $0xbf0] sm:$0xff]  ;;  %v1140_v41 = vld [vmem:[%s8885_s25 + $0xbe8] sm:$0xff] }
 0x3d1   : > { %v8357_v23 = vpop.eup %8356  ;;  %v5734_v24 = vadd.f32 %v5222_v14, %v4710_v44  ;;  %8370 = vpow2.f32 %v4071_v20  ;;  %v12434_v27 = vadd.f32 1.0, %v1647_v9  ;;  %v12436_v28 = vmul.f32 %v1135_v19, %v1135_v19  ;;  %v1141_v44 = vld [vmem:[%s8885_s25 + $0xbf0] sm:$0xff]  ;;  %v1655_v19 = vld [vmem:[%s8891_s21 + $0xc00] sm:$0xff] }
 0x3d2   : > { %6245 = vst [vmem:[#allocation2 + $0xcf0] sm:$0xff] %v5733_v5  ;;  %v4712_v26 = vsub.f32 %v3176_v61, %v8357_v23  ;;  %8372 = vpow2.f32 %v4073_v18  ;;  %v5735_v29 = vadd.f32 %v5223_v48, %v4711_v56  ;;  %v12438_v32 = vadd.f32 1.0, %v1648_v62  ;;  %v1654_v62 = vld [vmem:[%s8891_s21 + $0xbf8] sm:$0xff]  ;;  %v5229_v5 = vld [vmem:[#allocation2 + $0x248] sm:$0xff]  ;;  %v5230_v23 = vld [vmem:[#allocation2 + $0x3f0] sm:$0xff] }
 0x3d3   : > { %6246 = vst [vmem:[#allocation2 + $0x48] sm:$0xff] %v5734_v24  ;;  %v12440_v33 = vmul.f32 %v1136_v6, %v1136_v6  ;;  %v4075_v34 = vmul.f32 1.442695, %v1649_v22  ;;  %v3179_v39 = vsub.f32 %v12408_v7, %v12413_v11  ;;  %v3180_v42 = vsub.f32 %v12417_v15, %v12419_v17  ;;  %v5228_v11 = vld [vmem:[#allocation2 + $0xe10] sm:$0xff]  ;;  %v1656_v6 = vld [vmem:[%s8891_s21 + $0xc08] sm:$0xff] }
 0x3d4   : > { %v8359_v36 = vpop.eup %8358  ;;  %v5736_v37 = vadd.f32 %v5224_v57, %v4712_v26  ;;  %v4077_v45 = vmul.f32 1.442695, %v1650_v25  ;;  %6247 = vst [vmem:[#allocation2 + $0x4e8] sm:$0xff] %v5735_v29  ;;  %v3181_v52 = vsub.f32 %v12422_v3, %v12425_v49  ;;  %v3182_v53 = vsub.f32 %v12427_v4, %v12431_v16  ;;  %v5231_v29 = vld [vmem:[#allocation2 + $0x3c8] sm:$0xff] }
 0x3d5   : > { %v8361_v47 = vpop.eup %8360  ;;  %v4713_v50 = vsub.f32 %v3177_v2, %v8359_v36  ;;  %8374 = vpow2.f32 %v4075_v34  ;;  %v3183_v58 = vsub.f32 %v12434_v27, %v12436_v28  ;;  %v4079_v60 = vmul.f32 1.442695, %v1651_v35 }
 0x3d6   : > { %6248 = vst [vmem:[#allocation2 + $0x220] sm:$0xff] %v5736_v37  ;;  %v4714_v55 = vsub.f32 %v3178_v63, %v8361_v47  ;;  %8376 = vpow2.f32 %v4077_v45  ;;  %v8363_v61 = vpop.eup %8362  ;;  %v3184_v2 = vsub.f32 %v12438_v32, %v12440_v33  ;;  %v12458_v7 = vadd.f32 1.0, %v1649_v22  ;;  %v1143_v45 = vld [vmem:[%s8885_s25 + $0xc00] sm:$0xff] }
 0x3d7   : > { %v5737_v0 = vadd.f32 %v5225_v38, %v4713_v50  ;;  %v4081_v9 = vmul.f32 1.442695, %v1652_v46  ;;  %v4715_v63 = vsub.f32 %v3179_v39, %v8363_v61  ;;  %v12462_v40 = vmul.f32 %v1137_v54, %v1137_v54  ;;  %v5232_v39 = vld [vmem:[#allocation2 + $0xc98] sm:$0xff] }
 0x3d8   : > { %v8365_v30 = vpop.eup %8364  ;;  %v5738_v31 = vadd.f32 %v5226_v51, %v4714_v55  ;;  %8378 = vpow2.f32 %v4079_v60  ;;  %v12466_v13 = vadd.f32 1.0, %v1650_v25  ;;  %v12468_v14 = vmul.f32 %v1138_v59, %v1138_v59  ;;  %v1142_v25 = vld [vmem:[%s8885_s25 + $0xbf8] sm:$0xff]  ;;  %v1659_v60 = vld [vmem:[%s8891_s21 + $0xc20] sm:$0xff] }
 0x3d9   : > { %6249 = vst [vmem:[#allocation2 + $0x890] sm:$0xff] %v5737_v0  ;;  %v4716_v12 = vsub.f32 %v3180_v42, %v8365_v30  ;;  %8380 = vpow2.f32 %v4081_v9  ;;  %v5739_v15 = vadd.f32 %v5227_v1, %v4715_v63  ;;  %v12470_v17 = vadd.f32 1.0, %v1651_v35  ;;  %v1657_v35 = vld [vmem:[%s8891_s21 + $0xc10] sm:$0xff]  ;;  %v5233_v1 = vld [vmem:[#allocation2 + $0x280] sm:$0xff]  ;;  %v5234_v63 = vld [vmem:[#allocation2 + $0xa08] sm:$0xff] }
 0x3da   : > { %6250 = vst [vmem:[#allocation2 + $0x3b8] sm:$0xff] %v5738_v31  ;;  %v12472_v43 = vmul.f32 %v1139_v8, %v1139_v8  ;;  %v4083_v3 = vmul.f32 1.442695, %v1653_v10  ;;  %v12476_v48 = vadd.f32 1.0, %v1652_v46  ;;  %v12478_v49 = vmul.f32 %v1140_v41, %v1140_v41  ;;  %v1658_v46 = vld [vmem:[%s8891_s21 + $0xc18] sm:$0xff] }
 0x3db   : > { %v8367_v20 = vpop.eup %8366  ;;  %v5740_v21 = vadd.f32 %v5228_v11, %v4716_v12  ;;  %v4085_v4 = vmul.f32 1.442695, %v1654_v62  ;;  %6251 = vst [vmem:[#allocation2 + $0x3e8] sm:$0xff] %v5739_v15  ;;  %v3185_v24 = vsub.f32 %v12458_v7, %v12462_v40  ;;  %v12483_v56 = vadd.f32 1.0, %v1653_v10  ;;  %v1146_v8 = vld [vmem:[%s8885_s25 + $0xc18] sm:$0xff]  ;;  %v1660_v10 = vld [vmem:[%s8891_s21 + $0xc28] sm:$0xff] }
 0x3dc   : > { %v8369_v18 = vpop.eup %8368  ;;  %v4717_v22 = vsub.f32 %v3181_v52, %v8367_v20  ;;  %8382 = vpow2.f32 %v4083_v3  ;;  %v12485_v16 = vmul.f32 %v1141_v44, %v1141_v44  ;;  %v4087_v26 = vmul.f32 1.442695, %v1655_v19  ;;  %v1144_v52 = vld [vmem:[%s8885_s25 + $0xc08] sm:$0xff]  ;;  %v5235_v15 = vld [vmem:[#allocation2 + $0x540] sm:$0xff]  ;;  %v1661_v3 = vld [vmem:[%s8891_s21 + $0xc30] sm:$0xff] }
 0x3dd   : > { %6252 = vst [vmem:[#allocation2 + $0xe10] sm:$0xff] %v5740_v21  ;;  %v4718_v57 = vsub.f32 %v3182_v53, %v8369_v18  ;;  %8384 = vpow2.f32 %v4085_v4  ;;  %v3186_v32 = vsub.f32 %v12466_v13, %v12468_v14  ;;  %v3187_v33 = vsub.f32 %v12470_v17, %v12472_v43  ;;  %v1662_v4 = vld [vmem:[%s8891_s21 + $0xc38] sm:$0xff] }
 0x3de   : > { %v8371_v27 = vpop.eup %8370  ;;  %v5741_v28 = vadd.f32 %v5229_v5, %v4717_v22  ;;  %v4089_v34 = vmul.f32 1.442695, %v1656_v6  ;;  %v3188_v42 = vsub.f32 %v12476_v48, %v12478_v49  ;;  %8386 = vpow2.f32 %v4087_v26  ;;  %v5236_v5 = vld [vmem:[#allocation2 + $0x378] sm:$0xff]  ;;  %v1147_v49 = vld [vmem:[%s8885_s25 + $0xc20] sm:$0xff] }
 0x3df   : > { %v8373_v36 = vpop.eup %8372  ;;  %v5742_v37 = vadd.f32 %v5230_v23, %v4718_v57  ;;  %v4719_v38 = vsub.f32 %v3183_v58, %v8371_v27  ;;  %v12497_v50 = vadd.f32 1.0, %v1654_v62  ;;  %v12499_v51 = vmul.f32 %v1142_v25, %v1142_v25  ;;  %v1145_v58 = vld [vmem:[%s8885_s25 + $0xc10] sm:$0xff]  ;;  %v1148_v23 = vld [vmem:[%s8885_s25 + $0xc28] sm:$0xff]  ;;  %v1663_v25 = vld [vmem:[%s8891_s21 + $0xc40] sm:$0xff] }
 0x3e0   : > { %6253 = vst [vmem:[#allocation2 + $0x248] sm:$0xff] %v5741_v28  ;;  %v4720_v47 = vsub.f32 %v3184_v2, %v8373_v36  ;;  %8388 = vpow2.f32 %v4089_v34  ;;  %v3189_v54 = vsub.f32 %v12483_v56, %v12485_v16  ;;  %v12504_v55 = vadd.f32 1.0, %v1655_v19  ;;  %v5237_v28 = vld [vmem:[#allocation2 + $0x7d8] sm:$0xff] }
 0x3e1   : > { %6254 = vst [vmem:[#allocation2 + $0x3f0] sm:$0xff] %v5742_v37  ;;  %v5743_v53 = vadd.f32 %v5231_v29, %v4719_v38  ;;  %v4091_v59 = vmul.f32 1.442695, %v1657_v35  ;;  %v12508_v2 = vmul.f32 %v1143_v45, %v1143_v45  ;;  %v12510_v7 = vadd.f32 1.0, %v1656_v6  ;;  %v5238_v38 = vld [vmem:[#allocation2 + $0x68] sm:$0xff]  ;;  %v1150_v45 = vld [vmem:[%s8885_s25 + $0xc38] sm:$0xff] }
 0x3e2   : > { %v8375_v61 = vpop.eup %8374  ;;  %v5744_v0 = vadd.f32 %v5232_v39, %v4720_v47  ;;  %v4093_v9 = vmul.f32 1.442695, %v1658_v46  ;;  %v12514_v11 = vmul.f32 %v1144_v52, %v1144_v52  ;;  %v12516_v40 = vadd.f32 1.0, %v1657_v35  ;;  %v1664_v35 = vld [vmem:[%s8891_s21 + $0xc48] sm:$0xff] }
 0x3e3   : > { %v8377_v30 = vpop.eup %8376  ;;  %6255 = vst [vmem:[#allocation2 + $0x3c8] sm:$0xff] %v5743_v53  ;;  %v4721_v31 = vsub.f32 %v3185_v24, %v8375_v61  ;;  %8390 = vpow2.f32 %v4091_v59  ;;  %v12518_v62 = vmul.f32 %v1145_v58, %v1145_v58  ;;  %v4095_v12 = vmul.f32 1.442695, %v1659_v60  ;;  %v1152_v59 = vld [vmem:[%s8885_s25 + $0xc48] sm:$0xff]  ;;  %v1665_v61 = vld [vmem:[%s8891_s21 + $0xc50] sm:$0xff] }
 0x3e4   : > { %6256 = vst [vmem:[#allocation2 + $0xc98] sm:$0xff] %v5744_v0  ;;  %v4722_v41 = vsub.f32 %v3186_v32, %v8377_v30  ;;  %8392 = vpow2.f32 %v4093_v9  ;;  %v12520_v17 = vadd.f32 1.0, %v1658_v46  ;;  %v12522_v43 = vmul.f32 %v1146_v8, %v1146_v8  ;;  %v1666_v9 = vld [vmem:[%s8891_s21 + $0xc58] sm:$0xff] }
 0x3e5   : > { %v8379_v13 = vpop.eup %8378  ;;  %v5745_v14 = vadd.f32 %v5233_v1, %v4721_v31  ;;  %v4097_v44 = vmul.f32 1.442695, %v1660_v10  ;;  %v3190_v48 = vsub.f32 %v12497_v50, %v12499_v51  ;;  %8394 = vpow2.f32 %v4095_v12  ;;  %v1151_v50 = vld [vmem:[%s8885_s25 + $0xc40] sm:$0xff] }
 0x3e6   : > { %v8381_v19 = vpop.eup %8380  ;;  %v5746_v20 = vadd.f32 %v5234_v63, %v4722_v41  ;;  %v4723_v21 = vsub.f32 %v3187_v33, %v8379_v13  ;;  %v3191_v18 = vsub.f32 %v12504_v55, %v12508_v2  ;;  %v3192_v22 = vsub.f32 %v12510_v7, %v12514_v11  ;;  %v1149_v33 = vld [vmem:[%s8885_s25 + $0xc30] sm:$0xff] }
 0x3e7   : > { %6257 = vst [vmem:[#allocation2 + $0x280] sm:$0xff] %v5745_v14  ;;  %v4724_v6 = vsub.f32 %v3188_v42, %v8381_v19  ;;  %8396 = vpow2.f32 %v4097_v44  ;;  %v3193_v56 = vsub.f32 %v12516_v40, %v12518_v62  ;;  %v12536_v57 = vadd.f32 1.0, %v1659_v60  ;;  %v5240_v7 = vld [vmem:[#allocation2 + $0x190] sm:$0xff]  ;;  %v1667_v62 = vld [vmem:[%s8891_s21 + $0xc60] sm:$0xff]  ;;  %v5241_v14 = vld [vmem:[#allocation2 + $0x548] sm:$0xff] }
 0x3e8   : > { %6258 = vst [vmem:[#allocation2 + $0xa08] sm:$0xff] %v5746_v20  ;;  %v5747_v24 = vadd.f32 %v5235_v15, %v4723_v21  ;;  %v4099_v16 = vmul.f32 1.442695, %v1661_v3  ;;  %v3194_v29 = vsub.f32 %v12520_v17, %v12522_v43  ;;  %v12541_v32 = vmul.f32 %v1147_v49, %v1147_v49  ;;  %v1668_v44 = vld [vmem:[%s8891_s21 + $0xc68] sm:$0xff] }
 0x3e9   : > { %v8383_v26 = vpop.eup %8382  ;;  %v5748_v27 = vadd.f32 %v5236_v5, %v4724_v6  ;;  %v4101_v34 = vmul.f32 1.442695, %v1662_v4  ;;  %v12545_v39 = vadd.f32 1.0, %v1660_v10  ;;  %v12547_v42 = vmul.f32 %v1148_v23, %v1148_v23  ;;  %v5242_v20 = vld [vmem:[#allocation2 + $0x1e8] sm:$0xff]  ;;  %v1154_v6 = vld [vmem:[%s8885_s25 + $0xc58] sm:$0xff] }
 0x3ea   : > { %v8385_v36 = vpop.eup %8384  ;;  %6259 = vst [vmem:[#allocation2 + $0x540] sm:$0xff] %v5747_v24  ;;  %v4725_v37 = vsub.f32 %v3189_v54, %v8383_v26  ;;  %8398 = vpow2.f32 %v4099_v16  ;;  %v12550_v47 = vadd.f32 1.0, %v1661_v3  ;;  %v4103_v51 = vmul.f32 1.442695, %v1663_v25  ;;  %v5239_v54 = vld [vmem:[#allocation2 + $0xd38] sm:$0xff]  ;;  %v5243_v24 = vld [vmem:[#allocation2 + $0xc08] sm:$0xff] }
 0x3eb   : > { %6260 = vst [vmem:[#allocation2 + $0x378] sm:$0xff] %v5748_v27  ;;  %v4726_v46 = vsub.f32 %v3190_v48, %v8385_v36  ;;  %8400 = vpow2.f32 %v4101_v34  ;;  %v8387_v52 = vpop.eup %8386  ;;  %v12553_v55 = vmul.f32 %v1149_v33, %v1149_v33  ;;  %v12555_v58 = vadd.f32 1.0, %v1662_v4  ;;  %v1153_v48 = vld [vmem:[%s8885_s25 + $0xc50] sm:$0xff]  ;;  %v1155_v16 = vld [vmem:[%s8885_s25 + $0xc60] sm:$0xff]  ;;  %v1156_v34 = vld [vmem:[%s8885_s25 + $0xc68] sm:$0xff] }
 0x3ec   : > { %v5749_v53 = vadd.f32 %v5237_v28, %v4725_v37  ;;  %v4105_v60 = vmul.f32 1.442695, %v1664_v35  ;;  %v4727_v2 = vsub.f32 %v3191_v18, %v8387_v52  ;;  %v12559_v8 = vmul.f32 %v1150_v45, %v1150_v45  ;;  %v1669_v26 = vld [vmem:[%s8891_s21 + $0xc70] sm:$0xff] }
 0x3ed   : > { %v8389_v0 = vpop.eup %8388  ;;  %v5750_v1 = vadd.f32 %v5238_v38, %v4726_v46  ;;  %8402 = vpow2.f32 %v4103_v51  ;;  %v12562_v30 = vadd.f32 1.0, %v1663_v25  ;;  %v12564_v31 = vmul.f32 %v1151_v50, %v1151_v50  ;;  %v1157_v46 = vld [vmem:[%s8885_s25 + $0xc70] sm:$0xff]  ;;  %v1671_v50 = vld [vmem:[%s8891_s21 + $0xc80] sm:$0xff] }
 0x3ee   : > { %6261 = vst [vmem:[#allocation2 + $0x7d8] sm:$0xff] %v5749_v53  ;;  %v4728_v10 = vsub.f32 %v3192_v22, %v8389_v0  ;;  %8404 = vpow2.f32 %v4105_v60  ;;  %v5751_v63 = vadd.f32 %v5239_v54, %v4727_v2  ;;  %v12566_v11 = vadd.f32 1.0, %v1664_v35  ;;  %v1670_v35 = vld [vmem:[%s8891_s21 + $0xc78] sm:$0xff]  ;;  %v5245_v53 = vld [vmem:[#allocation2 + $0x408] sm:$0xff] }
 0x3ef   : > { %6262 = vst [vmem:[#allocation2 + $0x68] sm:$0xff] %v5750_v1  ;;  %v12568_v40 = vmul.f32 %v1152_v59, %v1152_v59  ;;  %v4107_v41 = vmul.f32 1.442695, %v1665_v61  ;;  %v3195_v15 = vsub.f32 %v12536_v57, %v12541_v32  ;;  %v3196_v17 = vsub.f32 %v12545_v39, %v12547_v42  ;;  %v5244_v32 = vld [vmem:[#allocation2 + $0x2a0] sm:$0xff]  ;;  %v1672_v59 = vld [vmem:[%s8891_s21 + $0xc88] sm:$0xff] }
 0x3f0   : > { %v8391_v12 = vpop.eup %8390  ;;  %v5752_v13 = vadd.f32 %v5240_v7, %v4728_v10  ;;  %v4109_v43 = vmul.f32 1.442695, %v1666_v9  ;;  %6263 = vst [vmem:[#allocation2 + $0xd38] sm:$0xff] %v5751_v63  ;;  %v3197_v21 = vsub.f32 %v12550_v47, %v12553_v55  ;;  %v3198_v5 = vsub.f32 %v12555_v58, %v12559_v8  ;;  %v5246_v0 = vld [vmem:[#allocation2 + $0x7e8] sm:$0xff] }
 0x3f1   : > { %v8393_v3 = vpop.eup %8392  ;;  %v4729_v19 = vsub.f32 %v3193_v56, %v8391_v12  ;;  %8406 = vpow2.f32 %v4107_v41  ;;  %v3199_v4 = vsub.f32 %v12562_v30, %v12564_v31  ;;  %v4111_v18 = vmul.f32 1.442695, %v1667_v62  ;;  %v5247_v63 = vld [vmem:[#allocation2 + $0xc68] sm:$0xff] }
 0x3f2   : > { %6264 = vst [vmem:[#allocation2 + $0x190] sm:$0xff] %v5752_v13  ;;  %v4730_v49 = vsub.f32 %v3194_v29, %v8393_v3  ;;  %8408 = vpow2.f32 %v4109_v43  ;;  %v8395_v22 = vpop.eup %8394  ;;  %v3200_v56 = vsub.f32 %v12566_v11, %v12568_v40  ;;  %v12586_v57 = vadd.f32 1.0, %v1665_v61  ;;  %v1159_v43 = vld [vmem:[%s8885_s25 + $0xc80] sm:$0xff] }
 0x3f3   : > { %v5753_v23 = vadd.f32 %v5241_v14, %v4729_v19  ;;  %v4113_v25 = vmul.f32 1.442695, %v1668_v44  ;;  %v4731_v29 = vsub.f32 %v3195_v15, %v8395_v22  ;;  %v12590_v33 = vmul.f32 %v1153_v48, %v1153_v48  ;;  %v5248_v15 = vld [vmem:[#allocation2 + $0x658] sm:$0xff] }
 0x3f4   : > { %v8397_v27 = vpop.eup %8396  ;;  %v5754_v28 = vadd.f32 %v5242_v20, %v4730_v49  ;;  %8410 = vpow2.f32 %v4111_v18  ;;  %v12594_v37 = vadd.f32 1.0, %v1666_v9  ;;  %v12596_v38 = vmul.f32 %v1154_v6, %v1154_v6  ;;  %v1158_v9 = vld [vmem:[%s8885_s25 + $0xc78] sm:$0xff]  ;;  %v1675_v18 = vld [vmem:[%s8891_s21 + $0xca0] sm:$0xff] }
 0x3f5   : > { %6265 = vst [vmem:[#allocation2 + $0x548] sm:$0xff] %v5753_v23  ;;  %v4732_v36 = vsub.f32 %v3196_v17, %v8397_v27  ;;  %8412 = vpow2.f32 %v4113_v25  ;;  %v5755_v39 = vadd.f32 %v5243_v24, %v4731_v29  ;;  %v12598_v42 = vadd.f32 1.0, %v1667_v62  ;;  %v1673_v62 = vld [vmem:[%s8891_s21 + $0xc90] sm:$0xff]  ;;  %v5249_v24 = vld [vmem:[#allocation2 + $0xf60] sm:$0xff] }
 0x3f6   : > { %6266 = vst [vmem:[#allocation2 + $0x1e8] sm:$0xff] %v5754_v28  ;;  %v12600_v45 = vmul.f32 %v1155_v16, %v1155_v16  ;;  %v4115_v47 = vmul.f32 1.442695, %v1669_v26  ;;  %v12604_v54 = vadd.f32 1.0, %v1668_v44  ;;  %v12606_v55 = vmul.f32 %v1156_v34, %v1156_v34  ;;  %v1674_v44 = vld [vmem:[%s8891_s21 + $0xc98] sm:$0xff]  ;;  %v5250_v29 = vld [vmem:[#allocation2 + $0xfc0] sm:$0xff] }
 0x3f7   : > { %v8399_v51 = vpop.eup %8398  ;;  %v5756_v52 = vadd.f32 %v5244_v32, %v4732_v36  ;;  %v4117_v58 = vmul.f32 1.442695, %v1670_v35  ;;  %6267 = vst [vmem:[#allocation2 + $0xc08] sm:$0xff] %v5755_v39  ;;  %v3201_v1 = vsub.f32 %v12586_v57, %v12590_v33  ;;  %v12611_v2 = vadd.f32 1.0, %v1669_v26  ;;  %v1162_v16 = vld [vmem:[%s8885_s25 + $0xc98] sm:$0xff]  ;;  %v1676_v26 = vld [vmem:[%s8891_s21 + $0xca8] sm:$0xff] }
 0x3f8   : > { %v8401_v60 = vpop.eup %8400  ;;  %v4733_v61 = vsub.f32 %v3197_v21, %v8399_v51  ;;  %8414 = vpow2.f32 %v4115_v47  ;;  %v12613_v8 = vmul.f32 %v1157_v46, %v1157_v46  ;;  %v4119_v10 = vmul.f32 1.442695, %v1671_v50  ;;  %v1160_v21 = vld [vmem:[%s8885_s25 + $0xc88] sm:$0xff]  ;;  %v1677_v47 = vld [vmem:[%s8891_s21 + $0xcb0] sm:$0xff] }
 0x3f9   : > { %6268 = vst [vmem:[#allocation2 + $0x2a0] sm:$0xff] %v5756_v52  ;;  %v4734_v7 = vsub.f32 %v3198_v5, %v8401_v60  ;;  %8416 = vpow2.f32 %v4117_v58  ;;  %v3202_v11 = vsub.f32 %v12594_v37, %v12596_v38  ;;  %v3203_v40 = vsub.f32 %v12598_v42, %v12600_v45  ;;  %v5251_v39 = vld [vmem:[#allocation2 + $0x5e8] sm:$0xff]  ;;  %v1678_v58 = vld [vmem:[%s8891_s21 + $0xcb8] sm:$0xff] }
 0x3fa   : > { %v8403_v30 = vpop.eup %8402  ;;  %v5757_v31 = vadd.f32 %v5245_v53, %v4733_v61  ;;  %v4121_v41 = vmul.f32 1.442695, %v1672_v59  ;;  %v3204_v17 = vsub.f32 %v12604_v54, %v12606_v55  ;;  %8418 = vpow2.f32 %v4119_v10  ;;  %v5252_v53 = vld [vmem:[#allocation2 + $0x440] sm:$0xff] }
 0x3fb   : > { %v8405_v12 = vpop.eup %8404  ;;  %v5758_v13 = vadd.f32 %v5246_v0, %v4734_v7  ;;  %v4735_v14 = vsub.f32 %v3199_v4, %v8403_v30  ;;  %v12625_v19 = vadd.f32 1.0, %v1670_v35  ;;  %v12627_v20 = vmul.f32 %v1158_v9, %v1158_v9  ;;  %v1161_v4 = vld [vmem:[%s8885_s25 + $0xc90] sm:$0xff]  ;;  %v1163_v55 = vld [vmem:[%s8885_s25 + $0xca0] sm:$0xff]  ;;  %v1164_v0 = vld [vmem:[%s8885_s25 + $0xca8] sm:$0xff] }
 0x3fc   : > { %6269 = vst [vmem:[#allocation2 + $0x408] sm:$0xff] %v5757_v31  ;;  %v4736_v3 = vsub.f32 %v3200_v56, %v8405_v12  ;;  %8420 = vpow2.f32 %v4121_v41  ;;  %v3205_v48 = vsub.f32 %v12611_v2, %v12613_v8  ;;  %v12632_v49 = vadd.f32 1.0, %v1671_v50  ;;  %v1679_v9 = vld [vmem:[%s8891_s21 + $0xcc0] sm:$0xff]  ;;  %v5253_v31 = vld [vmem:[#allocation2 + $0xff0] sm:$0xff] }
 0x3fd   : > { %6270 = vst [vmem:[#allocation2 + $0x7e8] sm:$0xff] %v5758_v13  ;;  %v5759_v5 = vadd.f32 %v5247_v63, %v4735_v14  ;;  %v4123_v6 = vmul.f32 1.442695, %v1673_v62  ;;  %v12636_v56 = vmul.f32 %v1159_v43, %v1159_v43  ;;  %v12638_v57 = vadd.f32 1.0, %v1672_v59  ;;  %v5254_v14 = vld [vmem:[#allocation2 + $0x720] sm:$0xff]  ;;  %v1166_v43 = vld [vmem:[%s8885_s25 + $0xcb8] sm:$0xff] }
 0x3fe   : > { %v8407_v22 = vpop.eup %8406  ;;  %v5760_v23 = vadd.f32 %v5248_v15, %v4736_v3  ;;  %v4125_v25 = vmul.f32 1.442695, %v1674_v44  ;;  %v12642_v32 = vmul.f32 %v1160_v21, %v1160_v21  ;;  %v12644_v33 = vadd.f32 1.0, %v1673_v62  ;;  %v1680_v62 = vld [vmem:[%s8891_s21 + $0xcc8] sm:$0xff] }
 0x3ff   : > { %v8409_v27 = vpop.eup %8408  ;;  %6271 = vst [vmem:[#allocation2 + $0xc68] sm:$0xff] %v5759_v5  ;;  %v4737_v28 = vsub.f32 %v3201_v1, %v8407_v22  ;;  %8422 = vpow2.f32 %v4123_v6  ;;  %v12646_v35 = vmul.f32 %v1161_v4, %v1161_v4  ;;  %v4127_v36 = vmul.f32 1.442695, %v1675_v18  ;;  %v1168_v6 = vld [vmem:[%s8885_s25 + $0xcc8] sm:$0xff]  ;;  %v1681_v22 = vld [vmem:[%s8891_s21 + $0xcd0] sm:$0xff] }
 0x400   : > { %6272 = vst [vmem:[#allocation2 + $0x658] sm:$0xff] %v5760_v23  ;;  %v4738_v34 = vsub.f32 %v3202_v11, %v8409_v27  ;;  %8424 = vpow2.f32 %v4125_v25  ;;  %v12648_v42 = vadd.f32 1.0, %v1674_v44  ;;  %v12650_v45 = vmul.f32 %v1162_v16, %v1162_v16  ;;  %v1682_v25 = vld [vmem:[%s8891_s21 + $0xcd8] sm:$0xff] }
 0x401   : > { %v8411_v37 = vpop.eup %8410  ;;  %v5761_v38 = vadd.f32 %v5249_v24, %v4737_v28  ;;  %v4129_v46 = vmul.f32 1.442695, %v1676_v26  ;;  %v3206_v54 = vsub.f32 %v12625_v19, %v12627_v20  ;;  %8426 = vpow2.f32 %v4127_v36  ;;  %v1167_v19 = vld [vmem:[%s8885_s25 + $0xcc0] sm:$0xff] }
 0x402   : > { %v8413_v50 = vpop.eup %8412  ;;  %v5762_v51 = vadd.f32 %v5250_v29, %v4738_v34  ;;  %v4739_v52 = vsub.f32 %v3203_v40, %v8411_v37  ;;  %v3207_v60 = vsub.f32 %v12632_v49, %v12636_v56  ;;  %v3208_v61 = vsub.f32 %v12638_v57, %v12642_v32  ;;  %v1165_v40 = vld [vmem:[%s8885_s25 + $0xcb0] sm:$0xff] }
 0x403   : > { %6273 = vst [vmem:[#allocation2 + $0xf60] sm:$0xff] %v5761_v38  ;;  %v4740_v59 = vsub.f32 %v3204_v17, %v8413_v50  ;;  %8428 = vpow2.f32 %v4129_v46  ;;  %v3209_v2 = vsub.f32 %v12644_v33, %v12646_v35  ;;  %v12664_v7 = vadd.f32 1.0, %v1675_v18  ;;  %v5256_v57 = vld [vmem:[#allocation2 + $0xb70] sm:$0xff]  ;;  %v1683_v35 = vld [vmem:[%s8891_s21 + $0xce0] sm:$0xff]  ;;  %v5257_v38 = vld [vmem:[#allocation2 + $0x2c8] sm:$0xff] }
 0x404   : > { %6274 = vst [vmem:[#allocation2 + $0xfc0] sm:$0xff] %v5762_v51  ;;  %v5763_v1 = vadd.f32 %v5251_v39, %v4739_v52  ;;  %v4131_v8 = vmul.f32 1.442695, %v1677_v47  ;;  %v3210_v63 = vsub.f32 %v12648_v42, %v12650_v45  ;;  %v12669_v11 = vmul.f32 %v1163_v55, %v1163_v55  ;;  %v1684_v46 = vld [vmem:[%s8891_s21 + $0xce8] sm:$0xff]  ;;  %v5258_v51 = vld [vmem:[#allocation2 + $0x738] sm:$0xff] }
 0x405   : > { %v8415_v10 = vpop.eup %8414  ;;  %v5764_v30 = vadd.f32 %v5252_v53, %v4740_v59  ;;  %v4133_v41 = vmul.f32 1.442695, %v1678_v58  ;;  %v12673_v15 = vadd.f32 1.0, %v1676_v26  ;;  %v12675_v17 = vmul.f32 %v1164_v0, %v1164_v0  ;;  %v1170_v59 = vld [vmem:[%s8885_s25 + $0xcd8] sm:$0xff] }
 0x406   : > { %v8417_v12 = vpop.eup %8416  ;;  %6275 = vst [vmem:[#allocation2 + $0x5e8] sm:$0xff] %v5763_v1  ;;  %v4741_v13 = vsub.f32 %v3205_v48, %v8415_v10  ;;  %8430 = vpow2.f32 %v4131_v8  ;;  %v12678_v3 = vadd.f32 1.0, %v1677_v47  ;;  %v4135_v20 = vmul.f32 1.442695, %v1679_v9  ;;  %v5255_v48 = vld [vmem:[#allocation2 + $0x5d8] sm:$0xff]  ;;  %v5259_v1 = vld [vmem:[#allocation2 + $0x808] sm:$0xff] }
 0x407   : > { %6276 = vst [vmem:[#allocation2 + $0x440] sm:$0xff] %v5764_v30  ;;  %v4742_v44 = vsub.f32 %v3206_v54, %v8417_v12  ;;  %8432 = vpow2.f32 %v4133_v41  ;;  %v8419_v21 = vpop.eup %8418  ;;  %v12681_v49 = vmul.f32 %v1165_v40, %v1165_v40  ;;  %v12683_v4 = vadd.f32 1.0, %v1678_v58  ;;  %v1169_v54 = vld [vmem:[%s8885_s25 + $0xcd0] sm:$0xff]  ;;  %v1171_v8 = vld [vmem:[%s8885_s25 + $0xce0] sm:$0xff]  ;;  %v1172_v41 = vld [vmem:[%s8885_s25 + $0xce8] sm:$0xff] }
 0x408   : > { %v5765_v5 = vadd.f32 %v5253_v31, %v4741_v13  ;;  %v4137_v18 = vmul.f32 1.442695, %v1680_v62  ;;  %v4743_v56 = vsub.f32 %v3207_v60, %v8419_v21  ;;  %v12687_v16 = vmul.f32 %v1166_v43, %v1166_v43  ;;  %v1685_v10 = vld [vmem:[%s8891_s21 + $0xcf0] sm:$0xff] }
 0x409   : > { %v8421_v23 = vpop.eup %8420  ;;  %v5766_v24 = vadd.f32 %v5254_v14, %v4742_v44  ;;  %8434 = vpow2.f32 %v4135_v20  ;;  %v12690_v27 = vadd.f32 1.0, %v1679_v9  ;;  %v12692_v28 = vmul.f32 %v1167_v19, %v1167_v19  ;;  %v1173_v44 = vld [vmem:[%s8885_s25 + $0xcf0] sm:$0xff]  ;;  %v1687_v19 = vld [vmem:[%s8891_s21 + $0xd00] sm:$0xff] }
 0x40a   : > { %6277 = vst [vmem:[#allocation2 + $0xff0] sm:$0xff] %v5765_v5  ;;  %v4744_v26 = vsub.f32 %v3208_v61, %v8421_v23  ;;  %8436 = vpow2.f32 %v4137_v18  ;;  %v5767_v29 = vadd.f32 %v5255_v48, %v4743_v56  ;;  %v12694_v32 = vadd.f32 1.0, %v1680_v62  ;;  %v1686_v62 = vld [vmem:[%s8891_s21 + $0xcf8] sm:$0xff]  ;;  %v5261_v5 = vld [vmem:[#allocation2 + $0x6c0] sm:$0xff]  ;;  %v5262_v23 = vld [vmem:[#allocation2 + $0xae8] sm:$0xff] }
 0x40b   : > { %6278 = vst [vmem:[#allocation2 + $0x720] sm:$0xff] %v5766_v24  ;;  %v12696_v33 = vmul.f32 %v1168_v6, %v1168_v6  ;;  %v4139_v34 = vmul.f32 1.442695, %v1681_v22  ;;  %v3211_v39 = vsub.f32 %v12664_v7, %v12669_v11  ;;  %v3212_v42 = vsub.f32 %v12673_v15, %v12675_v17  ;;  %v5260_v11 = vld [vmem:[#allocation2 + $0x60] sm:$0xff]  ;;  %v1688_v6 = vld [vmem:[%s8891_s21 + $0xd08] sm:$0xff] }
 0x40c   : > { %v8423_v36 = vpop.eup %8422  ;;  %v5768_v37 = vadd.f32 %v5256_v57, %v4744_v26  ;;  %v4141_v45 = vmul.f32 1.442695, %v1682_v25  ;;  %6279 = vst [vmem:[#allocation2 + $0x5d8] sm:$0xff] %v5767_v29  ;;  %v3213_v52 = vsub.f32 %v12678_v3, %v12681_v49  ;;  %v3214_v53 = vsub.f32 %v12683_v4, %v12687_v16  ;;  %v5263_v29 = vld [vmem:[#allocation2 + $0xfb8] sm:$0xff] }
 0x40d   : > { %v8425_v47 = vpop.eup %8424  ;;  %v4745_v50 = vsub.f32 %v3209_v2, %v8423_v36  ;;  %8438 = vpow2.f32 %v4139_v34  ;;  %v3215_v58 = vsub.f32 %v12690_v27, %v12692_v28  ;;  %v4143_v60 = vmul.f32 1.442695, %v1683_v35 }
 0x40e   : > { %6280 = vst [vmem:[#allocation2 + $0xb70] sm:$0xff] %v5768_v37  ;;  %v4746_v55 = vsub.f32 %v3210_v63, %v8425_v47  ;;  %8440 = vpow2.f32 %v4141_v45  ;;  %v8427_v61 = vpop.eup %8426  ;;  %v3216_v2 = vsub.f32 %v12694_v32, %v12696_v33  ;;  %v12714_v7 = vadd.f32 1.0, %v1681_v22  ;;  %v1175_v45 = vld [vmem:[%s8885_s25 + $0xd00] sm:$0xff] }
 0x40f   : > { %v5769_v0 = vadd.f32 %v5257_v38, %v4745_v50  ;;  %v4145_v9 = vmul.f32 1.442695, %v1684_v46  ;;  %v4747_v63 = vsub.f32 %v3211_v39, %v8427_v61  ;;  %v12718_v40 = vmul.f32 %v1169_v54, %v1169_v54  ;;  %v5264_v39 = vld [vmem:[#allocation2 + $0xb0] sm:$0xff] }
 0x410   : > { %v8429_v30 = vpop.eup %8428  ;;  %v5770_v31 = vadd.f32 %v5258_v51, %v4746_v55  ;;  %8442 = vpow2.f32 %v4143_v60  ;;  %v12722_v13 = vadd.f32 1.0, %v1682_v25  ;;  %v12724_v14 = vmul.f32 %v1170_v59, %v1170_v59  ;;  %v1174_v25 = vld [vmem:[%s8885_s25 + $0xcf8] sm:$0xff]  ;;  %v1691_v60 = vld [vmem:[%s8891_s21 + $0xd20] sm:$0xff] }
 0x411   : > { %6281 = vst [vmem:[#allocation2 + $0x2c8] sm:$0xff] %v5769_v0  ;;  %v4748_v12 = vsub.f32 %v3212_v42, %v8429_v30  ;;  %8444 = vpow2.f32 %v4145_v9  ;;  %v5771_v15 = vadd.f32 %v5259_v1, %v4747_v63  ;;  %v12726_v17 = vadd.f32 1.0, %v1683_v35  ;;  %v1689_v35 = vld [vmem:[%s8891_s21 + $0xd10] sm:$0xff]  ;;  %v5265_v1 = vld [vmem:[#allocation2 + $0xdd8] sm:$0xff] }
 0x412   : > { %6282 = vst [vmem:[#allocation2 + $0x738] sm:$0xff] %v5770_v31  ;;  %v12728_v43 = vmul.f32 %v1171_v8, %v1171_v8  ;;  %v4147_v3 = vmul.f32 1.442695, %v1685_v10  ;;  %v12732_v48 = vadd.f32 1.0, %v1684_v46  ;;  %v12734_v49 = vmul.f32 %v1172_v41, %v1172_v41  ;;  %v1690_v46 = vld [vmem:[%s8891_s21 + $0xd18] sm:$0xff]  ;;  %v5266_v63 = vld [vmem:[#allocation2 + $0xa30] sm:$0xff] }
 0x413   : > { %v8431_v20 = vpop.eup %8430  ;;  %v5772_v21 = vadd.f32 %v5260_v11, %v4748_v12  ;;  %v4149_v4 = vmul.f32 1.442695, %v1686_v62  ;;  %6283 = vst [vmem:[#allocation2 + $0x808] sm:$0xff] %v5771_v15  ;;  %v3217_v24 = vsub.f32 %v12714_v7, %v12718_v40  ;;  %v12739_v56 = vadd.f32 1.0, %v1685_v10  ;;  %v1178_v8 = vld [vmem:[%s8885_s25 + $0xd18] sm:$0xff]  ;;  %v1692_v10 = vld [vmem:[%s8891_s21 + $0xd28] sm:$0xff] }
 0x414   : > { %v8433_v18 = vpop.eup %8432  ;;  %v4749_v22 = vsub.f32 %v3213_v52, %v8431_v20  ;;  %8446 = vpow2.f32 %v4147_v3  ;;  %v12741_v16 = vmul.f32 %v1173_v44, %v1173_v44  ;;  %v4151_v26 = vmul.f32 1.442695, %v1687_v19  ;;  %v1176_v52 = vld [vmem:[%s8885_s25 + $0xd08] sm:$0xff]  ;;  %v5267_v15 = vld [vmem:[#allocation2 + $0x1d0] sm:$0xff] }
 0x415   : > { %6284 = vst [vmem:[#allocation2 + $0x60] sm:$0xff] %v5772_v21  ;;  %v4750_v57 = vsub.f32 %v3214_v53, %v8433_v18  ;;  %8448 = vpow2.f32 %v4149_v4  ;;  %v3218_v32 = vsub.f32 %v12722_v13, %v12724_v14  ;;  %v3219_v33 = vsub.f32 %v12726_v17, %v12728_v43  ;;  %v1693_v3 = vld [vmem:[%s8891_s21 + $0xd30] sm:$0xff]  ;;  %v1694_v4 = vld [vmem:[%s8891_s21 + $0xd38] sm:$0xff] }
 0x416   : > { %v8435_v27 = vpop.eup %8434  ;;  %v5773_v28 = vadd.f32 %v5261_v5, %v4749_v22  ;;  %v4153_v34 = vmul.f32 1.442695, %v1688_v6  ;;  %v3220_v42 = vsub.f32 %v12732_v48, %v12734_v49  ;;  %8450 = vpow2.f32 %v4151_v26  ;;  %v5268_v5 = vld [vmem:[#allocation2 + $0xdd0] sm:$0xff]  ;;  %v1179_v49 = vld [vmem:[%s8885_s25 + $0xd20] sm:$0xff] }
 0x417   : > { %v8437_v36 = vpop.eup %8436  ;;  %v5774_v37 = vadd.f32 %v5262_v23, %v4750_v57  ;;  %v4751_v38 = vsub.f32 %v3215_v58, %v8435_v27  ;;  %v12753_v50 = vadd.f32 1.0, %v1686_v62  ;;  %v12755_v51 = vmul.f32 %v1174_v25, %v1174_v25  ;;  %v1177_v58 = vld [vmem:[%s8885_s25 + $0xd10] sm:$0xff]  ;;  %v1180_v23 = vld [vmem:[%s8885_s25 + $0xd28] sm:$0xff]  ;;  %v1695_v25 = vld [vmem:[%s8891_s21 + $0xd40] sm:$0xff] }
 0x418   : > { %6285 = vst [vmem:[#allocation2 + $0x6c0] sm:$0xff] %v5773_v28  ;;  %v4752_v47 = vsub.f32 %v3216_v2, %v8437_v36  ;;  %8452 = vpow2.f32 %v4153_v34  ;;  %v3221_v54 = vsub.f32 %v12739_v56, %v12741_v16  ;;  %v12760_v55 = vadd.f32 1.0, %v1687_v19  ;;  %v5269_v28 = vld [vmem:[#allocation2 + $0x3a0] sm:$0xff] }
 0x419   : > { %6286 = vst [vmem:[#allocation2 + $0xae8] sm:$0xff] %v5774_v37  ;;  %v5775_v53 = vadd.f32 %v5263_v29, %v4751_v38  ;;  %v4155_v59 = vmul.f32 1.442695, %v1689_v35  ;;  %v12764_v2 = vmul.f32 %v1175_v45, %v1175_v45  ;;  %v12766_v7 = vadd.f32 1.0, %v1688_v6  ;;  %v5270_v38 = vld [vmem:[#allocation2 + $0x9b8] sm:$0xff] }
 0x41a   : > { %v8439_v61 = vpop.eup %8438  ;;  %v5776_v0 = vadd.f32 %v5264_v39, %v4752_v47  ;;  %v4157_v9 = vmul.f32 1.442695, %v1690_v46  ;;  %v12770_v11 = vmul.f32 %v1176_v52, %v1176_v52  ;;  %v12772_v40 = vadd.f32 1.0, %v1689_v35  ;;  %v1696_v35 = vld [vmem:[%s8891_s21 + $0xd48] sm:$0xff]  ;;  %v1182_v45 = vld [vmem:[%s8885_s25 + $0xd38] sm:$0xff] }
 0x41b   : > { %v8441_v30 = vpop.eup %8440  ;;  %6287 = vst [vmem:[#allocation2 + $0xfb8] sm:$0xff] %v5775_v53  ;;  %v4753_v31 = vsub.f32 %v3217_v24, %v8439_v61  ;;  %8454 = vpow2.f32 %v4155_v59  ;;  %v12774_v62 = vmul.f32 %v1177_v58, %v1177_v58  ;;  %v4159_v12 = vmul.f32 1.442695, %v1691_v60  ;;  %v1184_v59 = vld [vmem:[%s8885_s25 + $0xd48] sm:$0xff]  ;;  %v1697_v61 = vld [vmem:[%s8891_s21 + $0xd50] sm:$0xff] }
 0x41c   : > { %6288 = vst [vmem:[#allocation2 + $0xb0] sm:$0xff] %v5776_v0  ;;  %v4754_v41 = vsub.f32 %v3218_v32, %v8441_v30  ;;  %8456 = vpow2.f32 %v4157_v9  ;;  %v12776_v17 = vadd.f32 1.0, %v1690_v46  ;;  %v12778_v43 = vmul.f32 %v1178_v8, %v1178_v8  ;;  %v1698_v9 = vld [vmem:[%s8891_s21 + $0xd58] sm:$0xff] }
 0x41d   : > { %v8443_v13 = vpop.eup %8442  ;;  %v5777_v14 = vadd.f32 %v5265_v1, %v4753_v31  ;;  %v4161_v44 = vmul.f32 1.442695, %v1692_v10  ;;  %v3222_v48 = vsub.f32 %v12753_v50, %v12755_v51  ;;  %8458 = vpow2.f32 %v4159_v12  ;;  %v1183_v50 = vld [vmem:[%s8885_s25 + $0xd40] sm:$0xff] }
 0x41e   : > { %v8445_v19 = vpop.eup %8444  ;;  %v5778_v20 = vadd.f32 %v5266_v63, %v4754_v41  ;;  %v4755_v21 = vsub.f32 %v3219_v33, %v8443_v13  ;;  %v3223_v18 = vsub.f32 %v12760_v55, %v12764_v2  ;;  %v3224_v22 = vsub.f32 %v12766_v7, %v12770_v11  ;;  %v1181_v33 = vld [vmem:[%s8885_s25 + $0xd30] sm:$0xff] }
 0x41f   : > { %6289 = vst [vmem:[#allocation2 + $0xdd8] sm:$0xff] %v5777_v14  ;;  %v4756_v6 = vsub.f32 %v3220_v42, %v8445_v19  ;;  %8460 = vpow2.f32 %v4161_v44  ;;  %v3225_v56 = vsub.f32 %v12772_v40, %v12774_v62  ;;  %v12792_v57 = vadd.f32 1.0, %v1691_v60  ;;  %v5272_v7 = vld [vmem:[#allocation2 + $0xcd0] sm:$0xff]  ;;  %v1699_v62 = vld [vmem:[%s8891_s21 + $0xd60] sm:$0xff]  ;;  %v1700_v44 = vld [vmem:[%s8891_s21 + $0xd68] sm:$0xff] }
 0x420   : > { %6290 = vst [vmem:[#allocation2 + $0xa30] sm:$0xff] %v5778_v20  ;;  %v5779_v24 = vadd.f32 %v5267_v15, %v4755_v21  ;;  %v4163_v16 = vmul.f32 1.442695, %v1693_v3  ;;  %v3226_v29 = vsub.f32 %v12776_v17, %v12778_v43  ;;  %v12797_v32 = vmul.f32 %v1179_v49, %v1179_v49  ;;  %v5273_v14 = vld [vmem:[#allocation2 + $0x5f0] sm:$0xff]  ;;  %v5274_v20 = vld [vmem:[#allocation2 + $0x7a0] sm:$0xff] }
 0x421   : > { %v8447_v26 = vpop.eup %8446  ;;  %v5780_v27 = vadd.f32 %v5268_v5, %v4756_v6  ;;  %v4165_v34 = vmul.f32 1.442695, %v1694_v4  ;;  %v12801_v39 = vadd.f32 1.0, %v1692_v10  ;;  %v12803_v42 = vmul.f32 %v1180_v23, %v1180_v23  ;;  %v1186_v6 = vld [vmem:[%s8885_s25 + $0xd58] sm:$0xff] }
 0x422   : > { %v8449_v36 = vpop.eup %8448  ;;  %6291 = vst [vmem:[#allocation2 + $0x1d0] sm:$0xff] %v5779_v24  ;;  %v4757_v37 = vsub.f32 %v3221_v54, %v8447_v26  ;;  %8462 = vpow2.f32 %v4163_v16  ;;  %v12806_v47 = vadd.f32 1.0, %v1693_v3  ;;  %v4167_v51 = vmul.f32 1.442695, %v1695_v25  ;;  %v5271_v54 = vld [vmem:[#allocation2 + $0x198] sm:$0xff]  ;;  %v5275_v24 = vld [vmem:[#allocation2 + $0x1f0] sm:$0xff] }
 0x423   : > { %6292 = vst [vmem:[#allocation2 + $0xdd0] sm:$0xff] %v5780_v27  ;;  %v4758_v46 = vsub.f32 %v3222_v48, %v8449_v36  ;;  %8464 = vpow2.f32 %v4165_v34  ;;  %v8451_v52 = vpop.eup %8450  ;;  %v12809_v55 = vmul.f32 %v1181_v33, %v1181_v33  ;;  %v12811_v58 = vadd.f32 1.0, %v1694_v4  ;;  %v1185_v48 = vld [vmem:[%s8885_s25 + $0xd50] sm:$0xff]  ;;  %v1187_v16 = vld [vmem:[%s8885_s25 + $0xd60] sm:$0xff]  ;;  %v1188_v34 = vld [vmem:[%s8885_s25 + $0xd68] sm:$0xff] }
 0x424   : > { %v5781_v53 = vadd.f32 %v5269_v28, %v4757_v37  ;;  %v4169_v60 = vmul.f32 1.442695, %v1696_v35  ;;  %v4759_v2 = vsub.f32 %v3223_v18, %v8451_v52  ;;  %v12815_v8 = vmul.f32 %v1182_v45, %v1182_v45  ;;  %v1701_v26 = vld [vmem:[%s8891_s21 + $0xd70] sm:$0xff] }
 0x425   : > { %v8453_v0 = vpop.eup %8452  ;;  %v5782_v1 = vadd.f32 %v5270_v38, %v4758_v46  ;;  %8466 = vpow2.f32 %v4167_v51  ;;  %v12818_v30 = vadd.f32 1.0, %v1695_v25  ;;  %v12820_v31 = vmul.f32 %v1183_v50, %v1183_v50  ;;  %v1189_v46 = vld [vmem:[%s8885_s25 + $0xd70] sm:$0xff]  ;;  %v1703_v50 = vld [vmem:[%s8891_s21 + $0xd80] sm:$0xff] }
 0x426   : > { %6293 = vst [vmem:[#allocation2 + $0x3a0] sm:$0xff] %v5781_v53  ;;  %v4760_v10 = vsub.f32 %v3224_v22, %v8453_v0  ;;  %8468 = vpow2.f32 %v4169_v60  ;;  %v5783_v63 = vadd.f32 %v5271_v54, %v4759_v2  ;;  %v12822_v11 = vadd.f32 1.0, %v1696_v35  ;;  %v1702_v35 = vld [vmem:[%s8891_s21 + $0xd78] sm:$0xff]  ;;  %v5277_v53 = vld [vmem:[#allocation2 + $0xef0] sm:$0xff]  ;;  %v5278_v0 = vld [vmem:[#allocation2 + $0x148] sm:$0xff] }
 0x427   : > { %6294 = vst [vmem:[#allocation2 + $0x9b8] sm:$0xff] %v5782_v1  ;;  %v12824_v40 = vmul.f32 %v1184_v59, %v1184_v59  ;;  %v4171_v41 = vmul.f32 1.442695, %v1697_v61  ;;  %v3227_v15 = vsub.f32 %v12792_v57, %v12797_v32  ;;  %v3228_v17 = vsub.f32 %v12801_v39, %v12803_v42  ;;  %v5276_v32 = vld [vmem:[#allocation2 + $0xd88] sm:$0xff] }
 0x428   : > { %v8455_v12 = vpop.eup %8454  ;;  %v5784_v13 = vadd.f32 %v5272_v7, %v4760_v10  ;;  %v4173_v43 = vmul.f32 1.442695, %v1698_v9  ;;  %6295 = vst [vmem:[#allocation2 + $0x198] sm:$0xff] %v5783_v63  ;;  %v3229_v21 = vsub.f32 %v12806_v47, %v12809_v55  ;;  %v3230_v5 = vsub.f32 %v12811_v58, %v12815_v8  ;;  %v1704_v59 = vld [vmem:[%s8891_s21 + $0xd88] sm:$0xff]  ;;  %v5279_v63 = vld [vmem:[#allocation2 + $0x6b8] sm:$0xff] }
 0x429   : > { %v8457_v3 = vpop.eup %8456  ;;  %v4761_v19 = vsub.f32 %v3225_v56, %v8455_v12  ;;  %8470 = vpow2.f32 %v4171_v41  ;;  %v3231_v4 = vsub.f32 %v12818_v30, %v12820_v31  ;;  %v4175_v18 = vmul.f32 1.442695, %v1699_v62 }
 0x42a   : > { %6296 = vst [vmem:[#allocation2 + $0xcd0] sm:$0xff] %v5784_v13  ;;  %v4762_v49 = vsub.f32 %v3226_v29, %v8457_v3  ;;  %8472 = vpow2.f32 %v4173_v43  ;;  %v8459_v22 = vpop.eup %8458  ;;  %v3232_v56 = vsub.f32 %v12822_v11, %v12824_v40  ;;  %v12842_v57 = vadd.f32 1.0, %v1697_v61  ;;  %v1191_v43 = vld [vmem:[%s8885_s25 + $0xd80] sm:$0xff] }
 0x42b   : > { %v5785_v23 = vadd.f32 %v5273_v14, %v4761_v19  ;;  %v4177_v25 = vmul.f32 1.442695, %v1700_v44  ;;  %v4763_v29 = vsub.f32 %v3227_v15, %v8459_v22  ;;  %v12846_v33 = vmul.f32 %v1185_v48, %v1185_v48  ;;  %v5280_v15 = vld [vmem:[#allocation2 + $0xf58] sm:$0xff] }
 0x42c   : > { %v8461_v27 = vpop.eup %8460  ;;  %v5786_v28 = vadd.f32 %v5274_v20, %v4762_v49  ;;  %8474 = vpow2.f32 %v4175_v18  ;;  %v12850_v37 = vadd.f32 1.0, %v1698_v9  ;;  %v12852_v38 = vmul.f32 %v1186_v6, %v1186_v6  ;;  %v1190_v9 = vld [vmem:[%s8885_s25 + $0xd78] sm:$0xff]  ;;  %v1707_v18 = vld [vmem:[%s8891_s21 + $0xda0] sm:$0xff] }
 0x42d   : > { %6297 = vst [vmem:[#allocation2 + $0x5f0] sm:$0xff] %v5785_v23  ;;  %v4764_v36 = vsub.f32 %v3228_v17, %v8461_v27  ;;  %8476 = vpow2.f32 %v4177_v25  ;;  %v5787_v39 = vadd.f32 %v5275_v24, %v4763_v29  ;;  %v12854_v42 = vadd.f32 1.0, %v1699_v62  ;;  %v1705_v62 = vld [vmem:[%s8891_s21 + $0xd90] sm:$0xff] }
 0x42e   : > { %6298 = vst [vmem:[#allocation2 + $0x7a0] sm:$0xff] %v5786_v28  ;;  %v12856_v45 = vmul.f32 %v1187_v16, %v1187_v16  ;;  %v4179_v47 = vmul.f32 1.442695, %v1701_v26  ;;  %v12860_v54 = vadd.f32 1.0, %v1700_v44  ;;  %v12862_v55 = vmul.f32 %v1188_v34, %v1188_v34  ;;  %v1706_v44 = vld [vmem:[%s8891_s21 + $0xd98] sm:$0xff]  ;;  %v5281_v24 = vld [vmem:[#allocation2 + $0xa70] sm:$0xff] }
 0x42f   : > { %v8463_v51 = vpop.eup %8462  ;;  %v5788_v52 = vadd.f32 %v5276_v32, %v4764_v36  ;;  %v4181_v58 = vmul.f32 1.442695, %v1702_v35  ;;  %6299 = vst [vmem:[#allocation2 + $0x1f0] sm:$0xff] %v5787_v39  ;;  %v3233_v1 = vsub.f32 %v12842_v57, %v12846_v33  ;;  %v12867_v2 = vadd.f32 1.0, %v1701_v26  ;;  %v1194_v16 = vld [vmem:[%s8885_s25 + $0xd98] sm:$0xff]  ;;  %v1708_v26 = vld [vmem:[%s8891_s21 + $0xda8] sm:$0xff] }
 0x430   : > { %v8465_v60 = vpop.eup %8464  ;;  %v4765_v61 = vsub.f32 %v3229_v21, %v8463_v51  ;;  %8478 = vpow2.f32 %v4179_v47  ;;  %v12869_v8 = vmul.f32 %v1189_v46, %v1189_v46  ;;  %v4183_v10 = vmul.f32 1.442695, %v1703_v50  ;;  %v1192_v21 = vld [vmem:[%s8885_s25 + $0xd88] sm:$0xff]  ;;  %v5282_v29 = vld [vmem:[#allocation2 + $0xe70] sm:$0xff] }
 0x431   : > { %6300 = vst [vmem:[#allocation2 + $0xd88] sm:$0xff] %v5788_v52  ;;  %v4766_v7 = vsub.f32 %v3230_v5, %v8465_v60  ;;  %8480 = vpow2.f32 %v4181_v58  ;;  %v3234_v11 = vsub.f32 %v12850_v37, %v12852_v38  ;;  %v3235_v40 = vsub.f32 %v12854_v42, %v12856_v45  ;;  %v5283_v39 = vld [vmem:[#allocation2 + $0x7d0] sm:$0xff]  ;;  %v1710_v58 = vld [vmem:[%s8891_s21 + $0xdb8] sm:$0xff] }
 0x432   : > { %v8467_v30 = vpop.eup %8466  ;;  %v5789_v31 = vadd.f32 %v5277_v53, %v4765_v61  ;;  %v4185_v41 = vmul.f32 1.442695, %v1704_v59  ;;  %v3236_v17 = vsub.f32 %v12860_v54, %v12862_v55  ;;  %8482 = vpow2.f32 %v4183_v10  ;;  %v1709_v47 = vld [vmem:[%s8891_s21 + $0xdb0] sm:$0xff]  ;;  %v5284_v53 = vld [vmem:[#allocation2 + $0xe18] sm:$0xff]  ;;  %v1195_v55 = vld [vmem:[%s8885_s25 + $0xda0] sm:$0xff] }
 0x433   : > { %v8469_v12 = vpop.eup %8468  ;;  %v5790_v13 = vadd.f32 %v5278_v0, %v4766_v7  ;;  %v4767_v14 = vsub.f32 %v3231_v4, %v8467_v30  ;;  %v12881_v19 = vadd.f32 1.0, %v1702_v35  ;;  %v12883_v20 = vmul.f32 %v1190_v9, %v1190_v9  ;;  %v1193_v4 = vld [vmem:[%s8885_s25 + $0xd90] sm:$0xff]  ;;  %v1196_v0 = vld [vmem:[%s8885_s25 + $0xda8] sm:$0xff]  ;;  %v1711_v9 = vld [vmem:[%s8891_s21 + $0xdc0] sm:$0xff] }
 0x434   : > { %6301 = vst [vmem:[#allocation2 + $0xef0] sm:$0xff] %v5789_v31  ;;  %v4768_v3 = vsub.f32 %v3232_v56, %v8469_v12  ;;  %8484 = vpow2.f32 %v4185_v41  ;;  %v3237_v48 = vsub.f32 %v12867_v2, %v12869_v8  ;;  %v12888_v49 = vadd.f32 1.0, %v1703_v50  ;;  %v5285_v31 = vld [vmem:[#allocation2 + $0x518] sm:$0xff] }
 0x435   : > { %6302 = vst [vmem:[#allocation2 + $0x148] sm:$0xff] %v5790_v13  ;;  %v5791_v5 = vadd.f32 %v5279_v63, %v4767_v14  ;;  %v4187_v6 = vmul.f32 1.442695, %v1705_v62  ;;  %v12892_v56 = vmul.f32 %v1191_v43, %v1191_v43  ;;  %v12894_v57 = vadd.f32 1.0, %v1704_v59  ;;  %v5286_v14 = vld [vmem:[#allocation2 + $0x9f0] sm:$0xff]  ;;  %v1198_v43 = vld [vmem:[%s8885_s25 + $0xdb8] sm:$0xff] }
 0x436   : > { %v8471_v22 = vpop.eup %8470  ;;  %v5792_v23 = vadd.f32 %v5280_v15, %v4768_v3  ;;  %v4189_v25 = vmul.f32 1.442695, %v1706_v44  ;;  %v12898_v32 = vmul.f32 %v1192_v21, %v1192_v21  ;;  %v12900_v33 = vadd.f32 1.0, %v1705_v62  ;;  %v1712_v62 = vld [vmem:[%s8891_s21 + $0xdc8] sm:$0xff] }
 0x437   : > { %v8473_v27 = vpop.eup %8472  ;;  %6303 = vst [vmem:[#allocation2 + $0x6b8] sm:$0xff] %v5791_v5  ;;  %v4769_v28 = vsub.f32 %v3233_v1, %v8471_v22  ;;  %8486 = vpow2.f32 %v4187_v6  ;;  %v12902_v35 = vmul.f32 %v1193_v4, %v1193_v4  ;;  %v4191_v36 = vmul.f32 1.442695, %v1707_v18  ;;  %v1200_v6 = vld [vmem:[%s8885_s25 + $0xdc8] sm:$0xff]  ;;  %v1713_v22 = vld [vmem:[%s8891_s21 + $0xdd0] sm:$0xff] }
 0x438   : > { %6304 = vst [vmem:[#allocation2 + $0xf58] sm:$0xff] %v5792_v23  ;;  %v4770_v34 = vsub.f32 %v3234_v11, %v8473_v27  ;;  %8488 = vpow2.f32 %v4189_v25  ;;  %v12904_v42 = vadd.f32 1.0, %v1706_v44  ;;  %v12906_v45 = vmul.f32 %v1194_v16, %v1194_v16  ;;  %v1714_v25 = vld [vmem:[%s8891_s21 + $0xdd8] sm:$0xff] }
 0x439   : > { %v8475_v37 = vpop.eup %8474  ;;  %v5793_v38 = vadd.f32 %v5281_v24, %v4769_v28  ;;  %v4193_v46 = vmul.f32 1.442695, %v1708_v26  ;;  %v3238_v54 = vsub.f32 %v12881_v19, %v12883_v20  ;;  %8490 = vpow2.f32 %v4191_v36  ;;  %v1199_v19 = vld [vmem:[%s8885_s25 + $0xdc0] sm:$0xff] }
 0x43a   : > { %v8477_v50 = vpop.eup %8476  ;;  %v5794_v51 = vadd.f32 %v5282_v29, %v4770_v34  ;;  %v4771_v52 = vsub.f32 %v3235_v40, %v8475_v37  ;;  %v3239_v60 = vsub.f32 %v12888_v49, %v12892_v56  ;;  %v3240_v61 = vsub.f32 %v12894_v57, %v12898_v32  ;;  %v1197_v40 = vld [vmem:[%s8885_s25 + $0xdb0] sm:$0xff] }
 0x43b   : > { %6305 = vst [vmem:[#allocation2 + $0xa70] sm:$0xff] %v5793_v38  ;;  %v4772_v59 = vsub.f32 %v3236_v17, %v8477_v50  ;;  %8492 = vpow2.f32 %v4193_v46  ;;  %v3241_v2 = vsub.f32 %v12900_v33, %v12902_v35  ;;  %v12920_v7 = vadd.f32 1.0, %v1707_v18  ;;  %v5288_v57 = vld [vmem:[#allocation2 + $0xf0] sm:$0xff]  ;;  %v1715_v35 = vld [vmem:[%s8891_s21 + $0xde0] sm:$0xff]  ;;  %v5289_v38 = vld [vmem:[#allocation2 + $0x218] sm:$0xff] }
 0x43c   : > { %6306 = vst [vmem:[#allocation2 + $0xe70] sm:$0xff] %v5794_v51  ;;  %v5795_v1 = vadd.f32 %v5283_v39, %v4771_v52  ;;  %v4195_v8 = vmul.f32 1.442695, %v1709_v47  ;;  %v3242_v63 = vsub.f32 %v12904_v42, %v12906_v45  ;;  %v12925_v11 = vmul.f32 %v1195_v55, %v1195_v55  ;;  %v1716_v46 = vld [vmem:[%s8891_s21 + $0xde8] sm:$0xff]  ;;  %v5290_v51 = vld [vmem:[#allocation2 + $0x58] sm:$0xff] }
 0x43d   : > { %v8479_v10 = vpop.eup %8478  ;;  %v5796_v30 = vadd.f32 %v5284_v53, %v4772_v59  ;;  %v4197_v41 = vmul.f32 1.442695, %v1710_v58  ;;  %v12929_v15 = vadd.f32 1.0, %v1708_v26  ;;  %v12931_v17 = vmul.f32 %v1196_v0, %v1196_v0  ;;  %v1202_v59 = vld [vmem:[%s8885_s25 + $0xdd8] sm:$0xff] }
 0x43e   : > { %v8481_v12 = vpop.eup %8480  ;;  %6307 = vst [vmem:[#allocation2 + $0x7d0] sm:$0xff] %v5795_v1  ;;  %v4773_v13 = vsub.f32 %v3237_v48, %v8479_v10  ;;  %8494 = vpow2.f32 %v4195_v8  ;;  %v12934_v3 = vadd.f32 1.0, %v1709_v47  ;;  %v4199_v20 = vmul.f32 1.442695, %v1711_v9  ;;  %v5287_v48 = vld [vmem:[#allocation2 + $0x6a0] sm:$0xff]  ;;  %v5291_v1 = vld [vmem:[#allocation2 + $0x28] sm:$0xff] }
 0x43f   : > { %6308 = vst [vmem:[#allocation2 + $0xe18] sm:$0xff] %v5796_v30  ;;  %v4774_v44 = vsub.f32 %v3238_v54, %v8481_v12  ;;  %8496 = vpow2.f32 %v4197_v41  ;;  %v8483_v21 = vpop.eup %8482  ;;  %v12937_v49 = vmul.f32 %v1197_v40, %v1197_v40  ;;  %v12939_v4 = vadd.f32 1.0, %v1710_v58  ;;  %v1201_v54 = vld [vmem:[%s8885_s25 + $0xdd0] sm:$0xff]  ;;  %v1203_v8 = vld [vmem:[%s8885_s25 + $0xde0] sm:$0xff]  ;;  %v1204_v41 = vld [vmem:[%s8885_s25 + $0xde8] sm:$0xff] }
 0x440   : > { %v5797_v5 = vadd.f32 %v5285_v31, %v4773_v13  ;;  %v4201_v18 = vmul.f32 1.442695, %v1712_v62  ;;  %v4775_v56 = vsub.f32 %v3239_v60, %v8483_v21  ;;  %v12943_v16 = vmul.f32 %v1198_v43, %v1198_v43  ;;  %v1717_v10 = vld [vmem:[%s8891_s21 + $0xdf0] sm:$0xff] }
 0x441   : > { %v8485_v23 = vpop.eup %8484  ;;  %v5798_v24 = vadd.f32 %v5286_v14, %v4774_v44  ;;  %8498 = vpow2.f32 %v4199_v20  ;;  %v12946_v27 = vadd.f32 1.0, %v1711_v9  ;;  %v12948_v28 = vmul.f32 %v1199_v19, %v1199_v19  ;;  %v1205_v44 = vld [vmem:[%s8885_s25 + $0xdf0] sm:$0xff]  ;;  %v1719_v19 = vld [vmem:[%s8891_s21 + $0xe00] sm:$0xff] }
 0x442   : > { %6309 = vst [vmem:[#allocation2 + $0x518] sm:$0xff] %v5797_v5  ;;  %v4776_v26 = vsub.f32 %v3240_v61, %v8485_v23  ;;  %8500 = vpow2.f32 %v4201_v18  ;;  %v5799_v29 = vadd.f32 %v5287_v48, %v4775_v56  ;;  %v12950_v32 = vadd.f32 1.0, %v1712_v62  ;;  %v1718_v62 = vld [vmem:[%s8891_s21 + $0xdf8] sm:$0xff]  ;;  %v5293_v5 = vld [vmem:[#allocation2 + $0x290] sm:$0xff]  ;;  %v5294_v23 = vld [vmem:[#allocation2 + $0x4e0] sm:$0xff] }
 0x443   : > { %6310 = vst [vmem:[#allocation2 + $0x9f0] sm:$0xff] %v5798_v24  ;;  %v12952_v33 = vmul.f32 %v1200_v6, %v1200_v6  ;;  %v4203_v34 = vmul.f32 1.442695, %v1713_v22  ;;  %v3243_v39 = vsub.f32 %v12920_v7, %v12925_v11  ;;  %v3244_v42 = vsub.f32 %v12929_v15, %v12931_v17  ;;  %v5292_v11 = vld [vmem:[#allocation2 + $0xc18] sm:$0xff]  ;;  %v1720_v6 = vld [vmem:[%s8891_s21 + $0xe08] sm:$0xff] }
 0x444   : > { %v8487_v36 = vpop.eup %8486  ;;  %v5800_v37 = vadd.f32 %v5288_v57, %v4776_v26  ;;  %v4205_v45 = vmul.f32 1.442695, %v1714_v25  ;;  %6311 = vst [vmem:[#allocation2 + $0x6a0] sm:$0xff] %v5799_v29  ;;  %v3245_v52 = vsub.f32 %v12934_v3, %v12937_v49  ;;  %v3246_v53 = vsub.f32 %v12939_v4, %v12943_v16  ;;  %v5295_v29 = vld [vmem:[#allocation2 + $0x10] sm:$0xff] }
 0x445   : > { %v8489_v47 = vpop.eup %8488  ;;  %v4777_v50 = vsub.f32 %v3241_v2, %v8487_v36  ;;  %8502 = vpow2.f32 %v4203_v34  ;;  %v3247_v58 = vsub.f32 %v12946_v27, %v12948_v28  ;;  %v4207_v60 = vmul.f32 1.442695, %v1715_v35 }
 0x446   : > { %6312 = vst [vmem:[#allocation2 + $0xf0] sm:$0xff] %v5800_v37  ;;  %v4778_v55 = vsub.f32 %v3242_v63, %v8489_v47  ;;  %8504 = vpow2.f32 %v4205_v45  ;;  %v8491_v61 = vpop.eup %8490  ;;  %v3248_v2 = vsub.f32 %v12950_v32, %v12952_v33  ;;  %v12970_v7 = vadd.f32 1.0, %v1713_v22  ;;  %v1207_v45 = vld [vmem:[%s8885_s25 + $0xe00] sm:$0xff] }
 0x447   : > { %v5801_v0 = vadd.f32 %v5289_v38, %v4777_v50  ;;  %v4209_v9 = vmul.f32 1.442695, %v1716_v46  ;;  %v4779_v63 = vsub.f32 %v3243_v39, %v8491_v61  ;;  %v12974_v40 = vmul.f32 %v1201_v54, %v1201_v54  ;;  %v5296_v39 = vld [vmem:[#allocation2 + $0xa68] sm:$0xff] }
 0x448   : > { %v8493_v30 = vpop.eup %8492  ;;  %v5802_v31 = vadd.f32 %v5290_v51, %v4778_v55  ;;  %8506 = vpow2.f32 %v4207_v60  ;;  %v12978_v13 = vadd.f32 1.0, %v1714_v25  ;;  %v12980_v14 = vmul.f32 %v1202_v59, %v1202_v59  ;;  %v1206_v25 = vld [vmem:[%s8885_s25 + $0xdf8] sm:$0xff]  ;;  %v1723_v60 = vld [vmem:[%s8891_s21 + $0xe20] sm:$0xff] }
 0x449   : > { %6313 = vst [vmem:[#allocation2 + $0x218] sm:$0xff] %v5801_v0  ;;  %v4780_v12 = vsub.f32 %v3244_v42, %v8493_v30  ;;  %8508 = vpow2.f32 %v4209_v9  ;;  %v5803_v15 = vadd.f32 %v5291_v1, %v4779_v63  ;;  %v12982_v17 = vadd.f32 1.0, %v1715_v35  ;;  %v1721_v35 = vld [vmem:[%s8891_s21 + $0xe10] sm:$0xff]  ;;  %v5298_v63 = vld [vmem:[#allocation2 + $0x680] sm:$0xff] }
 0x44a   : > { %6314 = vst [vmem:[#allocation2 + $0x58] sm:$0xff] %v5802_v31  ;;  %v12984_v43 = vmul.f32 %v1203_v8, %v1203_v8  ;;  %v4211_v3 = vmul.f32 1.442695, %v1717_v10  ;;  %v12988_v48 = vadd.f32 1.0, %v1716_v46  ;;  %v12990_v49 = vmul.f32 %v1204_v41, %v1204_v41  ;;  %v1722_v46 = vld [vmem:[%s8891_s21 + $0xe18] sm:$0xff]  ;;  %v5297_v1 = vld [vmem:[#allocation2 + $0xf30] sm:$0xff] }
 0x44b   : > { %v8495_v20 = vpop.eup %8494  ;;  %v5804_v21 = vadd.f32 %v5292_v11, %v4780_v12  ;;  %v4213_v4 = vmul.f32 1.442695, %v1718_v62  ;;  %6315 = vst [vmem:[#allocation2 + $0x28] sm:$0xff] %v5803_v15  ;;  %v3249_v24 = vsub.f32 %v12970_v7, %v12974_v40  ;;  %v12995_v56 = vadd.f32 1.0, %v1717_v10  ;;  %v1210_v8 = vld [vmem:[%s8885_s25 + $0xe18] sm:$0xff]  ;;  %v1724_v10 = vld [vmem:[%s8891_s21 + $0xe28] sm:$0xff] }
 0x44c   : > { %v8497_v18 = vpop.eup %8496  ;;  %v4781_v22 = vsub.f32 %v3245_v52, %v8495_v20  ;;  %8510 = vpow2.f32 %v4211_v3  ;;  %v12997_v16 = vmul.f32 %v1205_v44, %v1205_v44  ;;  %v4215_v26 = vmul.f32 1.442695, %v1719_v19  ;;  %v1208_v52 = vld [vmem:[%s8885_s25 + $0xe08] sm:$0xff]  ;;  %v1725_v3 = vld [vmem:[%s8891_s21 + $0xe30] sm:$0xff] }
 0x44d   : > { %6316 = vst [vmem:[#allocation2 + $0xc18] sm:$0xff] %v5804_v21  ;;  %v4782_v57 = vsub.f32 %v3246_v53, %v8497_v18  ;;  %8512 = vpow2.f32 %v4213_v4  ;;  %v3250_v32 = vsub.f32 %v12978_v13, %v12980_v14  ;;  %v3251_v33 = vsub.f32 %v12982_v17, %v12984_v43  ;;  %v5299_v15 = vld [vmem:[#allocation2 + $0x108] sm:$0xff]  ;;  %v1726_v4 = vld [vmem:[%s8891_s21 + $0xe38] sm:$0xff] }
 0x44e   : > { %v8499_v27 = vpop.eup %8498  ;;  %v5805_v28 = vadd.f32 %v5293_v5, %v4781_v22  ;;  %v4217_v34 = vmul.f32 1.442695, %v1720_v6  ;;  %v3252_v42 = vsub.f32 %v12988_v48, %v12990_v49  ;;  %8514 = vpow2.f32 %v4215_v26  ;;  %v5300_v5 = vld [vmem:[#allocation2 + $0x778] sm:$0xff]  ;;  %v1211_v49 = vld [vmem:[%s8885_s25 + $0xe20] sm:$0xff] }
 0x44f   : > { %v8501_v36 = vpop.eup %8500  ;;  %v5806_v37 = vadd.f32 %v5294_v23, %v4782_v57  ;;  %v4783_v38 = vsub.f32 %v3247_v58, %v8499_v27  ;;  %v13009_v50 = vadd.f32 1.0, %v1718_v62  ;;  %v13011_v51 = vmul.f32 %v1206_v25, %v1206_v25  ;;  %v1209_v58 = vld [vmem:[%s8885_s25 + $0xe10] sm:$0xff]  ;;  %v1212_v23 = vld [vmem:[%s8885_s25 + $0xe28] sm:$0xff]  ;;  %v1727_v25 = vld [vmem:[%s8891_s21 + $0xe40] sm:$0xff] }
 0x450   : > { %6317 = vst [vmem:[#allocation2 + $0x290] sm:$0xff] %v5805_v28  ;;  %v4784_v47 = vsub.f32 %v3248_v2, %v8501_v36  ;;  %8516 = vpow2.f32 %v4217_v34  ;;  %v3253_v54 = vsub.f32 %v12995_v56, %v12997_v16  ;;  %v13016_v55 = vadd.f32 1.0, %v1719_v19  ;;  %v5301_v28 = vld [vmem:[#allocation2 + $0x368] sm:$0xff] }
 0x451   : > { %6318 = vst [vmem:[#allocation2 + $0x4e0] sm:$0xff] %v5806_v37  ;;  %v5807_v53 = vadd.f32 %v5295_v29, %v4783_v38  ;;  %v4219_v59 = vmul.f32 1.442695, %v1721_v35  ;;  %v13020_v2 = vmul.f32 %v1207_v45, %v1207_v45  ;;  %v13022_v7 = vadd.f32 1.0, %v1720_v6  ;;  %v5302_v38 = vld [vmem:[#allocation2 + $0x110] sm:$0xff]  ;;  %v1214_v45 = vld [vmem:[%s8885_s25 + $0xe38] sm:$0xff] }
 0x452   : > { %v8503_v61 = vpop.eup %8502  ;;  %v5808_v0 = vadd.f32 %v5296_v39, %v4784_v47  ;;  %v4221_v9 = vmul.f32 1.442695, %v1722_v46  ;;  %v13026_v11 = vmul.f32 %v1208_v52, %v1208_v52  ;;  %v13028_v40 = vadd.f32 1.0, %v1721_v35  ;;  %v1728_v35 = vld [vmem:[%s8891_s21 + $0xe48] sm:$0xff] }
 0x453   : > { %v8505_v30 = vpop.eup %8504  ;;  %6319 = vst [vmem:[#allocation2 + $0x10] sm:$0xff] %v5807_v53  ;;  %v4785_v31 = vsub.f32 %v3249_v24, %v8503_v61  ;;  %8518 = vpow2.f32 %v4219_v59  ;;  %v13030_v62 = vmul.f32 %v1209_v58, %v1209_v58  ;;  %v4223_v12 = vmul.f32 1.442695, %v1723_v60  ;;  %v1216_v59 = vld [vmem:[%s8885_s25 + $0xe48] sm:$0xff]  ;;  %v1729_v61 = vld [vmem:[%s8891_s21 + $0xe50] sm:$0xff] }
 0x454   : > { %6320 = vst [vmem:[#allocation2 + $0xa68] sm:$0xff] %v5808_v0  ;;  %v4786_v41 = vsub.f32 %v3250_v32, %v8505_v30  ;;  %8520 = vpow2.f32 %v4221_v9  ;;  %v13032_v17 = vadd.f32 1.0, %v1722_v46  ;;  %v13034_v43 = vmul.f32 %v1210_v8, %v1210_v8  ;;  %v1730_v9 = vld [vmem:[%s8891_s21 + $0xe58] sm:$0xff] }
 0x455   : > { %v8507_v13 = vpop.eup %8506  ;;  %v5809_v14 = vadd.f32 %v5297_v1, %v4785_v31  ;;  %v4225_v44 = vmul.f32 1.442695, %v1724_v10  ;;  %v3254_v48 = vsub.f32 %v13009_v50, %v13011_v51  ;;  %8522 = vpow2.f32 %v4223_v12  ;;  %v1215_v50 = vld [vmem:[%s8885_s25 + $0xe40] sm:$0xff] }
 0x456   : > { %v8509_v19 = vpop.eup %8508  ;;  %v5810_v20 = vadd.f32 %v5298_v63, %v4786_v41  ;;  %v4787_v21 = vsub.f32 %v3251_v33, %v8507_v13  ;;  %v3255_v18 = vsub.f32 %v13016_v55, %v13020_v2  ;;  %v3256_v22 = vsub.f32 %v13022_v7, %v13026_v11  ;;  %v1213_v33 = vld [vmem:[%s8885_s25 + $0xe30] sm:$0xff]  ;;  %v5304_v7 = vld [vmem:[#allocation2 + $0xee0] sm:$0xff] }
 0x457   : > { %6321 = vst [vmem:[#allocation2 + $0xf30] sm:$0xff] %v5809_v14  ;;  %v4788_v6 = vsub.f32 %v3252_v42, %v8509_v19  ;;  %8524 = vpow2.f32 %v4225_v44  ;;  %v3257_v56 = vsub.f32 %v13028_v40, %v13030_v62  ;;  %v13048_v57 = vadd.f32 1.0, %v1723_v60  ;;  %v1731_v62 = vld [vmem:[%s8891_s21 + $0xe60] sm:$0xff]  ;;  %v1732_v44 = vld [vmem:[%s8891_s21 + $0xe68] sm:$0xff] }
 0x458   : > { %6322 = vst [vmem:[#allocation2 + $0x680] sm:$0xff] %v5810_v20  ;;  %v5811_v24 = vadd.f32 %v5299_v15, %v4787_v21  ;;  %v4227_v16 = vmul.f32 1.442695, %v1725_v3  ;;  %v3258_v29 = vsub.f32 %v13032_v17, %v13034_v43  ;;  %v13053_v32 = vmul.f32 %v1211_v49, %v1211_v49  ;;  %v5305_v14 = vld [vmem:[#allocation2 + $0x260] sm:$0xff]  ;;  %v5306_v20 = vld [vmem:[#allocation2 + $0x3a8] sm:$0xff] }
 0x459   : > { %v8511_v26 = vpop.eup %8510  ;;  %v5812_v27 = vadd.f32 %v5300_v5, %v4788_v6  ;;  %v4229_v34 = vmul.f32 1.442695, %v1726_v4  ;;  %v13057_v39 = vadd.f32 1.0, %v1724_v10  ;;  %v13059_v42 = vmul.f32 %v1212_v23, %v1212_v23  ;;  %v1218_v6 = vld [vmem:[%s8885_s25 + $0xe58] sm:$0xff] }
 0x45a   : > { %v8513_v36 = vpop.eup %8512  ;;  %6323 = vst [vmem:[#allocation2 + $0x108] sm:$0xff] %v5811_v24  ;;  %v4789_v37 = vsub.f32 %v3253_v54, %v8511_v26  ;;  %8526 = vpow2.f32 %v4227_v16  ;;  %v13062_v47 = vadd.f32 1.0, %v1725_v3  ;;  %v4231_v51 = vmul.f32 1.442695, %v1727_v25  ;;  %v5303_v54 = vld [vmem:[#allocation2 + $0xaa0] sm:$0xff]  ;;  %v5307_v24 = vld [vmem:[#allocation2 + $0xf68] sm:$0xff] }
 0x45b   : > { %6324 = vst [vmem:[#allocation2 + $0x778] sm:$0xff] %v5812_v27  ;;  %v4790_v46 = vsub.f32 %v3254_v48, %v8513_v36  ;;  %8528 = vpow2.f32 %v4229_v34  ;;  %v8515_v52 = vpop.eup %8514  ;;  %v13065_v55 = vmul.f32 %v1213_v33, %v1213_v33  ;;  %v13067_v58 = vadd.f32 1.0, %v1726_v4  ;;  %v1217_v48 = vld [vmem:[%s8885_s25 + $0xe50] sm:$0xff]  ;;  %v1219_v16 = vld [vmem:[%s8885_s25 + $0xe60] sm:$0xff]  ;;  %v1220_v34 = vld [vmem:[%s8885_s25 + $0xe68] sm:$0xff] }
 0x45c   : > { %v5813_v53 = vadd.f32 %v5301_v28, %v4789_v37  ;;  %v4233_v60 = vmul.f32 1.442695, %v1728_v35  ;;  %v4791_v2 = vsub.f32 %v3255_v18, %v8515_v52  ;;  %v13071_v8 = vmul.f32 %v1214_v45, %v1214_v45  ;;  %v1733_v26 = vld [vmem:[%s8891_s21 + $0xe70] sm:$0xff] }
 0x45d   : > { %v8517_v0 = vpop.eup %8516  ;;  %v5814_v1 = vadd.f32 %v5302_v38, %v4790_v46  ;;  %8530 = vpow2.f32 %v4231_v51  ;;  %v13074_v30 = vadd.f32 1.0, %v1727_v25  ;;  %v13076_v31 = vmul.f32 %v1215_v50, %v1215_v50  ;;  %v1221_v46 = vld [vmem:[%s8885_s25 + $0xe70] sm:$0xff]  ;;  %v1735_v50 = vld [vmem:[%s8891_s21 + $0xe80] sm:$0xff] }
 0x45e   : > { %6325 = vst [vmem:[#allocation2 + $0x368] sm:$0xff] %v5813_v53  ;;  %v4792_v10 = vsub.f32 %v3256_v22, %v8517_v0  ;;  %8532 = vpow2.f32 %v4233_v60  ;;  %v5815_v63 = vadd.f32 %v5303_v54, %v4791_v2  ;;  %v13078_v11 = vadd.f32 1.0, %v1728_v35  ;;  %v1734_v35 = vld [vmem:[%s8891_s21 + $0xe78] sm:$0xff]  ;;  %v5309_v53 = vld [vmem:[#allocation2 + $0x4f0] sm:$0xff] }
 0x45f   : > { %6326 = vst [vmem:[#allocation2 + $0x110] sm:$0xff] %v5814_v1  ;;  %v13080_v40 = vmul.f32 %v1216_v59, %v1216_v59  ;;  %v4235_v41 = vmul.f32 1.442695, %v1729_v61  ;;  %v3259_v15 = vsub.f32 %v13048_v57, %v13053_v32  ;;  %v3260_v17 = vsub.f32 %v13057_v39, %v13059_v42  ;;  %v5308_v32 = vld [vmem:[#allocation2 + $0x880] sm:$0xff]  ;;  %v1736_v59 = vld [vmem:[%s8891_s21 + $0xe88] sm:$0xff]  ;;  %v5310_v0 = vld [vmem:[#allocation2 + $0x850] sm:$0xff] }
 0x460   : > { %v8519_v12 = vpop.eup %8518  ;;  %v5816_v13 = vadd.f32 %v5304_v7, %v4792_v10  ;;  %v4237_v43 = vmul.f32 1.442695, %v1730_v9  ;;  %6327 = vst [vmem:[#allocation2 + $0xaa0] sm:$0xff] %v5815_v63  ;;  %v3261_v21 = vsub.f32 %v13062_v47, %v13065_v55  ;;  %v3262_v5 = vsub.f32 %v13067_v58, %v13071_v8  ;;  %v5311_v63 = vld [vmem:[#allocation2 + $0xd10] sm:$0xff] }
 0x461   : > { %v8521_v3 = vpop.eup %8520  ;;  %v4793_v19 = vsub.f32 %v3257_v56, %v8519_v12  ;;  %8534 = vpow2.f32 %v4235_v41  ;;  %v3263_v4 = vsub.f32 %v13074_v30, %v13076_v31  ;;  %v4239_v18 = vmul.f32 1.442695, %v1731_v62 }
 0x462   : > { %6328 = vst [vmem:[#allocation2 + $0xee0] sm:$0xff] %v5816_v13  ;;  %v4794_v49 = vsub.f32 %v3258_v29, %v8521_v3  ;;  %8536 = vpow2.f32 %v4237_v43  ;;  %v8523_v22 = vpop.eup %8522  ;;  %v3264_v56 = vsub.f32 %v13078_v11, %v13080_v40  ;;  %v13098_v57 = vadd.f32 1.0, %v1729_v61  ;;  %v1223_v43 = vld [vmem:[%s8885_s25 + $0xe80] sm:$0xff] }
 0x463   : > { %v5817_v23 = vadd.f32 %v5305_v14, %v4793_v19  ;;  %v4241_v25 = vmul.f32 1.442695, %v1732_v44  ;;  %v4795_v29 = vsub.f32 %v3259_v15, %v8523_v22  ;;  %v13102_v33 = vmul.f32 %v1217_v48, %v1217_v48  ;;  %v5312_v15 = vld [vmem:[#allocation2 + $0xb38] sm:$0xff] }
 0x464   : > { %v8525_v27 = vpop.eup %8524  ;;  %v5818_v28 = vadd.f32 %v5306_v20, %v4794_v49  ;;  %8538 = vpow2.f32 %v4239_v18  ;;  %v13106_v37 = vadd.f32 1.0, %v1730_v9  ;;  %v13108_v38 = vmul.f32 %v1218_v6, %v1218_v6  ;;  %v1222_v9 = vld [vmem:[%s8885_s25 + $0xe78] sm:$0xff]  ;;  %v1739_v18 = vld [vmem:[%s8891_s21 + $0xea0] sm:$0xff] }
 0x465   : > { %6329 = vst [vmem:[#allocation2 + $0x260] sm:$0xff] %v5817_v23  ;;  %v4796_v36 = vsub.f32 %v3260_v17, %v8525_v27  ;;  %8540 = vpow2.f32 %v4241_v25  ;;  %v5819_v39 = vadd.f32 %v5307_v24, %v4795_v29  ;;  %v13110_v42 = vadd.f32 1.0, %v1731_v62  ;;  %v1737_v62 = vld [vmem:[%s8891_s21 + $0xe90] sm:$0xff]  ;;  %v5314_v29 = vld [vmem:[#allocation2 + $0x798] sm:$0xff] }
 0x466   : > { %6330 = vst [vmem:[#allocation2 + $0x3a8] sm:$0xff] %v5818_v28  ;;  %v13112_v45 = vmul.f32 %v1219_v16, %v1219_v16  ;;  %v4243_v47 = vmul.f32 1.442695, %v1733_v26  ;;  %v13116_v54 = vadd.f32 1.0, %v1732_v44  ;;  %v13118_v55 = vmul.f32 %v1220_v34, %v1220_v34  ;;  %v1738_v44 = vld [vmem:[%s8891_s21 + $0xe98] sm:$0xff]  ;;  %v5313_v24 = vld [vmem:[#allocation2 + $0x8f0] sm:$0xff] }
 0x467   : > { %v8527_v51 = vpop.eup %8526  ;;  %v5820_v52 = vadd.f32 %v5308_v32, %v4796_v36  ;;  %v4245_v58 = vmul.f32 1.442695, %v1734_v35  ;;  %6331 = vst [vmem:[#allocation2 + $0xf68] sm:$0xff] %v5819_v39  ;;  %v3265_v1 = vsub.f32 %v13098_v57, %v13102_v33  ;;  %v13123_v2 = vadd.f32 1.0, %v1733_v26  ;;  %v1226_v16 = vld [vmem:[%s8885_s25 + $0xe98] sm:$0xff]  ;;  %v1740_v26 = vld [vmem:[%s8891_s21 + $0xea8] sm:$0xff] }
 0x468   : > { %v8529_v60 = vpop.eup %8528  ;;  %v4797_v61 = vsub.f32 %v3261_v21, %v8527_v51  ;;  %8542 = vpow2.f32 %v4243_v47  ;;  %v13125_v8 = vmul.f32 %v1221_v46, %v1221_v46  ;;  %v4247_v10 = vmul.f32 1.442695, %v1735_v50  ;;  %v1224_v21 = vld [vmem:[%s8885_s25 + $0xe88] sm:$0xff]  ;;  %v5315_v39 = vld [vmem:[#allocation2 + $0x238] sm:$0xff]  ;;  %v1741_v47 = vld [vmem:[%s8891_s21 + $0xeb0] sm:$0xff] }
 0x469   : > { %6332 = vst [vmem:[#allocation2 + $0x880] sm:$0xff] %v5820_v52  ;;  %v4798_v7 = vsub.f32 %v3262_v5, %v8529_v60  ;;  %8544 = vpow2.f32 %v4245_v58  ;;  %v3266_v11 = vsub.f32 %v13106_v37, %v13108_v38  ;;  %v3267_v40 = vsub.f32 %v13110_v42, %v13112_v45  ;;  %v1742_v58 = vld [vmem:[%s8891_s21 + $0xeb8] sm:$0xff] }
 0x46a   : > { %v8531_v30 = vpop.eup %8530  ;;  %v5821_v31 = vadd.f32 %v5309_v53, %v4797_v61  ;;  %v4249_v41 = vmul.f32 1.442695, %v1736_v59  ;;  %v3268_v17 = vsub.f32 %v13116_v54, %v13118_v55  ;;  %8546 = vpow2.f32 %v4247_v10  ;;  %v5316_v53 = vld [vmem:[#allocation2 + $0xa00] sm:$0xff] }
 0x46b   : > { %v8533_v12 = vpop.eup %8532  ;;  %v5822_v13 = vadd.f32 %v5310_v0, %v4798_v7  ;;  %v4799_v14 = vsub.f32 %v3263_v4, %v8531_v30  ;;  %v13137_v19 = vadd.f32 1.0, %v1734_v35  ;;  %v13139_v20 = vmul.f32 %v1222_v9, %v1222_v9  ;;  %v1225_v4 = vld [vmem:[%s8885_s25 + $0xe90] sm:$0xff]  ;;  %v1227_v55 = vld [vmem:[%s8885_s25 + $0xea0] sm:$0xff]  ;;  %v1228_v0 = vld [vmem:[%s8885_s25 + $0xea8] sm:$0xff] }
 0x46c   : > { %6333 = vst [vmem:[#allocation2 + $0x4f0] sm:$0xff] %v5821_v31  ;;  %v4800_v3 = vsub.f32 %v3264_v56, %v8533_v12  ;;  %8548 = vpow2.f32 %v4249_v41  ;;  %v3269_v48 = vsub.f32 %v13123_v2, %v13125_v8  ;;  %v13144_v49 = vadd.f32 1.0, %v1735_v50  ;;  %v1743_v9 = vld [vmem:[%s8891_s21 + $0xec0] sm:$0xff]  ;;  %v5317_v31 = vld [vmem:[#allocation2 + $0xd18] sm:$0xff] }
 0x46d   : > { %6334 = vst [vmem:[#allocation2 + $0x850] sm:$0xff] %v5822_v13  ;;  %v5823_v5 = vadd.f32 %v5311_v63, %v4799_v14  ;;  %v4251_v6 = vmul.f32 1.442695, %v1737_v62  ;;  %v13148_v56 = vmul.f32 %v1223_v43, %v1223_v43  ;;  %v13150_v57 = vadd.f32 1.0, %v1736_v59  ;;  %v5318_v14 = vld [vmem:[#allocation2 + $0xd40] sm:$0xff]  ;;  %v1230_v43 = vld [vmem:[%s8885_s25 + $0xeb8] sm:$0xff] }
 0x46e   : > { %v8535_v22 = vpop.eup %8534  ;;  %v5824_v23 = vadd.f32 %v5312_v15, %v4800_v3  ;;  %v4253_v25 = vmul.f32 1.442695, %v1738_v44  ;;  %v13154_v32 = vmul.f32 %v1224_v21, %v1224_v21  ;;  %v13156_v33 = vadd.f32 1.0, %v1737_v62  ;;  %v1744_v62 = vld [vmem:[%s8891_s21 + $0xec8] sm:$0xff] }
 0x46f   : > { %v8537_v27 = vpop.eup %8536  ;;  %6335 = vst [vmem:[#allocation2 + $0xd10] sm:$0xff] %v5823_v5  ;;  %v4801_v28 = vsub.f32 %v3265_v1, %v8535_v22  ;;  %8550 = vpow2.f32 %v4251_v6  ;;  %v13158_v35 = vmul.f32 %v1225_v4, %v1225_v4  ;;  %v4255_v36 = vmul.f32 1.442695, %v1739_v18 }
 0x470   : > { %6336 = vst [vmem:[#allocation2 + $0xb38] sm:$0xff] %v5824_v23  ;;  %v4802_v34 = vsub.f32 %v3266_v11, %v8537_v27  ;;  %8552 = vpow2.f32 %v4253_v25  ;;  %v13160_v42 = vadd.f32 1.0, %v1738_v44  ;;  %v13162_v45 = vmul.f32 %v1226_v16, %v1226_v16  ;;  %v1746_v16 = vld [vmem:[%s8891_s21 + $0xed8] sm:$0xff] }
 0x471   : > { %v8539_v37 = vpop.eup %8538  ;;  %v5825_v38 = vadd.f32 %v5313_v24, %v4801_v28  ;;  %v4257_v46 = vmul.f32 1.442695, %v1740_v26  ;;  %v3270_v54 = vsub.f32 %v13137_v19, %v13139_v20  ;;  %8554 = vpow2.f32 %v4255_v36  ;;  %v1231_v19 = vld [vmem:[%s8885_s25 + $0xec0] sm:$0xff] }
 0x472   : > { %v8541_v50 = vpop.eup %8540  ;;  %v5826_v51 = vadd.f32 %v5314_v29, %v4802_v34  ;;  %v4803_v52 = vsub.f32 %v3267_v40, %v8539_v37  ;;  %v3271_v60 = vsub.f32 %v13144_v49, %v13148_v56  ;;  %v3272_v61 = vsub.f32 %v13150_v57, %v13154_v32  ;;  %v1229_v40 = vld [vmem:[%s8885_s25 + $0xeb0] sm:$0xff]  ;;  %v5319_v49 = vld [vmem:[#allocation2 + $0xa80] sm:$0xff] }
 0x473   : > { %6337 = vst [vmem:[#allocation2 + $0x8f0] sm:$0xff] %v5825_v38  ;;  %v4804_v59 = vsub.f32 %v3268_v17, %v8541_v50  ;;  %8556 = vpow2.f32 %v4257_v46  ;;  %v3273_v2 = vsub.f32 %v13156_v33, %v13158_v35  ;;  %v13176_v7 = vadd.f32 1.0, %v1739_v18  ;;  %v1745_v18 = vld [vmem:[%s8891_s21 + $0xed0] sm:$0xff]  ;;  %v1747_v33 = vld [vmem:[%s8891_s21 + $0xee0] sm:$0xff]  ;;  %v5322_v50 = vld [vmem:[#allocation2 + $0xaa8] sm:$0xff] }
 0x474   : > { %6338 = vst [vmem:[#allocation2 + $0x798] sm:$0xff] %v5826_v51  ;;  %v5827_v1 = vadd.f32 %v5315_v39, %v4803_v52  ;;  %v4259_v8 = vmul.f32 1.442695, %v1741_v47  ;;  %v3274_v63 = vsub.f32 %v13160_v42, %v13162_v45  ;;  %v13181_v11 = vmul.f32 %v1227_v55, %v1227_v55  ;;  %v5320_v56 = vld [vmem:[#allocation2 + $0x2b0] sm:$0xff]  ;;  %v5321_v36 = vld [vmem:[#allocation2 + $0x740] sm:$0xff]  ;;  %v1232_v39 = vld [vmem:[%s8885_s25 + $0xec8] sm:$0xff] }
 0x475   : > { %v8543_v10 = vpop.eup %8542  ;;  %v5828_v30 = vadd.f32 %v5316_v53, %v4804_v59  ;;  %v4261_v41 = vmul.f32 1.442695, %v1742_v58  ;;  %v13185_v15 = vadd.f32 1.0, %v1740_v26  ;;  %v13187_v17 = vmul.f32 %v1228_v0, %v1228_v0  ;;  %v1748_v45 = vld [vmem:[%s8891_s21 + $0xee8] sm:$0xff]  ;;  %v1233_v53 = vld [vmem:[%s8885_s25 + $0xed0] sm:$0xff] }
 0x476   : > { %v8545_v12 = vpop.eup %8544  ;;  %6339 = vst [vmem:[#allocation2 + $0x238] sm:$0xff] %v5827_v1  ;;  %v4805_v13 = vsub.f32 %v3269_v48, %v8543_v10  ;;  %8558 = vpow2.f32 %v4259_v8  ;;  %v13190_v3 = vadd.f32 1.0, %v1741_v47  ;;  %v4263_v20 = vmul.f32 1.442695, %v1743_v9  ;;  %v5323_v0 = vld [vmem:[#allocation2 + $0xfa8] sm:$0xff] }
 0x477   : > { %6340 = vst [vmem:[#allocation2 + $0xa00] sm:$0xff] %v5828_v30  ;;  %v4806_v44 = vsub.f32 %v3270_v54, %v8545_v12  ;;  %8560 = vpow2.f32 %v4261_v41  ;;  %v8547_v21 = vpop.eup %8546  ;;  %v13193_v48 = vmul.f32 %v1229_v40, %v1229_v40  ;;  %v13195_v4 = vadd.f32 1.0, %v1742_v58  ;;  %v1234_v58 = vld [vmem:[%s8885_s25 + $0xed8] sm:$0xff]  ;;  %v1236_v40 = vld [vmem:[%s8885_s25 + $0xee8] sm:$0xff] }
 0x478   : > { %v5829_v5 = vadd.f32 %v5317_v31, %v4805_v13  ;;  %v4265_v6 = vmul.f32 1.442695, %v1744_v62  ;;  %v4807_v24 = vsub.f32 %v3271_v60, %v8547_v21  ;;  %v13198_v57 = vmul.f32 %v1230_v43, %v1230_v43  ;;  %v1750_v41 = vld [vmem:[%s8891_s21 + $0xef8] sm:$0xff] }
 0x479   : > { %v8549_v22 = vpop.eup %8548  ;;  %v5830_v23 = vadd.f32 %v5318_v14, %v4806_v44  ;;  %8562 = vpow2.f32 %v4263_v20  ;;  %v13201_v26 = vadd.f32 1.0, %v1743_v9  ;;  %v13203_v27 = vmul.f32 %v1231_v19, %v1231_v19  ;;  %v1749_v9 = vld [vmem:[%s8891_s21 + $0xef0] sm:$0xff]  ;;  %v1751_v44 = vld [vmem:[%s8891_s21 + $0xf00] sm:$0xff]  ;;  %v5325_v20 = vld [vmem:[#allocation2 + $0xc78] sm:$0xff] }
 0x47a   : > { %6341 = vst [vmem:[#allocation2 + $0xd18] sm:$0xff] %v5829_v5  ;;  %v4808_v25 = vsub.f32 %v3272_v61, %v8549_v22  ;;  %8564 = vpow2.f32 %v4265_v6  ;;  %v5831_v28 = vadd.f32 %v5319_v49, %v4807_v24  ;;  %v3275_v29 = vsub.f32 %v13176_v7, %v13181_v11  ;;  %v1235_v7 = vld [vmem:[%s8885_s25 + $0xee0] sm:$0xff] }
 0x47b   : > { %6342 = vst [vmem:[#allocation2 + $0xd40] sm:$0xff] %v5830_v23  ;;  %v4267_v32 = vmul.f32 1.442695, %v1745_v18  ;;  %v3276_v37 = vsub.f32 %v13185_v15, %v13187_v17  ;;  %v3277_v38 = vsub.f32 %v13190_v3, %v13193_v48  ;;  %v4269_v42 = vmul.f32 1.442695, %v1746_v16  ;;  %v1752_v48 = vld [vmem:[%s8891_s21 + $0xf08] sm:$0xff] }
 0x47c   : > { %v8551_v34 = vpop.eup %8550  ;;  %v5832_v35 = vadd.f32 %v5320_v56, %v4808_v25  ;;  %6343 = vst [vmem:[#allocation2 + $0xa80] sm:$0xff] %v5831_v28  ;;  %v3278_v51 = vsub.f32 %v13195_v4, %v13198_v57  ;;  %v13216_v52 = vadd.f32 1.0, %v1744_v62  ;;  %v3279_v55 = vsub.f32 %v13201_v26, %v13203_v27  ;;  %v1237_v57 = vld [vmem:[%s8885_s25 + $0xef0] sm:$0xff] }
 0x47d   : > { %v8553_v46 = vpop.eup %8552  ;;  %v4809_v47 = vsub.f32 %v3273_v2, %v8551_v34  ;;  %8566 = vpow2.f32 %v4267_v32  ;;  %v4271_v59 = vmul.f32 1.442695, %v1747_v33  ;;  %v2768_v1 = vmul.f32 %v1232_v39, %v1232_v39  ;;  %v5327_v27 = vld [vmem:[#allocation2 + $0xc30] sm:$0xff]  ;;  %v1238_v32 = vld [vmem:[%s8885_s25 + $0xef8] sm:$0xff] }
 0x47e   : > { %6344 = vst [vmem:[#allocation2 + $0x2b0] sm:$0xff] %v5832_v35  ;;  %v4810_v54 = vsub.f32 %v3274_v63, %v8553_v46  ;;  %8568 = vpow2.f32 %v4269_v42  ;;  %v8555_v60 = vpop.eup %8554  ;;  %v13222_v2 = vadd.f32 1.0, %v1745_v18  ;;  %v4273_v8 = vmul.f32 1.442695, %v1748_v45  ;;  %v5324_v63 = vld [vmem:[#allocation2 + $0xa98] sm:$0xff]  ;;  %v1753_v34 = vld [vmem:[%s8891_s21 + $0xf10] sm:$0xff] }
 0x47f   : > { %v5833_v61 = vadd.f32 %v5321_v36, %v4809_v47  ;;  %v4811_v31 = vsub.f32 %v3275_v29, %v8555_v60  ;;  %v13226_v11 = vmul.f32 %v1233_v53, %v1233_v53  ;;  %8570 = vpow2.f32 %v4271_v59  ;;  %v5326_v18 = vld [vmem:[#allocation2 + $0x2d8] sm:$0xff]  ;;  %v1239_v42 = vld [vmem:[%s8885_s25 + $0xf00] sm:$0xff] }
 0x480   : > { %v8557_v10 = vpop.eup %8556  ;;  %v5834_v30 = vadd.f32 %v5322_v50, %v4810_v54  ;;  %v13230_v12 = vadd.f32 1.0, %v1746_v16  ;;  %v13232_v13 = vmul.f32 %v1234_v58, %v1234_v58  ;;  %8572 = vpow2.f32 %v4273_v8  ;;  %v1755_v59 = vld [vmem:[%s8891_s21 + $0xf20] sm:$0xff]  ;;  %v1756_v8 = vld [vmem:[%s8891_s21 + $0xf28] sm:$0xff] }
 0x481   : > { %6345 = vst [vmem:[#allocation2 + $0x740] sm:$0xff] %v5833_v61  ;;  %v4812_v62 = vsub.f32 %v3276_v37, %v8557_v10  ;;  %v5835_v14 = vadd.f32 %v5323_v0, %v4811_v31  ;;  %v13234_v15 = vadd.f32 1.0, %v1747_v33  ;;  %v13236_v17 = vmul.f32 %v1235_v7, %v1235_v7  ;;  %v5329_v0 = vld [vmem:[#allocation2 + $0x460] sm:$0xff] }
 0x482   : > { %6346 = vst [vmem:[#allocation2 + $0xaa8] sm:$0xff] %v5834_v30  ;;  %v4275_v43 = vmul.f32 1.442695, %v1749_v9  ;;  %v13239_v21 = vadd.f32 1.0, %v1748_v45  ;;  %v13241_v5 = vmul.f32 %v1236_v40, %v1236_v40  ;;  %v4277_v49 = vmul.f32 1.442695, %v1750_v41 }
 0x483   : > { %v8559_v3 = vpop.eup %8558  ;;  %v5836_v19 = vadd.f32 %v5324_v63, %v4812_v62  ;;  %6347 = vst [vmem:[#allocation2 + $0xfa8] sm:$0xff] %v5835_v14  ;;  %v3280_v22 = vsub.f32 %v13216_v52, %v2768_v1  ;;  %v3281_v23 = vsub.f32 %v13222_v2, %v13226_v11  ;;  %v3282_v56 = vsub.f32 %v13230_v12, %v13232_v13  ;;  %v1754_v45 = vld [vmem:[%s8891_s21 + $0xf18] sm:$0xff] }
 0x484   : > { %v8561_v4 = vpop.eup %8560  ;;  %v4813_v6 = vsub.f32 %v3277_v38, %v8559_v3  ;;  %8574 = vpow2.f32 %v4275_v43  ;;  %v4279_v16 = vmul.f32 1.442695, %v1751_v44  ;;  %v3283_v28 = vsub.f32 %v13234_v15, %v13236_v17  ;;  %v5328_v38 = vld [vmem:[#allocation2 + $0xf10] sm:$0xff]  ;;  %v5330_v30 = vld [vmem:[#allocation2 + $0x898] sm:$0xff] }
 0x485   : > { %6348 = vst [vmem:[#allocation2 + $0xa98] sm:$0xff] %v5836_v19  ;;  %v4814_v24 = vsub.f32 %v3278_v51, %v8561_v4  ;;  %8576 = vpow2.f32 %v4277_v49  ;;  %v13252_v29 = vadd.f32 1.0, %v1749_v9  ;;  %v4281_v33 = vmul.f32 1.442695, %v1752_v48  ;;  %v1240_v51 = vld [vmem:[%s8885_s25 + $0xf08] sm:$0xff]  ;;  %v5331_v13 = vld [vmem:[#allocation2 + $0x538] sm:$0xff] }
 0x486   : > { %v8563_v25 = vpop.eup %8562  ;;  %v5837_v26 = vadd.f32 %v5325_v20, %v4813_v6  ;;  %v3284_v39 = vsub.f32 %v13239_v21, %v13241_v5  ;;  %8578 = vpow2.f32 %v4279_v16  ;;  %v13260_v47 = vmul.f32 %v1237_v57, %v1237_v57  ;;  %v1242_v17 = vld [vmem:[%s8885_s25 + $0xf18] sm:$0xff]  ;;  %v5332_v21 = vld [vmem:[#allocation2 + $0x328] sm:$0xff]  ;;  %v1243_v49 = vld [vmem:[%s8885_s25 + $0xf20] sm:$0xff] }
 0x487   : > { %v8565_v35 = vpop.eup %8564  ;;  %v5838_v36 = vadd.f32 %v5326_v18, %v4814_v24  ;;  %v4815_v37 = vsub.f32 %v3279_v55, %v8563_v25  ;;  %v13262_v50 = vadd.f32 1.0, %v1750_v41  ;;  %8580 = vpow2.f32 %v4281_v33  ;;  %v1241_v55 = vld [vmem:[%s8885_s25 + $0xf10] sm:$0xff]  ;;  %v1759_v16 = vld [vmem:[%s8891_s21 + $0xf40] sm:$0xff] }
 0x488   : > { %6349 = vst [vmem:[#allocation2 + $0xc78] sm:$0xff] %v5837_v26  ;;  %v4816_v46 = vsub.f32 %v3280_v22, %v8565_v35  ;;  %v13265_v53 = vmul.f32 %v1238_v32, %v1238_v32  ;;  %v13267_v54 = vadd.f32 1.0, %v1751_v44  ;;  %v4283_v58 = vmul.f32 1.442695, %v1753_v34  ;;  %v1757_v44 = vld [vmem:[%s8891_s21 + $0xf30] sm:$0xff]  ;;  %v1244_v22 = vld [vmem:[%s8885_s25 + $0xf28] sm:$0xff] }
 0x489   : > { %6350 = vst [vmem:[#allocation2 + $0x2d8] sm:$0xff] %v5838_v36  ;;  %v5839_v52 = vadd.f32 %v5327_v27, %v4815_v37  ;;  %v13271_v1 = vmul.f32 %v1239_v42, %v1239_v42  ;;  %v13273_v2 = vadd.f32 1.0, %v1752_v48  ;;  %v4285_v7 = vmul.f32 1.442695, %v1754_v45  ;;  %v1758_v48 = vld [vmem:[%s8891_s21 + $0xf38] sm:$0xff]  ;;  %v5333_v27 = vld [vmem:[#allocation2 + $0xa50] sm:$0xff] }
 0x48a   : > { %v8567_v60 = vpop.eup %8566  ;;  %v5840_v61 = vadd.f32 %v5328_v38, %v4816_v46  ;;  %v13276_v31 = vmul.f32 %v1240_v51, %v1240_v51  ;;  %v13278_v63 = vadd.f32 1.0, %v1753_v34  ;;  %8582 = vpow2.f32 %v4283_v58  ;;  %v1245_v32 = vld [vmem:[%s8885_s25 + $0xf30] sm:$0xff]  ;;  %v1760_v34 = vld [vmem:[%s8891_s21 + $0xf48] sm:$0xff]  ;;  %v1246_v42 = vld [vmem:[%s8885_s25 + $0xf38] sm:$0xff] }
 0x48b   : > { %v8569_v9 = vpop.eup %8568  ;;  %6351 = vst [vmem:[#allocation2 + $0xc30] sm:$0xff] %v5839_v52  ;;  %v4817_v10 = vsub.f32 %v3281_v23, %v8567_v60  ;;  %v13280_v40 = vmul.f32 %v1241_v55, %v1241_v55  ;;  %8584 = vpow2.f32 %v4285_v7  ;;  %v4287_v41 = vmul.f32 1.442695, %v1755_v59  ;;  %v5334_v37 = vld [vmem:[#allocation2 + $0x7b0] sm:$0xff]  ;;  %v5335_v52 = vld [vmem:[#allocation2 + $0xdf8] sm:$0xff] }
 0x48c   : > { %6352 = vst [vmem:[#allocation2 + $0xf10] sm:$0xff] %v5840_v61  ;;  %v4818_v11 = vsub.f32 %v3282_v56, %v8569_v9  ;;  %v8571_v62 = vpop.eup %8570  ;;  %v3285_v14 = vsub.f32 %v13252_v29, %v13260_v47  ;;  %v3286_v15 = vsub.f32 %v13262_v50, %v13265_v53  ;;  %v4289_v43 = vmul.f32 1.442695, %v1756_v8  ;;  %v1761_v58 = vld [vmem:[%s8891_s21 + $0xf50] sm:$0xff]  ;;  %v1247_v9 = vld [vmem:[%s8885_s25 + $0xf40] sm:$0xff] }
 0x48d   : > { %v5841_v12 = vadd.f32 %v5329_v0, %v4817_v10  ;;  %v8573_v3 = vpop.eup %8572  ;;  %v4819_v20 = vsub.f32 %v3283_v28, %v8571_v62  ;;  %v3287_v5 = vsub.f32 %v13267_v54, %v13271_v1  ;;  %8586 = vpow2.f32 %v4287_v41  ;;  %v5336_v0 = vld [vmem:[#allocation2 + $0x9a0] sm:$0xff]  ;;  %v5337_v62 = vld [vmem:[#allocation2 + $0xe38] sm:$0xff] }
 0x48e   : > { %v5842_v19 = vadd.f32 %v5330_v30, %v4818_v11  ;;  %v4820_v4 = vsub.f32 %v3284_v39, %v8573_v3  ;;  %v3288_v6 = vsub.f32 %v13273_v2, %v13276_v31  ;;  %v13294_v18 = vadd.f32 1.0, %v1754_v45  ;;  %v1762_v2 = vld [vmem:[%s8891_s21 + $0xf58] sm:$0xff]  ;;  %v1763_v11 = vld [vmem:[%s8891_s21 + $0xf60] sm:$0xff]  ;;  %v5338_v3 = vld [vmem:[#allocation2 + $0x390] sm:$0xff] }
 0x48f   : > { %6353 = vst [vmem:[#allocation2 + $0x460] sm:$0xff] %v5841_v12  ;;  %8588 = vpow2.f32 %v4289_v43  ;;  %v5843_v23 = vadd.f32 %v5331_v13, %v4819_v20  ;;  %v3289_v24 = vsub.f32 %v13278_v63, %v13280_v40  ;;  %v13299_v56 = vmul.f32 %v1242_v17, %v1242_v17  ;;  %v1764_v17 = vld [vmem:[%s8891_s21 + $0xf68] sm:$0xff] }
 0x490   : > { %6354 = vst [vmem:[#allocation2 + $0x898] sm:$0xff] %v5842_v19  ;;  %v4291_v57 = vmul.f32 1.442695, %v1757_v44  ;;  %v5844_v26 = vadd.f32 %v5332_v21, %v4820_v4  ;;  %v13302_v28 = vadd.f32 1.0, %v1755_v59  ;;  %v13304_v29 = vmul.f32 %v1243_v49, %v1243_v49  ;;  %v1249_v21 = vld [vmem:[%s8885_s25 + $0xf50] sm:$0xff] }
 0x491   : > { %v8575_v25 = vpop.eup %8574  ;;  %v4293_v33 = vmul.f32 1.442695, %v1758_v48  ;;  %6355 = vst [vmem:[#allocation2 + $0x538] sm:$0xff] %v5843_v23  ;;  %v13308_v38 = vadd.f32 1.0, %v1756_v8  ;;  %v13310_v39 = vmul.f32 %v1244_v22, %v1244_v22  ;;  %v13313_v46 = vadd.f32 1.0, %v1757_v44  ;;  %v5339_v22 = vld [vmem:[#allocation2 + $0x7e0] sm:$0xff] }
 0x492   : > { %v8577_v35 = vpop.eup %8576  ;;  %v4821_v36 = vsub.f32 %v3285_v14, %v8575_v25  ;;  %8590 = vpow2.f32 %v4291_v57  ;;  %6356 = vst [vmem:[#allocation2 + $0x328] sm:$0xff] %v5844_v26  ;;  %v4295_v47 = vmul.f32 1.442695, %v1759_v16  ;;  %v13315_v53 = vmul.f32 %v1245_v32, %v1245_v32  ;;  %v1248_v14 = vld [vmem:[%s8885_s25 + $0xf48] sm:$0xff]  ;;  %v1766_v32 = vld [vmem:[%s8891_s21 + $0xf78] sm:$0xff] }
 0x493   : > { %v4822_v45 = vsub.f32 %v3286_v15, %v8577_v35  ;;  %8592 = vpow2.f32 %v4293_v33  ;;  %v8579_v50 = vpop.eup %8578  ;;  %v13317_v54 = vadd.f32 1.0, %v1758_v48  ;;  %v4297_v55 = vmul.f32 1.442695, %v1760_v34  ;;  %v1250_v48 = vld [vmem:[%s8885_s25 + $0xf58] sm:$0xff] }
 0x494   : > { %v5845_v51 = vadd.f32 %v5333_v27, %v4821_v36  ;;  %v8581_v59 = vpop.eup %8580  ;;  %v4823_v61 = vsub.f32 %v3287_v5, %v8579_v50  ;;  %v13320_v1 = vmul.f32 %v1246_v42, %v1246_v42  ;;  %8594 = vpow2.f32 %v4295_v47  ;;  %v1252_v36 = vld [vmem:[%s8885_s25 + $0xf68] sm:$0xff]  ;;  %v5341_v50 = vld [vmem:[#allocation2 + $0x4c0] sm:$0xff] }
 0x495   : > { %v5846_v60 = vadd.f32 %v5334_v37, %v4822_v45  ;;  %v4824_v7 = vsub.f32 %v3288_v6, %v8581_v59  ;;  %v3290_v8 = vsub.f32 %v13294_v18, %v13299_v56  ;;  %8596 = vpow2.f32 %v4297_v55  ;;  %v1251_v56 = vld [vmem:[%s8885_s25 + $0xf60] sm:$0xff]  ;;  %v5342_v59 = vld [vmem:[#allocation2 + $0x710] sm:$0xff] }
 0x496   : > { %6357 = vst [vmem:[#allocation2 + $0xa50] sm:$0xff] %v5845_v51  ;;  %v5847_v10 = vadd.f32 %v5335_v52, %v4823_v61  ;;  %v3291_v30 = vsub.f32 %v13302_v28, %v13304_v29  ;;  %v3292_v31 = vsub.f32 %v13308_v38, %v13310_v39  ;;  %v4299_v63 = vmul.f32 1.442695, %v1761_v58  ;;  %v5340_v28 = vld [vmem:[#allocation2 + $0x900] sm:$0xff] }
 0x497   : > { %6358 = vst [vmem:[#allocation2 + $0x7b0] sm:$0xff] %v5846_v60  ;;  %v8583_v40 = vpop.eup %8582  ;;  %v5848_v41 = vadd.f32 %v5336_v0, %v4824_v7  ;;  %v3293_v12 = vsub.f32 %v13313_v46, %v13315_v53  ;;  %v13333_v13 = vadd.f32 1.0, %v1759_v16  ;;  %v4301_v15 = vmul.f32 1.442695, %v1762_v2  ;;  %v1765_v16 = vld [vmem:[%s8891_s21 + $0xf70] sm:$0xff]  ;;  %v1767_v45 = vld [vmem:[%s8891_s21 + $0xf80] sm:$0xff] }
 0x498   : > { %v8585_v43 = vpop.eup %8584  ;;  %6359 = vst [vmem:[#allocation2 + $0xdf8] sm:$0xff] %v5847_v10  ;;  %v4825_v44 = vsub.f32 %v3289_v24, %v8583_v40  ;;  %v3294_v19 = vsub.f32 %v13317_v54, %v13320_v1  ;;  %v13339_v20 = vmul.f32 %v1247_v9, %v1247_v9  ;;  %8598 = vpow2.f32 %v4299_v63  ;;  %v1768_v54 = vld [vmem:[%s8891_s21 + $0xf88] sm:$0xff]  ;;  %v1254_v63 = vld [vmem:[%s8885_s25 + $0xf78] sm:$0xff]  ;;  %v1769_v40 = vld [vmem:[%s8891_s21 + $0xf90] sm:$0xff] }
 0x499   : > { %6360 = vst [vmem:[#allocation2 + $0x9a0] sm:$0xff] %v5848_v41  ;;  %v4826_v5 = vsub.f32 %v3290_v8, %v8585_v43  ;;  %v13342_v49 = vadd.f32 1.0, %v1760_v34  ;;  %8600 = vpow2.f32 %v4301_v15  ;;  %v4303_v4 = vmul.f32 1.442695, %v1763_v11  ;;  %v5343_v10 = vld [vmem:[#allocation2 + $0x508] sm:$0xff]  ;;  %v1255_v15 = vld [vmem:[%s8885_s25 + $0xf80] sm:$0xff] }
 0x49a   : > { %v8587_v6 = vpop.eup %8586  ;;  %v5849_v18 = vadd.f32 %v5337_v62, %v4825_v44  ;;  %v2784_v23 = vmul.f32 %v1248_v14, %v1248_v14  ;;  %v13345_v24 = vadd.f32 1.0, %v1761_v58  ;;  %v4305_v57 = vmul.f32 1.442695, %v1764_v17 }
 0x49b   : > { %v5850_v26 = vadd.f32 %v5338_v3, %v4826_v5  ;;  %v4827_v27 = vsub.f32 %v3291_v30, %v8587_v6  ;;  %v13349_v29 = vmul.f32 %v1249_v21, %v1249_v21  ;;  %8602 = vpow2.f32 %v4303_v4 }
 0x49c   : > { %v8589_v25 = vpop.eup %8588  ;;  %6361 = vst [vmem:[#allocation2 + $0xe38] sm:$0xff] %v5849_v18  ;;  %v13352_v34 = vadd.f32 1.0, %v1762_v2  ;;  %v13354_v35 = vmul.f32 %v1250_v48, %v1250_v48  ;;  %8604 = vpow2.f32 %v4305_v57  ;;  %v13357_v38 = vadd.f32 1.0, %v1763_v11  ;;  %v1253_v2 = vld [vmem:[%s8885_s25 + $0xf70] sm:$0xff]  ;;  %v1771_v48 = vld [vmem:[%s8891_s21 + $0xfa0] sm:$0xff]  ;;  %v5345_v18 = vld [vmem:[#allocation2 + $0x938] sm:$0xff] }
 0x49d   : > { %v4828_v33 = vsub.f32 %v3292_v31, %v8589_v25  ;;  %6362 = vst [vmem:[#allocation2 + $0x390] sm:$0xff] %v5850_v26  ;;  %v5851_v37 = vadd.f32 %v5339_v22, %v4827_v27  ;;  %v13359_v39 = vmul.f32 %v1251_v56, %v1251_v56  ;;  %v4307_v42 = vmul.f32 1.442695, %v1765_v16  ;;  %v1772_v56 = vld [vmem:[%s8891_s21 + $0xfa8] sm:$0xff]  ;;  %v5346_v25 = vld [vmem:[#allocation2 + $0x558] sm:$0xff] }
 0x49e   : > { %v3295_v51 = vsub.f32 %v13333_v13, %v13339_v20  ;;  %v3296_v52 = vsub.f32 %v13342_v49, %v2784_v23  ;;  %v4309_v53 = vmul.f32 1.442695, %v1766_v32  ;;  %v13366_v60 = vadd.f32 1.0, %v1764_v17  ;;  %v5344_v13 = vld [vmem:[#allocation2 + $0x9e8] sm:$0xff]  ;;  %v1770_v17 = vld [vmem:[%s8891_s21 + $0xf98] sm:$0xff] }
 0x49f   : > { %v8591_v46 = vpop.eup %8590  ;;  %v5852_v47 = vadd.f32 %v5340_v28, %v4828_v33  ;;  %6363 = vst [vmem:[#allocation2 + $0x7e0] sm:$0xff] %v5851_v37  ;;  %v13368_v61 = vmul.f32 %v1252_v36, %v1252_v36  ;;  %8606 = vpow2.f32 %v4307_v42  ;;  %v3297_v1 = vsub.f32 %v13345_v24, %v13349_v29  ;;  %v1257_v37 = vld [vmem:[%s8885_s25 + $0xf90] sm:$0xff] }
 0x4a0   : > { %v8593_v55 = vpop.eup %8592  ;;  %v4829_v58 = vsub.f32 %v3293_v12, %v8591_v46  ;;  %8608 = vpow2.f32 %v4309_v53  ;;  %v4311_v7 = vmul.f32 1.442695, %v1767_v45  ;;  %v3298_v30 = vsub.f32 %v13352_v34, %v13354_v35  ;;  %v5347_v34 = vld [vmem:[#allocation2 + $0xac0] sm:$0xff] }
 0x4a1   : > { %6364 = vst [vmem:[#allocation2 + $0x900] sm:$0xff] %v5852_v47  ;;  %v4830_v0 = vsub.f32 %v3294_v19, %v8593_v55  ;;  %v8595_v8 = vpop.eup %8594  ;;  %v3299_v31 = vsub.f32 %v13357_v38, %v13359_v39  ;;  %v4313_v11 = vmul.f32 1.442695, %v1768_v54  ;;  %v13379_v14 = vadd.f32 1.0, %v1765_v16  ;;  %v1256_v19 = vld [vmem:[%s8885_s25 + $0xf88] sm:$0xff]  ;;  %v13408_v39 = vld [vmem:[%s8891_s21 + $0xfb0] sm:$0xff] }
 0x4a2   : > { %v5853_v9 = vadd.f32 %v5341_v50, %v4829_v58  ;;  %v8597_v41 = vpop.eup %8596  ;;  %v4831_v12 = vsub.f32 %v3295_v51, %v8595_v8  ;;  %8610 = vpow2.f32 %v4311_v7  ;;  %v3300_v44 = vsub.f32 %v13366_v60, %v13368_v61  ;;  %v5348_v47 = vld [vmem:[#allocation2 + $0x930] sm:$0xff]  ;;  %v1258_v51 = vld [vmem:[%s8885_s25 + $0xf98] sm:$0xff]  ;;  %v1259_v58 = vld [vmem:[%s8885_s25 + $0xfa0] sm:$0xff] }
 0x4a3   : > { %v5854_v62 = vadd.f32 %v5342_v59, %v4830_v0  ;;  %v4832_v43 = vsub.f32 %v3296_v52, %v8597_v41  ;;  %v13385_v3 = vmul.f32 %v1253_v2, %v1253_v2  ;;  %8612 = vpow2.f32 %v4313_v11  ;;  %v13414_v52 = vld [vmem:[%s8891_s21 + $0xfb8] sm:$0xff]  ;;  %v1260_v0 = vld [vmem:[%s8885_s25 + $0xfa8] sm:$0xff]  ;;  %v1775_v2 = vld [vmem:[%s8891_s21 + $0xfc0] sm:$0xff] }
 0x4a4   : > { %6365 = vst [vmem:[#allocation2 + $0x4c0] sm:$0xff] %v5853_v9  ;;  %v5855_v20 = vadd.f32 %v5343_v10, %v4831_v12  ;;  %v13388_v21 = vadd.f32 1.0, %v1766_v32  ;;  %v13390_v5 = vmul.f32 %v1254_v63, %v1254_v63  ;;  %v4315_v49 = vmul.f32 1.442695, %v1769_v40  ;;  %v5349_v9 = vld [vmem:[#allocation2 + $0x988] sm:$0xff] }
 0x4a5   : > { %6366 = vst [vmem:[#allocation2 + $0x710] sm:$0xff] %v5854_v62  ;;  %v8599_v4 = vpop.eup %8598  ;;  %v5856_v6 = vadd.f32 %v5344_v13, %v4832_v43  ;;  %v13393_v22 = vadd.f32 1.0, %v1767_v45  ;;  %v13395_v23 = vmul.f32 %v1255_v15, %v1255_v15  ;;  %v4317_v24 = vmul.f32 1.442695, %v1770_v17  ;;  %v1776_v63 = vld [vmem:[%s8891_s21 + $0xfc8] sm:$0xff] }
 0x4a6   : > { %v8601_v57 = vpop.eup %8600  ;;  %6367 = vst [vmem:[#allocation2 + $0x508] sm:$0xff] %v5855_v20  ;;  %v4833_v16 = vsub.f32 %v3297_v1, %v8599_v4  ;;  %v13398_v26 = vadd.f32 1.0, %v1768_v54  ;;  %v13400_v27 = vmul.f32 %v1256_v19, %v1256_v19  ;;  %8614 = vpow2.f32 %v4315_v49  ;;  %v5350_v41 = vld [vmem:[#allocation2 + $0x348] sm:$0xff]  ;;  %v13437_v19 = vld [vmem:[%s8891_s21 + $0xfd0] sm:$0xff] }
 0x4a7   : > { %6368 = vst [vmem:[#allocation2 + $0x9e8] sm:$0xff] %v5856_v6  ;;  %v4834_v28 = vsub.f32 %v3298_v30, %v8601_v57  ;;  %8616 = vpow2.f32 %v4317_v24  ;;  %v4319_v29 = vmul.f32 1.442695, %v1771_v48  ;;  %v3301_v35 = vsub.f32 %v13379_v14, %v13385_v3  ;;  %v5352_v49 = vld [vmem:[#allocation2 + $0xce8] sm:$0xff]  ;;  %v1261_v4 = vld [vmem:[%s8885_s25 + $0xfb0] sm:$0xff]  ;;  %v13442_v6 = vld [vmem:[%s8891_s21 + $0xfd8] sm:$0xff] }
 0x4a8   : > { %v8603_v32 = vpop.eup %8602  ;;  %v5857_v33 = vadd.f32 %v5345_v18, %v4833_v16  ;;  %v3302_v36 = vsub.f32 %v13388_v21, %v13390_v5  ;;  %v4321_v38 = vmul.f32 1.442695, %v1772_v56  ;;  %v3303_v50 = vsub.f32 %v13393_v22, %v13395_v23  ;;  %v1262_v24 = vld [vmem:[%s8885_s25 + $0xfb8] sm:$0xff] }
 0x4a9   : > { %v8605_v42 = vpop.eup %8604  ;;  %v5858_v45 = vadd.f32 %v5346_v25, %v4834_v28  ;;  %v4835_v46 = vsub.f32 %v3299_v31, %v8603_v32  ;;  %8618 = vpow2.f32 %v4319_v29  ;;  %v3304_v54 = vsub.f32 %v13398_v26, %v13400_v27  ;;  %v1263_v25 = vld [vmem:[%s8885_s25 + $0xfc0] sm:$0xff]  ;;  %v5353_v32 = vld [vmem:[#allocation2 + $0xcf8] sm:$0xff] }
 0x4aa   : > { %6369 = vst [vmem:[#allocation2 + $0x938] sm:$0xff] %v5857_v33  ;;  %v4836_v53 = vsub.f32 %v3300_v44, %v8605_v42  ;;  %v13418_v55 = vadd.f32 1.0, %v1769_v40  ;;  %8620 = vpow2.f32 %v4321_v38  ;;  %v2793_v60 = vmul.f32 %v1257_v37, %v1257_v37  ;;  %v5351_v44 = vld [vmem:[#allocation2 + $0xc90] sm:$0xff]  ;;  %v13454_v27 = vld [vmem:[%s8891_s21 + $0xfe0] sm:$0xff]  ;;  %v13460_v37 = vld [vmem:[%s8891_s21 + $0xfe8] sm:$0xff] }
 0x4ab   : > { %6370 = vst [vmem:[#allocation2 + $0x558] sm:$0xff] %v5858_v45  ;;  %v5859_v59 = vadd.f32 %v5347_v34, %v4835_v46  ;;  %v13421_v61 = vadd.f32 1.0, %v1770_v17  ;;  %v4323_v1 = vmul.f32 1.442695, %v13408_v39  ;;  %v2794_v10 = vmul.f32 %v1258_v51, %v1258_v51  ;;  %v5354_v42 = vld [vmem:[#allocation2 + $0x1a8] sm:$0xff] }
 0x4ac   : > { %v8607_v7 = vpop.eup %8606  ;;  %v5860_v8 = vadd.f32 %v5348_v47, %v4836_v53  ;;  %v13426_v30 = vadd.f32 1.0, %v1771_v48  ;;  %v4325_v31 = vmul.f32 1.442695, %v13414_v52  ;;  %v13430_v62 = vmul.f32 %v1259_v58, %v1259_v58 }
 0x4ad   : > { %v8609_v11 = vpop.eup %8608  ;;  %6371 = vst [vmem:[#allocation2 + $0xac0] sm:$0xff] %v5859_v59  ;;  %v4837_v40 = vsub.f32 %v3301_v35, %v8607_v7  ;;  %v13432_v12 = vadd.f32 1.0, %v1772_v56  ;;  %8622 = vpow2.f32 %v4323_v1  ;;  %v13434_v14 = vmul.f32 %v1260_v0, %v1260_v0  ;;  %v1264_v35 = vld [vmem:[%s8885_s25 + $0xfc8] sm:$0xff]  ;;  %v1265_v59 = vld [vmem:[%s8885_s25 + $0xfd0] sm:$0xff]  ;;  %v5356_v7 = vld [vmem:[#allocation2 + $0x40] sm:$0xff] }
 0x4ae   : > { %6372 = vst [vmem:[#allocation2 + $0x930] sm:$0xff] %v5860_v8  ;;  %v4838_v13 = vsub.f32 %v3302_v36, %v8609_v11  ;;  %8624 = vpow2.f32 %v4325_v31  ;;  %v4327_v15 = vmul.f32 1.442695, %v1775_v2  ;;  %v4329_v3 = vmul.f32 1.442695, %v1776_v63  ;;  %v1266_v31 = vld [vmem:[%s8885_s25 + $0xfd8] sm:$0xff] }
 0x4af   : > { %v8611_v17 = vpop.eup %8610  ;;  %v5861_v43 = vadd.f32 %v5349_v9, %v4837_v40  ;;  %v3305_v48 = vsub.f32 %v13418_v55, %v2793_v60  ;;  %v3306_v22 = vsub.f32 %v13421_v61, %v2794_v10  ;;  %v3307_v23 = vsub.f32 %v13426_v30, %v13430_v62  ;;  %v1781_v61 = vld [vmem:[%s8891_s21 + $0xff0] sm:$0xff]  ;;  %v1782_v9 = vld [vmem:[%s8891_s21 + $0xff8] sm:$0xff] }
 0x4b0   : > { %v8613_v20 = vpop.eup %8612  ;;  %v5862_v21 = vadd.f32 %v5350_v41, %v4838_v13  ;;  %v4839_v5 = vsub.f32 %v3303_v50, %v8611_v17  ;;  %8626 = vpow2.f32 %v4327_v15  ;;  %v3308_v57 = vsub.f32 %v13432_v12, %v13434_v14  ;;  %v5357_v13 = vld [vmem:[#allocation2 + $0x1c8] sm:$0xff]  ;;  %v1267_v17 = vld [vmem:[%s8885_s25 + $0xfe0] sm:$0xff] }
 0x4b1   : > { %6373 = vst [vmem:[#allocation2 + $0x988] sm:$0xff] %v5861_v43  ;;  %v4840_v18 = vsub.f32 %v3304_v54, %v8613_v20  ;;  %8628 = vpow2.f32 %v4329_v3  ;;  %v2285_v16 = vadd.f32 1.0, %v13408_v39  ;;  %v4331_v26 = vmul.f32 1.442695, %v13437_v19  ;;  %v5355_v54 = vld [vmem:[#allocation2 + $0x4a8] sm:$0xff] }
 0x4b2   : > { %6374 = vst [vmem:[#allocation2 + $0x348] sm:$0xff] %v5862_v21  ;;  %v5863_v56 = vadd.f32 %v5351_v44, %v4839_v5  ;;  %v2797_v33 = vmul.f32 %v1261_v4, %v1261_v4  ;;  %v2286_v34 = vadd.f32 1.0, %v13414_v52  ;;  %v4333_v36 = vmul.f32 1.442695, %v13442_v6  ;;  %v5358_v20 = vld [vmem:[#allocation2 + $0xfe8] sm:$0xff] }
 0x4b3   : > { %v8615_v28 = vpop.eup %8614  ;;  %v5864_v29 = vadd.f32 %v5352_v49, %v4840_v18  ;;  %v2798_v45 = vmul.f32 %v1262_v24, %v1262_v24  ;;  %v2287_v46 = vadd.f32 1.0, %v1775_v2  ;;  %8630 = vpow2.f32 %v4331_v26  ;;  %v1268_v49 = vld [vmem:[%s8885_s25 + $0xfe8] sm:$0xff]  ;;  %v5359_v18 = vld [vmem:[#allocation2 + $0xd98] sm:$0xff] }
 0x4b4   : > { %v8617_v38 = vpop.eup %8616  ;;  %6375 = vst [vmem:[#allocation2 + $0xc90] sm:$0xff] %v5863_v56  ;;  %v4841_v39 = vsub.f32 %v3305_v48, %v8615_v28  ;;  %v2799_v50 = vmul.f32 %v1263_v25, %v1263_v25  ;;  %8632 = vpow2.f32 %v4333_v36  ;;  %v4335_v51 = vmul.f32 1.442695, %v13454_v27  ;;  %v5360_v25 = vld [vmem:[#allocation2 + $0x150] sm:$0xff] }
 0x4b5   : > { %6376 = vst [vmem:[#allocation2 + $0xce8] sm:$0xff] %v5864_v29  ;;  %v4842_v47 = vsub.f32 %v3306_v22, %v8617_v38  ;;  %v2288_v55 = vadd.f32 1.0, %v1776_v63  ;;  %v2800_v58 = vmul.f32 %v1264_v35, %v1264_v35  ;;  %v4337_v60 = vmul.f32 1.442695, %v13460_v37  ;;  %v1269_v28 = vld [vmem:[%s8885_s25 + $0xff0] sm:$0xff]  ;;  %v5361_v38 = vld [vmem:[#allocation2 + $0x400] sm:$0xff] }
 0x4b6   : > { %v8619_v52 = vpop.eup %8618  ;;  %v5865_v53 = vadd.f32 %v5353_v32, %v4841_v39  ;;  %v3309_v8 = vsub.f32 %v2285_v16, %v2797_v33  ;;  %8634 = vpow2.f32 %v4335_v51  ;;  %v3310_v30 = vsub.f32 %v2286_v34, %v2798_v45  ;;  %v1270_v33 = vld [vmem:[%s8885_s25 + $0xff8] sm:$0xff] }
 0x4b7   : > { %v8621_v0 = vpop.eup %8620  ;;  %v5866_v1 = vadd.f32 %v5354_v42, %v4842_v47  ;;  %v4843_v2 = vsub.f32 %v3307_v23, %v8619_v52  ;;  %8636 = vpow2.f32 %v4337_v60  ;;  %v2289_v11 = vadd.f32 1.0, %v13437_v19  ;;  %v5362_v47 = vld [vmem:[#allocation2 + $0x298] sm:$0xff] }
 0x4b8   : > { %6377 = vst [vmem:[#allocation2 + $0xcf8] sm:$0xff] %v5865_v53  ;;  %v4844_v10 = vsub.f32 %v3308_v57, %v8621_v0  ;;  %v2801_v40 = vmul.f32 %v1265_v59, %v1265_v59  ;;  %v4339_v41 = vmul.f32 1.442695, %v1781_v61  ;;  %v3311_v14 = vsub.f32 %v2287_v46, %v2799_v50  ;;  %v5364_v0 = vld [vmem:[#allocation2 + $0x3c0] sm:$0xff] }
 0x4b9   : > { %6378 = vst [vmem:[#allocation2 + $0x1a8] sm:$0xff] %v5866_v1  ;;  %v5867_v63 = vadd.f32 %v5355_v54, %v4843_v2  ;;  %v3312_v15 = vsub.f32 %v2288_v55, %v2800_v58  ;;  %v4341_v43 = vmul.f32 1.442695, %v1782_v9  ;;  %v2290_v21 = vadd.f32 1.0, %v13442_v6  ;;  %v5363_v55 = vld [vmem:[#allocation2 + $0x730] sm:$0xff] }
 0x4ba   : > { %v8623_v62 = vpop.eup %8622  ;;  %v5868_v12 = vadd.f32 %v5356_v7, %v4844_v10  ;;  %v2802_v5 = vmul.f32 %v1266_v31, %v1266_v31  ;;  %8638 = vpow2.f32 %v4339_v41  ;;  %v3313_v22 = vsub.f32 %v2289_v11, %v2801_v40 }
 0x4bb   : > { %v8625_v44 = vpop.eup %8624  ;;  %6379 = vst [vmem:[#allocation2 + $0x4a8] sm:$0xff] %v5867_v63  ;;  %v4845_v3 = vsub.f32 %v3309_v8, %v8623_v62  ;;  %8640 = vpow2.f32 %v4341_v43  ;;  %v2291_v23 = vadd.f32 1.0, %v13454_v27  ;;  %v2803_v24 = vmul.f32 %v1267_v17, %v1267_v17  ;;  %v5366_v63 = vld [vmem:[#allocation2 + $0x4a0] sm:$0xff] }
 0x4bc   : > { %6380 = vst [vmem:[#allocation2 + $0x40] sm:$0xff] %v5868_v12  ;;  %v4846_v19 = vsub.f32 %v3310_v30, %v8625_v44  ;;  %v2292_v6 = vadd.f32 1.0, %v13460_v37  ;;  %v2804_v26 = vmul.f32 %v1268_v49, %v1268_v49  ;;  %v3314_v32 = vsub.f32 %v2290_v21, %v2802_v5  ;;  %v5365_v30 = vld [vmem:[#allocation2 + $0x2c0] sm:$0xff] }
 0x4bd   : > { %v8627_v48 = vpop.eup %8626  ;;  %v5869_v4 = vadd.f32 %v5357_v13, %v4845_v3  ;;  %v3315_v39 = vsub.f32 %v2291_v23, %v2803_v24  ;;  %v2293_v27 = vadd.f32 1.0, %v1781_v61  ;;  %v2805_v42 = vmul.f32 %v1269_v28, %v1269_v28 }
 0x4be   : > { %v8629_v56 = vpop.eup %8628  ;;  %v5870_v57 = vadd.f32 %v5358_v20, %v4846_v19  ;;  %v4847_v16 = vsub.f32 %v3311_v14, %v8627_v48  ;;  %v3316_v50 = vsub.f32 %v2292_v6, %v2804_v26  ;;  %v2294_v37 = vadd.f32 1.0, %v1782_v9 }
 0x4bf   : > { %6381 = vst [vmem:[#allocation2 + $0x1c8] sm:$0xff] %v5869_v4  ;;  %v4848_v29 = vsub.f32 %v3312_v15, %v8629_v56  ;;  %v2806_v51 = vmul.f32 %v1270_v33, %v1270_v33  ;;  %v3317_v1 = vsub.f32 %v2293_v27, %v2805_v42 }
 0x4c0   : > { %6382 = vst [vmem:[#allocation2 + $0xfe8] sm:$0xff] %v5870_v57  ;;  %v5871_v34 = vadd.f32 %v5359_v18, %v4847_v16  ;;  %v8631_v35 = vpop.eup %8630 }
 0x4c1   : > { %v5872_v36 = vadd.f32 %v5360_v25, %v4848_v29  ;;  %v8633_v45 = vpop.eup %8632  ;;  %v4849_v46 = vsub.f32 %v3313_v22, %v8631_v35  ;;  %v3318_v2 = vsub.f32 %v2294_v37, %v2806_v51 }
 0x4c2   : > { %6383 = vst [vmem:[#allocation2 + $0xd98] sm:$0xff] %v5871_v34  ;;  %v4850_v52 = vsub.f32 %v3314_v32, %v8633_v45 }
 0x4c3   : > { %6384 = vst [vmem:[#allocation2 + $0x150] sm:$0xff] %v5872_v36  ;;  %v8635_v53 = vpop.eup %8634  ;;  %v5873_v54 = vadd.f32 %v5361_v38, %v4849_v46 }
 0x4c4   : > { %v8637_v58 = vpop.eup %8636  ;;  %v5874_v59 = vadd.f32 %v5362_v47, %v4850_v52  ;;  %v4851_v60 = vsub.f32 %v3315_v39, %v8635_v53 }
 0x4c5   : > { %6385 = vst [vmem:[#allocation2 + $0x400] sm:$0xff] %v5873_v54  ;;  %v4852_v61 = vsub.f32 %v3316_v50, %v8637_v58 }
 0x4c6   : > { %6386 = vst [vmem:[#allocation2 + $0x298] sm:$0xff] %v5874_v59  ;;  %v5875_v7 = vadd.f32 %v5363_v55, %v4851_v60 }
 0x4c7   : > { %v8639_v8 = vpop.eup %8638  ;;  %v5876_v10 = vadd.f32 %v5364_v0, %v4852_v61 }
 0x4c8   : > { %v8641_v9 = vpop.eup %8640  ;;  %6387 = vst [vmem:[#allocation2 + $0x730] sm:$0xff] %v5875_v7  ;;  %v4853_v31 = vsub.f32 %v3317_v1, %v8639_v8 }
 0x4c9   : > { %6388 = vst [vmem:[#allocation2 + $0x3c0] sm:$0xff] %v5876_v10  ;;  %v4854_v11 = vsub.f32 %v3318_v2, %v8641_v9  ;;  %6394 = sbr.rel (%p7537_p8) target bundleno = 2457 (0x999), region = 44 }
 0x4ca   : > { %v5877_v40 = vadd.f32 %v5365_v30, %v4853_v31 }
 0x4cb   : > { %v5878_v41 = vadd.f32 %v5366_v63, %v4854_v11 }
 0x4cc   : > { %6389 = vst [vmem:[#allocation2 + $0x2c0] sm:$0xff] %v5877_v40 }
 0x4cd   : > { %6390 = vst [vmem:[#allocation2 + $0x4a0] sm:$0xff] %v5878_v41 }
 0x4ce   : > { %v6395_v62 = vld [vmem:[#allocation2 + $0xab0] sm:$0xff]  ;;  %v6397_v13 = vld [vmem:[#allocation2 + $0x4d8] sm:$0xff]  ;;  %v6404_v18 = vld [vmem:[#allocation2 + $0xb88] sm:$0xff] }
 0x4cf   : > { %v6396_v12 = vld [vmem:[#allocation2 + $0xbb0] sm:$0xff]  ;;  %v6398_v15 = vld [vmem:[#allocation2 + $0x818] sm:$0xff]  ;;  %v6406_v56 = vld [vmem:[#allocation2 + $0xd20] sm:$0xff] }
 0x4d0   : > { %v6907_v14 = vadd.f32 %v6396_v12, %v6395_v62  ;;  %v6399_v43 = vld [vmem:[#allocation2 + $0xc50] sm:$0xff]  ;;  %v6402_v49 = vld [vmem:[#allocation2 + $0x338] sm:$0xff]  ;;  %v6407_v16 = vld [vmem:[#allocation2 + $0xca0] sm:$0xff] }
 0x4d1   : > { %v6400_v3 = vld [vmem:[#allocation2 + $0x810] sm:$0xff]  ;;  %v6405_v23 = vld [vmem:[#allocation2 + $0x918] sm:$0xff]  ;;  %v6408_v6 = vld [vmem:[#allocation2 + $0xb28] sm:$0xff] }
 0x4d2   : > { %v6908_v17 = vadd.f32 %v6907_v14, %v6397_v13  ;;  %v6401_v21 = vld [vmem:[#allocation2 + $0x770] sm:$0xff]  ;;  %v6409_v28 = vld [vmem:[#allocation2 + $0xd58] sm:$0xff]  ;;  %v6411_v34 = vld [vmem:[#allocation2 + $0x728] sm:$0xff] }
 0x4d3   : > { %v6403_v48 = vld [vmem:[#allocation2 + $0x450] sm:$0xff]  ;;  %v6412_v36 = vld [vmem:[#allocation2 + $0x6e8] sm:$0xff]  ;;  %v6414_v42 = vld [vmem:[#allocation2 + $0x340] sm:$0xff] }
 0x4d4   : > { %v6909_v44 = vadd.f32 %v6908_v17, %v6398_v15  ;;  %v6410_v32 = vld [vmem:[#allocation2 + $0x510] sm:$0xff]  ;;  %v6415_v46 = vld [vmem:[#allocation2 + $0x748] sm:$0xff]  ;;  %v6418_v53 = vld [vmem:[#allocation2 + $0x5b8] sm:$0xff] }
 0x4d5   : > { %v6413_v39 = vld [vmem:[#allocation2 + $0x790] sm:$0xff]  ;;  %v6419_v55 = vld [vmem:[#allocation2 + $0x5c8] sm:$0xff]  ;;  %v6420_v59 = vld [vmem:[#allocation2 + $0xd78] sm:$0xff] }
 0x4d6   : > { %v6910_v20 = vadd.f32 %v6909_v44, %v6399_v43  ;;  %v6416_v50 = vld [vmem:[#allocation2 + $0x830] sm:$0xff]  ;;  %v6421_v0 = vld [vmem:[#allocation2 + $0x3f8] sm:$0xff]  ;;  %v6422_v61 = vld [vmem:[#allocation2 + $0xf08] sm:$0xff] }
 0x4d7   : > { %v6417_v51 = vld [vmem:[#allocation2 + $0xaf0] sm:$0xff]  ;;  %v6423_v7 = vld [vmem:[#allocation2 + $0xea0] sm:$0xff]  ;;  %v6424_v10 = vld [vmem:[#allocation2 + $0xb78] sm:$0xff] }
 0x4d8   : > { %v6911_v5 = vadd.f32 %v6910_v20, %v6400_v3  ;;  %v6425_v9 = vld [vmem:[#allocation2 + $0x948] sm:$0xff]  ;;  %v6426_v63 = vld [vmem:[#allocation2 + $0xbf8] sm:$0xff]  ;;  %v6427_v40 = vld [vmem:[#allocation2 + $0x9d0] sm:$0xff] }
 0x4d9   : > { %v6428_v62 = vld [vmem:[#allocation2 + $0xa90] sm:$0xff]  ;;  %v6431_v43 = vld [vmem:[#allocation2 + $0xd68] sm:$0xff] }
 0x4da   : > { %v6912_v19 = vadd.f32 %v6911_v5, %v6401_v21  ;;  %v6429_v13 = vld [vmem:[#allocation2 + $0x910] sm:$0xff]  ;;  %v6433_v21 = vld [vmem:[#allocation2 + $0x868] sm:$0xff] }
 0x4db   : > { %v6430_v15 = vld [vmem:[#allocation2 + $0xbd0] sm:$0xff] }
 0x4dc   : > { %v6913_v4 = vadd.f32 %v6912_v19, %v6402_v49  ;;  %v6432_v3 = vld [vmem:[#allocation2 + $0xbf0] sm:$0xff] }
 0x4dd   : > { %v6434_v49 = vld [vmem:[#allocation2 + $0xe30] sm:$0xff] }
 0x4de   : > { %v6914_v22 = vadd.f32 %v6913_v4, %v6403_v48  ;;  %v6435_v48 = vld [vmem:[#allocation2 + $0xcd8] sm:$0xff] }
 0x4e0   : > { %v6915_v24 = vadd.f32 %v6914_v22, %v6404_v18  ;;  %v6436_v18 = vld [vmem:[#allocation2 + $0x18] sm:$0xff] }
 0x4e2   : > { %v6916_v57 = vadd.f32 %v6915_v24, %v6405_v23  ;;  %v6437_v23 = vld [vmem:[#allocation2 + $0x528] sm:$0xff] }
 0x4e4   : > { %v6917_v25 = vadd.f32 %v6916_v57, %v6406_v56  ;;  %v6438_v56 = vld [vmem:[#allocation2 + $0xfd8] sm:$0xff] }
 0x4e6   : > { %v6918_v26 = vadd.f32 %v6917_v25, %v6407_v16  ;;  %v6439_v16 = vld [vmem:[#allocation2 + $0x420] sm:$0xff] }
 0x4e8   : > { %v6919_v29 = vadd.f32 %v6918_v26, %v6408_v6  ;;  %v6440_v6 = vld [vmem:[#allocation2 + $0x940] sm:$0xff] }
 0x4ea   : > { %v6920_v33 = vadd.f32 %v6919_v29, %v6409_v28  ;;  %v6441_v28 = vld [vmem:[#allocation2 + $0xed0] sm:$0xff] }
 0x4ec   : > { %v6921_v35 = vadd.f32 %v6920_v33, %v6410_v32  ;;  %v6442_v32 = vld [vmem:[#allocation2 + $0x160] sm:$0xff] }
 0x4ee   : > { %v6922_v38 = vadd.f32 %v6921_v35, %v6411_v34  ;;  %v6443_v34 = vld [vmem:[#allocation2 + $0x8e8] sm:$0xff] }
 0x4f0   : > { %v6923_v27 = vadd.f32 %v6922_v38, %v6412_v36  ;;  %v6444_v36 = vld [vmem:[#allocation2 + $0x8b0] sm:$0xff] }
 0x4f2   : > { %v6924_v45 = vadd.f32 %v6923_v27, %v6413_v39  ;;  %v6445_v39 = vld [vmem:[#allocation2 + $0x320] sm:$0xff] }
 0x4f4   : > { %v6925_v47 = vadd.f32 %v6924_v45, %v6414_v42  ;;  %v6446_v42 = vld [vmem:[#allocation2 + $0x700] sm:$0xff] }
 0x4f6   : > { %v6926_v37 = vadd.f32 %v6925_v47, %v6415_v46  ;;  %v6447_v46 = vld [vmem:[#allocation2 + $0x5f8] sm:$0xff] }
 0x4f8   : > { %v6927_v52 = vadd.f32 %v6926_v37, %v6416_v50  ;;  %v6448_v50 = vld [vmem:[#allocation2 + $0x620] sm:$0xff] }
 0x4fa   : > { %v6928_v54 = vadd.f32 %v6927_v52, %v6417_v51  ;;  %v6449_v51 = vld [vmem:[#allocation2 + $0x630] sm:$0xff] }
 0x4fc   : > { %v6929_v58 = vadd.f32 %v6928_v54, %v6418_v53  ;;  %v6450_v53 = vld [vmem:[#allocation2 + $0x7a8] sm:$0xff] }
 0x4fe   : > { %v6930_v60 = vadd.f32 %v6929_v58, %v6419_v55  ;;  %v6451_v55 = vld [vmem:[#allocation2 + $0x70] sm:$0xff] }
 0x500   : > { %v6931_v1 = vadd.f32 %v6930_v60, %v6420_v59  ;;  %v6452_v59 = vld [vmem:[#allocation2 + $0x678] sm:$0xff] }
 0x502   : > { %v6932_v2 = vadd.f32 %v6931_v1, %v6421_v0  ;;  %v6453_v0 = vld [vmem:[#allocation2 + $0xa88] sm:$0xff] }
 0x504   : > { %v6933_v8 = vadd.f32 %v6932_v2, %v6422_v61  ;;  %v6454_v61 = vld [vmem:[#allocation2 + $0xb80] sm:$0xff] }
 0x506   : > { %v6934_v30 = vadd.f32 %v6933_v8, %v6423_v7  ;;  %v6455_v7 = vld [vmem:[#allocation2 + $0xc58] sm:$0xff] }
 0x508   : > { %v6935_v31 = vadd.f32 %v6934_v30, %v6424_v10  ;;  %v6456_v10 = vld [vmem:[#allocation2 + $0x8d8] sm:$0xff] }
 0x50a   : > { %v6936_v11 = vadd.f32 %v6935_v31, %v6425_v9  ;;  %v6457_v9 = vld [vmem:[#allocation2 + $0x9d8] sm:$0xff] }
 0x50c   : > { %v6937_v41 = vadd.f32 %v6936_v11, %v6426_v63  ;;  %v6458_v63 = vld [vmem:[#allocation2 + $0x800] sm:$0xff] }
 0x50e   : > { %v6938_v12 = vadd.f32 %v6937_v41, %v6427_v40  ;;  %v6459_v40 = vld [vmem:[#allocation2 + $0xe68] sm:$0xff] }
 0x510   : > { %v6939_v14 = vadd.f32 %v6938_v12, %v6428_v62  ;;  %v6460_v62 = vld [vmem:[#allocation2 + $0x6f0] sm:$0xff] }
 0x512   : > { %v6940_v17 = vadd.f32 %v6939_v14, %v6429_v13  ;;  %v6461_v13 = vld [vmem:[#allocation2 + $0xbe8] sm:$0xff] }
 0x514   : > { %v6941_v44 = vadd.f32 %v6940_v17, %v6430_v15  ;;  %v6462_v15 = vld [vmem:[#allocation2 + $0xd30] sm:$0xff] }
 0x516   : > { %v6942_v20 = vadd.f32 %v6941_v44, %v6431_v43  ;;  %v6463_v43 = vld [vmem:[#allocation2 + $0x358] sm:$0xff] }
 0x518   : > { %v6943_v5 = vadd.f32 %v6942_v20, %v6432_v3  ;;  %v6464_v3 = vld [vmem:[#allocation2 + $0x490] sm:$0xff] }
 0x51a   : > { %v6944_v19 = vadd.f32 %v6943_v5, %v6433_v21  ;;  %v6465_v21 = vld [vmem:[#allocation2 + $0x488] sm:$0xff] }
 0x51c   : > { %v6945_v4 = vadd.f32 %v6944_v19, %v6434_v49  ;;  %v6466_v49 = vld [vmem:[#allocation2 + $0xd60] sm:$0xff] }
 0x51e   : > { %v6946_v22 = vadd.f32 %v6945_v4, %v6435_v48  ;;  %v6467_v48 = vld [vmem:[#allocation2 + $0xbd8] sm:$0xff] }
 0x520   : > { %v6947_v24 = vadd.f32 %v6946_v22, %v6436_v18  ;;  %v6468_v18 = vld [vmem:[#allocation2 + $0x580] sm:$0xff] }
 0x522   : > { %v6948_v57 = vadd.f32 %v6947_v24, %v6437_v23  ;;  %v6469_v23 = vld [vmem:[#allocation2 + $0x208] sm:$0xff] }
 0x524   : > { %v6949_v25 = vadd.f32 %v6948_v57, %v6438_v56  ;;  %v6470_v56 = vld [vmem:[#allocation2 + $0x158] sm:$0xff] }
 0x526   : > { %v6950_v26 = vadd.f32 %v6949_v25, %v6439_v16  ;;  %v6471_v16 = vld [vmem:[#allocation2 + $0xec8] sm:$0xff] }
 0x528   : > { %v6951_v29 = vadd.f32 %v6950_v26, %v6440_v6  ;;  %v6472_v6 = vld [vmem:[#allocation2 + $0xdb0] sm:$0xff] }
 0x52a   : > { %v6952_v33 = vadd.f32 %v6951_v29, %v6441_v28  ;;  %v6473_v28 = vld [vmem:[#allocation2 + $0x660] sm:$0xff] }
 0x52c   : > { %v6953_v35 = vadd.f32 %v6952_v33, %v6442_v32  ;;  %v6474_v32 = vld [vmem:[#allocation2 + $0x6d8] sm:$0xff] }
 0x52e   : > { %v6954_v38 = vadd.f32 %v6953_v35, %v6443_v34  ;;  %v6475_v34 = vld [vmem:[#allocation2 + $0xbc8] sm:$0xff] }
 0x530   : > { %v6955_v27 = vadd.f32 %v6954_v38, %v6444_v36  ;;  %v6476_v36 = vld [vmem:[#allocation2 + $0xf38] sm:$0xff] }
 0x532   : > { %v6956_v45 = vadd.f32 %v6955_v27, %v6445_v39  ;;  %v6477_v39 = vld [vmem:[#allocation2 + $0x98] sm:$0xff] }
 0x534   : > { %v6957_v47 = vadd.f32 %v6956_v45, %v6446_v42  ;;  %v6478_v42 = vld [vmem:[#allocation2 + $0xa48] sm:$0xff] }
 0x536   : > { %v6958_v37 = vadd.f32 %v6957_v47, %v6447_v46  ;;  %v6479_v46 = vld [vmem:[#allocation2 + $0x1b8] sm:$0xff] }
 0x538   : > { %v6959_v52 = vadd.f32 %v6958_v37, %v6448_v50  ;;  %v6480_v50 = vld [vmem:[#allocation2 + $0x188] sm:$0xff] }
 0x53a   : > { %v6960_v54 = vadd.f32 %v6959_v52, %v6449_v51  ;;  %v6481_v51 = vld [vmem:[#allocation2 + $0x650] sm:$0xff] }
 0x53c   : > { %v6961_v58 = vadd.f32 %v6960_v54, %v6450_v53  ;;  %v6482_v53 = vld [vmem:[#allocation2 + $0x90] sm:$0xff] }
 0x53e   : > { %v6962_v60 = vadd.f32 %v6961_v58, %v6451_v55  ;;  %v6483_v55 = vld [vmem:[#allocation2 + $0xdf0] sm:$0xff] }
 0x540   : > { %v6963_v1 = vadd.f32 %v6962_v60, %v6452_v59  ;;  %v6484_v59 = vld [vmem:[#allocation2 + $0x9b0] sm:$0xff] }
 0x542   : > { %v6964_v2 = vadd.f32 %v6963_v1, %v6453_v0  ;;  %v6485_v0 = vld [vmem:[#allocation2 + $0x180] sm:$0xff] }
 0x544   : > { %v6965_v8 = vadd.f32 %v6964_v2, %v6454_v61  ;;  %v6486_v61 = vld [vmem:[#allocation2 + $0x288] sm:$0xff] }
 0x546   : > { %v6966_v30 = vadd.f32 %v6965_v8, %v6455_v7  ;;  %v6487_v7 = vld [vmem:[#allocation2 + $0x8e0] sm:$0xff] }
 0x548   : > { %v6967_v31 = vadd.f32 %v6966_v30, %v6456_v10  ;;  %v6488_v10 = vld [vmem:[#allocation2 + $0xc00] sm:$0xff] }
 0x54a   : > { %v6968_v11 = vadd.f32 %v6967_v31, %v6457_v9  ;;  %v6489_v9 = vld [vmem:[#allocation2 + $0x230] sm:$0xff] }
 0x54c   : > { %v6969_v41 = vadd.f32 %v6968_v11, %v6458_v63  ;;  %v6490_v63 = vld [vmem:[#allocation2 + $0x2e0] sm:$0xff] }
 0x54e   : > { %v6970_v12 = vadd.f32 %v6969_v41, %v6459_v40  ;;  %v6491_v40 = vld [vmem:[#allocation2 + $0x708] sm:$0xff] }
 0x550   : > { %v6971_v14 = vadd.f32 %v6970_v12, %v6460_v62  ;;  %v6492_v62 = vld [vmem:[#allocation2 + $0x428] sm:$0xff] }
 0x552   : > { %v6972_v17 = vadd.f32 %v6971_v14, %v6461_v13  ;;  %v6493_v13 = vld [vmem:[#allocation2 + $0xe48] sm:$0xff] }
 0x554   : > { %v6973_v44 = vadd.f32 %v6972_v17, %v6462_v15  ;;  %v6494_v15 = vld [vmem:[#allocation2 + $0xe80] sm:$0xff] }
 0x556   : > { %v6974_v20 = vadd.f32 %v6973_v44, %v6463_v43  ;;  %v6495_v43 = vld [vmem:[#allocation2 + $0x250] sm:$0xff] }
 0x558   : > { %v6975_v5 = vadd.f32 %v6974_v20, %v6464_v3  ;;  %v6496_v3 = vld [vmem:[#allocation2 + $0x380] sm:$0xff] }
 0x55a   : > { %v6976_v19 = vadd.f32 %v6975_v5, %v6465_v21  ;;  %v6497_v21 = vld [vmem:[#allocation2 + $0xa58] sm:$0xff] }
 0x55c   : > { %v6977_v4 = vadd.f32 %v6976_v19, %v6466_v49  ;;  %v6498_v49 = vld [vmem:[#allocation2 + $0xae0] sm:$0xff] }
 0x55e   : > { %v6978_v22 = vadd.f32 %v6977_v4, %v6467_v48  ;;  %v6499_v48 = vld [vmem:[#allocation2 + $0xea8] sm:$0xff] }
 0x560   : > { %v6979_v24 = vadd.f32 %v6978_v22, %v6468_v18  ;;  %v6500_v18 = vld [vmem:[#allocation2 + $0x9c0] sm:$0xff] }
 0x562   : > { %v6980_v57 = vadd.f32 %v6979_v24, %v6469_v23  ;;  %v6501_v23 = vld [vmem:[#allocation2 + $0x418] sm:$0xff] }
 0x564   : > { %v6981_v25 = vadd.f32 %v6980_v57, %v6470_v56  ;;  %v6502_v56 = vld [vmem:[#allocation2 + $0x410] sm:$0xff] }
 0x566   : > { %v6982_v26 = vadd.f32 %v6981_v25, %v6471_v16  ;;  %v6503_v16 = vld [vmem:[#allocation2 + $0x760] sm:$0xff] }
 0x568   : > { %v6983_v29 = vadd.f32 %v6982_v26, %v6472_v6  ;;  %v6504_v6 = vld [vmem:[#allocation2 + $0x9e0] sm:$0xff] }
 0x56a   : > { %v6984_v33 = vadd.f32 %v6983_v29, %v6473_v28  ;;  %v6505_v28 = vld [vmem:[#allocation2 + $0x100] sm:$0xff] }
 0x56c   : > { %v6985_v35 = vadd.f32 %v6984_v33, %v6474_v32  ;;  %v6506_v32 = vld [vmem:[#allocation2 + $0x78] sm:$0xff] }
 0x56e   : > { %v6986_v38 = vadd.f32 %v6985_v35, %v6475_v34  ;;  %v6507_v34 = vld [vmem:[#allocation2 + $0xec0] sm:$0xff] }
 0x570   : > { %v6987_v27 = vadd.f32 %v6986_v38, %v6476_v36  ;;  %v6508_v36 = vld [vmem:[#allocation2 + $0x438] sm:$0xff] }
 0x572   : > { %v6988_v45 = vadd.f32 %v6987_v27, %v6477_v39  ;;  %v6509_v39 = vld [vmem:[#allocation2 + $0xca8] sm:$0xff] }
 0x574   : > { %v6989_v47 = vadd.f32 %v6988_v45, %v6478_v42  ;;  %v6510_v42 = vld [vmem:[#allocation2 + $0xaf8] sm:$0xff] }
 0x576   : > { %v6990_v37 = vadd.f32 %v6989_v47, %v6479_v46  ;;  %v6511_v46 = vld [vmem:[#allocation2 + $0xa28] sm:$0xff] }
 0x578   : > { %v6991_v52 = vadd.f32 %v6990_v37, %v6480_v50  ;;  %v6512_v50 = vld [vmem:[#allocation2 + $0xa20] sm:$0xff] }
 0x57a   : > { %v6992_v54 = vadd.f32 %v6991_v52, %v6481_v51  ;;  %v6513_v51 = vld [vmem:[#allocation2 + $0xd50] sm:$0xff] }
 0x57c   : > { %v6993_v58 = vadd.f32 %v6992_v54, %v6482_v53  ;;  %v6514_v53 = vld [vmem:[#allocation2 + $0xbb8] sm:$0xff] }
 0x57e   : > { %v6994_v60 = vadd.f32 %v6993_v58, %v6483_v55  ;;  %v6515_v55 = vld [vmem:[#allocation2 + $0x3d8] sm:$0xff] }
 0x580   : > { %v6995_v1 = vadd.f32 %v6994_v60, %v6484_v59  ;;  %v6516_v59 = vld [vmem:[#allocation2 + $0x5e0] sm:$0xff] }
 0x582   : > { %v6996_v2 = vadd.f32 %v6995_v1, %v6485_v0  ;;  %v6517_v0 = vld [vmem:[#allocation2 + $0x980] sm:$0xff] }
 0x584   : > { %v6997_v8 = vadd.f32 %v6996_v2, %v6486_v61  ;;  %v6518_v61 = vld [vmem:[#allocation2 + $0x990] sm:$0xff] }
 0x586   : > { %v6998_v30 = vadd.f32 %v6997_v8, %v6487_v7  ;;  %v6519_v7 = vld [vmem:[#allocation2 + $0xb10] sm:$0xff] }
 0x588   : > { %v6999_v31 = vadd.f32 %v6998_v30, %v6488_v10  ;;  %v6520_v10 = vld [vmem:[#allocation2 + $0x960] sm:$0xff] }
 0x58a   : > { %v7000_v11 = vadd.f32 %v6999_v31, %v6489_v9  ;;  %v6521_v9 = vld [vmem:[#allocation2 + $0x310] sm:$0xff] }
 0x58c   : > { %v7001_v41 = vadd.f32 %v7000_v11, %v6490_v63  ;;  %v6522_v63 = vld [vmem:[#allocation2 + $0xd8] sm:$0xff] }
 0x58e   : > { %v7002_v12 = vadd.f32 %v7001_v41, %v6491_v40  ;;  %v6523_v40 = vld [vmem:[#allocation2 + $0x1c0] sm:$0xff] }
 0x590   : > { %v7003_v14 = vadd.f32 %v7002_v12, %v6492_v62  ;;  %v6524_v62 = vld [vmem:[#allocation2 + $0xac8] sm:$0xff] }
 0x592   : > { %v7004_v17 = vadd.f32 %v7003_v14, %v6493_v13  ;;  %v6525_v13 = vld [vmem:[#allocation2 + $0x820] sm:$0xff] }
 0x594   : > { %v7005_v44 = vadd.f32 %v7004_v17, %v6494_v15  ;;  %v6526_v15 = vld [vmem:[#allocation2 + $0x8c8] sm:$0xff] }
 0x596   : > { %v7006_v20 = vadd.f32 %v7005_v44, %v6495_v43  ;;  %v6527_v43 = vld [vmem:[#allocation2 + $0xe20] sm:$0xff] }
 0x598   : > { %v7007_v5 = vadd.f32 %v7006_v20, %v6496_v3  ;;  %v6528_v3 = vld [vmem:[#allocation2 + $0xb60] sm:$0xff] }
 0x59a   : > { %v7008_v19 = vadd.f32 %v7007_v5, %v6497_v21  ;;  %v6529_v21 = vld [vmem:[#allocation2 + $0xed8] sm:$0xff] }
 0x59c   : > { %v7009_v4 = vadd.f32 %v7008_v19, %v6498_v49  ;;  %v6530_v49 = vld [vmem:[#allocation2 + $0xc80] sm:$0xff] }
 0x59e   : > { %v7010_v22 = vadd.f32 %v7009_v4, %v6499_v48  ;;  %v6531_v48 = vld [vmem:[#allocation2 + $0x950] sm:$0xff] }
 0x5a0   : > { %v7011_v24 = vadd.f32 %v7010_v22, %v6500_v18  ;;  %v6532_v18 = vld [vmem:[#allocation2 + $0x698] sm:$0xff] }
 0x5a2   : > { %v7012_v57 = vadd.f32 %v7011_v24, %v6501_v23  ;;  %v6533_v23 = vld [vmem:[#allocation2 + $0x2d0] sm:$0xff] }
 0x5a4   : > { %v7013_v25 = vadd.f32 %v7012_v57, %v6502_v56  ;;  %v6534_v56 = vld [vmem:[#allocation2 + $0xf18] sm:$0xff] }
 0x5a6   : > { %v7014_v26 = vadd.f32 %v7013_v25, %v6503_v16  ;;  %v6535_v16 = vld [vmem:[#allocation2 + $0xb90] sm:$0xff] }
 0x5a8   : > { %v7015_v29 = vadd.f32 %v7014_v26, %v6504_v6  ;;  %v6536_v6 = vld [vmem:[#allocation2 + $0x458] sm:$0xff] }
 0x5aa   : > { %v7016_v33 = vadd.f32 %v7015_v29, %v6505_v28  ;;  %v6537_v28 = vld [vmem:[#allocation2 + $0xf20] sm:$0xff] }
 0x5ac   : > { %v7017_v35 = vadd.f32 %v7016_v33, %v6506_v32  ;;  %v6538_v32 = vld [vmem:[#allocation2 + $0x8] sm:$0xff] }
 0x5ae   : > { %v7018_v38 = vadd.f32 %v7017_v35, %v6507_v34  ;;  %v6539_v34 = vld [vmem:[#allocation2 + $0xc40] sm:$0xff] }
 0x5b0   : > { %v7019_v27 = vadd.f32 %v7018_v38, %v6508_v36  ;;  %v6540_v36 = vld [vmem:[#allocation2 + $0xd48] sm:$0xff] }
 0x5b2   : > { %v7020_v45 = vadd.f32 %v7019_v27, %v6509_v39  ;;  %v6541_v39 = vld [vmem:[#allocation2 + $0x7b8] sm:$0xff] }
 0x5b4   : > { %v7021_v47 = vadd.f32 %v7020_v45, %v6510_v42  ;;  %v6542_v42 = vld [vmem:[#allocation2 + $0x6b0] sm:$0xff] }
 0x5b6   : > { %v7022_v37 = vadd.f32 %v7021_v47, %v6511_v46  ;;  %v6543_v46 = vld [vmem:[#allocation2 + $0x3d0] sm:$0xff] }
 0x5b8   : > { %v7023_v52 = vadd.f32 %v7022_v37, %v6512_v50  ;;  %v6544_v50 = vld [vmem:[#allocation2 + $0x228] sm:$0xff] }
 0x5ba   : > { %v7024_v54 = vadd.f32 %v7023_v52, %v6513_v51  ;;  %v6545_v51 = vld [vmem:[#allocation2 + $0xd00] sm:$0xff] }
 0x5bc   : > { %v7025_v58 = vadd.f32 %v7024_v54, %v6514_v53  ;;  %v6546_v53 = vld [vmem:[#allocation2 + $0x498] sm:$0xff] }
 0x5be   : > { %v7026_v60 = vadd.f32 %v7025_v58, %v6515_v55  ;;  %v6547_v55 = vld [vmem:[#allocation2 + $0x688] sm:$0xff] }
 0x5c0   : > { %v7027_v1 = vadd.f32 %v7026_v60, %v6516_v59  ;;  %v6548_v59 = vld [vmem:[#allocation2 + $0x5c0] sm:$0xff] }
 0x5c2   : > { %v7028_v2 = vadd.f32 %v7027_v1, %v6517_v0  ;;  %v6549_v0 = vld [vmem:[#allocation2 + $0x858] sm:$0xff] }
 0x5c4   : > { %v7029_v8 = vadd.f32 %v7028_v2, %v6518_v61  ;;  %v6550_v61 = vld [vmem:[#allocation2 + $0x478] sm:$0xff] }
 0x5c6   : > { %v7030_v30 = vadd.f32 %v7029_v8, %v6519_v7  ;;  %v6551_v7 = vld [vmem:[#allocation2 + $0x6f8] sm:$0xff] }
 0x5c8   : > { %v7031_v31 = vadd.f32 %v7030_v30, %v6520_v10  ;;  %v6552_v10 = vld [vmem:[#allocation2 + $0xc70] sm:$0xff] }
 0x5ca   : > { %v7032_v11 = vadd.f32 %v7031_v31, %v6521_v9  ;;  %v6553_v9 = vld [vmem:[#allocation2 + $0x780] sm:$0xff] }
 0x5cc   : > { %v7033_v41 = vadd.f32 %v7032_v11, %v6522_v63  ;;  %v6554_v63 = vld [vmem:[#allocation2 + $0x1f8] sm:$0xff] }
 0x5ce   : > { %v7034_v12 = vadd.f32 %v7033_v41, %v6523_v40  ;;  %v6555_v40 = vld [vmem:[#allocation2 + $0xbc0] sm:$0xff] }
 0x5d0   : > { %v7035_v14 = vadd.f32 %v7034_v12, %v6524_v62  ;;  %v6556_v62 = vld [vmem:[#allocation2 + $0x788] sm:$0xff] }
 0x5d2   : > { %v7036_v17 = vadd.f32 %v7035_v14, %v6525_v13  ;;  %v6557_v13 = vld [vmem:[#allocation2 + $0x4b8] sm:$0xff] }
 0x5d4   : > { %v7037_v44 = vadd.f32 %v7036_v17, %v6526_v15  ;;  %v6558_v15 = vld [vmem:[#allocation2 + $0x4c8] sm:$0xff] }
 0x5d6   : > { %v7038_v20 = vadd.f32 %v7037_v44, %v6527_v43  ;;  %v6559_v43 = vld [vmem:[#allocation2 + $0x38] sm:$0xff] }
 0x5d8   : > { %v7039_v5 = vadd.f32 %v7038_v20, %v6528_v3  ;;  %v6560_v3 = vld [vmem:[#allocation2 + $0x3b0] sm:$0xff] }
 0x5da   : > { %v7040_v19 = vadd.f32 %v7039_v5, %v6529_v21  ;;  %v6561_v21 = vld [vmem:[#allocation2 + $0x7c8] sm:$0xff] }
 0x5dc   : > { %v7041_v4 = vadd.f32 %v7040_v19, %v6530_v49  ;;  %v6562_v49 = vld [vmem:[#allocation2 + $0xd90] sm:$0xff] }
 0x5de   : > { %v7042_v22 = vadd.f32 %v7041_v4, %v6531_v48  ;;  %v6563_v48 = vld [vmem:[#allocation2 + $0xba8] sm:$0xff] }
 0x5e0   : > { %v7043_v24 = vadd.f32 %v7042_v22, %v6532_v18  ;;  %v6564_v18 = vld [vmem:[#allocation2 + $0x9c8] sm:$0xff] }
 0x5e2   : > { %v7044_v57 = vadd.f32 %v7043_v24, %v6533_v23  ;;  %v6565_v23 = vld [vmem:[#allocation2 + $0x2f0] sm:$0xff] }
 0x5e4   : > { %v7045_v25 = vadd.f32 %v7044_v57, %v6534_v56  ;;  %v6566_v56 = vld [vmem:[#allocation2 + $0x5d0] sm:$0xff] }
 0x5e6   : > { %v7046_v26 = vadd.f32 %v7045_v25, %v6535_v16  ;;  %v6567_v16 = vld [vmem:[#allocation2 + $0xfe0] sm:$0xff] }
 0x5e8   : > { %v7047_v29 = vadd.f32 %v7046_v26, %v6536_v6  ;;  %v6568_v6 = vld [vmem:[#allocation2 + $0xb98] sm:$0xff] }
 0x5ea   : > { %v7048_v33 = vadd.f32 %v7047_v29, %v6537_v28  ;;  %v6569_v28 = vld [vmem:[#allocation2 + $0x840] sm:$0xff] }
 0x5ec   : > { %v7049_v35 = vadd.f32 %v7048_v33, %v6538_v32  ;;  %v6570_v32 = vld [vmem:[#allocation2 + $0x768] sm:$0xff] }
 0x5ee   : > { %v7050_v38 = vadd.f32 %v7049_v35, %v6539_v34  ;;  %v6571_v34 = vld [vmem:[#allocation2 + $0x568] sm:$0xff] }
 0x5f0   : > { %v7051_v27 = vadd.f32 %v7050_v38, %v6540_v36  ;;  %v6572_v36 = vld [vmem:[#allocation2 + $0xb30] sm:$0xff] }
 0x5f2   : > { %v7052_v45 = vadd.f32 %v7051_v27, %v6541_v39  ;;  %v6573_v39 = vld [vmem:[#allocation2 + $0x9f8] sm:$0xff] }
 0x5f4   : > { %v7053_v47 = vadd.f32 %v7052_v45, %v6542_v42  ;;  %v6574_v42 = vld [vmem:[#allocation2 + $0x138] sm:$0xff] }
 0x5f6   : > { %v7054_v37 = vadd.f32 %v7053_v47, %v6543_v46  ;;  %v6575_v46 = vld [vmem:[#allocation2 + $0xf00] sm:$0xff] }
 0x5f8   : > { %v7055_v52 = vadd.f32 %v7054_v37, %v6544_v50  ;;  %v6576_v50 = vld [vmem:[#allocation2 + $0xd08] sm:$0xff] }
 0x5fa   : > { %v7056_v54 = vadd.f32 %v7055_v52, %v6545_v51  ;;  %v6577_v51 = vld [vmem:[#allocation2 + $0xe00] sm:$0xff] }
 0x5fc   : > { %v7057_v58 = vadd.f32 %v7056_v54, %v6546_v53  ;;  %v6578_v53 = vld [vmem:[#allocation2 + $0xc28] sm:$0xff] }
 0x5fe   : > { %v7058_v60 = vadd.f32 %v7057_v58, %v6547_v55  ;;  %v6579_v55 = vld [vmem:[#allocation2 + $0x6e0] sm:$0xff] }
 0x600   : > { %v7059_v1 = vadd.f32 %v7058_v60, %v6548_v59  ;;  %v6580_v59 = vld [vmem:[#allocation2 + $0x970] sm:$0xff] }
 0x602   : > { %v7060_v2 = vadd.f32 %v7059_v1, %v6549_v0  ;;  %v6581_v0 = vld [vmem:[#allocation2 + $0x628] sm:$0xff] }
 0x604   : > { %v7061_v8 = vadd.f32 %v7060_v2, %v6550_v61  ;;  %v6582_v61 = vld [vmem:[#allocation2 + $0xb50] sm:$0xff] }
 0x606   : > { %v7062_v30 = vadd.f32 %v7061_v8, %v6551_v7  ;;  %v6583_v7 = vld [vmem:[#allocation2 + $0x920] sm:$0xff] }
 0x608   : > { %v7063_v31 = vadd.f32 %v7062_v30, %v6552_v10  ;;  %v6584_v10 = vld [vmem:[#allocation2 + $0xef8] sm:$0xff] }
 0x60a   : > { %v7064_v11 = vadd.f32 %v7063_v31, %v6553_v9  ;;  %v6585_v9 = vld [vmem:[#allocation2 + $0x370] sm:$0xff] }
 0x60c   : > { %v7065_v41 = vadd.f32 %v7064_v11, %v6554_v63  ;;  %v6586_v63 = vld [vmem:[#allocation2 + $0x2e8] sm:$0xff] }
 0x60e   : > { %v7066_v12 = vadd.f32 %v7065_v41, %v6555_v40  ;;  %v6587_v40 = vld [vmem:[#allocation2 + $0x398] sm:$0xff] }
 0x610   : > { %v7067_v14 = vadd.f32 %v7066_v12, %v6556_v62  ;;  %v6588_v62 = vld [vmem:[#allocation2 + $0xe0] sm:$0xff] }
 0x612   : > { %v7068_v17 = vadd.f32 %v7067_v14, %v6557_v13  ;;  %v6589_v13 = vld [vmem:[#allocation2 + $0x1e0] sm:$0xff] }
 0x614   : > { %v7069_v44 = vadd.f32 %v7068_v17, %v6558_v15  ;;  %v6590_v15 = vld [vmem:[#allocation2 + $0xf90] sm:$0xff] }
 0x616   : > { %v7070_v20 = vadd.f32 %v7069_v44, %v6559_v43  ;;  %v6591_v43 = vld [vmem:[#allocation2 + $0x270] sm:$0xff] }
 0x618   : > { %v7071_v5 = vadd.f32 %v7070_v20, %v6560_v3  ;;  %v6592_v3 = vld [vmem:[#allocation2 + $0x8f8] sm:$0xff] }
 0x61a   : > { %v7072_v19 = vadd.f32 %v7071_v5, %v6561_v21  ;;  %v6593_v21 = vld [vmem:[#allocation2 + $0x598] sm:$0xff] }
 0x61c   : > { %v7073_v4 = vadd.f32 %v7072_v19, %v6562_v49  ;;  %v6594_v49 = vld [vmem:[#allocation2 + $0x750] sm:$0xff] }
 0x61e   : > { %v7074_v22 = vadd.f32 %v7073_v4, %v6563_v48  ;;  %v6595_v48 = vld [vmem:[#allocation2 + $0xb08] sm:$0xff] }
 0x620   : > { %v7075_v24 = vadd.f32 %v7074_v22, %v6564_v18  ;;  %v6596_v18 = vld [vmem:[#allocation2 + $0xde8] sm:$0xff] }
 0x622   : > { %v7076_v57 = vadd.f32 %v7075_v24, %v6565_v23  ;;  %v6597_v23 = vld [vmem:[#allocation2 + $0x308] sm:$0xff] }
 0x624   : > { %v7077_v25 = vadd.f32 %v7076_v57, %v6566_v56  ;;  %v6598_v56 = vld [vmem:[#allocation2 + $0x9a8] sm:$0xff] }
 0x626   : > { %v7078_v26 = vadd.f32 %v7077_v25, %v6567_v16  ;;  %v6599_v16 = vld [vmem:[#allocation2 + $0xe98] sm:$0xff] }
 0x628   : > { %v7079_v29 = vadd.f32 %v7078_v26, %v6568_v6  ;;  %v6600_v6 = vld [vmem:[#allocation2 + $0x268] sm:$0xff] }
 0x62a   : > { %v7080_v33 = vadd.f32 %v7079_v29, %v6569_v28  ;;  %v6601_v28 = vld [vmem:[#allocation2 + $0x610] sm:$0xff] }
 0x62c   : > { %v7081_v35 = vadd.f32 %v7080_v33, %v6570_v32  ;;  %v6602_v32 = vld [vmem:[#allocation2 + $0x50] sm:$0xff] }
 0x62e   : > { %v7082_v38 = vadd.f32 %v7081_v35, %v6571_v34  ;;  %v6603_v34 = vld [vmem:[#allocation2 + $0x6d0] sm:$0xff] }
 0x630   : > { %v7083_v27 = vadd.f32 %v7082_v38, %v6572_v36  ;;  %v6604_v36 = vld [vmem:[#allocation2 + $0xa60] sm:$0xff] }
 0x632   : > { %v7084_v45 = vadd.f32 %v7083_v27, %v6573_v39  ;;  %v6605_v39 = vld [vmem:[#allocation2 + $0x470] sm:$0xff] }
 0x634   : > { %v7085_v47 = vadd.f32 %v7084_v45, %v6574_v42  ;;  %v6606_v42 = vld [vmem:[#allocation2 + $0x928] sm:$0xff] }
 0x636   : > { %v7086_v37 = vadd.f32 %v7085_v47, %v6575_v46  ;;  %v6607_v46 = vld [vmem:[#allocation2 + $0x8a0] sm:$0xff] }
 0x638   : > { %v7087_v52 = vadd.f32 %v7086_v37, %v6576_v50  ;;  %v6608_v50 = vld [vmem:[#allocation2 + $0xe88] sm:$0xff] }
 0x63a   : > { %v7088_v54 = vadd.f32 %v7087_v52, %v6577_v51  ;;  %v6609_v51 = vld [vmem:[#allocation2 + $0xb68] sm:$0xff] }
 0x63c   : > { %v7089_v58 = vadd.f32 %v7088_v54, %v6578_v53  ;;  %v6610_v53 = vld [vmem:[#allocation2 + $0x6a8] sm:$0xff] }
 0x63e   : > { %v7090_v60 = vadd.f32 %v7089_v58, %v6579_v55  ;;  %v6611_v55 = vld [vmem:[#allocation2 + $0xe50] sm:$0xff] }
 0x640   : > { %v7091_v1 = vadd.f32 %v7090_v60, %v6580_v59  ;;  %v6612_v59 = vld [vmem:[#allocation2 + $0x7c0] sm:$0xff] }
 0x642   : > { %v7092_v2 = vadd.f32 %v7091_v1, %v6581_v0  ;;  %v6613_v0 = vld [vmem:[#allocation2 + $0xe90] sm:$0xff] }
 0x644   : > { %v7093_v8 = vadd.f32 %v7092_v2, %v6582_v61  ;;  %v6614_v61 = vld [vmem:[#allocation2 + $0xc38] sm:$0xff] }
 0x646   : > { %v7094_v30 = vadd.f32 %v7093_v8, %v6583_v7  ;;  %v6615_v7 = vld [vmem:[#allocation2 + $0xb8] sm:$0xff] }
 0x648   : > { %v7095_v31 = vadd.f32 %v7094_v30, %v6584_v10  ;;  %v6616_v10 = vld [vmem:[#allocation2 + $0xc48] sm:$0xff] }
 0x64a   : > { %v7096_v11 = vadd.f32 %v7095_v31, %v6585_v9  ;;  %v6617_v9 = vld [vmem:[#allocation2 + $0xb20] sm:$0xff] }
 0x64c   : > { %v7097_v41 = vadd.f32 %v7096_v11, %v6586_v63  ;;  %v6618_v63 = vld [vmem:[#allocation2 + $0x30] sm:$0xff] }
 0x64e   : > { %v7098_v12 = vadd.f32 %v7097_v41, %v6587_v40  ;;  %v6619_v40 = vld [vmem:[#allocation2 + $0xc8] sm:$0xff] }
 0x650   : > { %v7099_v14 = vadd.f32 %v7098_v12, %v6588_v62  ;;  %v6620_v62 = vld [vmem:[#allocation2 + $0x2b8] sm:$0xff] }
 0x652   : > { %v7100_v17 = vadd.f32 %v7099_v14, %v6589_v13  ;;  %v6621_v13 = vld [vmem:[#allocation2 + $0x2a8] sm:$0xff] }
 0x654   : > { %v7101_v44 = vadd.f32 %v7100_v17, %v6590_v15  ;;  %v6622_v15 = vld [vmem:[#allocation2 + $0xf78] sm:$0xff] }
 0x656   : > { %v7102_v20 = vadd.f32 %v7101_v44, %v6591_v43  ;;  %v6623_v43 = vld [vmem:[#allocation2 + $0x210] sm:$0xff] }
 0x658   : > { %v7103_v5 = vadd.f32 %v7102_v20, %v6592_v3  ;;  %v6624_v3 = vld [vmem:[#allocation2 + $0x998] sm:$0xff] }
 0x65a   : > { %v7104_v19 = vadd.f32 %v7103_v5, %v6593_v21  ;;  %v6625_v21 = vld [vmem:[#allocation2 + $0xc88] sm:$0xff] }
 0x65c   : > { %v7105_v4 = vadd.f32 %v7104_v19, %v6594_v49  ;;  %v6626_v49 = vld [vmem:[#allocation2 + $0xab8] sm:$0xff] }
 0x65e   : > { %v7106_v22 = vadd.f32 %v7105_v4, %v6595_v48  ;;  %v6627_v48 = vld [vmem:[#allocation2 + $0x5a8] sm:$0xff] }
 0x660   : > { %v7107_v24 = vadd.f32 %v7106_v22, %v6596_v18  ;;  %v6628_v18 = vld [vmem:[#allocation2 + $0x668] sm:$0xff] }
 0x662   : > { %v7108_v57 = vadd.f32 %v7107_v24, %v6597_v23  ;;  %v6629_v23 = vld [vmem:[#allocation2 + $0xb18] sm:$0xff] }
 0x664   : > { %v7109_v25 = vadd.f32 %v7108_v57, %v6598_v56  ;;  %v6630_v56 = vld [vmem:[#allocation2 + $0x468] sm:$0xff] }
 0x666   : > { %v7110_v26 = vadd.f32 %v7109_v25, %v6599_v16  ;;  %v6631_v16 = vld [vmem:[#allocation2 + $0x578] sm:$0xff] }
 0x668   : > { %v7111_v29 = vadd.f32 %v7110_v26, %v6600_v6  ;;  %v6632_v6 = vld [vmem:[#allocation2 + $0x600] sm:$0xff] }
 0x66a   : > { %v7112_v33 = vadd.f32 %v7111_v29, %v6601_v28  ;;  %v6633_v28 = vld [vmem:[#allocation2 + $0x570] sm:$0xff] }
 0x66c   : > { %v7113_v35 = vadd.f32 %v7112_v33, %v6602_v32  ;;  %v6634_v32 = vld [vmem:[#allocation2 + $0xb40] sm:$0xff] }
 0x66e   : > { %v7114_v38 = vadd.f32 %v7113_v35, %v6603_v34  ;;  %v6635_v34 = vld [vmem:[#allocation2 + $0x170] sm:$0xff] }
 0x670   : > { %v7115_v27 = vadd.f32 %v7114_v38, %v6604_v36  ;;  %v6636_v36 = vld [vmem:[#allocation2 + $0x838] sm:$0xff] }
 0x672   : > { %v7116_v45 = vadd.f32 %v7115_v27, %v6605_v39  ;;  %v6637_v39 = vld [vmem:[#allocation2 + $0xcb8] sm:$0xff] }
 0x674   : > { %v7117_v47 = vadd.f32 %v7116_v45, %v6606_v42  ;;  %v6638_v42 = vld [vmem:[#allocation2 + $0xe28] sm:$0xff] }
 0x676   : > { %v7118_v37 = vadd.f32 %v7117_v47, %v6607_v46  ;;  %v6639_v46 = vld [vmem:[#allocation2 + $0x500] sm:$0xff] }
 0x678   : > { %v7119_v52 = vadd.f32 %v7118_v37, %v6608_v50  ;;  %v6640_v50 = vld [vmem:[#allocation2 + $0xe60] sm:$0xff] }
 0x67a   : > { %v7120_v54 = vadd.f32 %v7119_v52, %v6609_v51  ;;  %v6641_v51 = vld [vmem:[#allocation2 + $0x8c0] sm:$0xff] }
 0x67c   : > { %v7121_v58 = vadd.f32 %v7120_v54, %v6610_v53  ;;  %v6642_v53 = vld [vmem:[#allocation2 + $0xe08] sm:$0xff] }
 0x67e   : > { %v7122_v60 = vadd.f32 %v7121_v58, %v6611_v55  ;;  %v6643_v55 = vld [vmem:[#allocation2 + $0xb58] sm:$0xff] }
 0x680   : > { %v7123_v1 = vadd.f32 %v7122_v60, %v6612_v59  ;;  %v6644_v59 = vld [vmem:[#allocation2 + $0x618] sm:$0xff] }
 0x682   : > { %v7124_v2 = vadd.f32 %v7123_v1, %v6613_v0  ;;  %v6645_v0 = vld [vmem:[#allocation2 + $0x200] sm:$0xff] }
 0x684   : > { %v7125_v8 = vadd.f32 %v7124_v2, %v6614_v61  ;;  %v6646_v61 = vld [vmem:[#allocation2 + $0x5b0] sm:$0xff] }
 0x686   : > { %v7126_v30 = vadd.f32 %v7125_v8, %v6615_v7  ;;  %v6647_v7 = vld [vmem:[#allocation2 + $0x140] sm:$0xff] }
 0x688   : > { %v7127_v31 = vadd.f32 %v7126_v30, %v6616_v10  ;;  %v6648_v10 = vld [vmem:[#allocation2 + $0xc0] sm:$0xff] }
 0x68a   : > { %v7128_v11 = vadd.f32 %v7127_v31, %v6617_v9  ;;  %v6649_v9 = vld [vmem:[#allocation2 + $0xba0] sm:$0xff] }
 0x68c   : > { %v7129_v41 = vadd.f32 %v7128_v11, %v6618_v63  ;;  %v6650_v63 = vld [vmem:[#allocation2 + $0xd0] sm:$0xff] }
 0x68e   : > { %v7130_v12 = vadd.f32 %v7129_v41, %v6619_v40  ;;  %v6651_v40 = vld [vmem:[#allocation2 + $0xd70] sm:$0xff] }
 0x690   : > { %v7131_v14 = vadd.f32 %v7130_v12, %v6620_v62  ;;  %v6652_v62 = vld [vmem:[#allocation2 + $0x448] sm:$0xff] }
 0x692   : > { %v7132_v17 = vadd.f32 %v7131_v14, %v6621_v13  ;;  %v6653_v13 = vld [vmem:[#allocation2 + $0x5a0] sm:$0xff] }
 0x694   : > { %v7133_v44 = vadd.f32 %v7132_v17, %v6622_v15  ;;  %v6654_v15 = vld [vmem:[#allocation2 + $0xc60] sm:$0xff] }
 0x696   : > { %v7134_v20 = vadd.f32 %v7133_v44, %v6623_v43  ;;  %v6655_v43 = vld [vmem:[#allocation2 + $0x360] sm:$0xff] }
 0x698   : > { %v7135_v5 = vadd.f32 %v7134_v20, %v6624_v3  ;;  %v6656_v3 = vld [vmem:[#allocation2 + $0xde0] sm:$0xff] }
 0x69a   : > { %v7136_v19 = vadd.f32 %v7135_v5, %v6625_v21  ;;  %v6657_v21 = vld [vmem:[#allocation2 + $0x118] sm:$0xff] }
 0x69c   : > { %v7137_v4 = vadd.f32 %v7136_v19, %v6626_v49  ;;  %v6658_v49 = vld [vmem:[#allocation2 + $0x690] sm:$0xff] }
 0x69e   : > { %v7138_v22 = vadd.f32 %v7137_v4, %v6627_v48  ;;  %v6659_v48 = vld [vmem:[#allocation2 + $0xb48] sm:$0xff] }
 0x6a0   : > { %v7139_v24 = vadd.f32 %v7138_v22, %v6628_v18  ;;  %v6660_v18 = vld [vmem:[#allocation2 + $0xeb0] sm:$0xff] }
 0x6a2   : > { %v7140_v57 = vadd.f32 %v7139_v24, %v6629_v23  ;;  %v6661_v23 = vld [vmem:[#allocation2 + $0x860] sm:$0xff] }
 0x6a4   : > { %v7141_v25 = vadd.f32 %v7140_v57, %v6630_v56  ;;  %v6662_v56 = vld [vmem:[#allocation2 + $0xcc8] sm:$0xff] }
 0x6a6   : > { %v7142_v26 = vadd.f32 %v7141_v25, %v6631_v16  ;;  %v6663_v16 = vld [vmem:[#allocation2 + $0xff8] sm:$0xff] }
 0x6a8   : > { %v7143_v29 = vadd.f32 %v7142_v26, %v6632_v6  ;;  %v6664_v6 = vld [vmem:[#allocation2 + $0x758] sm:$0xff] }
 0x6aa   : > { %v7144_v33 = vadd.f32 %v7143_v29, %v6633_v28  ;;  %v6665_v28 = vld [vmem:[#allocation2 + $0x590] sm:$0xff] }
 0x6ac   : > { %v7145_v35 = vadd.f32 %v7144_v33, %v6634_v32  ;;  %v6666_v32 = vld [vmem:[#allocation2 + $0xb00] sm:$0xff] }
 0x6ae   : > { %v7146_v38 = vadd.f32 %v7145_v35, %v6635_v34  ;;  %v6667_v34 = vld [vmem:[#allocation2 + $0x6c8] sm:$0xff] }
 0x6b0   : > { %v7147_v27 = vadd.f32 %v7146_v38, %v6636_v36  ;;  %v6668_v36 = vld [vmem:[#allocation2 + $0xee8] sm:$0xff] }
 0x6b2   : > { %v7148_v45 = vadd.f32 %v7147_v27, %v6637_v39  ;;  %v6669_v39 = vld [vmem:[#allocation2 + $0x848] sm:$0xff] }
 0x6b4   : > { %v7149_v47 = vadd.f32 %v7148_v45, %v6638_v42  ;;  %v6670_v42 = vld [vmem:[#allocation2 + $0xe78] sm:$0xff] }
 0x6b6   : > { %v7150_v37 = vadd.f32 %v7149_v47, %v6639_v46  ;;  %v6671_v46 = vld [vmem:[#allocation2 + $0x640] sm:$0xff] }
 0x6b8   : > { %v7151_v52 = vadd.f32 %v7150_v37, %v6640_v50  ;;  %v6672_v50 = vld [vmem:[#allocation2 + $0x258] sm:$0xff] }
 0x6ba   : > { %v7152_v54 = vadd.f32 %v7151_v52, %v6641_v51  ;;  %v6673_v51 = vld [vmem:[#allocation2 + $0x7f8] sm:$0xff] }
 0x6bc   : > { %v7153_v58 = vadd.f32 %v7152_v54, %v6642_v53  ;;  %v6674_v53 = vld [vmem:[#allocation2 + $0x278] sm:$0xff] }
 0x6be   : > { %v7154_v60 = vadd.f32 %v7153_v58, %v6643_v55  ;;  %v6675_v55 = vld [vmem:[#allocation2 + $0x648] sm:$0xff] }
 0x6c0   : > { %v7155_v1 = vadd.f32 %v7154_v60, %v6644_v59  ;;  %v6676_v59 = vld [vmem:[#allocation2 + $0x120] sm:$0xff] }
 0x6c2   : > { %v7156_v2 = vadd.f32 %v7155_v1, %v6645_v0  ;;  %v6677_v0 = vld [vmem:[#allocation2 + $0x330] sm:$0xff] }
 0x6c4   : > { %v7157_v8 = vadd.f32 %v7156_v2, %v6646_v61  ;;  %v6678_v61 = vld [vmem:[#allocation2 + $0x718] sm:$0xff] }
 0x6c6   : > { %v7158_v30 = vadd.f32 %v7157_v8, %v6647_v7  ;;  %v6679_v7 = vld [vmem:[#allocation2 + $0x968] sm:$0xff] }
 0x6c8   : > { %v7159_v31 = vadd.f32 %v7158_v30, %v6648_v10  ;;  %v6680_v10 = vld [vmem:[#allocation2 + $0x7f0] sm:$0xff] }
 0x6ca   : > { %v7160_v11 = vadd.f32 %v7159_v31, %v6649_v9  ;;  %v6681_v9 = vld [vmem:[#allocation2 + $0x2f8] sm:$0xff] }
 0x6cc   : > { %v7161_v41 = vadd.f32 %v7160_v11, %v6650_v63  ;;  %v6682_v63 = vld [vmem:[#allocation2 + $0xc20] sm:$0xff] }
 0x6ce   : > { %v7162_v12 = vadd.f32 %v7161_v41, %v6651_v40  ;;  %v6683_v40 = vld [vmem:[#allocation2] sm:$0xff] }
 0x6d0   : > { %v7163_v14 = vadd.f32 %v7162_v12, %v6652_v62  ;;  %v6684_v62 = vld [vmem:[#allocation2 + $0xe8] sm:$0xff] }
 0x6d2   : > { %v7164_v17 = vadd.f32 %v7163_v14, %v6653_v13  ;;  %v6685_v13 = vld [vmem:[#allocation2 + $0xfd0] sm:$0xff] }
 0x6d4   : > { %v7165_v44 = vadd.f32 %v7164_v17, %v6654_v15  ;;  %v6686_v15 = vld [vmem:[#allocation2 + $0x8a8] sm:$0xff] }
 0x6d6   : > { %v7166_v20 = vadd.f32 %v7165_v44, %v6655_v43  ;;  %v6687_v43 = vld [vmem:[#allocation2 + $0xad8] sm:$0xff] }
 0x6d8   : > { %v7167_v5 = vadd.f32 %v7166_v20, %v6656_v3  ;;  %v6688_v3 = vld [vmem:[#allocation2 + $0x878] sm:$0xff] }
 0x6da   : > { %v7168_v19 = vadd.f32 %v7167_v5, %v6657_v21  ;;  %v6689_v21 = vld [vmem:[#allocation2 + $0x80] sm:$0xff] }
 0x6dc   : > { %v7169_v4 = vadd.f32 %v7168_v19, %v6658_v49  ;;  %v6690_v49 = vld [vmem:[#allocation2 + $0xda8] sm:$0xff] }
 0x6de   : > { %v7170_v22 = vadd.f32 %v7169_v4, %v6659_v48  ;;  %v6691_v48 = vld [vmem:[#allocation2 + $0x670] sm:$0xff] }
 0x6e0   : > { %v7171_v24 = vadd.f32 %v7170_v22, %v6660_v18  ;;  %v6692_v18 = vld [vmem:[#allocation2 + $0xda0] sm:$0xff] }
 0x6e2   : > { %v7172_v57 = vadd.f32 %v7171_v24, %v6661_v23  ;;  %v6693_v23 = vld [vmem:[#allocation2 + $0x530] sm:$0xff] }
 0x6e4   : > { %v7173_v25 = vadd.f32 %v7172_v57, %v6662_v56  ;;  %v6694_v56 = vld [vmem:[#allocation2 + $0x20] sm:$0xff] }
 0x6e6   : > { %v7174_v26 = vadd.f32 %v7173_v25, %v6663_v16  ;;  %v6695_v16 = vld [vmem:[#allocation2 + $0xf70] sm:$0xff] }
 0x6e8   : > { %v7175_v29 = vadd.f32 %v7174_v26, %v6664_v6  ;;  %v6696_v6 = vld [vmem:[#allocation2 + $0xeb8] sm:$0xff] }
 0x6ea   : > { %v7176_v33 = vadd.f32 %v7175_v29, %v6665_v28  ;;  %v6697_v28 = vld [vmem:[#allocation2 + $0x88] sm:$0xff] }
 0x6ec   : > { %v7177_v35 = vadd.f32 %v7176_v33, %v6666_v32  ;;  %v6698_v32 = vld [vmem:[#allocation2 + $0x318] sm:$0xff] }
 0x6ee   : > { %v7178_v38 = vadd.f32 %v7177_v35, %v6667_v34  ;;  %v6699_v34 = vld [vmem:[#allocation2 + $0x520] sm:$0xff] }
 0x6f0   : > { %v7179_v27 = vadd.f32 %v7178_v38, %v6668_v36  ;;  %v6700_v36 = vld [vmem:[#allocation2 + $0x430] sm:$0xff] }
 0x6f2   : > { %v7180_v45 = vadd.f32 %v7179_v27, %v6669_v39  ;;  %v6701_v39 = vld [vmem:[#allocation2 + $0x8b8] sm:$0xff] }
 0x6f4   : > { %v7181_v47 = vadd.f32 %v7180_v45, %v6670_v42  ;;  %v6702_v42 = vld [vmem:[#allocation2 + $0x4b0] sm:$0xff] }
 0x6f6   : > { %v7182_v37 = vadd.f32 %v7181_v47, %v6671_v46  ;;  %v6703_v46 = vld [vmem:[#allocation2 + $0xa38] sm:$0xff] }
 0x6f8   : > { %v7183_v52 = vadd.f32 %v7182_v37, %v6672_v50  ;;  %v6704_v50 = vld [vmem:[#allocation2 + $0x588] sm:$0xff] }
 0x6fa   : > { %v7184_v54 = vadd.f32 %v7183_v52, %v6673_v51  ;;  %v6705_v51 = vld [vmem:[#allocation2 + $0xd80] sm:$0xff] }
 0x6fc   : > { %v7185_v58 = vadd.f32 %v7184_v54, %v6674_v53  ;;  %v6706_v53 = vld [vmem:[#allocation2 + $0xa0] sm:$0xff] }
 0x6fe   : > { %v7186_v60 = vadd.f32 %v7185_v58, %v6675_v55  ;;  %v6707_v55 = vld [vmem:[#allocation2 + $0x550] sm:$0xff] }
 0x700   : > { %v7187_v1 = vadd.f32 %v7186_v60, %v6676_v59  ;;  %v6708_v59 = vld [vmem:[#allocation2 + $0xf98] sm:$0xff] }
 0x702   : > { %v7188_v2 = vadd.f32 %v7187_v1, %v6677_v0  ;;  %v6709_v0 = vld [vmem:[#allocation2 + $0x4f8] sm:$0xff] }
 0x704   : > { %v7189_v8 = vadd.f32 %v7188_v2, %v6678_v61  ;;  %v6710_v61 = vld [vmem:[#allocation2 + $0xce0] sm:$0xff] }
 0x706   : > { %v7190_v30 = vadd.f32 %v7189_v8, %v6679_v7  ;;  %v6711_v7 = vld [vmem:[#allocation2 + $0xfc8] sm:$0xff] }
 0x708   : > { %v7191_v31 = vadd.f32 %v7190_v30, %v6680_v10  ;;  %v6712_v10 = vld [vmem:[#allocation2 + $0xf48] sm:$0xff] }
 0x70a   : > { %v7192_v11 = vadd.f32 %v7191_v31, %v6681_v9  ;;  %v6713_v9 = vld [vmem:[#allocation2 + $0x828] sm:$0xff] }
 0x70c   : > { %v7193_v41 = vadd.f32 %v7192_v11, %v6682_v63  ;;  %v6714_v63 = vld [vmem:[#allocation2 + $0xe40] sm:$0xff] }
 0x70e   : > { %v7194_v12 = vadd.f32 %v7193_v41, %v6683_v40  ;;  %v6715_v40 = vld [vmem:[#allocation2 + $0x978] sm:$0xff] }
 0x710   : > { %v7195_v14 = vadd.f32 %v7194_v12, %v6684_v62  ;;  %v6716_v62 = vld [vmem:[#allocation2 + $0x3e0] sm:$0xff] }
 0x712   : > { %v7196_v17 = vadd.f32 %v7195_v14, %v6685_v13  ;;  %v6717_v13 = vld [vmem:[#allocation2 + $0xf80] sm:$0xff] }
 0x714   : > { %v7197_v44 = vadd.f32 %v7196_v17, %v6686_v15  ;;  %v6718_v15 = vld [vmem:[#allocation2 + $0xf50] sm:$0xff] }
 0x716   : > { %v7198_v20 = vadd.f32 %v7197_v44, %v6687_v43  ;;  %v6719_v43 = vld [vmem:[#allocation2 + $0x1b0] sm:$0xff] }
 0x718   : > { %v7199_v5 = vadd.f32 %v7198_v20, %v6688_v3  ;;  %v6720_v3 = vld [vmem:[#allocation2 + $0xdc0] sm:$0xff] }
 0x71a   : > { %v7200_v19 = vadd.f32 %v7199_v5, %v6689_v21  ;;  %v6721_v21 = vld [vmem:[#allocation2 + $0xfb0] sm:$0xff] }
 0x71c   : > { %v7201_v4 = vadd.f32 %v7200_v19, %v6690_v49  ;;  %v6722_v49 = vld [vmem:[#allocation2 + $0xdb8] sm:$0xff] }
 0x71e   : > { %v7202_v22 = vadd.f32 %v7201_v4, %v6691_v48  ;;  %v6723_v48 = vld [vmem:[#allocation2 + $0x350] sm:$0xff] }
 0x720   : > { %v7203_v24 = vadd.f32 %v7202_v22, %v6692_v18  ;;  %v6724_v18 = vld [vmem:[#allocation2 + $0x388] sm:$0xff] }
 0x722   : > { %v7204_v57 = vadd.f32 %v7203_v24, %v6693_v23  ;;  %v6725_v23 = vld [vmem:[#allocation2 + $0xa78] sm:$0xff] }
 0x724   : > { %v7205_v25 = vadd.f32 %v7204_v57, %v6694_v56  ;;  %v6726_v56 = vld [vmem:[#allocation2 + $0xcc0] sm:$0xff] }
 0x726   : > { %v7206_v26 = vadd.f32 %v7205_v25, %v6695_v16  ;;  %v6727_v16 = vld [vmem:[#allocation2 + $0xf40] sm:$0xff] }
 0x728   : > { %v7207_v29 = vadd.f32 %v7206_v26, %v6696_v6  ;;  %v6728_v6 = vld [vmem:[#allocation2 + $0x908] sm:$0xff] }
 0x72a   : > { %v7208_v33 = vadd.f32 %v7207_v29, %v6697_v28  ;;  %v6729_v28 = vld [vmem:[#allocation2 + $0xc10] sm:$0xff] }
 0x72c   : > { %v7209_v35 = vadd.f32 %v7208_v33, %v6698_v32  ;;  %v6730_v32 = vld [vmem:[#allocation2 + $0x1a0] sm:$0xff] }
 0x72e   : > { %v7210_v38 = vadd.f32 %v7209_v35, %v6699_v34  ;;  %v6731_v34 = vld [vmem:[#allocation2 + $0x4d0] sm:$0xff] }
 0x730   : > { %v7211_v27 = vadd.f32 %v7210_v38, %v6700_v36  ;;  %v6732_v36 = vld [vmem:[#allocation2 + $0xfa0] sm:$0xff] }
 0x732   : > { %v7212_v45 = vadd.f32 %v7211_v27, %v6701_v39  ;;  %v6733_v39 = vld [vmem:[#allocation2 + $0xcb0] sm:$0xff] }
 0x734   : > { %v7213_v47 = vadd.f32 %v7212_v45, %v6702_v42  ;;  %v6734_v42 = vld [vmem:[#allocation2 + $0x168] sm:$0xff] }
 0x736   : > { %v7214_v37 = vadd.f32 %v7213_v47, %v6703_v46  ;;  %v6735_v46 = vld [vmem:[#allocation2 + $0xf28] sm:$0xff] }
 0x738   : > { %v7215_v52 = vadd.f32 %v7214_v37, %v6704_v50  ;;  %v6736_v50 = vld [vmem:[#allocation2 + $0xf88] sm:$0xff] }
 0x73a   : > { %v7216_v54 = vadd.f32 %v7215_v52, %v6705_v51  ;;  %v6737_v51 = vld [vmem:[#allocation2 + $0xdc8] sm:$0xff] }
 0x73c   : > { %v7217_v58 = vadd.f32 %v7216_v54, %v6706_v53  ;;  %v6738_v53 = vld [vmem:[#allocation2 + $0x560] sm:$0xff] }
 0x73e   : > { %v7218_v60 = vadd.f32 %v7217_v58, %v6707_v55  ;;  %v6739_v55 = vld [vmem:[#allocation2 + $0x888] sm:$0xff] }
 0x740   : > { %v7219_v1 = vadd.f32 %v7218_v60, %v6708_v59  ;;  %v6740_v59 = vld [vmem:[#allocation2 + $0x608] sm:$0xff] }
 0x742   : > { %v7220_v2 = vadd.f32 %v7219_v1, %v6709_v0  ;;  %v6741_v0 = vld [vmem:[#allocation2 + $0x128] sm:$0xff] }
 0x744   : > { %v7221_v8 = vadd.f32 %v7220_v2, %v6710_v61  ;;  %v6742_v61 = vld [vmem:[#allocation2 + $0x178] sm:$0xff] }
 0x746   : > { %v7222_v30 = vadd.f32 %v7221_v8, %v6711_v7  ;;  %v6743_v7 = vld [vmem:[#allocation2 + $0xf8] sm:$0xff] }
 0x748   : > { %v7223_v31 = vadd.f32 %v7222_v30, %v6712_v10  ;;  %v6744_v10 = vld [vmem:[#allocation2 + $0x8d0] sm:$0xff] }
 0x74a   : > { %v7224_v11 = vadd.f32 %v7223_v31, %v6713_v9  ;;  %v6745_v9 = vld [vmem:[#allocation2 + $0x130] sm:$0xff] }
 0x74c   : > { %v7225_v41 = vadd.f32 %v7224_v11, %v6714_v63  ;;  %v6746_v63 = vld [vmem:[#allocation2 + $0xa8] sm:$0xff] }
 0x74e   : > { %v7226_v12 = vadd.f32 %v7225_v41, %v6715_v40  ;;  %v6747_v40 = vld [vmem:[#allocation2 + $0x1d8] sm:$0xff] }
 0x750   : > { %v7227_v14 = vadd.f32 %v7226_v12, %v6716_v62  ;;  %v6748_v62 = vld [vmem:[#allocation2 + $0xe58] sm:$0xff] }
 0x752   : > { %v7228_v17 = vadd.f32 %v7227_v14, %v6717_v13  ;;  %v6749_v13 = vld [vmem:[#allocation2 + $0x638] sm:$0xff] }
 0x754   : > { %v7229_v44 = vadd.f32 %v7228_v17, %v6718_v15  ;;  %v6750_v15 = vld [vmem:[#allocation2 + $0x870] sm:$0xff] }
 0x756   : > { %v7230_v20 = vadd.f32 %v7229_v44, %v6719_v43  ;;  %v6751_v43 = vld [vmem:[#allocation2 + $0xa40] sm:$0xff] }
 0x758   : > { %v7231_v5 = vadd.f32 %v7230_v20, %v6720_v3  ;;  %v6752_v3 = vld [vmem:[#allocation2 + $0x958] sm:$0xff] }
 0x75a   : > { %v7232_v19 = vadd.f32 %v7231_v5, %v6721_v21  ;;  %v6753_v21 = vld [vmem:[#allocation2 + $0xbe0] sm:$0xff] }
 0x75c   : > { %v7233_v4 = vadd.f32 %v7232_v19, %v6722_v49  ;;  %v6754_v49 = vld [vmem:[#allocation2 + $0xad0] sm:$0xff] }
 0x75e   : > { %v7234_v22 = vadd.f32 %v7233_v4, %v6723_v48  ;;  %v6755_v48 = vld [vmem:[#allocation2 + $0xa18] sm:$0xff] }
 0x760   : > { %v7235_v24 = vadd.f32 %v7234_v22, %v6724_v18  ;;  %v6756_v18 = vld [vmem:[#allocation2 + $0x300] sm:$0xff] }
 0x762   : > { %v7236_v57 = vadd.f32 %v7235_v24, %v6725_v23  ;;  %v6757_v23 = vld [vmem:[#allocation2 + $0xa10] sm:$0xff] }
 0x764   : > { %v7237_v25 = vadd.f32 %v7236_v57, %v6726_v56  ;;  %v6758_v56 = vld [vmem:[#allocation2 + $0xd28] sm:$0xff] }
 0x766   : > { %v7238_v26 = vadd.f32 %v7237_v25, %v6727_v16  ;;  %v6759_v16 = vld [vmem:[#allocation2 + $0x480] sm:$0xff] }
 0x768   : > { %v7239_v29 = vadd.f32 %v7238_v26, %v6728_v6  ;;  %v6760_v6 = vld [vmem:[#allocation2 + $0x240] sm:$0xff] }
 0x76a   : > { %v7240_v33 = vadd.f32 %v7239_v29, %v6729_v28  ;;  %v6761_v28 = vld [vmem:[#allocation2 + $0xcf0] sm:$0xff] }
 0x76c   : > { %v7241_v35 = vadd.f32 %v7240_v33, %v6730_v32  ;;  %v6762_v32 = vld [vmem:[#allocation2 + $0x48] sm:$0xff] }
 0x76e   : > { %v7242_v38 = vadd.f32 %v7241_v35, %v6731_v34  ;;  %v6763_v34 = vld [vmem:[#allocation2 + $0x4e8] sm:$0xff] }
 0x770   : > { %v7243_v27 = vadd.f32 %v7242_v38, %v6732_v36  ;;  %v6764_v36 = vld [vmem:[#allocation2 + $0x220] sm:$0xff] }
 0x772   : > { %v7244_v45 = vadd.f32 %v7243_v27, %v6733_v39  ;;  %v6765_v39 = vld [vmem:[#allocation2 + $0x890] sm:$0xff] }
 0x774   : > { %v7245_v47 = vadd.f32 %v7244_v45, %v6734_v42  ;;  %v6766_v42 = vld [vmem:[#allocation2 + $0x3b8] sm:$0xff] }
 0x776   : > { %v7246_v37 = vadd.f32 %v7245_v47, %v6735_v46  ;;  %v6767_v46 = vld [vmem:[#allocation2 + $0x3e8] sm:$0xff] }
 0x778   : > { %v7247_v52 = vadd.f32 %v7246_v37, %v6736_v50  ;;  %v6768_v50 = vld [vmem:[#allocation2 + $0xe10] sm:$0xff] }
 0x77a   : > { %v7248_v54 = vadd.f32 %v7247_v52, %v6737_v51  ;;  %v6769_v51 = vld [vmem:[#allocation2 + $0x248] sm:$0xff] }
 0x77c   : > { %v7249_v58 = vadd.f32 %v7248_v54, %v6738_v53  ;;  %v6770_v53 = vld [vmem:[#allocation2 + $0x3f0] sm:$0xff] }
 0x77e   : > { %v7250_v60 = vadd.f32 %v7249_v58, %v6739_v55  ;;  %v6771_v55 = vld [vmem:[#allocation2 + $0x3c8] sm:$0xff] }
 0x780   : > { %v7251_v1 = vadd.f32 %v7250_v60, %v6740_v59  ;;  %v6772_v59 = vld [vmem:[#allocation2 + $0xc98] sm:$0xff] }
 0x782   : > { %v7252_v2 = vadd.f32 %v7251_v1, %v6741_v0  ;;  %v6773_v0 = vld [vmem:[#allocation2 + $0x280] sm:$0xff] }
 0x784   : > { %v7253_v8 = vadd.f32 %v7252_v2, %v6742_v61  ;;  %v6774_v61 = vld [vmem:[#allocation2 + $0xa08] sm:$0xff] }
 0x786   : > { %v7254_v30 = vadd.f32 %v7253_v8, %v6743_v7  ;;  %v6775_v7 = vld [vmem:[#allocation2 + $0x540] sm:$0xff] }
 0x788   : > { %v7255_v31 = vadd.f32 %v7254_v30, %v6744_v10  ;;  %v6776_v10 = vld [vmem:[#allocation2 + $0x378] sm:$0xff] }
 0x78a   : > { %v7256_v11 = vadd.f32 %v7255_v31, %v6745_v9  ;;  %v6777_v9 = vld [vmem:[#allocation2 + $0x7d8] sm:$0xff] }
 0x78c   : > { %v7257_v41 = vadd.f32 %v7256_v11, %v6746_v63  ;;  %v6778_v63 = vld [vmem:[#allocation2 + $0x68] sm:$0xff] }
 0x78e   : > { %v7258_v12 = vadd.f32 %v7257_v41, %v6747_v40  ;;  %v6779_v40 = vld [vmem:[#allocation2 + $0xd38] sm:$0xff] }
 0x790   : > { %v7259_v14 = vadd.f32 %v7258_v12, %v6748_v62  ;;  %v6780_v62 = vld [vmem:[#allocation2 + $0x190] sm:$0xff] }
 0x792   : > { %v7260_v17 = vadd.f32 %v7259_v14, %v6749_v13  ;;  %v6781_v13 = vld [vmem:[#allocation2 + $0x548] sm:$0xff] }
 0x794   : > { %v7261_v44 = vadd.f32 %v7260_v17, %v6750_v15  ;;  %v6782_v15 = vld [vmem:[#allocation2 + $0x1e8] sm:$0xff] }
 0x796   : > { %v7262_v20 = vadd.f32 %v7261_v44, %v6751_v43  ;;  %v6783_v43 = vld [vmem:[#allocation2 + $0xc08] sm:$0xff] }
 0x798   : > { %v7263_v5 = vadd.f32 %v7262_v20, %v6752_v3  ;;  %v6784_v3 = vld [vmem:[#allocation2 + $0x2a0] sm:$0xff] }
 0x79a   : > { %v7264_v19 = vadd.f32 %v7263_v5, %v6753_v21  ;;  %v6785_v21 = vld [vmem:[#allocation2 + $0x408] sm:$0xff] }
 0x79c   : > { %v7265_v4 = vadd.f32 %v7264_v19, %v6754_v49  ;;  %v6786_v49 = vld [vmem:[#allocation2 + $0x7e8] sm:$0xff] }
 0x79e   : > { %v7266_v22 = vadd.f32 %v7265_v4, %v6755_v48  ;;  %v6787_v48 = vld [vmem:[#allocation2 + $0xc68] sm:$0xff] }
 0x7a0   : > { %v7267_v24 = vadd.f32 %v7266_v22, %v6756_v18  ;;  %v6788_v18 = vld [vmem:[#allocation2 + $0x658] sm:$0xff] }
 0x7a2   : > { %v7268_v57 = vadd.f32 %v7267_v24, %v6757_v23  ;;  %v6789_v23 = vld [vmem:[#allocation2 + $0xf60] sm:$0xff] }
 0x7a4   : > { %v7269_v25 = vadd.f32 %v7268_v57, %v6758_v56  ;;  %v6790_v56 = vld [vmem:[#allocation2 + $0xfc0] sm:$0xff] }
 0x7a6   : > { %v7270_v26 = vadd.f32 %v7269_v25, %v6759_v16  ;;  %v6791_v16 = vld [vmem:[#allocation2 + $0x5e8] sm:$0xff] }
 0x7a8   : > { %v7271_v29 = vadd.f32 %v7270_v26, %v6760_v6  ;;  %v6792_v6 = vld [vmem:[#allocation2 + $0x440] sm:$0xff] }
 0x7aa   : > { %v7272_v33 = vadd.f32 %v7271_v29, %v6761_v28  ;;  %v6793_v28 = vld [vmem:[#allocation2 + $0xff0] sm:$0xff] }
 0x7ac   : > { %v7273_v35 = vadd.f32 %v7272_v33, %v6762_v32  ;;  %v6794_v32 = vld [vmem:[#allocation2 + $0x720] sm:$0xff] }
 0x7ae   : > { %v7274_v38 = vadd.f32 %v7273_v35, %v6763_v34  ;;  %v6795_v34 = vld [vmem:[#allocation2 + $0x5d8] sm:$0xff] }
 0x7b0   : > { %v7275_v27 = vadd.f32 %v7274_v38, %v6764_v36  ;;  %v6796_v36 = vld [vmem:[#allocation2 + $0xb70] sm:$0xff] }
 0x7b2   : > { %v7276_v45 = vadd.f32 %v7275_v27, %v6765_v39  ;;  %v6797_v39 = vld [vmem:[#allocation2 + $0x2c8] sm:$0xff] }
 0x7b4   : > { %v7277_v47 = vadd.f32 %v7276_v45, %v6766_v42  ;;  %v6798_v42 = vld [vmem:[#allocation2 + $0x738] sm:$0xff] }
 0x7b6   : > { %v7278_v37 = vadd.f32 %v7277_v47, %v6767_v46  ;;  %v6799_v46 = vld [vmem:[#allocation2 + $0x808] sm:$0xff] }
 0x7b8   : > { %v7279_v52 = vadd.f32 %v7278_v37, %v6768_v50  ;;  %v6800_v50 = vld [vmem:[#allocation2 + $0x60] sm:$0xff] }
 0x7ba   : > { %v7280_v54 = vadd.f32 %v7279_v52, %v6769_v51  ;;  %v6801_v51 = vld [vmem:[#allocation2 + $0x6c0] sm:$0xff] }
 0x7bc   : > { %v7281_v58 = vadd.f32 %v7280_v54, %v6770_v53  ;;  %v6802_v53 = vld [vmem:[#allocation2 + $0xae8] sm:$0xff] }
 0x7be   : > { %v7282_v60 = vadd.f32 %v7281_v58, %v6771_v55  ;;  %v6803_v55 = vld [vmem:[#allocation2 + $0xfb8] sm:$0xff] }
 0x7c0   : > { %v7283_v1 = vadd.f32 %v7282_v60, %v6772_v59  ;;  %v6804_v59 = vld [vmem:[#allocation2 + $0xb0] sm:$0xff] }
 0x7c2   : > { %v7284_v2 = vadd.f32 %v7283_v1, %v6773_v0  ;;  %v6805_v0 = vld [vmem:[#allocation2 + $0xdd8] sm:$0xff] }
 0x7c4   : > { %v7285_v8 = vadd.f32 %v7284_v2, %v6774_v61  ;;  %v6806_v61 = vld [vmem:[#allocation2 + $0xa30] sm:$0xff] }
 0x7c6   : > { %v7286_v30 = vadd.f32 %v7285_v8, %v6775_v7  ;;  %v6807_v7 = vld [vmem:[#allocation2 + $0x1d0] sm:$0xff] }
 0x7c8   : > { %v7287_v31 = vadd.f32 %v7286_v30, %v6776_v10  ;;  %v6808_v10 = vld [vmem:[#allocation2 + $0xdd0] sm:$0xff] }
 0x7ca   : > { %v7288_v11 = vadd.f32 %v7287_v31, %v6777_v9  ;;  %v6809_v9 = vld [vmem:[#allocation2 + $0x3a0] sm:$0xff] }
 0x7cc   : > { %v7289_v41 = vadd.f32 %v7288_v11, %v6778_v63  ;;  %v6810_v63 = vld [vmem:[#allocation2 + $0x9b8] sm:$0xff] }
 0x7ce   : > { %v7290_v12 = vadd.f32 %v7289_v41, %v6779_v40  ;;  %v6811_v40 = vld [vmem:[#allocation2 + $0x198] sm:$0xff] }
 0x7d0   : > { %v7291_v14 = vadd.f32 %v7290_v12, %v6780_v62  ;;  %v6812_v62 = vld [vmem:[#allocation2 + $0xcd0] sm:$0xff] }
 0x7d2   : > { %v7292_v17 = vadd.f32 %v7291_v14, %v6781_v13  ;;  %v6813_v13 = vld [vmem:[#allocation2 + $0x5f0] sm:$0xff] }
 0x7d4   : > { %v7293_v44 = vadd.f32 %v7292_v17, %v6782_v15  ;;  %v6814_v15 = vld [vmem:[#allocation2 + $0x7a0] sm:$0xff] }
 0x7d6   : > { %v7294_v20 = vadd.f32 %v7293_v44, %v6783_v43  ;;  %v6815_v43 = vld [vmem:[#allocation2 + $0x1f0] sm:$0xff] }
 0x7d8   : > { %v7295_v5 = vadd.f32 %v7294_v20, %v6784_v3  ;;  %v6816_v3 = vld [vmem:[#allocation2 + $0xd88] sm:$0xff] }
 0x7da   : > { %v7296_v19 = vadd.f32 %v7295_v5, %v6785_v21  ;;  %v6817_v21 = vld [vmem:[#allocation2 + $0xef0] sm:$0xff] }
 0x7dc   : > { %v7297_v4 = vadd.f32 %v7296_v19, %v6786_v49  ;;  %v6818_v49 = vld [vmem:[#allocation2 + $0x148] sm:$0xff] }
 0x7de   : > { %v7298_v22 = vadd.f32 %v7297_v4, %v6787_v48  ;;  %v6819_v48 = vld [vmem:[#allocation2 + $0x6b8] sm:$0xff] }
 0x7e0   : > { %v7299_v24 = vadd.f32 %v7298_v22, %v6788_v18  ;;  %v6820_v18 = vld [vmem:[#allocation2 + $0xf58] sm:$0xff] }
 0x7e2   : > { %v7300_v57 = vadd.f32 %v7299_v24, %v6789_v23  ;;  %v6821_v23 = vld [vmem:[#allocation2 + $0xa70] sm:$0xff] }
 0x7e4   : > { %v7301_v25 = vadd.f32 %v7300_v57, %v6790_v56  ;;  %v6822_v56 = vld [vmem:[#allocation2 + $0xe70] sm:$0xff] }
 0x7e6   : > { %v7302_v26 = vadd.f32 %v7301_v25, %v6791_v16  ;;  %v6823_v16 = vld [vmem:[#allocation2 + $0x7d0] sm:$0xff] }
 0x7e8   : > { %v7303_v29 = vadd.f32 %v7302_v26, %v6792_v6  ;;  %v6824_v6 = vld [vmem:[#allocation2 + $0xe18] sm:$0xff] }
 0x7ea   : > { %v7304_v33 = vadd.f32 %v7303_v29, %v6793_v28  ;;  %v6825_v28 = vld [vmem:[#allocation2 + $0x518] sm:$0xff] }
 0x7ec   : > { %v7305_v35 = vadd.f32 %v7304_v33, %v6794_v32  ;;  %v6826_v32 = vld [vmem:[#allocation2 + $0x9f0] sm:$0xff] }
 0x7ee   : > { %v7306_v38 = vadd.f32 %v7305_v35, %v6795_v34  ;;  %v6827_v34 = vld [vmem:[#allocation2 + $0x6a0] sm:$0xff] }
 0x7f0   : > { %v7307_v27 = vadd.f32 %v7306_v38, %v6796_v36  ;;  %v6828_v36 = vld [vmem:[#allocation2 + $0xf0] sm:$0xff] }
 0x7f2   : > { %v7308_v45 = vadd.f32 %v7307_v27, %v6797_v39  ;;  %v6829_v39 = vld [vmem:[#allocation2 + $0x218] sm:$0xff] }
 0x7f4   : > { %v7309_v47 = vadd.f32 %v7308_v45, %v6798_v42  ;;  %v6830_v42 = vld [vmem:[#allocation2 + $0x58] sm:$0xff] }
 0x7f6   : > { %v7310_v37 = vadd.f32 %v7309_v47, %v6799_v46  ;;  %v6831_v46 = vld [vmem:[#allocation2 + $0x28] sm:$0xff] }
 0x7f8   : > { %v7311_v52 = vadd.f32 %v7310_v37, %v6800_v50  ;;  %v6832_v50 = vld [vmem:[#allocation2 + $0xc18] sm:$0xff] }
 0x7fa   : > { %v7312_v54 = vadd.f32 %v7311_v52, %v6801_v51  ;;  %v6833_v51 = vld [vmem:[#allocation2 + $0x290] sm:$0xff] }
 0x7fc   : > { %v7313_v58 = vadd.f32 %v7312_v54, %v6802_v53  ;;  %v6834_v53 = vld [vmem:[#allocation2 + $0x4e0] sm:$0xff] }
 0x7fe   : > { %v7314_v60 = vadd.f32 %v7313_v58, %v6803_v55  ;;  %v6835_v55 = vld [vmem:[#allocation2 + $0x10] sm:$0xff] }
 0x800   : > { %v7315_v1 = vadd.f32 %v7314_v60, %v6804_v59  ;;  %v6836_v59 = vld [vmem:[#allocation2 + $0xa68] sm:$0xff] }
 0x802   : > { %v7316_v2 = vadd.f32 %v7315_v1, %v6805_v0  ;;  %v6837_v0 = vld [vmem:[#allocation2 + $0xf30] sm:$0xff] }
 0x804   : > { %v7317_v8 = vadd.f32 %v7316_v2, %v6806_v61  ;;  %v6838_v61 = vld [vmem:[#allocation2 + $0x680] sm:$0xff] }
 0x806   : > { %v7318_v30 = vadd.f32 %v7317_v8, %v6807_v7  ;;  %v6839_v7 = vld [vmem:[#allocation2 + $0x108] sm:$0xff] }
 0x808   : > { %v7319_v31 = vadd.f32 %v7318_v30, %v6808_v10  ;;  %v6840_v10 = vld [vmem:[#allocation2 + $0x778] sm:$0xff] }
 0x80a   : > { %v7320_v11 = vadd.f32 %v7319_v31, %v6809_v9  ;;  %v6841_v9 = vld [vmem:[#allocation2 + $0x368] sm:$0xff] }
 0x80c   : > { %v7321_v41 = vadd.f32 %v7320_v11, %v6810_v63  ;;  %v6842_v63 = vld [vmem:[#allocation2 + $0x110] sm:$0xff] }
 0x80e   : > { %v7322_v12 = vadd.f32 %v7321_v41, %v6811_v40  ;;  %v6843_v40 = vld [vmem:[#allocation2 + $0xaa0] sm:$0xff] }
 0x810   : > { %v7323_v14 = vadd.f32 %v7322_v12, %v6812_v62  ;;  %v6844_v62 = vld [vmem:[#allocation2 + $0xee0] sm:$0xff] }
 0x812   : > { %v7324_v17 = vadd.f32 %v7323_v14, %v6813_v13  ;;  %v6845_v13 = vld [vmem:[#allocation2 + $0x260] sm:$0xff] }
 0x814   : > { %v7325_v44 = vadd.f32 %v7324_v17, %v6814_v15  ;;  %v6846_v15 = vld [vmem:[#allocation2 + $0x3a8] sm:$0xff] }
 0x816   : > { %v7326_v20 = vadd.f32 %v7325_v44, %v6815_v43  ;;  %v6847_v43 = vld [vmem:[#allocation2 + $0xf68] sm:$0xff] }
 0x818   : > { %v7327_v5 = vadd.f32 %v7326_v20, %v6816_v3  ;;  %v6848_v3 = vld [vmem:[#allocation2 + $0x880] sm:$0xff] }
 0x81a   : > { %v7328_v19 = vadd.f32 %v7327_v5, %v6817_v21  ;;  %v6849_v21 = vld [vmem:[#allocation2 + $0x4f0] sm:$0xff] }
 0x81c   : > { %v7329_v4 = vadd.f32 %v7328_v19, %v6818_v49  ;;  %v6850_v49 = vld [vmem:[#allocation2 + $0x850] sm:$0xff] }
 0x81e   : > { %v7330_v22 = vadd.f32 %v7329_v4, %v6819_v48  ;;  %v6851_v48 = vld [vmem:[#allocation2 + $0xd10] sm:$0xff] }
 0x820   : > { %v7331_v24 = vadd.f32 %v7330_v22, %v6820_v18  ;;  %v6852_v18 = vld [vmem:[#allocation2 + $0xb38] sm:$0xff] }
 0x822   : > { %v7332_v57 = vadd.f32 %v7331_v24, %v6821_v23  ;;  %v6853_v23 = vld [vmem:[#allocation2 + $0x8f0] sm:$0xff] }
 0x824   : > { %v7333_v25 = vadd.f32 %v7332_v57, %v6822_v56  ;;  %v6854_v56 = vld [vmem:[#allocation2 + $0x798] sm:$0xff] }
 0x826   : > { %v7334_v26 = vadd.f32 %v7333_v25, %v6823_v16  ;;  %v6855_v16 = vld [vmem:[#allocation2 + $0x238] sm:$0xff] }
 0x828   : > { %v7335_v29 = vadd.f32 %v7334_v26, %v6824_v6  ;;  %v6856_v6 = vld [vmem:[#allocation2 + $0xa00] sm:$0xff] }
 0x82a   : > { %v7336_v33 = vadd.f32 %v7335_v29, %v6825_v28  ;;  %v6857_v28 = vld [vmem:[#allocation2 + $0xd18] sm:$0xff] }
 0x82c   : > { %v7337_v35 = vadd.f32 %v7336_v33, %v6826_v32  ;;  %v6858_v32 = vld [vmem:[#allocation2 + $0xd40] sm:$0xff] }
 0x82e   : > { %v7338_v38 = vadd.f32 %v7337_v35, %v6827_v34  ;;  %v6859_v34 = vld [vmem:[#allocation2 + $0xa80] sm:$0xff] }
 0x830   : > { %v7339_v27 = vadd.f32 %v7338_v38, %v6828_v36  ;;  %v6860_v36 = vld [vmem:[#allocation2 + $0x2b0] sm:$0xff] }
 0x832   : > { %v7340_v45 = vadd.f32 %v7339_v27, %v6829_v39  ;;  %v6861_v39 = vld [vmem:[#allocation2 + $0x740] sm:$0xff] }
 0x834   : > { %v7341_v47 = vadd.f32 %v7340_v45, %v6830_v42  ;;  %v6862_v42 = vld [vmem:[#allocation2 + $0xaa8] sm:$0xff] }
 0x836   : > { %v7342_v37 = vadd.f32 %v7341_v47, %v6831_v46  ;;  %v6863_v46 = vld [vmem:[#allocation2 + $0xfa8] sm:$0xff] }
 0x838   : > { %v7343_v52 = vadd.f32 %v7342_v37, %v6832_v50  ;;  %v6864_v50 = vld [vmem:[#allocation2 + $0xa98] sm:$0xff] }
 0x83a   : > { %v7344_v54 = vadd.f32 %v7343_v52, %v6833_v51  ;;  %v6865_v51 = vld [vmem:[#allocation2 + $0xc78] sm:$0xff] }
 0x83c   : > { %v7345_v58 = vadd.f32 %v7344_v54, %v6834_v53  ;;  %v6866_v53 = vld [vmem:[#allocation2 + $0x2d8] sm:$0xff] }
 0x83e   : > { %v7346_v60 = vadd.f32 %v7345_v58, %v6835_v55  ;;  %v6867_v55 = vld [vmem:[#allocation2 + $0xc30] sm:$0xff] }
 0x840   : > { %v7347_v1 = vadd.f32 %v7346_v60, %v6836_v59  ;;  %v6868_v59 = vld [vmem:[#allocation2 + $0xf10] sm:$0xff] }
 0x842   : > { %v7348_v2 = vadd.f32 %v7347_v1, %v6837_v0  ;;  %v6869_v0 = vld [vmem:[#allocation2 + $0x460] sm:$0xff] }
 0x844   : > { %v7349_v8 = vadd.f32 %v7348_v2, %v6838_v61  ;;  %v6870_v61 = vld [vmem:[#allocation2 + $0x898] sm:$0xff] }
 0x846   : > { %v7350_v30 = vadd.f32 %v7349_v8, %v6839_v7  ;;  %v6871_v7 = vld [vmem:[#allocation2 + $0x538] sm:$0xff] }
 0x848   : > { %v7351_v31 = vadd.f32 %v7350_v30, %v6840_v10  ;;  %v6872_v10 = vld [vmem:[#allocation2 + $0x328] sm:$0xff] }
 0x84a   : > { %v7352_v11 = vadd.f32 %v7351_v31, %v6841_v9  ;;  %v6873_v9 = vld [vmem:[#allocation2 + $0xa50] sm:$0xff] }
 0x84c   : > { %v7353_v41 = vadd.f32 %v7352_v11, %v6842_v63  ;;  %v6874_v63 = vld [vmem:[#allocation2 + $0x7b0] sm:$0xff] }
 0x84e   : > { %v7354_v12 = vadd.f32 %v7353_v41, %v6843_v40  ;;  %v6875_v40 = vld [vmem:[#allocation2 + $0xdf8] sm:$0xff] }
 0x850   : > { %v7355_v14 = vadd.f32 %v7354_v12, %v6844_v62  ;;  %v6876_v62 = vld [vmem:[#allocation2 + $0x9a0] sm:$0xff] }
 0x852   : > { %v7356_v17 = vadd.f32 %v7355_v14, %v6845_v13  ;;  %v6877_v13 = vld [vmem:[#allocation2 + $0xe38] sm:$0xff] }
 0x854   : > { %v7357_v44 = vadd.f32 %v7356_v17, %v6846_v15  ;;  %v6878_v15 = vld [vmem:[#allocation2 + $0x390] sm:$0xff] }
 0x856   : > { %v7358_v20 = vadd.f32 %v7357_v44, %v6847_v43  ;;  %v6879_v43 = vld [vmem:[#allocation2 + $0x7e0] sm:$0xff] }
 0x858   : > { %v7359_v5 = vadd.f32 %v7358_v20, %v6848_v3  ;;  %v6880_v3 = vld [vmem:[#allocation2 + $0x900] sm:$0xff] }
 0x85a   : > { %v7360_v19 = vadd.f32 %v7359_v5, %v6849_v21  ;;  %v6881_v21 = vld [vmem:[#allocation2 + $0x4c0] sm:$0xff] }
 0x85c   : > { %v7361_v4 = vadd.f32 %v7360_v19, %v6850_v49  ;;  %v6882_v49 = vld [vmem:[#allocation2 + $0x710] sm:$0xff] }
 0x85e   : > { %v7362_v22 = vadd.f32 %v7361_v4, %v6851_v48  ;;  %v6883_v48 = vld [vmem:[#allocation2 + $0x508] sm:$0xff] }
 0x860   : > { %v7363_v24 = vadd.f32 %v7362_v22, %v6852_v18  ;;  %v6884_v18 = vld [vmem:[#allocation2 + $0x9e8] sm:$0xff] }
 0x862   : > { %v7364_v57 = vadd.f32 %v7363_v24, %v6853_v23  ;;  %v6885_v23 = vld [vmem:[#allocation2 + $0x938] sm:$0xff] }
 0x864   : > { %v7365_v25 = vadd.f32 %v7364_v57, %v6854_v56  ;;  %v6886_v56 = vld [vmem:[#allocation2 + $0x558] sm:$0xff] }
 0x866   : > { %v7366_v26 = vadd.f32 %v7365_v25, %v6855_v16  ;;  %v6887_v16 = vld [vmem:[#allocation2 + $0xac0] sm:$0xff] }
 0x868   : > { %v7367_v29 = vadd.f32 %v7366_v26, %v6856_v6  ;;  %v6888_v6 = vld [vmem:[#allocation2 + $0x930] sm:$0xff] }
 0x86a   : > { %v7368_v33 = vadd.f32 %v7367_v29, %v6857_v28  ;;  %v6889_v28 = vld [vmem:[#allocation2 + $0x988] sm:$0xff] }
 0x86c   : > { %v7369_v35 = vadd.f32 %v7368_v33, %v6858_v32  ;;  %v6890_v32 = vld [vmem:[#allocation2 + $0x348] sm:$0xff] }
 0x86e   : > { %v7370_v38 = vadd.f32 %v7369_v35, %v6859_v34  ;;  %v6891_v34 = vld [vmem:[#allocation2 + $0xc90] sm:$0xff] }
 0x870   : > { %v7371_v27 = vadd.f32 %v7370_v38, %v6860_v36  ;;  %v6892_v36 = vld [vmem:[#allocation2 + $0xce8] sm:$0xff] }
 0x872   : > { %v7372_v45 = vadd.f32 %v7371_v27, %v6861_v39  ;;  %v6893_v39 = vld [vmem:[#allocation2 + $0xcf8] sm:$0xff] }
 0x874   : > { %v7373_v47 = vadd.f32 %v7372_v45, %v6862_v42  ;;  %v6894_v42 = vld [vmem:[#allocation2 + $0x1a8] sm:$0xff] }
 0x876   : > { %v7374_v37 = vadd.f32 %v7373_v47, %v6863_v46  ;;  %v6895_v46 = vld [vmem:[#allocation2 + $0x4a8] sm:$0xff] }
 0x878   : > { %v7375_v52 = vadd.f32 %v7374_v37, %v6864_v50  ;;  %v6896_v50 = vld [vmem:[#allocation2 + $0x40] sm:$0xff] }
 0x87a   : > { %v7376_v54 = vadd.f32 %v7375_v52, %v6865_v51  ;;  %v6897_v51 = vld [vmem:[#allocation2 + $0x1c8] sm:$0xff] }
 0x87c   : > { %v7377_v58 = vadd.f32 %v7376_v54, %v6866_v53  ;;  %v6898_v53 = vld [vmem:[#allocation2 + $0xfe8] sm:$0xff] }
 0x87e   : > { %v7378_v60 = vadd.f32 %v7377_v58, %v6867_v55  ;;  %v6899_v55 = vld [vmem:[#allocation2 + $0xd98] sm:$0xff] }
 0x880   : > { %v7379_v1 = vadd.f32 %v7378_v60, %v6868_v59  ;;  %v6900_v59 = vld [vmem:[#allocation2 + $0x150] sm:$0xff] }
 0x882   : > { %v7380_v2 = vadd.f32 %v7379_v1, %v6869_v0  ;;  %v6901_v0 = vld [vmem:[#allocation2 + $0x400] sm:$0xff] }
 0x884   : > { %v7381_v8 = vadd.f32 %v7380_v2, %v6870_v61  ;;  %v6902_v61 = vld [vmem:[#allocation2 + $0x298] sm:$0xff] }
 0x886   : > { %v7382_v30 = vadd.f32 %v7381_v8, %v6871_v7  ;;  %v6903_v7 = vld [vmem:[#allocation2 + $0x730] sm:$0xff] }
 0x888   : > { %v7383_v31 = vadd.f32 %v7382_v30, %v6872_v10  ;;  %v6904_v10 = vld [vmem:[#allocation2 + $0x3c0] sm:$0xff] }
 0x88a   : > { %v7384_v11 = vadd.f32 %v7383_v31, %v6873_v9  ;;  %v6905_v9 = vld [vmem:[#allocation2 + $0x2c0] sm:$0xff] }
 0x88c   : > { %v7385_v41 = vadd.f32 %v7384_v11, %v6874_v63  ;;  %v6906_v63 = vld [vmem:[#allocation2 + $0x4a0] sm:$0xff] }
 0x88e   : > { %v7386_v12 = vadd.f32 %v7385_v41, %v6875_v40 }
 0x890   : > { %v7387_v14 = vadd.f32 %v7386_v12, %v6876_v62 }
 0x892   : > { %v7388_v17 = vadd.f32 %v7387_v14, %v6877_v13 }
 0x894   : > { %v7389_v44 = vadd.f32 %v7388_v17, %v6878_v15 }
 0x896   : > { %v7390_v20 = vadd.f32 %v7389_v44, %v6879_v43 }
 0x898   : > { %v7391_v5 = vadd.f32 %v7390_v20, %v6880_v3 }
 0x89a   : > { %v7392_v19 = vadd.f32 %v7391_v5, %v6881_v21 }
 0x89c   : > { %v7393_v4 = vadd.f32 %v7392_v19, %v6882_v49 }
 0x89e   : > { %v7394_v22 = vadd.f32 %v7393_v4, %v6883_v48 }
 0x8a0   : > { %v7395_v24 = vadd.f32 %v7394_v22, %v6884_v18 }
 0x8a2   : > { %v7396_v57 = vadd.f32 %v7395_v24, %v6885_v23 }
 0x8a4   : > { %v7397_v25 = vadd.f32 %v7396_v57, %v6886_v56 }
 0x8a6   : > { %v7398_v26 = vadd.f32 %v7397_v25, %v6887_v16 }
 0x8a8   : > { %v7399_v29 = vadd.f32 %v7398_v26, %v6888_v6 }
 0x8aa   : > { %v7400_v33 = vadd.f32 %v7399_v29, %v6889_v28 }
 0x8ac   : > { %v7401_v35 = vadd.f32 %v7400_v33, %v6890_v32 }
 0x8ae   : > { %v7402_v38 = vadd.f32 %v7401_v35, %v6891_v34 }
 0x8b0   : > { %v7403_v27 = vadd.f32 %v7402_v38, %v6892_v36 }
 0x8b2   : > { %v7404_v45 = vadd.f32 %v7403_v27, %v6893_v39 }
 0x8b4   : > { %v7405_v47 = vadd.f32 %v7404_v45, %v6894_v42 }
 0x8b6   : > { %v7406_v37 = vadd.f32 %v7405_v47, %v6895_v46 }
 0x8b8   : > { %v7407_v52 = vadd.f32 %v7406_v37, %v6896_v50 }
 0x8ba   : > { %v7408_v54 = vadd.f32 %v7407_v52, %v6897_v51 }
 0x8bc   : > { %v7409_v58 = vadd.f32 %v7408_v54, %v6898_v53 }
 0x8be   : > { %v7410_v60 = vadd.f32 %v7409_v58, %v6899_v55 }
 0x8c0   : > { %v7411_v1 = vadd.f32 %v7410_v60, %v6900_v59 }
 0x8c2   : > { %v7412_v2 = vadd.f32 %v7411_v1, %v6901_v0 }
 0x8c4   : > { %v7413_v8 = vadd.f32 %v7412_v2, %v6902_v61 }
 0x8c6   : > { %v7414_v30 = vadd.f32 %v7413_v8, %v6903_v7 }
 0x8c8   : > { %v7415_v31 = vadd.f32 %v7414_v30, %v6904_v10 }
 0x8ca   : > { %v7416_v11 = vadd.f32 %v7415_v31, %v6905_v9 }
 0x8cc   : > { %v7417_v40 = vadd.f32 %v7416_v11, %v6906_v63 }
 0x8ce   : > { %7418 = vadd.xlane.f32.xlu0 %v7417_v40 }
 0x957   : > { %v7419_v41 = vpop.xlane.xlu0 %7418 }
 0x958   : > { %v7420_v62 = vrot.slane %v7419_v41, 4 }
 0x95a   : > { %v7421_v12 = vadd.f32 %v7420_v62, %v7419_v41 }
 0x95c   : > { %v7422_v13 = vrot.slane %v7421_v12, 2 }
 0x95e   : > { %v7423_v14 = vadd.f32 %v7422_v13, %v7421_v12 }
 0x960   : > { %v7424_v15 = vrot.slane %v7423_v14, 1 }
 0x962   : > { %v7425_v17 = vadd.f32 %v7424_v15, %v7423_v14 }
 0x964   : > { %7546 = vpush %v7425_v17 }
 0x995   : > { %s7547_s12 = spop %7546 }
 0x996   : > { %s7427_s20 = smul.f32 -0.5, %s7547_s12 }
 0x998   : > { %7429 = sst [smem:[#allocation8]] %s7427_s20 }
 0x999 PF: > { %p7564_p12 = scmp.eq.s32.totalorder %s7522_s15, 3  ;;  %s8773_s3 = smov [#allocation8]  }
 0x99b   : > { %7553 = dma.smem_to_hbm (%p7564_p12), %s8773_s3, 16, %s13502_s2, [#allocation5]  }
 0x99c   : > { %8741 = dma.done.wait (%p7564_p12), [#allocation5], 16  }
 0x99d   : > { %8743 = vsyncadd (%p7564_p12), [#allocation5], 4294967280 }
 0x99e   : > { %7445 = sfence }
 0x99f PF: > { %s19_s14 = sadd.s32 1, %s8766_s14   ;;  %s13506_s9 = smov %s8750_s10 }
 0x9a0   : > { %p16_p5 = scmp.ge.s32.totalorder %s19_s14, 6   ;;  %s13507_s10 = smov %s8754_s11 }
 0x9a1   : > { %s13508_s11 = smov %s8845_s24  ;;  %s13509_s12 = smov %s8762_s13 }
 0x9a2   : > { %s13510_s13 = smov %s13512_s16  ;;  %18 = sbr.rel (!%p16_p5) target bundleno = 7 (0x7), region = 88 }
 0x9a7   :  { %7451 = vsyncpa [#allocation4], 1 }
 0x9a8   :  { %7453 = vsyncpa [#allocation4 + $0x1], 1 }
 0x9a9   :  { %7454 = vsyncpa [#allocation7], 1 }
 0x9aa   :  { %7456 = vsyncpa [#allocation7 + $0x1], 1 }
 0x9ab   :  { %7457 = vsyncpa [#allocation5], 1 }
 0x9ac   :  { %7459 = vsyncpa [#allocation5 + $0x1], 1 }

</bundles_post_ra>
